<compile_context>
chip_gen: v5e
topology: v5e:2x2
jax: 0.10.0
libtpu: 0.0.40
codegen_flags: <defaults>
</compile_context>

<pallas_src>
import functools

import jax
import jax.numpy as jnp
import numpy as np
from jax import lax
from jax.experimental import pallas as pl
from jax.experimental.pallas import tpu as pltpu


def spatial_attention_kernel(x_ref, w_ref, y_ref, pad_ref, scale_ref,
                             *, bt, C, H, W, K, p):
    """One batch tile (bt images) per grid step.

    x_ref    : (bt, C, H*W)        VMEM  lane-dense input block
    w_ref    : (2*K*K,)            SMEM  conv1 weights, (o=1, ci, ky, kx) order
    y_ref    : (bt, C, H*W)        VMEM  lane-dense output block
    pad_ref  : (2, H+2p, W+2p)     VMEM  zero-padded pooled maps (scratch)
    scale_ref: (1, H*W)            VMEM  flat attention scale (scratch)
    """
    f32 = jnp.float32
    HW = H * W
    Hp, Wp = H + 2 * p, W + 2 * p

    # Zero only the border strips (interior is fully overwritten per image).
    pad_ref[:, 0:p, :] = jnp.zeros((2, p, Wp), f32)
    pad_ref[:, p + H:, :] = jnp.zeros((2, p, Wp), f32)
    pad_ref[:, :, 0:p] = jnp.zeros((2, Hp, p), f32)
    pad_ref[:, :, p + W:] = jnp.zeros((2, Hp, p), f32)

    inv_c = f32(1.0 / C)

    for i in range(bt):
        # --- channel pooling on the lane-dense flat layout (VPU only) ------
        s_acc = x_ref[i, 0].astype(f32)                 # (HW,)
        m_acc = s_acc
        for c in range(1, C):
            xc = x_ref[i, c].astype(f32)                # streamed (HW,) read
            s_acc = s_acc + xc
            m_acc = jnp.maximum(m_acc, xc)
        avg = s_acc * inv_c                             # (HW,)

        # --- scatter the tiny pooled maps into the padded 2-D scratch ------
        for r in range(H):
            pad_ref[0, p + r, p:p + W] = avg[r * W:(r + 1) * W]
            pad_ref[1, p + r, p:p + W] = m_acc[r * W:(r + 1) * W]

        # --- KxK "same" conv as VPU shift-and-add, (ci, dx) outermost ------
        acc = jnp.zeros((H, W), f32)
        for ci in range(2):
            for dx in range(K):
                cols = pad_ref[ci, :, dx:dx + W]        # (H+2p, W): 1 lane shift
                for dy in range(K):
                    wt = w_ref[ci * K * K + dy * K + dx]   # SMEM scalar
                    acc = acc + cols[dy:dy + H, :] * wt

        # --- fused attention + residual: y = x * (sigmoid(relu(conv)) + 1) -
        scale = jax.nn.sigmoid(jnp.maximum(acc, 0.0)) + 1.0    # (H, W)
        for r in range(H):
            scale_ref[0, r * W:(r + 1) * W] = scale[r]
        scale_flat = scale_ref[0, :]                            # (HW,)

        # Lane-dense big multiply + store, re-reading x (not held live above).
        y_ref[i] = (x_ref[i].astype(f32) * scale_flat[None, :]).astype(y_ref.dtype)


def spatial_attention_pallas(x_nchw, weight_oikk, kernel_size=7):
    """Wrapper matching the PyTorch module: NCHW in / NCHW out (native dtype).

    weight_oikk: (1, 2, K, K) conv1 weight (PyTorch OIHW layout, bias=False).
    """
    assert kernel_size in (3, 7), "kernel size must be 3 or 7"
    p = 3 if kernel_size == 7 else 1
    K = kernel_size
    B, C, H, W = x_nchw.shape
    HW = H * W

    # Lane-dense I/O: fold spatial dims so the last (lane) axis is H*W.
    x_flat = x_nchw.reshape(B, C, HW)

    # Batch tile: make each grid step move ~O(MiB) (amortize ~0.35us/step)
    # while 2x(in)+2x(out) double-buffered blocks stay well under scoped VMEM.
    bytes_per_img = C * HW * x_flat.dtype.itemsize
    target_block_bytes = 2 * 1024 * 1024
    bt = max(1, min(B, target_block_bytes // max(bytes_per_img, 1)))
    while B % bt:
        bt -= 1
    # TODO(synk): for full-size SSDGL images (C~100-200, H*W >= 145^2) a whole
    # image no longer fits VMEM; tile H (multiples of 8) with a p-row halo for
    # the conv, and add that H-tile as a second "parallel" grid axis for v7x.

    # Flatten conv weights to 2*K*K SMEM scalars; (o, ci, ky, kx) row-major
    # order matches the kernel's `ci*K*K + dy*K + dx` indexing.
    w_flat = weight_oikk.astype(jnp.float32).reshape(2 * K * K)

    kernel = functools.partial(spatial_attention_kernel,
                               bt=bt, C=C, H=H, W=W, K=K, p=p)

    y_flat = pl.pallas_call(
        kernel,
        out_shape=jax.ShapeDtypeStruct((B, C, HW), x_flat.dtype),
        grid_spec=pltpu.PrefetchScalarGridSpec(
            num_scalar_prefetch=0,
            grid=(B // bt,),
            in_specs=[
                pl.BlockSpec((bt, C, HW), lambda b: (b, 0, 0)),
                pl.BlockSpec(memory_space=pltpu.MemorySpace.SMEM),
            ],
            out_specs=pl.BlockSpec((bt, C, HW), lambda b: (b, 0, 0)),
            scratch_shapes=[
                pltpu.VMEM((2, H + 2 * p, W + 2 * p), jnp.float32),
                pltpu.VMEM((1, HW), jnp.float32),
            ],
        ),
        compiler_params=pltpu.CompilerParams(
            dimension_semantics=("parallel",)),
    )(x_flat, w_flat)

    return y_flat.reshape(B, C, H, W)


# --------------------------------------------------------------------------
# Pure-JAX reference (mirrors the PyTorch forward, NCHW / OIHW conventions).
# --------------------------------------------------------------------------
def spatial_attention_ref(x, weight, kernel_size=7):
    p = 3 if kernel_size == 7 else 1
    avg = jnp.mean(x, axis=1, keepdims=True)
    mx = jnp.max(x, axis=1, keepdims=True)
    s = jnp.concatenate([avg, mx], axis=1)
    conv = lax.conv_general_dilated(
        s, weight, window_strides=(1, 1), padding=[(p, p), (p, p)],
        dimension_numbers=("NCHW", "OIHW", "NCHW"),
        precision=lax.Precision.HIGHEST)
    attn = jax.nn.sigmoid(jnp.maximum(conv, 0.0))
    return x * attn + x


if __name__ == "__main__":
    B, C, H, W, K = 2, 4, 16, 16, 7   # module default kernel_size=7

    key = jax.random.PRNGKey(0)
    kx, kw = jax.random.split(key)
    x = jax.random.normal(kx, (B, C, H, W), dtype=jnp.float32)
    conv1_w = (0.1 * jax.random.normal(kw, (1, 2, K, K))).astype(jnp.float32)

    y_k = spatial_attention_pallas(x, conv1_w, kernel_size=K)
    jax.block_until_ready(y_k)

    y_r = spatial_attention_ref(x, conv1_w, kernel_size=K)
    np.testing.assert_allclose(np.asarray(y_k), np.asarray(y_r),
                               atol=1e-4, rtol=1e-4)

    print("KERNEL_OK")
</pallas_src>

<mosaic_0001>
module attributes {stable_mosaic.version = 11 : i64} {
  func.func @spatial_attention_kernel(%arg0: i32, %arg1: memref<2x4x256xf32, #tpu.memory_space<vmem>>, %arg2: memref<98xf32, #tpu.memory_space<smem>>, %arg3: memref<2x4x256xf32, #tpu.memory_space<vmem>>, %arg4: memref<2x22x22xf32, #tpu.memory_space<vmem>>, %arg5: memref<1x256xf32, #tpu.memory_space<vmem>>) attributes {dimension_semantics = [#tpu.dimension_semantics<parallel>], iteration_bounds = array<i64: 1>, scalar_prefetch = 0 : i64, scratch_operands = 2 : i64, tpu.core_type = #tpu.core_type<tc>, window_params = [{transform_indices = @transform_0, window_bounds = array<i64: 2, 4, 256>}, {transform_indices = @transform_1, window_bounds = array<i64: 98>}, {transform_indices = @transform_2, window_bounds = array<i64: 2, 4, 256>}]} {
    %cst = arith.constant 0.000000e+00 : f32
    %0 = vector.broadcast %cst : f32 to vector<2x3x22xf32>
    %c0 = arith.constant 0 : index
    %c0_0 = arith.constant 0 : index
    %c0_1 = arith.constant 0 : index
    %1 = vector.load %arg4[%c0, %c0_0, %c0_1] : memref<2x22x22xf32, #tpu.memory_space<vmem>>, vector<2x3x22xf32>
    tpu.vector_store %arg4[%c0, %c0_0, %c0_1], %0 {strides = array<i32>} : memref<2x22x22xf32, #tpu.memory_space<vmem>>, vector<2x3x22xf32>,
    %cst_2 = arith.constant 0.000000e+00 : f32
    %2 = vector.broadcast %cst_2 : f32 to vector<2x3x22xf32>
    %c0_3 = arith.constant 0 : index
    %c19 = arith.constant 19 : index
    %c0_4 = arith.constant 0 : index
    %3 = vector.load %arg4[%c0_3, %c19, %c0_4] : memref<2x22x22xf32, #tpu.memory_space<vmem>>, vector<2x3x22xf32>
    tpu.vector_store %arg4[%c0_3, %c19, %c0_4], %2 {strides = array<i32>} : memref<2x22x22xf32, #tpu.memory_space<vmem>>, vector<2x3x22xf32>,
    %cst_5 = arith.constant 0.000000e+00 : f32
    %4 = vector.broadcast %cst_5 : f32 to vector<2x22x3xf32>
    %c0_6 = arith.constant 0 : index
    %c0_7 = arith.constant 0 : index
    %c0_8 = arith.constant 0 : index
    %5 = vector.load %arg4[%c0_6, %c0_7, %c0_8] : memref<2x22x22xf32, #tpu.memory_space<vmem>>, vector<2x22x3xf32>
    tpu.vector_store %arg4[%c0_6, %c0_7, %c0_8], %4 {strides = array<i32>} : memref<2x22x22xf32, #tpu.memory_space<vmem>>, vector<2x22x3xf32>,
    %cst_9 = arith.constant 0.000000e+00 : f32
    %6 = vector.broadcast %cst_9 : f32 to vector<2x22x3xf32>
    %c0_10 = arith.constant 0 : index
    %c0_11 = arith.constant 0 : index
    %c19_12 = arith.constant 19 : index
    %7 = vector.load %arg4[%c0_10, %c0_11, %c19_12] : memref<2x22x22xf32, #tpu.memory_space<vmem>>, vector<2x22x3xf32>
    tpu.vector_store %arg4[%c0_10, %c0_11, %c19_12], %6 {strides = array<i32>} : memref<2x22x22xf32, #tpu.memory_space<vmem>>, vector<2x22x3xf32>,
    %c0_13 = arith.constant 0 : index
    %c0_14 = arith.constant 0 : index
    %c0_15 = arith.constant 0 : index
    %8 = vector.load %arg1[%c0_13, %c0_14, %c0_15] : memref<2x4x256xf32, #tpu.memory_space<vmem>>, vector<1x1x256xf32>
    %9 = vector.shape_cast %8 : vector<1x1x256xf32> to vector<256xf32>
    %c0_16 = arith.constant 0 : index
    %c1 = arith.constant 1 : index
    %c0_17 = arith.constant 0 : index
    %10 = vector.load %arg1[%c0_16, %c1, %c0_17] : memref<2x4x256xf32, #tpu.memory_space<vmem>>, vector<1x1x256xf32>
    %11 = vector.shape_cast %10 : vector<1x1x256xf32> to vector<256xf32>
    %12 = arith.addf %9, %11 : vector<256xf32>
    %13 = arith.maximumf %9, %11 : vector<256xf32>
    %c0_18 = arith.constant 0 : index
    %c2 = arith.constant 2 : index
    %c0_19 = arith.constant 0 : index
    %14 = vector.load %arg1[%c0_18, %c2, %c0_19] : memref<2x4x256xf32, #tpu.memory_space<vmem>>, vector<1x1x256xf32>
    %15 = vector.shape_cast %14 : vector<1x1x256xf32> to vector<256xf32>
    %16 = arith.addf %12, %15 : vector<256xf32>
    %17 = arith.maximumf %13, %15 : vector<256xf32>
    %c0_20 = arith.constant 0 : index
    %c3 = arith.constant 3 : index
    %c0_21 = arith.constant 0 : index
    %18 = vector.load %arg1[%c0_20, %c3, %c0_21] : memref<2x4x256xf32, #tpu.memory_space<vmem>>, vector<1x1x256xf32>
    %19 = vector.shape_cast %18 : vector<1x1x256xf32> to vector<256xf32>
    %20 = arith.addf %16, %19 : vector<256xf32>
    %21 = arith.maximumf %17, %19 : vector<256xf32>
    %cst_22 = arith.constant 2.500000e-01 : f32
    %22 = vector.broadcast %cst_22 : f32 to vector<256xf32>
    %23 = arith.mulf %20, %22 : vector<256xf32>
    %24 = vector.extract_strided_slice %23 {offsets = [0], sizes = [16], strides = [1]} : vector<256xf32> to vector<16xf32>
    %c0_23 = arith.constant 0 : index
    %c3_24 = arith.constant 3 : index
    %c3_25 = arith.constant 3 : index
    %25 = vector.load %arg4[%c0_23, %c3_24, %c3_25] : memref<2x22x22xf32, #tpu.memory_space<vmem>>, vector<1x1x16xf32>
    %26 = vector.shape_cast %25 : vector<1x1x16xf32> to vector<16xf32>
    %27 = vector.shape_cast %24 : vector<16xf32> to vector<1x1x16xf32>
    tpu.vector_store %arg4[%c0_23, %c3_24, %c3_25], %27 {strides = array<i32>} : memref<2x22x22xf32, #tpu.memory_space<vmem>>, vector<1x1x16xf32>,
    %28 = vector.extract_strided_slice %21 {offsets = [0], sizes = [16], strides = [1]} : vector<256xf32> to vector<16xf32>
    %c1_26 = arith.constant 1 : index
    %c3_27 = arith.constant 3 : index
    %c3_28 = arith.constant 3 : index
    %29 = vector.load %arg4[%c1_26, %c3_27, %c3_28] : memref<2x22x22xf32, #tpu.memory_space<vmem>>, vector<1x1x16xf32>
    %30 = vector.shape_cast %29 : vector<1x1x16xf32> to vector<16xf32>
    %31 = vector.shape_cast %28 : vector<16xf32> to vector<1x1x16xf32>
    tpu.vector_store %arg4[%c1_26, %c3_27, %c3_28], %31 {strides = array<i32>} : memref<2x22x22xf32, #tpu.memory_space<vmem>>, vector<1x1x16xf32>,
    %32 = vector.extract_strided_slice %23 {offsets = [16], sizes = [16], strides = [1]} : vector<256xf32> to vector<16xf32>
    %c0_29 = arith.constant 0 : index
    %c4 = arith.constant 4 : index
    %c3_30 = arith.constant 3 : index
    %33 = vector.load %arg4[%c0_29, %c4, %c3_30] : memref<2x22x22xf32, #tpu.memory_space<vmem>>, vector<1x1x16xf32>
    %34 = vector.shape_cast %33 : vector<1x1x16xf32> to vector<16xf32>
    %35 = vector.shape_cast %32 : vector<16xf32> to vector<1x1x16xf32>
    tpu.vector_store %arg4[%c0_29, %c4, %c3_30], %35 {strides = array<i32>} : memref<2x22x22xf32, #tpu.memory_space<vmem>>, vector<1x1x16xf32>,
    %36 = vector.extract_strided_slice %21 {offsets = [16], sizes = [16], strides = [1]} : vector<256xf32> to vector<16xf32>
    %c1_31 = arith.constant 1 : index
    %c4_32 = arith.constant 4 : index
    %c3_33 = arith.constant 3 : index
    %37 = vector.load %arg4[%c1_31, %c4_32, %c3_33] : memref<2x22x22xf32, #tpu.memory_space<vmem>>, vector<1x1x16xf32>
    %38 = vector.shape_cast %37 : vector<1x1x16xf32> to vector<16xf32>
    %39 = vector.shape_cast %36 : vector<16xf32> to vector<1x1x16xf32>
    tpu.vector_store %arg4[%c1_31, %c4_32, %c3_33], %39 {strides = array<i32>} : memref<2x22x22xf32, #tpu.memory_space<vmem>>, vector<1x1x16xf32>,
    %40 = vector.extract_strided_slice %23 {offsets = [32], sizes = [16], strides = [1]} : vector<256xf32> to vector<16xf32>
    %c0_34 = arith.constant 0 : index
    %c5 = arith.constant 5 : index
    %c3_35 = arith.constant 3 : index
    %41 = vector.load %arg4[%c0_34, %c5, %c3_35] : memref<2x22x22xf32, #tpu.memory_space<vmem>>, vector<1x1x16xf32>
    %42 = vector.shape_cast %41 : vector<1x1x16xf32> to vector<16xf32>
    %43 = vector.shape_cast %40 : vector<16xf32> to vector<1x1x16xf32>
    tpu.vector_store %arg4[%c0_34, %c5, %c3_35], %43 {strides = array<i32>} : memref<2x22x22xf32, #tpu.memory_space<vmem>>, vector<1x1x16xf32>,
    %44 = vector.extract_strided_slice %21 {offsets = [32], sizes = [16], strides = [1]} : vector<256xf32> to vector<16xf32>
    %c1_36 = arith.constant 1 : index
    %c5_37 = arith.constant 5 : index
    %c3_38 = arith.constant 3 : index
    %45 = vector.load %arg4[%c1_36, %c5_37, %c3_38] : memref<2x22x22xf32, #tpu.memory_space<vmem>>, vector<1x1x16xf32>
    %46 = vector.shape_cast %45 : vector<1x1x16xf32> to vector<16xf32>
    %47 = vector.shape_cast %44 : vector<16xf32> to vector<1x1x16xf32>
    tpu.vector_store %arg4[%c1_36, %c5_37, %c3_38], %47 {strides = array<i32>} : memref<2x22x22xf32, #tpu.memory_space<vmem>>, vector<1x1x16xf32>,
    %48 = vector.extract_strided_slice %23 {offsets = [48], sizes = [16], strides = [1]} : vector<256xf32> to vector<16xf32>
    %c0_39 = arith.constant 0 : index
    %c6 = arith.constant 6 : index
    %c3_40 = arith.constant 3 : index
    %49 = vector.load %arg4[%c0_39, %c6, %c3_40] : memref<2x22x22xf32, #tpu.memory_space<vmem>>, vector<1x1x16xf32>
    %50 = vector.shape_cast %49 : vector<1x1x16xf32> to vector<16xf32>
    %51 = vector.shape_cast %48 : vector<16xf32> to vector<1x1x16xf32>
    tpu.vector_store %arg4[%c0_39, %c6, %c3_40], %51 {strides = array<i32>} : memref<2x22x22xf32, #tpu.memory_space<vmem>>, vector<1x1x16xf32>,
    %52 = vector.extract_strided_slice %21 {offsets = [48], sizes = [16], strides = [1]} : vector<256xf32> to vector<16xf32>
    %c1_41 = arith.constant 1 : index
    %c6_42 = arith.constant 6 : index
    %c3_43 = arith.constant 3 : index
    %53 = vector.load %arg4[%c1_41, %c6_42, %c3_43] : memref<2x22x22xf32, #tpu.memory_space<vmem>>, vector<1x1x16xf32>
    %54 = vector.shape_cast %53 : vector<1x1x16xf32> to vector<16xf32>
    %55 = vector.shape_cast %52 : vector<16xf32> to vector<1x1x16xf32>
    tpu.vector_store %arg4[%c1_41, %c6_42, %c3_43], %55 {strides = array<i32>} : memref<2x22x22xf32, #tpu.memory_space<vmem>>, vector<1x1x16xf32>,
    %56 = vector.extract_strided_slice %23 {offsets = [64], sizes = [16], strides = [1]} : vector<256xf32> to vector<16xf32>
    %c0_44 = arith.constant 0 : index
    %c7 = arith.constant 7 : index
    %c3_45 = arith.constant 3 : index
    %57 = vector.load %arg4[%c0_44, %c7, %c3_45] : memref<2x22x22xf32, #tpu.memory_space<vmem>>, vector<1x1x16xf32>
    %58 = vector.shape_cast %57 : vector<1x1x16xf32> to vector<16xf32>
    %59 = vector.shape_cast %56 : vector<16xf32> to vector<1x1x16xf32>
    tpu.vector_store %arg4[%c0_44, %c7, %c3_45], %59 {strides = array<i32>} : memref<2x22x22xf32, #tpu.memory_space<vmem>>, vector<1x1x16xf32>,
    %60 = vector.extract_strided_slice %21 {offsets = [64], sizes = [16], strides = [1]} : vector<256xf32> to vector<16xf32>
    %c1_46 = arith.constant 1 : index
    %c7_47 = arith.constant 7 : index
    %c3_48 = arith.constant 3 : index
    %61 = vector.load %arg4[%c1_46, %c7_47, %c3_48] : memref<2x22x22xf32, #tpu.memory_space<vmem>>, vector<1x1x16xf32>
    %62 = vector.shape_cast %61 : vector<1x1x16xf32> to vector<16xf32>
    %63 = vector.shape_cast %60 : vector<16xf32> to vector<1x1x16xf32>
    tpu.vector_store %arg4[%c1_46, %c7_47, %c3_48], %63 {strides = array<i32>} : memref<2x22x22xf32, #tpu.memory_space<vmem>>, vector<1x1x16xf32>,
    %64 = vector.extract_strided_slice %23 {offsets = [80], sizes = [16], strides = [1]} : vector<256xf32> to vector<16xf32>
    %c0_49 = arith.constant 0 : index
    %c8 = arith.constant 8 : index
    %c3_50 = arith.constant 3 : index
    %65 = vector.load %arg4[%c0_49, %c8, %c3_50] : memref<2x22x22xf32, #tpu.memory_space<vmem>>, vector<1x1x16xf32>
    %66 = vector.shape_cast %65 : vector<1x1x16xf32> to vector<16xf32>
    %67 = vector.shape_cast %64 : vector<16xf32> to vector<1x1x16xf32>
    tpu.vector_store %arg4[%c0_49, %c8, %c3_50], %67 {strides = array<i32>} : memref<2x22x22xf32, #tpu.memory_space<vmem>>, vector<1x1x16xf32>,
    %68 = vector.extract_strided_slice %21 {offsets = [80], sizes = [16], strides = [1]} : vector<256xf32> to vector<16xf32>
    %c1_51 = arith.constant 1 : index
    %c8_52 = arith.constant 8 : index
    %c3_53 = arith.constant 3 : index
    %69 = vector.load %arg4[%c1_51, %c8_52, %c3_53] : memref<2x22x22xf32, #tpu.memory_space<vmem>>, vector<1x1x16xf32>
    %70 = vector.shape_cast %69 : vector<1x1x16xf32> to vector<16xf32>
    %71 = vector.shape_cast %68 : vector<16xf32> to vector<1x1x16xf32>
    tpu.vector_store %arg4[%c1_51, %c8_52, %c3_53], %71 {strides = array<i32>} : memref<2x22x22xf32, #tpu.memory_space<vmem>>, vector<1x1x16xf32>,
    %72 = vector.extract_strided_slice %23 {offsets = [96], sizes = [16], strides = [1]} : vector<256xf32> to vector<16xf32>
    %c0_54 = arith.constant 0 : index
    %c9 = arith.constant 9 : index
    %c3_55 = arith.constant 3 : index
    %73 = vector.load %arg4[%c0_54, %c9, %c3_55] : memref<2x22x22xf32, #tpu.memory_space<vmem>>, vector<1x1x16xf32>
    %74 = vector.shape_cast %73 : vector<1x1x16xf32> to vector<16xf32>
    %75 = vector.shape_cast %72 : vector<16xf32> to vector<1x1x16xf32>
    tpu.vector_store %arg4[%c0_54, %c9, %c3_55], %75 {strides = array<i32>} : memref<2x22x22xf32, #tpu.memory_space<vmem>>, vector<1x1x16xf32>,
    %76 = vector.extract_strided_slice %21 {offsets = [96], sizes = [16], strides = [1]} : vector<256xf32> to vector<16xf32>
    %c1_56 = arith.constant 1 : index
    %c9_57 = arith.constant 9 : index
    %c3_58 = arith.constant 3 : index
    %77 = vector.load %arg4[%c1_56, %c9_57, %c3_58] : memref<2x22x22xf32, #tpu.memory_space<vmem>>, vector<1x1x16xf32>
    %78 = vector.shape_cast %77 : vector<1x1x16xf32> to vector<16xf32>
    %79 = vector.shape_cast %76 : vector<16xf32> to vector<1x1x16xf32>
    tpu.vector_store %arg4[%c1_56, %c9_57, %c3_58], %79 {strides = array<i32>} : memref<2x22x22xf32, #tpu.memory_space<vmem>>, vector<1x1x16xf32>,
    %80 = vector.extract_strided_slice %23 {offsets = [112], sizes = [16], strides = [1]} : vector<256xf32> to vector<16xf32>
    %c0_59 = arith.constant 0 : index
    %c10 = arith.constant 10 : index
    %c3_60 = arith.constant 3 : index
    %81 = vector.load %arg4[%c0_59, %c10, %c3_60] : memref<2x22x22xf32, #tpu.memory_space<vmem>>, vector<1x1x16xf32>
    %82 = vector.shape_cast %81 : vector<1x1x16xf32> to vector<16xf32>
    %83 = vector.shape_cast %80 : vector<16xf32> to vector<1x1x16xf32>
    tpu.vector_store %arg4[%c0_59, %c10, %c3_60], %83 {strides = array<i32>} : memref<2x22x22xf32, #tpu.memory_space<vmem>>, vector<1x1x16xf32>,
    %84 = vector.extract_strided_slice %21 {offsets = [112], sizes = [16], strides = [1]} : vector<256xf32> to vector<16xf32>
    %c1_61 = arith.constant 1 : index
    %c10_62 = arith.constant 10 : index
    %c3_63 = arith.constant 3 : index
    %85 = vector.load %arg4[%c1_61, %c10_62, %c3_63] : memref<2x22x22xf32, #tpu.memory_space<vmem>>, vector<1x1x16xf32>
    %86 = vector.shape_cast %85 : vector<1x1x16xf32> to vector<16xf32>
    %87 = vector.shape_cast %84 : vector<16xf32> to vector<1x1x16xf32>
    tpu.vector_store %arg4[%c1_61, %c10_62, %c3_63], %87 {strides = array<i32>} : memref<2x22x22xf32, #tpu.memory_space<vmem>>, vector<1x1x16xf32>,
    %88 = vector.extract_strided_slice %23 {offsets = [128], sizes = [16], strides = [1]} : vector<256xf32> to vector<16xf32>
    %c0_64 = arith.constant 0 : index
    %c11 = arith.constant 11 : index
    %c3_65 = arith.constant 3 : index
    %89 = vector.load %arg4[%c0_64, %c11, %c3_65] : memref<2x22x22xf32, #tpu.memory_space<vmem>>, vector<1x1x16xf32>
    %90 = vector.shape_cast %89 : vector<1x1x16xf32> to vector<16xf32>
    %91 = vector.shape_cast %88 : vector<16xf32> to vector<1x1x16xf32>
    tpu.vector_store %arg4[%c0_64, %c11, %c3_65], %91 {strides = array<i32>} : memref<2x22x22xf32, #tpu.memory_space<vmem>>, vector<1x1x16xf32>,
    %92 = vector.extract_strided_slice %21 {offsets = [128], sizes = [16], strides = [1]} : vector<256xf32> to vector<16xf32>
    %c1_66 = arith.constant 1 : index
    %c11_67 = arith.constant 11 : index
    %c3_68 = arith.constant 3 : index
    %93 = vector.load %arg4[%c1_66, %c11_67, %c3_68] : memref<2x22x22xf32, #tpu.memory_space<vmem>>, vector<1x1x16xf32>
    %94 = vector.shape_cast %93 : vector<1x1x16xf32> to vector<16xf32>
    %95 = vector.shape_cast %92 : vector<16xf32> to vector<1x1x16xf32>
    tpu.vector_store %arg4[%c1_66, %c11_67, %c3_68], %95 {strides = array<i32>} : memref<2x22x22xf32, #tpu.memory_space<vmem>>, vector<1x1x16xf32>,
    %96 = vector.extract_strided_slice %23 {offsets = [144], sizes = [16], strides = [1]} : vector<256xf32> to vector<16xf32>
    %c0_69 = arith.constant 0 : index
    %c12 = arith.constant 12 : index
    %c3_70 = arith.constant 3 : index
    %97 = vector.load %arg4[%c0_69, %c12, %c3_70] : memref<2x22x22xf32, #tpu.memory_space<vmem>>, vector<1x1x16xf32>
    %98 = vector.shape_cast %97 : vector<1x1x16xf32> to vector<16xf32>
    %99 = vector.shape_cast %96 : vector<16xf32> to vector<1x1x16xf32>
    tpu.vector_store %arg4[%c0_69, %c12, %c3_70], %99 {strides = array<i32>} : memref<2x22x22xf32, #tpu.memory_space<vmem>>, vector<1x1x16xf32>,
    %100 = vector.extract_strided_slice %21 {offsets = [144], sizes = [16], strides = [1]} : vector<256xf32> to vector<16xf32>
    %c1_71 = arith.constant 1 : index
    %c12_72 = arith.constant 12 : index
    %c3_73 = arith.constant 3 : index
    %101 = vector.load %arg4[%c1_71, %c12_72, %c3_73] : memref<2x22x22xf32, #tpu.memory_space<vmem>>, vector<1x1x16xf32>
    %102 = vector.shape_cast %101 : vector<1x1x16xf32> to vector<16xf32>
    %103 = vector.shape_cast %100 : vector<16xf32> to vector<1x1x16xf32>
    tpu.vector_store %arg4[%c1_71, %c12_72, %c3_73], %103 {strides = array<i32>} : memref<2x22x22xf32, #tpu.memory_space<vmem>>, vector<1x1x16xf32>,
    %104 = vector.extract_strided_slice %23 {offsets = [160], sizes = [16], strides = [1]} : vector<256xf32> to vector<16xf32>
    %c0_74 = arith.constant 0 : index
    %c13 = arith.constant 13 : index
    %c3_75 = arith.constant 3 : index
    %105 = vector.load %arg4[%c0_74, %c13, %c3_75] : memref<2x22x22xf32, #tpu.memory_space<vmem>>, vector<1x1x16xf32>
    %106 = vector.shape_cast %105 : vector<1x1x16xf32> to vector<16xf32>
    %107 = vector.shape_cast %104 : vector<16xf32> to vector<1x1x16xf32>
    tpu.vector_store %arg4[%c0_74, %c13, %c3_75], %107 {strides = array<i32>} : memref<2x22x22xf32, #tpu.memory_space<vmem>>, vector<1x1x16xf32>,
    %108 = vector.extract_strided_slice %21 {offsets = [160], sizes = [16], strides = [1]} : vector<256xf32> to vector<16xf32>
    %c1_76 = arith.constant 1 : index
    %c13_77 = arith.constant 13 : index
    %c3_78 = arith.constant 3 : index
    %109 = vector.load %arg4[%c1_76, %c13_77, %c3_78] : memref<2x22x22xf32, #tpu.memory_space<vmem>>, vector<1x1x16xf32>
    %110 = vector.shape_cast %109 : vector<1x1x16xf32> to vector<16xf32>
    %111 = vector.shape_cast %108 : vector<16xf32> to vector<1x1x16xf32>
    tpu.vector_store %arg4[%c1_76, %c13_77, %c3_78], %111 {strides = array<i32>} : memref<2x22x22xf32, #tpu.memory_space<vmem>>, vector<1x1x16xf32>,
    %112 = vector.extract_strided_slice %23 {offsets = [176], sizes = [16], strides = [1]} : vector<256xf32> to vector<16xf32>
    %c0_79 = arith.constant 0 : index
    %c14 = arith.constant 14 : index
    %c3_80 = arith.constant 3 : index
    %113 = vector.load %arg4[%c0_79, %c14, %c3_80] : memref<2x22x22xf32, #tpu.memory_space<vmem>>, vector<1x1x16xf32>
    %114 = vector.shape_cast %113 : vector<1x1x16xf32> to vector<16xf32>
    %115 = vector.shape_cast %112 : vector<16xf32> to vector<1x1x16xf32>
    tpu.vector_store %arg4[%c0_79, %c14, %c3_80], %115 {strides = array<i32>} : memref<2x22x22xf32, #tpu.memory_space<vmem>>, vector<1x1x16xf32>,
    %116 = vector.extract_strided_slice %21 {offsets = [176], sizes = [16], strides = [1]} : vector<256xf32> to vector<16xf32>
    %c1_81 = arith.constant 1 : index
    %c14_82 = arith.constant 14 : index
    %c3_83 = arith.constant 3 : index
    %117 = vector.load %arg4[%c1_81, %c14_82, %c3_83] : memref<2x22x22xf32, #tpu.memory_space<vmem>>, vector<1x1x16xf32>
    %118 = vector.shape_cast %117 : vector<1x1x16xf32> to vector<16xf32>
    %119 = vector.shape_cast %116 : vector<16xf32> to vector<1x1x16xf32>
    tpu.vector_store %arg4[%c1_81, %c14_82, %c3_83], %119 {strides = array<i32>} : memref<2x22x22xf32, #tpu.memory_space<vmem>>, vector<1x1x16xf32>,
    %120 = vector.extract_strided_slice %23 {offsets = [192], sizes = [16], strides = [1]} : vector<256xf32> to vector<16xf32>
    %c0_84 = arith.constant 0 : index
    %c15 = arith.constant 15 : index
    %c3_85 = arith.constant 3 : index
    %121 = vector.load %arg4[%c0_84, %c15, %c3_85] : memref<2x22x22xf32, #tpu.memory_space<vmem>>, vector<1x1x16xf32>
    %122 = vector.shape_cast %121 : vector<1x1x16xf32> to vector<16xf32>
    %123 = vector.shape_cast %120 : vector<16xf32> to vector<1x1x16xf32>
    tpu.vector_store %arg4[%c0_84, %c15, %c3_85], %123 {strides = array<i32>} : memref<2x22x22xf32, #tpu.memory_space<vmem>>, vector<1x1x16xf32>,
    %124 = vector.extract_strided_slice %21 {offsets = [192], sizes = [16], strides = [1]} : vector<256xf32> to vector<16xf32>
    %c1_86 = arith.constant 1 : index
    %c15_87 = arith.constant 15 : index
    %c3_88 = arith.constant 3 : index
    %125 = vector.load %arg4[%c1_86, %c15_87, %c3_88] : memref<2x22x22xf32, #tpu.memory_space<vmem>>, vector<1x1x16xf32>
    %126 = vector.shape_cast %125 : vector<1x1x16xf32> to vector<16xf32>
    %127 = vector.shape_cast %124 : vector<16xf32> to vector<1x1x16xf32>
    tpu.vector_store %arg4[%c1_86, %c15_87, %c3_88], %127 {strides = array<i32>} : memref<2x22x22xf32, #tpu.memory_space<vmem>>, vector<1x1x16xf32>,
    %128 = vector.extract_strided_slice %23 {offsets = [208], sizes = [16], strides = [1]} : vector<256xf32> to vector<16xf32>
    %c0_89 = arith.constant 0 : index
    %c16 = arith.constant 16 : index
    %c3_90 = arith.constant 3 : index
    %129 = vector.load %arg4[%c0_89, %c16, %c3_90] : memref<2x22x22xf32, #tpu.memory_space<vmem>>, vector<1x1x16xf32>
    %130 = vector.shape_cast %129 : vector<1x1x16xf32> to vector<16xf32>
    %131 = vector.shape_cast %128 : vector<16xf32> to vector<1x1x16xf32>
    tpu.vector_store %arg4[%c0_89, %c16, %c3_90], %131 {strides = array<i32>} : memref<2x22x22xf32, #tpu.memory_space<vmem>>, vector<1x1x16xf32>,
    %132 = vector.extract_strided_slice %21 {offsets = [208], sizes = [16], strides = [1]} : vector<256xf32> to vector<16xf32>
    %c1_91 = arith.constant 1 : index
    %c16_92 = arith.constant 16 : index
    %c3_93 = arith.constant 3 : index
    %133 = vector.load %arg4[%c1_91, %c16_92, %c3_93] : memref<2x22x22xf32, #tpu.memory_space<vmem>>, vector<1x1x16xf32>
    %134 = vector.shape_cast %133 : vector<1x1x16xf32> to vector<16xf32>
    %135 = vector.shape_cast %132 : vector<16xf32> to vector<1x1x16xf32>
    tpu.vector_store %arg4[%c1_91, %c16_92, %c3_93], %135 {strides = array<i32>} : memref<2x22x22xf32, #tpu.memory_space<vmem>>, vector<1x1x16xf32>,
    %136 = vector.extract_strided_slice %23 {offsets = [224], sizes = [16], strides = [1]} : vector<256xf32> to vector<16xf32>
    %c0_94 = arith.constant 0 : index
    %c17 = arith.constant 17 : index
    %c3_95 = arith.constant 3 : index
    %137 = vector.load %arg4[%c0_94, %c17, %c3_95] : memref<2x22x22xf32, #tpu.memory_space<vmem>>, vector<1x1x16xf32>
    %138 = vector.shape_cast %137 : vector<1x1x16xf32> to vector<16xf32>
    %139 = vector.shape_cast %136 : vector<16xf32> to vector<1x1x16xf32>
    tpu.vector_store %arg4[%c0_94, %c17, %c3_95], %139 {strides = array<i32>} : memref<2x22x22xf32, #tpu.memory_space<vmem>>, vector<1x1x16xf32>,
    %140 = vector.extract_strided_slice %21 {offsets = [224], sizes = [16], strides = [1]} : vector<256xf32> to vector<16xf32>
    %c1_96 = arith.constant 1 : index
    %c17_97 = arith.constant 17 : index
    %c3_98 = arith.constant 3 : index
    %141 = vector.load %arg4[%c1_96, %c17_97, %c3_98] : memref<2x22x22xf32, #tpu.memory_space<vmem>>, vector<1x1x16xf32>
    %142 = vector.shape_cast %141 : vector<1x1x16xf32> to vector<16xf32>
    %143 = vector.shape_cast %140 : vector<16xf32> to vector<1x1x16xf32>
    tpu.vector_store %arg4[%c1_96, %c17_97, %c3_98], %143 {strides = array<i32>} : memref<2x22x22xf32, #tpu.memory_space<vmem>>, vector<1x1x16xf32>,
    %144 = vector.extract_strided_slice %23 {offsets = [240], sizes = [16], strides = [1]} : vector<256xf32> to vector<16xf32>
    %c0_99 = arith.constant 0 : index
    %c18 = arith.constant 18 : index
    %c3_100 = arith.constant 3 : index
    %145 = vector.load %arg4[%c0_99, %c18, %c3_100] : memref<2x22x22xf32, #tpu.memory_space<vmem>>, vector<1x1x16xf32>
    %146 = vector.shape_cast %145 : vector<1x1x16xf32> to vector<16xf32>
    %147 = vector.shape_cast %144 : vector<16xf32> to vector<1x1x16xf32>
    tpu.vector_store %arg4[%c0_99, %c18, %c3_100], %147 {strides = array<i32>} : memref<2x22x22xf32, #tpu.memory_space<vmem>>, vector<1x1x16xf32>,
    %148 = vector.extract_strided_slice %21 {offsets = [240], sizes = [16], strides = [1]} : vector<256xf32> to vector<16xf32>
    %c1_101 = arith.constant 1 : index
    %c18_102 = arith.constant 18 : index
    %c3_103 = arith.constant 3 : index
    %149 = vector.load %arg4[%c1_101, %c18_102, %c3_103] : memref<2x22x22xf32, #tpu.memory_space<vmem>>, vector<1x1x16xf32>
    %150 = vector.shape_cast %149 : vector<1x1x16xf32> to vector<16xf32>
    %151 = vector.shape_cast %148 : vector<16xf32> to vector<1x1x16xf32>
    tpu.vector_store %arg4[%c1_101, %c18_102, %c3_103], %151 {strides = array<i32>} : memref<2x22x22xf32, #tpu.memory_space<vmem>>, vector<1x1x16xf32>,
    %cst_104 = arith.constant 0.000000e+00 : f32
    %152 = vector.broadcast %cst_104 : f32 to vector<16x16xf32>
    %c0_105 = arith.constant 0 : index
    %c0_106 = arith.constant 0 : index
    %c0_107 = arith.constant 0 : index
    %153 = vector.load %arg4[%c0_105, %c0_106, %c0_107] : memref<2x22x22xf32, #tpu.memory_space<vmem>>, vector<1x22x16xf32>
    %154 = vector.shape_cast %153 : vector<1x22x16xf32> to vector<22x16xf32>
    %c0_108 = arith.constant 0 : index
    %155 = memref.load %arg2[%c0_108] : memref<98xf32, #tpu.memory_space<smem>>
    %156 = vector.extract_strided_slice %154 {offsets = [0, 0], sizes = [16, 16], strides = [1, 1]} : vector<22x16xf32> to vector<16x16xf32>
    %157 = vector.broadcast %155 : f32 to vector<16x16xf32>
    %158 = arith.mulf %156, %157 : vector<16x16xf32>
    %159 = arith.addf %152, %158 : vector<16x16xf32>
    %c7_109 = arith.constant 7 : index
    %160 = memref.load %arg2[%c7_109] : memref<98xf32, #tpu.memory_space<smem>>
    %161 = vector.extract_strided_slice %154 {offsets = [1, 0], sizes = [16, 16], strides = [1, 1]} : vector<22x16xf32> to vector<16x16xf32>
    %162 = vector.broadcast %160 : f32 to vector<16x16xf32>
    %163 = arith.mulf %161, %162 : vector<16x16xf32>
    %164 = arith.addf %159, %163 : vector<16x16xf32>
    %c14_110 = arith.constant 14 : index
    %165 = memref.load %arg2[%c14_110] : memref<98xf32, #tpu.memory_space<smem>>
    %166 = vector.extract_strided_slice %154 {offsets = [2, 0], sizes = [16, 16], strides = [1, 1]} : vector<22x16xf32> to vector<16x16xf32>
    %167 = vector.broadcast %165 : f32 to vector<16x16xf32>
    %168 = arith.mulf %166, %167 : vector<16x16xf32>
    %169 = arith.addf %164, %168 : vector<16x16xf32>
    %c21 = arith.constant 21 : index
    %170 = memref.load %arg2[%c21] : memref<98xf32, #tpu.memory_space<smem>>
    %171 = vector.extract_strided_slice %154 {offsets = [3, 0], sizes = [16, 16], strides = [1, 1]} : vector<22x16xf32> to vector<16x16xf32>
    %172 = vector.broadcast %170 : f32 to vector<16x16xf32>
    %173 = arith.mulf %171, %172 : vector<16x16xf32>
    %174 = arith.addf %169, %173 : vector<16x16xf32>
    %c28 = arith.constant 28 : index
    %175 = memref.load %arg2[%c28] : memref<98xf32, #tpu.memory_space<smem>>
    %176 = vector.extract_strided_slice %154 {offsets = [4, 0], sizes = [16, 16], strides = [1, 1]} : vector<22x16xf32> to vector<16x16xf32>
    %177 = vector.broadcast %175 : f32 to vector<16x16xf32>
    %178 = arith.mulf %176, %177 : vector<16x16xf32>
    %179 = arith.addf %174, %178 : vector<16x16xf32>
    %c35 = arith.constant 35 : index
    %180 = memref.load %arg2[%c35] : memref<98xf32, #tpu.memory_space<smem>>
    %181 = vector.extract_strided_slice %154 {offsets = [5, 0], sizes = [16, 16], strides = [1, 1]} : vector<22x16xf32> to vector<16x16xf32>
    %182 = vector.broadcast %180 : f32 to vector<16x16xf32>
    %183 = arith.mulf %181, %182 : vector<16x16xf32>
    %184 = arith.addf %179, %183 : vector<16x16xf32>
    %c42 = arith.constant 42 : index
    %185 = memref.load %arg2[%c42] : memref<98xf32, #tpu.memory_space<smem>>
    %186 = vector.extract_strided_slice %154 {offsets = [6, 0], sizes = [16, 16], strides = [1, 1]} : vector<22x16xf32> to vector<16x16xf32>
    %187 = vector.broadcast %185 : f32 to vector<16x16xf32>
    %188 = arith.mulf %186, %187 : vector<16x16xf32>
    %189 = arith.addf %184, %188 : vector<16x16xf32>
    %c0_111 = arith.constant 0 : index
    %c0_112 = arith.constant 0 : index
    %c1_113 = arith.constant 1 : index
    %190 = vector.load %arg4[%c0_111, %c0_112, %c1_113] : memref<2x22x22xf32, #tpu.memory_space<vmem>>, vector<1x22x16xf32>
    %191 = vector.shape_cast %190 : vector<1x22x16xf32> to vector<22x16xf32>
    %c1_114 = arith.constant 1 : index
    %192 = memref.load %arg2[%c1_114] : memref<98xf32, #tpu.memory_space<smem>>
    %193 = vector.extract_strided_slice %191 {offsets = [0, 0], sizes = [16, 16], strides = [1, 1]} : vector<22x16xf32> to vector<16x16xf32>
    %194 = vector.broadcast %192 : f32 to vector<16x16xf32>
    %195 = arith.mulf %193, %194 : vector<16x16xf32>
    %196 = arith.addf %189, %195 : vector<16x16xf32>
    %c8_115 = arith.constant 8 : index
    %197 = memref.load %arg2[%c8_115] : memref<98xf32, #tpu.memory_space<smem>>
    %198 = vector.extract_strided_slice %191 {offsets = [1, 0], sizes = [16, 16], strides = [1, 1]} : vector<22x16xf32> to vector<16x16xf32>
    %199 = vector.broadcast %197 : f32 to vector<16x16xf32>
    %200 = arith.mulf %198, %199 : vector<16x16xf32>
    %201 = arith.addf %196, %200 : vector<16x16xf32>
    %c15_116 = arith.constant 15 : index
    %202 = memref.load %arg2[%c15_116] : memref<98xf32, #tpu.memory_space<smem>>
    %203 = vector.extract_strided_slice %191 {offsets = [2, 0], sizes = [16, 16], strides = [1, 1]} : vector<22x16xf32> to vector<16x16xf32>
    %204 = vector.broadcast %202 : f32 to vector<16x16xf32>
    %205 = arith.mulf %203, %204 : vector<16x16xf32>
    %206 = arith.addf %201, %205 : vector<16x16xf32>
    %c22 = arith.constant 22 : index
    %207 = memref.load %arg2[%c22] : memref<98xf32, #tpu.memory_space<smem>>
    %208 = vector.extract_strided_slice %191 {offsets = [3, 0], sizes = [16, 16], strides = [1, 1]} : vector<22x16xf32> to vector<16x16xf32>
    %209 = vector.broadcast %207 : f32 to vector<16x16xf32>
    %210 = arith.mulf %208, %209 : vector<16x16xf32>
    %211 = arith.addf %206, %210 : vector<16x16xf32>
    %c29 = arith.constant 29 : index
    %212 = memref.load %arg2[%c29] : memref<98xf32, #tpu.memory_space<smem>>
    %213 = vector.extract_strided_slice %191 {offsets = [4, 0], sizes = [16, 16], strides = [1, 1]} : vector<22x16xf32> to vector<16x16xf32>
    %214 = vector.broadcast %212 : f32 to vector<16x16xf32>
    %215 = arith.mulf %213, %214 : vector<16x16xf32>
    %216 = arith.addf %211, %215 : vector<16x16xf32>
    %c36 = arith.constant 36 : index
    %217 = memref.load %arg2[%c36] : memref<98xf32, #tpu.memory_space<smem>>
    %218 = vector.extract_strided_slice %191 {offsets = [5, 0], sizes = [16, 16], strides = [1, 1]} : vector<22x16xf32> to vector<16x16xf32>
    %219 = vector.broadcast %217 : f32 to vector<16x16xf32>
    %220 = arith.mulf %218, %219 : vector<16x16xf32>
    %221 = arith.addf %216, %220 : vector<16x16xf32>
    %c43 = arith.constant 43 : index
    %222 = memref.load %arg2[%c43] : memref<98xf32, #tpu.memory_space<smem>>
    %223 = vector.extract_strided_slice %191 {offsets = [6, 0], sizes = [16, 16], strides = [1, 1]} : vector<22x16xf32> to vector<16x16xf32>
    %224 = vector.broadcast %222 : f32 to vector<16x16xf32>
    %225 = arith.mulf %223, %224 : vector<16x16xf32>
    %226 = arith.addf %221, %225 : vector<16x16xf32>
    %c0_117 = arith.constant 0 : index
    %c0_118 = arith.constant 0 : index
    %c2_119 = arith.constant 2 : index
    %227 = vector.load %arg4[%c0_117, %c0_118, %c2_119] : memref<2x22x22xf32, #tpu.memory_space<vmem>>, vector<1x22x16xf32>
    %228 = vector.shape_cast %227 : vector<1x22x16xf32> to vector<22x16xf32>
    %c2_120 = arith.constant 2 : index
    %229 = memref.load %arg2[%c2_120] : memref<98xf32, #tpu.memory_space<smem>>
    %230 = vector.extract_strided_slice %228 {offsets = [0, 0], sizes = [16, 16], strides = [1, 1]} : vector<22x16xf32> to vector<16x16xf32>
    %231 = vector.broadcast %229 : f32 to vector<16x16xf32>
    %232 = arith.mulf %230, %231 : vector<16x16xf32>
    %233 = arith.addf %226, %232 : vector<16x16xf32>
    %c9_121 = arith.constant 9 : index
    %234 = memref.load %arg2[%c9_121] : memref<98xf32, #tpu.memory_space<smem>>
    %235 = vector.extract_strided_slice %228 {offsets = [1, 0], sizes = [16, 16], strides = [1, 1]} : vector<22x16xf32> to vector<16x16xf32>
    %236 = vector.broadcast %234 : f32 to vector<16x16xf32>
    %237 = arith.mulf %235, %236 : vector<16x16xf32>
    %238 = arith.addf %233, %237 : vector<16x16xf32>
    %c16_122 = arith.constant 16 : index
    %239 = memref.load %arg2[%c16_122] : memref<98xf32, #tpu.memory_space<smem>>
    %240 = vector.extract_strided_slice %228 {offsets = [2, 0], sizes = [16, 16], strides = [1, 1]} : vector<22x16xf32> to vector<16x16xf32>
    %241 = vector.broadcast %239 : f32 to vector<16x16xf32>
    %242 = arith.mulf %240, %241 : vector<16x16xf32>
    %243 = arith.addf %238, %242 : vector<16x16xf32>
    %c23 = arith.constant 23 : index
    %244 = memref.load %arg2[%c23] : memref<98xf32, #tpu.memory_space<smem>>
    %245 = vector.extract_strided_slice %228 {offsets = [3, 0], sizes = [16, 16], strides = [1, 1]} : vector<22x16xf32> to vector<16x16xf32>
    %246 = vector.broadcast %244 : f32 to vector<16x16xf32>
    %247 = arith.mulf %245, %246 : vector<16x16xf32>
    %248 = arith.addf %243, %247 : vector<16x16xf32>
    %c30 = arith.constant 30 : index
    %249 = memref.load %arg2[%c30] : memref<98xf32, #tpu.memory_space<smem>>
    %250 = vector.extract_strided_slice %228 {offsets = [4, 0], sizes = [16, 16], strides = [1, 1]} : vector<22x16xf32> to vector<16x16xf32>
    %251 = vector.broadcast %249 : f32 to vector<16x16xf32>
    %252 = arith.mulf %250, %251 : vector<16x16xf32>
    %253 = arith.addf %248, %252 : vector<16x16xf32>
    %c37 = arith.constant 37 : index
    %254 = memref.load %arg2[%c37] : memref<98xf32, #tpu.memory_space<smem>>
    %255 = vector.extract_strided_slice %228 {offsets = [5, 0], sizes = [16, 16], strides = [1, 1]} : vector<22x16xf32> to vector<16x16xf32>
    %256 = vector.broadcast %254 : f32 to vector<16x16xf32>
    %257 = arith.mulf %255, %256 : vector<16x16xf32>
    %258 = arith.addf %253, %257 : vector<16x16xf32>
    %c44 = arith.constant 44 : index
    %259 = memref.load %arg2[%c44] : memref<98xf32, #tpu.memory_space<smem>>
    %260 = vector.extract_strided_slice %228 {offsets = [6, 0], sizes = [16, 16], strides = [1, 1]} : vector<22x16xf32> to vector<16x16xf32>
    %261 = vector.broadcast %259 : f32 to vector<16x16xf32>
    %262 = arith.mulf %260, %261 : vector<16x16xf32>
    %263 = arith.addf %258, %262 : vector<16x16xf32>
    %c0_123 = arith.constant 0 : index
    %c0_124 = arith.constant 0 : index
    %c3_125 = arith.constant 3 : index
    %264 = vector.load %arg4[%c0_123, %c0_124, %c3_125] : memref<2x22x22xf32, #tpu.memory_space<vmem>>, vector<1x22x16xf32>
    %265 = vector.shape_cast %264 : vector<1x22x16xf32> to vector<22x16xf32>
    %c3_126 = arith.constant 3 : index
    %266 = memref.load %arg2[%c3_126] : memref<98xf32, #tpu.memory_space<smem>>
    %267 = vector.extract_strided_slice %265 {offsets = [0, 0], sizes = [16, 16], strides = [1, 1]} : vector<22x16xf32> to vector<16x16xf32>
    %268 = vector.broadcast %266 : f32 to vector<16x16xf32>
    %269 = arith.mulf %267, %268 : vector<16x16xf32>
    %270 = arith.addf %263, %269 : vector<16x16xf32>
    %c10_127 = arith.constant 10 : index
    %271 = memref.load %arg2[%c10_127] : memref<98xf32, #tpu.memory_space<smem>>
    %272 = vector.extract_strided_slice %265 {offsets = [1, 0], sizes = [16, 16], strides = [1, 1]} : vector<22x16xf32> to vector<16x16xf32>
    %273 = vector.broadcast %271 : f32 to vector<16x16xf32>
    %274 = arith.mulf %272, %273 : vector<16x16xf32>
    %275 = arith.addf %270, %274 : vector<16x16xf32>
    %c17_128 = arith.constant 17 : index
    %276 = memref.load %arg2[%c17_128] : memref<98xf32, #tpu.memory_space<smem>>
    %277 = vector.extract_strided_slice %265 {offsets = [2, 0], sizes = [16, 16], strides = [1, 1]} : vector<22x16xf32> to vector<16x16xf32>
    %278 = vector.broadcast %276 : f32 to vector<16x16xf32>
    %279 = arith.mulf %277, %278 : vector<16x16xf32>
    %280 = arith.addf %275, %279 : vector<16x16xf32>
    %c24 = arith.constant 24 : index
    %281 = memref.load %arg2[%c24] : memref<98xf32, #tpu.memory_space<smem>>
    %282 = vector.extract_strided_slice %265 {offsets = [3, 0], sizes = [16, 16], strides = [1, 1]} : vector<22x16xf32> to vector<16x16xf32>
    %283 = vector.broadcast %281 : f32 to vector<16x16xf32>
    %284 = arith.mulf %282, %283 : vector<16x16xf32>
    %285 = arith.addf %280, %284 : vector<16x16xf32>
    %c31 = arith.constant 31 : index
    %286 = memref.load %arg2[%c31] : memref<98xf32, #tpu.memory_space<smem>>
    %287 = vector.extract_strided_slice %265 {offsets = [4, 0], sizes = [16, 16], strides = [1, 1]} : vector<22x16xf32> to vector<16x16xf32>
    %288 = vector.broadcast %286 : f32 to vector<16x16xf32>
    %289 = arith.mulf %287, %288 : vector<16x16xf32>
    %290 = arith.addf %285, %289 : vector<16x16xf32>
    %c38 = arith.constant 38 : index
    %291 = memref.load %arg2[%c38] : memref<98xf32, #tpu.memory_space<smem>>
    %292 = vector.extract_strided_slice %265 {offsets = [5, 0], sizes = [16, 16], strides = [1, 1]} : vector<22x16xf32> to vector<16x16xf32>
    %293 = vector.broadcast %291 : f32 to vector<16x16xf32>
    %294 = arith.mulf %292, %293 : vector<16x16xf32>
    %295 = arith.addf %290, %294 : vector<16x16xf32>
    %c45 = arith.constant 45 : index
    %296 = memref.load %arg2[%c45] : memref<98xf32, #tpu.memory_space<smem>>
    %297 = vector.extract_strided_slice %265 {offsets = [6, 0], sizes = [16, 16], strides = [1, 1]} : vector<22x16xf32> to vector<16x16xf32>
    %298 = vector.broadcast %296 : f32 to vector<16x16xf32>
    %299 = arith.mulf %297, %298 : vector<16x16xf32>
    %300 = arith.addf %295, %299 : vector<16x16xf32>
    %c0_129 = arith.constant 0 : index
    %c0_130 = arith.constant 0 : index
    %c4_131 = arith.constant 4 : index
    %301 = vector.load %arg4[%c0_129, %c0_130, %c4_131] : memref<2x22x22xf32, #tpu.memory_space<vmem>>, vector<1x22x16xf32>
    %302 = vector.shape_cast %301 : vector<1x22x16xf32> to vector<22x16xf32>
    %c4_132 = arith.constant 4 : index
    %303 = memref.load %arg2[%c4_132] : memref<98xf32, #tpu.memory_space<smem>>
    %304 = vector.extract_strided_slice %302 {offsets = [0, 0], sizes = [16, 16], strides = [1, 1]} : vector<22x16xf32> to vector<16x16xf32>
    %305 = vector.broadcast %303 : f32 to vector<16x16xf32>
    %306 = arith.mulf %304, %305 : vector<16x16xf32>
    %307 = arith.addf %300, %306 : vector<16x16xf32>
    %c11_133 = arith.constant 11 : index
    %308 = memref.load %arg2[%c11_133] : memref<98xf32, #tpu.memory_space<smem>>
    %309 = vector.extract_strided_slice %302 {offsets = [1, 0], sizes = [16, 16], strides = [1, 1]} : vector<22x16xf32> to vector<16x16xf32>
    %310 = vector.broadcast %308 : f32 to vector<16x16xf32>
    %311 = arith.mulf %309, %310 : vector<16x16xf32>
    %312 = arith.addf %307, %311 : vector<16x16xf32>
    %c18_134 = arith.constant 18 : index
    %313 = memref.load %arg2[%c18_134] : memref<98xf32, #tpu.memory_space<smem>>
    %314 = vector.extract_strided_slice %302 {offsets = [2, 0], sizes = [16, 16], strides = [1, 1]} : vector<22x16xf32> to vector<16x16xf32>
    %315 = vector.broadcast %313 : f32 to vector<16x16xf32>
    %316 = arith.mulf %314, %315 : vector<16x16xf32>
    %317 = arith.addf %312, %316 : vector<16x16xf32>
    %c25 = arith.constant 25 : index
    %318 = memref.load %arg2[%c25] : memref<98xf32, #tpu.memory_space<smem>>
    %319 = vector.extract_strided_slice %302 {offsets = [3, 0], sizes = [16, 16], strides = [1, 1]} : vector<22x16xf32> to vector<16x16xf32>
    %320 = vector.broadcast %318 : f32 to vector<16x16xf32>
    %321 = arith.mulf %319, %320 : vector<16x16xf32>
    %322 = arith.addf %317, %321 : vector<16x16xf32>
    %c32 = arith.constant 32 : index
    %323 = memref.load %arg2[%c32] : memref<98xf32, #tpu.memory_space<smem>>
    %324 = vector.extract_strided_slice %302 {offsets = [4, 0], sizes = [16, 16], strides = [1, 1]} : vector<22x16xf32> to vector<16x16xf32>
    %325 = vector.broadcast %323 : f32 to vector<16x16xf32>
    %326 = arith.mulf %324, %325 : vector<16x16xf32>
    %327 = arith.addf %322, %326 : vector<16x16xf32>
    %c39 = arith.constant 39 : index
    %328 = memref.load %arg2[%c39] : memref<98xf32, #tpu.memory_space<smem>>
    %329 = vector.extract_strided_slice %302 {offsets = [5, 0], sizes = [16, 16], strides = [1, 1]} : vector<22x16xf32> to vector<16x16xf32>
    %330 = vector.broadcast %328 : f32 to vector<16x16xf32>
    %331 = arith.mulf %329, %330 : vector<16x16xf32>
    %332 = arith.addf %327, %331 : vector<16x16xf32>
    %c46 = arith.constant 46 : index
    %333 = memref.load %arg2[%c46] : memref<98xf32, #tpu.memory_space<smem>>
    %334 = vector.extract_strided_slice %302 {offsets = [6, 0], sizes = [16, 16], strides = [1, 1]} : vector<22x16xf32> to vector<16x16xf32>
    %335 = vector.broadcast %333 : f32 to vector<16x16xf32>
    %336 = arith.mulf %334, %335 : vector<16x16xf32>
    %337 = arith.addf %332, %336 : vector<16x16xf32>
    %c0_135 = arith.constant 0 : index
    %c0_136 = arith.constant 0 : index
    %c5_137 = arith.constant 5 : index
    %338 = vector.load %arg4[%c0_135, %c0_136, %c5_137] : memref<2x22x22xf32, #tpu.memory_space<vmem>>, vector<1x22x16xf32>
    %339 = vector.shape_cast %338 : vector<1x22x16xf32> to vector<22x16xf32>
    %c5_138 = arith.constant 5 : index
    %340 = memref.load %arg2[%c5_138] : memref<98xf32, #tpu.memory_space<smem>>
    %341 = vector.extract_strided_slice %339 {offsets = [0, 0], sizes = [16, 16], strides = [1, 1]} : vector<22x16xf32> to vector<16x16xf32>
    %342 = vector.broadcast %340 : f32 to vector<16x16xf32>
    %343 = arith.mulf %341, %342 : vector<16x16xf32>
    %344 = arith.addf %337, %343 : vector<16x16xf32>
    %c12_139 = arith.constant 12 : index
    %345 = memref.load %arg2[%c12_139] : memref<98xf32, #tpu.memory_space<smem>>
    %346 = vector.extract_strided_slice %339 {offsets = [1, 0], sizes = [16, 16], strides = [1, 1]} : vector<22x16xf32> to vector<16x16xf32>
    %347 = vector.broadcast %345 : f32 to vector<16x16xf32>
    %348 = arith.mulf %346, %347 : vector<16x16xf32>
    %349 = arith.addf %344, %348 : vector<16x16xf32>
    %c19_140 = arith.constant 19 : index
    %350 = memref.load %arg2[%c19_140] : memref<98xf32, #tpu.memory_space<smem>>
    %351 = vector.extract_strided_slice %339 {offsets = [2, 0], sizes = [16, 16], strides = [1, 1]} : vector<22x16xf32> to vector<16x16xf32>
    %352 = vector.broadcast %350 : f32 to vector<16x16xf32>
    %353 = arith.mulf %351, %352 : vector<16x16xf32>
    %354 = arith.addf %349, %353 : vector<16x16xf32>
    %c26 = arith.constant 26 : index
    %355 = memref.load %arg2[%c26] : memref<98xf32, #tpu.memory_space<smem>>
    %356 = vector.extract_strided_slice %339 {offsets = [3, 0], sizes = [16, 16], strides = [1, 1]} : vector<22x16xf32> to vector<16x16xf32>
    %357 = vector.broadcast %355 : f32 to vector<16x16xf32>
    %358 = arith.mulf %356, %357 : vector<16x16xf32>
    %359 = arith.addf %354, %358 : vector<16x16xf32>
    %c33 = arith.constant 33 : index
    %360 = memref.load %arg2[%c33] : memref<98xf32, #tpu.memory_space<smem>>
    %361 = vector.extract_strided_slice %339 {offsets = [4, 0], sizes = [16, 16], strides = [1, 1]} : vector<22x16xf32> to vector<16x16xf32>
    %362 = vector.broadcast %360 : f32 to vector<16x16xf32>
    %363 = arith.mulf %361, %362 : vector<16x16xf32>
    %364 = arith.addf %359, %363 : vector<16x16xf32>
    %c40 = arith.constant 40 : index
    %365 = memref.load %arg2[%c40] : memref<98xf32, #tpu.memory_space<smem>>
    %366 = vector.extract_strided_slice %339 {offsets = [5, 0], sizes = [16, 16], strides = [1, 1]} : vector<22x16xf32> to vector<16x16xf32>
    %367 = vector.broadcast %365 : f32 to vector<16x16xf32>
    %368 = arith.mulf %366, %367 : vector<16x16xf32>
    %369 = arith.addf %364, %368 : vector<16x16xf32>
    %c47 = arith.constant 47 : index
    %370 = memref.load %arg2[%c47] : memref<98xf32, #tpu.memory_space<smem>>
    %371 = vector.extract_strided_slice %339 {offsets = [6, 0], sizes = [16, 16], strides = [1, 1]} : vector<22x16xf32> to vector<16x16xf32>
    %372 = vector.broadcast %370 : f32 to vector<16x16xf32>
    %373 = arith.mulf %371, %372 : vector<16x16xf32>
    %374 = arith.addf %369, %373 : vector<16x16xf32>
    %c0_141 = arith.constant 0 : index
    %c0_142 = arith.constant 0 : index
    %c6_143 = arith.constant 6 : index
    %375 = vector.load %arg4[%c0_141, %c0_142, %c6_143] : memref<2x22x22xf32, #tpu.memory_space<vmem>>, vector<1x22x16xf32>
    %376 = vector.shape_cast %375 : vector<1x22x16xf32> to vector<22x16xf32>
    %c6_144 = arith.constant 6 : index
    %377 = memref.load %arg2[%c6_144] : memref<98xf32, #tpu.memory_space<smem>>
    %378 = vector.extract_strided_slice %376 {offsets = [0, 0], sizes = [16, 16], strides = [1, 1]} : vector<22x16xf32> to vector<16x16xf32>
    %379 = vector.broadcast %377 : f32 to vector<16x16xf32>
    %380 = arith.mulf %378, %379 : vector<16x16xf32>
    %381 = arith.addf %374, %380 : vector<16x16xf32>
    %c13_145 = arith.constant 13 : index
    %382 = memref.load %arg2[%c13_145] : memref<98xf32, #tpu.memory_space<smem>>
    %383 = vector.extract_strided_slice %376 {offsets = [1, 0], sizes = [16, 16], strides = [1, 1]} : vector<22x16xf32> to vector<16x16xf32>
    %384 = vector.broadcast %382 : f32 to vector<16x16xf32>
    %385 = arith.mulf %383, %384 : vector<16x16xf32>
    %386 = arith.addf %381, %385 : vector<16x16xf32>
    %c20 = arith.constant 20 : index
    %387 = memref.load %arg2[%c20] : memref<98xf32, #tpu.memory_space<smem>>
    %388 = vector.extract_strided_slice %376 {offsets = [2, 0], sizes = [16, 16], strides = [1, 1]} : vector<22x16xf32> to vector<16x16xf32>
    %389 = vector.broadcast %387 : f32 to vector<16x16xf32>
    %390 = arith.mulf %388, %389 : vector<16x16xf32>
    %391 = arith.addf %386, %390 : vector<16x16xf32>
    %c27 = arith.constant 27 : index
    %392 = memref.load %arg2[%c27] : memref<98xf32, #tpu.memory_space<smem>>
    %393 = vector.extract_strided_slice %376 {offsets = [3, 0], sizes = [16, 16], strides = [1, 1]} : vector<22x16xf32> to vector<16x16xf32>
    %394 = vector.broadcast %392 : f32 to vector<16x16xf32>
    %395 = arith.mulf %393, %394 : vector<16x16xf32>
    %396 = arith.addf %391, %395 : vector<16x16xf32>
    %c34 = arith.constant 34 : index
    %397 = memref.load %arg2[%c34] : memref<98xf32, #tpu.memory_space<smem>>
    %398 = vector.extract_strided_slice %376 {offsets = [4, 0], sizes = [16, 16], strides = [1, 1]} : vector<22x16xf32> to vector<16x16xf32>
    %399 = vector.broadcast %397 : f32 to vector<16x16xf32>
    %400 = arith.mulf %398, %399 : vector<16x16xf32>
    %401 = arith.addf %396, %400 : vector<16x16xf32>
    %c41 = arith.constant 41 : index
    %402 = memref.load %arg2[%c41] : memref<98xf32, #tpu.memory_space<smem>>
    %403 = vector.extract_strided_slice %376 {offsets = [5, 0], sizes = [16, 16], strides = [1, 1]} : vector<22x16xf32> to vector<16x16xf32>
    %404 = vector.broadcast %402 : f32 to vector<16x16xf32>
    %405 = arith.mulf %403, %404 : vector<16x16xf32>
    %406 = arith.addf %401, %405 : vector<16x16xf32>
    %c48 = arith.constant 48 : index
    %407 = memref.load %arg2[%c48] : memref<98xf32, #tpu.memory_space<smem>>
    %408 = vector.extract_strided_slice %376 {offsets = [6, 0], sizes = [16, 16], strides = [1, 1]} : vector<22x16xf32> to vector<16x16xf32>
    %409 = vector.broadcast %407 : f32 to vector<16x16xf32>
    %410 = arith.mulf %408, %409 : vector<16x16xf32>
    %411 = arith.addf %406, %410 : vector<16x16xf32>
    %c1_146 = arith.constant 1 : index
    %c0_147 = arith.constant 0 : index
    %c0_148 = arith.constant 0 : index
    %412 = vector.load %arg4[%c1_146, %c0_147, %c0_148] : memref<2x22x22xf32, #tpu.memory_space<vmem>>, vector<1x22x16xf32>
    %413 = vector.shape_cast %412 : vector<1x22x16xf32> to vector<22x16xf32>
    %c49 = arith.constant 49 : index
    %414 = memref.load %arg2[%c49] : memref<98xf32, #tpu.memory_space<smem>>
    %415 = vector.extract_strided_slice %413 {offsets = [0, 0], sizes = [16, 16], strides = [1, 1]} : vector<22x16xf32> to vector<16x16xf32>
    %416 = vector.broadcast %414 : f32 to vector<16x16xf32>
    %417 = arith.mulf %415, %416 : vector<16x16xf32>
    %418 = arith.addf %411, %417 : vector<16x16xf32>
    %c56 = arith.constant 56 : index
    %419 = memref.load %arg2[%c56] : memref<98xf32, #tpu.memory_space<smem>>
    %420 = vector.extract_strided_slice %413 {offsets = [1, 0], sizes = [16, 16], strides = [1, 1]} : vector<22x16xf32> to vector<16x16xf32>
    %421 = vector.broadcast %419 : f32 to vector<16x16xf32>
    %422 = arith.mulf %420, %421 : vector<16x16xf32>
    %423 = arith.addf %418, %422 : vector<16x16xf32>
    %c63 = arith.constant 63 : index
    %424 = memref.load %arg2[%c63] : memref<98xf32, #tpu.memory_space<smem>>
    %425 = vector.extract_strided_slice %413 {offsets = [2, 0], sizes = [16, 16], strides = [1, 1]} : vector<22x16xf32> to vector<16x16xf32>
    %426 = vector.broadcast %424 : f32 to vector<16x16xf32>
    %427 = arith.mulf %425, %426 : vector<16x16xf32>
    %428 = arith.addf %423, %427 : vector<16x16xf32>
    %c70 = arith.constant 70 : index
    %429 = memref.load %arg2[%c70] : memref<98xf32, #tpu.memory_space<smem>>
    %430 = vector.extract_strided_slice %413 {offsets = [3, 0], sizes = [16, 16], strides = [1, 1]} : vector<22x16xf32> to vector<16x16xf32>
    %431 = vector.broadcast %429 : f32 to vector<16x16xf32>
    %432 = arith.mulf %430, %431 : vector<16x16xf32>
    %433 = arith.addf %428, %432 : vector<16x16xf32>
    %c77 = arith.constant 77 : index
    %434 = memref.load %arg2[%c77] : memref<98xf32, #tpu.memory_space<smem>>
    %435 = vector.extract_strided_slice %413 {offsets = [4, 0], sizes = [16, 16], strides = [1, 1]} : vector<22x16xf32> to vector<16x16xf32>
    %436 = vector.broadcast %434 : f32 to vector<16x16xf32>
    %437 = arith.mulf %435, %436 : vector<16x16xf32>
    %438 = arith.addf %433, %437 : vector<16x16xf32>
    %c84 = arith.constant 84 : index
    %439 = memref.load %arg2[%c84] : memref<98xf32, #tpu.memory_space<smem>>
    %440 = vector.extract_strided_slice %413 {offsets = [5, 0], sizes = [16, 16], strides = [1, 1]} : vector<22x16xf32> to vector<16x16xf32>
    %441 = vector.broadcast %439 : f32 to vector<16x16xf32>
    %442 = arith.mulf %440, %441 : vector<16x16xf32>
    %443 = arith.addf %438, %442 : vector<16x16xf32>
    %c91 = arith.constant 91 : index
    %444 = memref.load %arg2[%c91] : memref<98xf32, #tpu.memory_space<smem>>
    %445 = vector.extract_strided_slice %413 {offsets = [6, 0], sizes = [16, 16], strides = [1, 1]} : vector<22x16xf32> to vector<16x16xf32>
    %446 = vector.broadcast %444 : f32 to vector<16x16xf32>
    %447 = arith.mulf %445, %446 : vector<16x16xf32>
    %448 = arith.addf %443, %447 : vector<16x16xf32>
    %c1_149 = arith.constant 1 : index
    %c0_150 = arith.constant 0 : index
    %c1_151 = arith.constant 1 : index
    %449 = vector.load %arg4[%c1_149, %c0_150, %c1_151] : memref<2x22x22xf32, #tpu.memory_space<vmem>>, vector<1x22x16xf32>
    %450 = vector.shape_cast %449 : vector<1x22x16xf32> to vector<22x16xf32>
    %c50 = arith.constant 50 : index
    %451 = memref.load %arg2[%c50] : memref<98xf32, #tpu.memory_space<smem>>
    %452 = vector.extract_strided_slice %450 {offsets = [0, 0], sizes = [16, 16], strides = [1, 1]} : vector<22x16xf32> to vector<16x16xf32>
    %453 = vector.broadcast %451 : f32 to vector<16x16xf32>
    %454 = arith.mulf %452, %453 : vector<16x16xf32>
    %455 = arith.addf %448, %454 : vector<16x16xf32>
    %c57 = arith.constant 57 : index
    %456 = memref.load %arg2[%c57] : memref<98xf32, #tpu.memory_space<smem>>
    %457 = vector.extract_strided_slice %450 {offsets = [1, 0], sizes = [16, 16], strides = [1, 1]} : vector<22x16xf32> to vector<16x16xf32>
    %458 = vector.broadcast %456 : f32 to vector<16x16xf32>
    %459 = arith.mulf %457, %458 : vector<16x16xf32>
    %460 = arith.addf %455, %459 : vector<16x16xf32>
    %c64 = arith.constant 64 : index
    %461 = memref.load %arg2[%c64] : memref<98xf32, #tpu.memory_space<smem>>
    %462 = vector.extract_strided_slice %450 {offsets = [2, 0], sizes = [16, 16], strides = [1, 1]} : vector<22x16xf32> to vector<16x16xf32>
    %463 = vector.broadcast %461 : f32 to vector<16x16xf32>
    %464 = arith.mulf %462, %463 : vector<16x16xf32>
    %465 = arith.addf %460, %464 : vector<16x16xf32>
    %c71 = arith.constant 71 : index
    %466 = memref.load %arg2[%c71] : memref<98xf32, #tpu.memory_space<smem>>
    %467 = vector.extract_strided_slice %450 {offsets = [3, 0], sizes = [16, 16], strides = [1, 1]} : vector<22x16xf32> to vector<16x16xf32>
    %468 = vector.broadcast %466 : f32 to vector<16x16xf32>
    %469 = arith.mulf %467, %468 : vector<16x16xf32>
    %470 = arith.addf %465, %469 : vector<16x16xf32>
    %c78 = arith.constant 78 : index
    %471 = memref.load %arg2[%c78] : memref<98xf32, #tpu.memory_space<smem>>
    %472 = vector.extract_strided_slice %450 {offsets = [4, 0], sizes = [16, 16], strides = [1, 1]} : vector<22x16xf32> to vector<16x16xf32>
    %473 = vector.broadcast %471 : f32 to vector<16x16xf32>
    %474 = arith.mulf %472, %473 : vector<16x16xf32>
    %475 = arith.addf %470, %474 : vector<16x16xf32>
    %c85 = arith.constant 85 : index
    %476 = memref.load %arg2[%c85] : memref<98xf32, #tpu.memory_space<smem>>
    %477 = vector.extract_strided_slice %450 {offsets = [5, 0], sizes = [16, 16], strides = [1, 1]} : vector<22x16xf32> to vector<16x16xf32>
    %478 = vector.broadcast %476 : f32 to vector<16x16xf32>
    %479 = arith.mulf %477, %478 : vector<16x16xf32>
    %480 = arith.addf %475, %479 : vector<16x16xf32>
    %c92 = arith.constant 92 : index
    %481 = memref.load %arg2[%c92] : memref<98xf32, #tpu.memory_space<smem>>
    %482 = vector.extract_strided_slice %450 {offsets = [6, 0], sizes = [16, 16], strides = [1, 1]} : vector<22x16xf32> to vector<16x16xf32>
    %483 = vector.broadcast %481 : f32 to vector<16x16xf32>
    %484 = arith.mulf %482, %483 : vector<16x16xf32>
    %485 = arith.addf %480, %484 : vector<16x16xf32>
    %c1_152 = arith.constant 1 : index
    %c0_153 = arith.constant 0 : index
    %c2_154 = arith.constant 2 : index
    %486 = vector.load %arg4[%c1_152, %c0_153, %c2_154] : memref<2x22x22xf32, #tpu.memory_space<vmem>>, vector<1x22x16xf32>
    %487 = vector.shape_cast %486 : vector<1x22x16xf32> to vector<22x16xf32>
    %c51 = arith.constant 51 : index
    %488 = memref.load %arg2[%c51] : memref<98xf32, #tpu.memory_space<smem>>
    %489 = vector.extract_strided_slice %487 {offsets = [0, 0], sizes = [16, 16], strides = [1, 1]} : vector<22x16xf32> to vector<16x16xf32>
    %490 = vector.broadcast %488 : f32 to vector<16x16xf32>
    %491 = arith.mulf %489, %490 : vector<16x16xf32>
    %492 = arith.addf %485, %491 : vector<16x16xf32>
    %c58 = arith.constant 58 : index
    %493 = memref.load %arg2[%c58] : memref<98xf32, #tpu.memory_space<smem>>
    %494 = vector.extract_strided_slice %487 {offsets = [1, 0], sizes = [16, 16], strides = [1, 1]} : vector<22x16xf32> to vector<16x16xf32>
    %495 = vector.broadcast %493 : f32 to vector<16x16xf32>
    %496 = arith.mulf %494, %495 : vector<16x16xf32>
    %497 = arith.addf %492, %496 : vector<16x16xf32>
    %c65 = arith.constant 65 : index
    %498 = memref.load %arg2[%c65] : memref<98xf32, #tpu.memory_space<smem>>
    %499 = vector.extract_strided_slice %487 {offsets = [2, 0], sizes = [16, 16], strides = [1, 1]} : vector<22x16xf32> to vector<16x16xf32>
    %500 = vector.broadcast %498 : f32 to vector<16x16xf32>
    %501 = arith.mulf %499, %500 : vector<16x16xf32>
    %502 = arith.addf %497, %501 : vector<16x16xf32>
    %c72 = arith.constant 72 : index
    %503 = memref.load %arg2[%c72] : memref<98xf32, #tpu.memory_space<smem>>
    %504 = vector.extract_strided_slice %487 {offsets = [3, 0], sizes = [16, 16], strides = [1, 1]} : vector<22x16xf32> to vector<16x16xf32>
    %505 = vector.broadcast %503 : f32 to vector<16x16xf32>
    %506 = arith.mulf %504, %505 : vector<16x16xf32>
    %507 = arith.addf %502, %506 : vector<16x16xf32>
    %c79 = arith.constant 79 : index
    %508 = memref.load %arg2[%c79] : memref<98xf32, #tpu.memory_space<smem>>
    %509 = vector.extract_strided_slice %487 {offsets = [4, 0], sizes = [16, 16], strides = [1, 1]} : vector<22x16xf32> to vector<16x16xf32>
    %510 = vector.broadcast %508 : f32 to vector<16x16xf32>
    %511 = arith.mulf %509, %510 : vector<16x16xf32>
    %512 = arith.addf %507, %511 : vector<16x16xf32>
    %c86 = arith.constant 86 : index
    %513 = memref.load %arg2[%c86] : memref<98xf32, #tpu.memory_space<smem>>
    %514 = vector.extract_strided_slice %487 {offsets = [5, 0], sizes = [16, 16], strides = [1, 1]} : vector<22x16xf32> to vector<16x16xf32>
    %515 = vector.broadcast %513 : f32 to vector<16x16xf32>
    %516 = arith.mulf %514, %515 : vector<16x16xf32>
    %517 = arith.addf %512, %516 : vector<16x16xf32>
    %c93 = arith.constant 93 : index
    %518 = memref.load %arg2[%c93] : memref<98xf32, #tpu.memory_space<smem>>
    %519 = vector.extract_strided_slice %487 {offsets = [6, 0], sizes = [16, 16], strides = [1, 1]} : vector<22x16xf32> to vector<16x16xf32>
    %520 = vector.broadcast %518 : f32 to vector<16x16xf32>
    %521 = arith.mulf %519, %520 : vector<16x16xf32>
    %522 = arith.addf %517, %521 : vector<16x16xf32>
    %c1_155 = arith.constant 1 : index
    %c0_156 = arith.constant 0 : index
    %c3_157 = arith.constant 3 : index
    %523 = vector.load %arg4[%c1_155, %c0_156, %c3_157] : memref<2x22x22xf32, #tpu.memory_space<vmem>>, vector<1x22x16xf32>
    %524 = vector.shape_cast %523 : vector<1x22x16xf32> to vector<22x16xf32>
    %c52 = arith.constant 52 : index
    %525 = memref.load %arg2[%c52] : memref<98xf32, #tpu.memory_space<smem>>
    %526 = vector.extract_strided_slice %524 {offsets = [0, 0], sizes = [16, 16], strides = [1, 1]} : vector<22x16xf32> to vector<16x16xf32>
    %527 = vector.broadcast %525 : f32 to vector<16x16xf32>
    %528 = arith.mulf %526, %527 : vector<16x16xf32>
    %529 = arith.addf %522, %528 : vector<16x16xf32>
    %c59 = arith.constant 59 : index
    %530 = memref.load %arg2[%c59] : memref<98xf32, #tpu.memory_space<smem>>
    %531 = vector.extract_strided_slice %524 {offsets = [1, 0], sizes = [16, 16], strides = [1, 1]} : vector<22x16xf32> to vector<16x16xf32>
    %532 = vector.broadcast %530 : f32 to vector<16x16xf32>
    %533 = arith.mulf %531, %532 : vector<16x16xf32>
    %534 = arith.addf %529, %533 : vector<16x16xf32>
    %c66 = arith.constant 66 : index
    %535 = memref.load %arg2[%c66] : memref<98xf32, #tpu.memory_space<smem>>
    %536 = vector.extract_strided_slice %524 {offsets = [2, 0], sizes = [16, 16], strides = [1, 1]} : vector<22x16xf32> to vector<16x16xf32>
    %537 = vector.broadcast %535 : f32 to vector<16x16xf32>
    %538 = arith.mulf %536, %537 : vector<16x16xf32>
    %539 = arith.addf %534, %538 : vector<16x16xf32>
    %c73 = arith.constant 73 : index
    %540 = memref.load %arg2[%c73] : memref<98xf32, #tpu.memory_space<smem>>
    %541 = vector.extract_strided_slice %524 {offsets = [3, 0], sizes = [16, 16], strides = [1, 1]} : vector<22x16xf32> to vector<16x16xf32>
    %542 = vector.broadcast %540 : f32 to vector<16x16xf32>
    %543 = arith.mulf %541, %542 : vector<16x16xf32>
    %544 = arith.addf %539, %543 : vector<16x16xf32>
    %c80 = arith.constant 80 : index
    %545 = memref.load %arg2[%c80] : memref<98xf32, #tpu.memory_space<smem>>
    %546 = vector.extract_strided_slice %524 {offsets = [4, 0], sizes = [16, 16], strides = [1, 1]} : vector<22x16xf32> to vector<16x16xf32>
    %547 = vector.broadcast %545 : f32 to vector<16x16xf32>
    %548 = arith.mulf %546, %547 : vector<16x16xf32>
    %549 = arith.addf %544, %548 : vector<16x16xf32>
    %c87 = arith.constant 87 : index
    %550 = memref.load %arg2[%c87] : memref<98xf32, #tpu.memory_space<smem>>
    %551 = vector.extract_strided_slice %524 {offsets = [5, 0], sizes = [16, 16], strides = [1, 1]} : vector<22x16xf32> to vector<16x16xf32>
    %552 = vector.broadcast %550 : f32 to vector<16x16xf32>
    %553 = arith.mulf %551, %552 : vector<16x16xf32>
    %554 = arith.addf %549, %553 : vector<16x16xf32>
    %c94 = arith.constant 94 : index
    %555 = memref.load %arg2[%c94] : memref<98xf32, #tpu.memory_space<smem>>
    %556 = vector.extract_strided_slice %524 {offsets = [6, 0], sizes = [16, 16], strides = [1, 1]} : vector<22x16xf32> to vector<16x16xf32>
    %557 = vector.broadcast %555 : f32 to vector<16x16xf32>
    %558 = arith.mulf %556, %557 : vector<16x16xf32>
    %559 = arith.addf %554, %558 : vector<16x16xf32>
    %c1_158 = arith.constant 1 : index
    %c0_159 = arith.constant 0 : index
    %c4_160 = arith.constant 4 : index
    %560 = vector.load %arg4[%c1_158, %c0_159, %c4_160] : memref<2x22x22xf32, #tpu.memory_space<vmem>>, vector<1x22x16xf32>
    %561 = vector.shape_cast %560 : vector<1x22x16xf32> to vector<22x16xf32>
    %c53 = arith.constant 53 : index
    %562 = memref.load %arg2[%c53] : memref<98xf32, #tpu.memory_space<smem>>
    %563 = vector.extract_strided_slice %561 {offsets = [0, 0], sizes = [16, 16], strides = [1, 1]} : vector<22x16xf32> to vector<16x16xf32>
    %564 = vector.broadcast %562 : f32 to vector<16x16xf32>
    %565 = arith.mulf %563, %564 : vector<16x16xf32>
    %566 = arith.addf %559, %565 : vector<16x16xf32>
    %c60 = arith.constant 60 : index
    %567 = memref.load %arg2[%c60] : memref<98xf32, #tpu.memory_space<smem>>
    %568 = vector.extract_strided_slice %561 {offsets = [1, 0], sizes = [16, 16], strides = [1, 1]} : vector<22x16xf32> to vector<16x16xf32>
    %569 = vector.broadcast %567 : f32 to vector<16x16xf32>
    %570 = arith.mulf %568, %569 : vector<16x16xf32>
    %571 = arith.addf %566, %570 : vector<16x16xf32>
    %c67 = arith.constant 67 : index
    %572 = memref.load %arg2[%c67] : memref<98xf32, #tpu.memory_space<smem>>
    %573 = vector.extract_strided_slice %561 {offsets = [2, 0], sizes = [16, 16], strides = [1, 1]} : vector<22x16xf32> to vector<16x16xf32>
    %574 = vector.broadcast %572 : f32 to vector<16x16xf32>
    %575 = arith.mulf %573, %574 : vector<16x16xf32>
    %576 = arith.addf %571, %575 : vector<16x16xf32>
    %c74 = arith.constant 74 : index
    %577 = memref.load %arg2[%c74] : memref<98xf32, #tpu.memory_space<smem>>
    %578 = vector.extract_strided_slice %561 {offsets = [3, 0], sizes = [16, 16], strides = [1, 1]} : vector<22x16xf32> to vector<16x16xf32>
    %579 = vector.broadcast %577 : f32 to vector<16x16xf32>
    %580 = arith.mulf %578, %579 : vector<16x16xf32>
    %581 = arith.addf %576, %580 : vector<16x16xf32>
    %c81 = arith.constant 81 : index
    %582 = memref.load %arg2[%c81] : memref<98xf32, #tpu.memory_space<smem>>
    %583 = vector.extract_strided_slice %561 {offsets = [4, 0], sizes = [16, 16], strides = [1, 1]} : vector<22x16xf32> to vector<16x16xf32>
    %584 = vector.broadcast %582 : f32 to vector<16x16xf32>
    %585 = arith.mulf %583, %584 : vector<16x16xf32>
    %586 = arith.addf %581, %585 : vector<16x16xf32>
    %c88 = arith.constant 88 : index
    %587 = memref.load %arg2[%c88] : memref<98xf32, #tpu.memory_space<smem>>
    %588 = vector.extract_strided_slice %561 {offsets = [5, 0], sizes = [16, 16], strides = [1, 1]} : vector<22x16xf32> to vector<16x16xf32>
    %589 = vector.broadcast %587 : f32 to vector<16x16xf32>
    %590 = arith.mulf %588, %589 : vector<16x16xf32>
    %591 = arith.addf %586, %590 : vector<16x16xf32>
    %c95 = arith.constant 95 : index
    %592 = memref.load %arg2[%c95] : memref<98xf32, #tpu.memory_space<smem>>
    %593 = vector.extract_strided_slice %561 {offsets = [6, 0], sizes = [16, 16], strides = [1, 1]} : vector<22x16xf32> to vector<16x16xf32>
    %594 = vector.broadcast %592 : f32 to vector<16x16xf32>
    %595 = arith.mulf %593, %594 : vector<16x16xf32>
    %596 = arith.addf %591, %595 : vector<16x16xf32>
    %c1_161 = arith.constant 1 : index
    %c0_162 = arith.constant 0 : index
    %c5_163 = arith.constant 5 : index
    %597 = vector.load %arg4[%c1_161, %c0_162, %c5_163] : memref<2x22x22xf32, #tpu.memory_space<vmem>>, vector<1x22x16xf32>
    %598 = vector.shape_cast %597 : vector<1x22x16xf32> to vector<22x16xf32>
    %c54 = arith.constant 54 : index
    %599 = memref.load %arg2[%c54] : memref<98xf32, #tpu.memory_space<smem>>
    %600 = vector.extract_strided_slice %598 {offsets = [0, 0], sizes = [16, 16], strides = [1, 1]} : vector<22x16xf32> to vector<16x16xf32>
    %601 = vector.broadcast %599 : f32 to vector<16x16xf32>
    %602 = arith.mulf %600, %601 : vector<16x16xf32>
    %603 = arith.addf %596, %602 : vector<16x16xf32>
    %c61 = arith.constant 61 : index
    %604 = memref.load %arg2[%c61] : memref<98xf32, #tpu.memory_space<smem>>
    %605 = vector.extract_strided_slice %598 {offsets = [1, 0], sizes = [16, 16], strides = [1, 1]} : vector<22x16xf32> to vector<16x16xf32>
    %606 = vector.broadcast %604 : f32 to vector<16x16xf32>
    %607 = arith.mulf %605, %606 : vector<16x16xf32>
    %608 = arith.addf %603, %607 : vector<16x16xf32>
    %c68 = arith.constant 68 : index
    %609 = memref.load %arg2[%c68] : memref<98xf32, #tpu.memory_space<smem>>
    %610 = vector.extract_strided_slice %598 {offsets = [2, 0], sizes = [16, 16], strides = [1, 1]} : vector<22x16xf32> to vector<16x16xf32>
    %611 = vector.broadcast %609 : f32 to vector<16x16xf32>
    %612 = arith.mulf %610, %611 : vector<16x16xf32>
    %613 = arith.addf %608, %612 : vector<16x16xf32>
    %c75 = arith.constant 75 : index
    %614 = memref.load %arg2[%c75] : memref<98xf32, #tpu.memory_space<smem>>
    %615 = vector.extract_strided_slice %598 {offsets = [3, 0], sizes = [16, 16], strides = [1, 1]} : vector<22x16xf32> to vector<16x16xf32>
    %616 = vector.broadcast %614 : f32 to vector<16x16xf32>
    %617 = arith.mulf %615, %616 : vector<16x16xf32>
    %618 = arith.addf %613, %617 : vector<16x16xf32>
    %c82 = arith.constant 82 : index
    %619 = memref.load %arg2[%c82] : memref<98xf32, #tpu.memory_space<smem>>
    %620 = vector.extract_strided_slice %598 {offsets = [4, 0], sizes = [16, 16], strides = [1, 1]} : vector<22x16xf32> to vector<16x16xf32>
    %621 = vector.broadcast %619 : f32 to vector<16x16xf32>
    %622 = arith.mulf %620, %621 : vector<16x16xf32>
    %623 = arith.addf %618, %622 : vector<16x16xf32>
    %c89 = arith.constant 89 : index
    %624 = memref.load %arg2[%c89] : memref<98xf32, #tpu.memory_space<smem>>
    %625 = vector.extract_strided_slice %598 {offsets = [5, 0], sizes = [16, 16], strides = [1, 1]} : vector<22x16xf32> to vector<16x16xf32>
    %626 = vector.broadcast %624 : f32 to vector<16x16xf32>
    %627 = arith.mulf %625, %626 : vector<16x16xf32>
    %628 = arith.addf %623, %627 : vector<16x16xf32>
    %c96 = arith.constant 96 : index
    %629 = memref.load %arg2[%c96] : memref<98xf32, #tpu.memory_space<smem>>
    %630 = vector.extract_strided_slice %598 {offsets = [6, 0], sizes = [16, 16], strides = [1, 1]} : vector<22x16xf32> to vector<16x16xf32>
    %631 = vector.broadcast %629 : f32 to vector<16x16xf32>
    %632 = arith.mulf %630, %631 : vector<16x16xf32>
    %633 = arith.addf %628, %632 : vector<16x16xf32>
    %c1_164 = arith.constant 1 : index
    %c0_165 = arith.constant 0 : index
    %c6_166 = arith.constant 6 : index
    %634 = vector.load %arg4[%c1_164, %c0_165, %c6_166] : memref<2x22x22xf32, #tpu.memory_space<vmem>>, vector<1x22x16xf32>
    %635 = vector.shape_cast %634 : vector<1x22x16xf32> to vector<22x16xf32>
    %c55 = arith.constant 55 : index
    %636 = memref.load %arg2[%c55] : memref<98xf32, #tpu.memory_space<smem>>
    %637 = vector.extract_strided_slice %635 {offsets = [0, 0], sizes = [16, 16], strides = [1, 1]} : vector<22x16xf32> to vector<16x16xf32>
    %638 = vector.broadcast %636 : f32 to vector<16x16xf32>
    %639 = arith.mulf %637, %638 : vector<16x16xf32>
    %640 = arith.addf %633, %639 : vector<16x16xf32>
    %c62 = arith.constant 62 : index
    %641 = memref.load %arg2[%c62] : memref<98xf32, #tpu.memory_space<smem>>
    %642 = vector.extract_strided_slice %635 {offsets = [1, 0], sizes = [16, 16], strides = [1, 1]} : vector<22x16xf32> to vector<16x16xf32>
    %643 = vector.broadcast %641 : f32 to vector<16x16xf32>
    %644 = arith.mulf %642, %643 : vector<16x16xf32>
    %645 = arith.addf %640, %644 : vector<16x16xf32>
    %c69 = arith.constant 69 : index
    %646 = memref.load %arg2[%c69] : memref<98xf32, #tpu.memory_space<smem>>
    %647 = vector.extract_strided_slice %635 {offsets = [2, 0], sizes = [16, 16], strides = [1, 1]} : vector<22x16xf32> to vector<16x16xf32>
    %648 = vector.broadcast %646 : f32 to vector<16x16xf32>
    %649 = arith.mulf %647, %648 : vector<16x16xf32>
    %650 = arith.addf %645, %649 : vector<16x16xf32>
    %c76 = arith.constant 76 : index
    %651 = memref.load %arg2[%c76] : memref<98xf32, #tpu.memory_space<smem>>
    %652 = vector.extract_strided_slice %635 {offsets = [3, 0], sizes = [16, 16], strides = [1, 1]} : vector<22x16xf32> to vector<16x16xf32>
    %653 = vector.broadcast %651 : f32 to vector<16x16xf32>
    %654 = arith.mulf %652, %653 : vector<16x16xf32>
    %655 = arith.addf %650, %654 : vector<16x16xf32>
    %c83 = arith.constant 83 : index
    %656 = memref.load %arg2[%c83] : memref<98xf32, #tpu.memory_space<smem>>
    %657 = vector.extract_strided_slice %635 {offsets = [4, 0], sizes = [16, 16], strides = [1, 1]} : vector<22x16xf32> to vector<16x16xf32>
    %658 = vector.broadcast %656 : f32 to vector<16x16xf32>
    %659 = arith.mulf %657, %658 : vector<16x16xf32>
    %660 = arith.addf %655, %659 : vector<16x16xf32>
    %c90 = arith.constant 90 : index
    %661 = memref.load %arg2[%c90] : memref<98xf32, #tpu.memory_space<smem>>
    %662 = vector.extract_strided_slice %635 {offsets = [5, 0], sizes = [16, 16], strides = [1, 1]} : vector<22x16xf32> to vector<16x16xf32>
    %663 = vector.broadcast %661 : f32 to vector<16x16xf32>
    %664 = arith.mulf %662, %663 : vector<16x16xf32>
    %665 = arith.addf %660, %664 : vector<16x16xf32>
    %c97 = arith.constant 97 : index
    %666 = memref.load %arg2[%c97] : memref<98xf32, #tpu.memory_space<smem>>
    %667 = vector.extract_strided_slice %635 {offsets = [6, 0], sizes = [16, 16], strides = [1, 1]} : vector<22x16xf32> to vector<16x16xf32>
    %668 = vector.broadcast %666 : f32 to vector<16x16xf32>
    %669 = arith.mulf %667, %668 : vector<16x16xf32>
    %670 = arith.addf %665, %669 : vector<16x16xf32>
    %cst_167 = arith.constant 0.000000e+00 : f32
    %671 = vector.broadcast %cst_167 : f32 to vector<16x16xf32>
    %672 = arith.maximumf %670, %671 : vector<16x16xf32>
    %673 = arith.negf %672 : vector<16x16xf32>
    %674 = math.exp %673 : vector<16x16xf32>
    %cst_168 = arith.constant 1.000000e+00 : f32
    %675 = vector.broadcast %cst_168 : f32 to vector<16x16xf32>
    %676 = arith.addf %675, %674 : vector<16x16xf32>
    %677 = arith.divf %675, %676 : vector<16x16xf32>
    %cst_169 = arith.constant 1.000000e+00 : f32
    %678 = vector.broadcast %cst_169 : f32 to vector<16x16xf32>
    %679 = arith.addf %677, %678 : vector<16x16xf32>
    %680 = vector.extract_strided_slice %679 {offsets = [0, 0], sizes = [1, 16], strides = [1, 1]} : vector<16x16xf32> to vector<1x16xf32>
    %681 = vector.shape_cast %680 : vector<1x16xf32> to vector<16xf32>
    %c0_170 = arith.constant 0 : index
    %c0_171 = arith.constant 0 : index
    %682 = vector.load %arg5[%c0_170, %c0_171] : memref<1x256xf32, #tpu.memory_space<vmem>>, vector<1x16xf32>
    %683 = vector.shape_cast %682 : vector<1x16xf32> to vector<16xf32>
    %684 = vector.shape_cast %681 : vector<16xf32> to vector<1x16xf32>
    tpu.vector_store %arg5[%c0_170, %c0_171], %684 {strides = array<i32>} : memref<1x256xf32, #tpu.memory_space<vmem>>, vector<1x16xf32>,
    %685 = vector.extract_strided_slice %679 {offsets = [1, 0], sizes = [1, 16], strides = [1, 1]} : vector<16x16xf32> to vector<1x16xf32>
    %686 = vector.shape_cast %685 : vector<1x16xf32> to vector<16xf32>
    %c0_172 = arith.constant 0 : index
    %c16_173 = arith.constant 16 : index
    %687 = vector.load %arg5[%c0_172, %c16_173] : memref<1x256xf32, #tpu.memory_space<vmem>>, vector<1x16xf32>
    %688 = vector.shape_cast %687 : vector<1x16xf32> to vector<16xf32>
    %689 = vector.shape_cast %686 : vector<16xf32> to vector<1x16xf32>
    tpu.vector_store %arg5[%c0_172, %c16_173], %689 {strides = array<i32>} : memref<1x256xf32, #tpu.memory_space<vmem>>, vector<1x16xf32>,
    %690 = vector.extract_strided_slice %679 {offsets = [2, 0], sizes = [1, 16], strides = [1, 1]} : vector<16x16xf32> to vector<1x16xf32>
    %691 = vector.shape_cast %690 : vector<1x16xf32> to vector<16xf32>
    %c0_174 = arith.constant 0 : index
    %c32_175 = arith.constant 32 : index
    %692 = vector.load %arg5[%c0_174, %c32_175] : memref<1x256xf32, #tpu.memory_space<vmem>>, vector<1x16xf32>
    %693 = vector.shape_cast %692 : vector<1x16xf32> to vector<16xf32>
    %694 = vector.shape_cast %691 : vector<16xf32> to vector<1x16xf32>
    tpu.vector_store %arg5[%c0_174, %c32_175], %694 {strides = array<i32>} : memref<1x256xf32, #tpu.memory_space<vmem>>, vector<1x16xf32>,
    %695 = vector.extract_strided_slice %679 {offsets = [3, 0], sizes = [1, 16], strides = [1, 1]} : vector<16x16xf32> to vector<1x16xf32>
    %696 = vector.shape_cast %695 : vector<1x16xf32> to vector<16xf32>
    %c0_176 = arith.constant 0 : index
    %c48_177 = arith.constant 48 : index
    %697 = vector.load %arg5[%c0_176, %c48_177] : memref<1x256xf32, #tpu.memory_space<vmem>>, vector<1x16xf32>
    %698 = vector.shape_cast %697 : vector<1x16xf32> to vector<16xf32>
    %699 = vector.shape_cast %696 : vector<16xf32> to vector<1x16xf32>
    tpu.vector_store %arg5[%c0_176, %c48_177], %699 {strides = array<i32>} : memref<1x256xf32, #tpu.memory_space<vmem>>, vector<1x16xf32>,
    %700 = vector.extract_strided_slice %679 {offsets = [4, 0], sizes = [1, 16], strides = [1, 1]} : vector<16x16xf32> to vector<1x16xf32>
    %701 = vector.shape_cast %700 : vector<1x16xf32> to vector<16xf32>
    %c0_178 = arith.constant 0 : index
    %c64_179 = arith.constant 64 : index
    %702 = vector.load %arg5[%c0_178, %c64_179] : memref<1x256xf32, #tpu.memory_space<vmem>>, vector<1x16xf32>
    %703 = vector.shape_cast %702 : vector<1x16xf32> to vector<16xf32>
    %704 = vector.shape_cast %701 : vector<16xf32> to vector<1x16xf32>
    tpu.vector_store %arg5[%c0_178, %c64_179], %704 {strides = array<i32>} : memref<1x256xf32, #tpu.memory_space<vmem>>, vector<1x16xf32>,
    %705 = vector.extract_strided_slice %679 {offsets = [5, 0], sizes = [1, 16], strides = [1, 1]} : vector<16x16xf32> to vector<1x16xf32>
    %706 = vector.shape_cast %705 : vector<1x16xf32> to vector<16xf32>
    %c0_180 = arith.constant 0 : index
    %c80_181 = arith.constant 80 : index
    %707 = vector.load %arg5[%c0_180, %c80_181] : memref<1x256xf32, #tpu.memory_space<vmem>>, vector<1x16xf32>
    %708 = vector.shape_cast %707 : vector<1x16xf32> to vector<16xf32>
    %709 = vector.shape_cast %706 : vector<16xf32> to vector<1x16xf32>
    tpu.vector_store %arg5[%c0_180, %c80_181], %709 {strides = array<i32>} : memref<1x256xf32, #tpu.memory_space<vmem>>, vector<1x16xf32>,
    %710 = vector.extract_strided_slice %679 {offsets = [6, 0], sizes = [1, 16], strides = [1, 1]} : vector<16x16xf32> to vector<1x16xf32>
    %711 = vector.shape_cast %710 : vector<1x16xf32> to vector<16xf32>
    %c0_182 = arith.constant 0 : index
    %c96_183 = arith.constant 96 : index
    %712 = vector.load %arg5[%c0_182, %c96_183] : memref<1x256xf32, #tpu.memory_space<vmem>>, vector<1x16xf32>
    %713 = vector.shape_cast %712 : vector<1x16xf32> to vector<16xf32>
    %714 = vector.shape_cast %711 : vector<16xf32> to vector<1x16xf32>
    tpu.vector_store %arg5[%c0_182, %c96_183], %714 {strides = array<i32>} : memref<1x256xf32, #tpu.memory_space<vmem>>, vector<1x16xf32>,
    %715 = vector.extract_strided_slice %679 {offsets = [7, 0], sizes = [1, 16], strides = [1, 1]} : vector<16x16xf32> to vector<1x16xf32>
    %716 = vector.shape_cast %715 : vector<1x16xf32> to vector<16xf32>
    %c0_184 = arith.constant 0 : index
    %c112 = arith.constant 112 : index
    %717 = vector.load %arg5[%c0_184, %c112] : memref<1x256xf32, #tpu.memory_space<vmem>>, vector<1x16xf32>
    %718 = vector.shape_cast %717 : vector<1x16xf32> to vector<16xf32>
    %719 = vector.shape_cast %716 : vector<16xf32> to vector<1x16xf32>
    tpu.vector_store %arg5[%c0_184, %c112], %719 {strides = array<i32>} : memref<1x256xf32, #tpu.memory_space<vmem>>, vector<1x16xf32>,
    %720 = vector.extract_strided_slice %679 {offsets = [8, 0], sizes = [1, 16], strides = [1, 1]} : vector<16x16xf32> to vector<1x16xf32>
    %721 = vector.shape_cast %720 : vector<1x16xf32> to vector<16xf32>
    %c0_185 = arith.constant 0 : index
    %c128 = arith.constant 128 : index
    %722 = vector.load %arg5[%c0_185, %c128] : memref<1x256xf32, #tpu.memory_space<vmem>>, vector<1x16xf32>
    %723 = vector.shape_cast %722 : vector<1x16xf32> to vector<16xf32>
    %724 = vector.shape_cast %721 : vector<16xf32> to vector<1x16xf32>
    tpu.vector_store %arg5[%c0_185, %c128], %724 {strides = array<i32>} : memref<1x256xf32, #tpu.memory_space<vmem>>, vector<1x16xf32>,
    %725 = vector.extract_strided_slice %679 {offsets = [9, 0], sizes = [1, 16], strides = [1, 1]} : vector<16x16xf32> to vector<1x16xf32>
    %726 = vector.shape_cast %725 : vector<1x16xf32> to vector<16xf32>
    %c0_186 = arith.constant 0 : index
    %c144 = arith.constant 144 : index
    %727 = vector.load %arg5[%c0_186, %c144] : memref<1x256xf32, #tpu.memory_space<vmem>>, vector<1x16xf32>
    %728 = vector.shape_cast %727 : vector<1x16xf32> to vector<16xf32>
    %729 = vector.shape_cast %726 : vector<16xf32> to vector<1x16xf32>
    tpu.vector_store %arg5[%c0_186, %c144], %729 {strides = array<i32>} : memref<1x256xf32, #tpu.memory_space<vmem>>, vector<1x16xf32>,
    %730 = vector.extract_strided_slice %679 {offsets = [10, 0], sizes = [1, 16], strides = [1, 1]} : vector<16x16xf32> to vector<1x16xf32>
    %731 = vector.shape_cast %730 : vector<1x16xf32> to vector<16xf32>
    %c0_187 = arith.constant 0 : index
    %c160 = arith.constant 160 : index
    %732 = vector.load %arg5[%c0_187, %c160] : memref<1x256xf32, #tpu.memory_space<vmem>>, vector<1x16xf32>
    %733 = vector.shape_cast %732 : vector<1x16xf32> to vector<16xf32>
    %734 = vector.shape_cast %731 : vector<16xf32> to vector<1x16xf32>
    tpu.vector_store %arg5[%c0_187, %c160], %734 {strides = array<i32>} : memref<1x256xf32, #tpu.memory_space<vmem>>, vector<1x16xf32>,
    %735 = vector.extract_strided_slice %679 {offsets = [11, 0], sizes = [1, 16], strides = [1, 1]} : vector<16x16xf32> to vector<1x16xf32>
    %736 = vector.shape_cast %735 : vector<1x16xf32> to vector<16xf32>
    %c0_188 = arith.constant 0 : index
    %c176 = arith.constant 176 : index
    %737 = vector.load %arg5[%c0_188, %c176] : memref<1x256xf32, #tpu.memory_space<vmem>>, vector<1x16xf32>
    %738 = vector.shape_cast %737 : vector<1x16xf32> to vector<16xf32>
    %739 = vector.shape_cast %736 : vector<16xf32> to vector<1x16xf32>
    tpu.vector_store %arg5[%c0_188, %c176], %739 {strides = array<i32>} : memref<1x256xf32, #tpu.memory_space<vmem>>, vector<1x16xf32>,
    %740 = vector.extract_strided_slice %679 {offsets = [12, 0], sizes = [1, 16], strides = [1, 1]} : vector<16x16xf32> to vector<1x16xf32>
    %741 = vector.shape_cast %740 : vector<1x16xf32> to vector<16xf32>
    %c0_189 = arith.constant 0 : index
    %c192 = arith.constant 192 : index
    %742 = vector.load %arg5[%c0_189, %c192] : memref<1x256xf32, #tpu.memory_space<vmem>>, vector<1x16xf32>
    %743 = vector.shape_cast %742 : vector<1x16xf32> to vector<16xf32>
    %744 = vector.shape_cast %741 : vector<16xf32> to vector<1x16xf32>
    tpu.vector_store %arg5[%c0_189, %c192], %744 {strides = array<i32>} : memref<1x256xf32, #tpu.memory_space<vmem>>, vector<1x16xf32>,
    %745 = vector.extract_strided_slice %679 {offsets = [13, 0], sizes = [1, 16], strides = [1, 1]} : vector<16x16xf32> to vector<1x16xf32>
    %746 = vector.shape_cast %745 : vector<1x16xf32> to vector<16xf32>
    %c0_190 = arith.constant 0 : index
    %c208 = arith.constant 208 : index
    %747 = vector.load %arg5[%c0_190, %c208] : memref<1x256xf32, #tpu.memory_space<vmem>>, vector<1x16xf32>
    %748 = vector.shape_cast %747 : vector<1x16xf32> to vector<16xf32>
    %749 = vector.shape_cast %746 : vector<16xf32> to vector<1x16xf32>
    tpu.vector_store %arg5[%c0_190, %c208], %749 {strides = array<i32>} : memref<1x256xf32, #tpu.memory_space<vmem>>, vector<1x16xf32>,
    %750 = vector.extract_strided_slice %679 {offsets = [14, 0], sizes = [1, 16], strides = [1, 1]} : vector<16x16xf32> to vector<1x16xf32>
    %751 = vector.shape_cast %750 : vector<1x16xf32> to vector<16xf32>
    %c0_191 = arith.constant 0 : index
    %c224 = arith.constant 224 : index
    %752 = vector.load %arg5[%c0_191, %c224] : memref<1x256xf32, #tpu.memory_space<vmem>>, vector<1x16xf32>
    %753 = vector.shape_cast %752 : vector<1x16xf32> to vector<16xf32>
    %754 = vector.shape_cast %751 : vector<16xf32> to vector<1x16xf32>
    tpu.vector_store %arg5[%c0_191, %c224], %754 {strides = array<i32>} : memref<1x256xf32, #tpu.memory_space<vmem>>, vector<1x16xf32>,
    %755 = vector.extract_strided_slice %679 {offsets = [15, 0], sizes = [1, 16], strides = [1, 1]} : vector<16x16xf32> to vector<1x16xf32>
    %756 = vector.shape_cast %755 : vector<1x16xf32> to vector<16xf32>
    %c0_192 = arith.constant 0 : index
    %c240 = arith.constant 240 : index
    %757 = vector.load %arg5[%c0_192, %c240] : memref<1x256xf32, #tpu.memory_space<vmem>>, vector<1x16xf32>
    %758 = vector.shape_cast %757 : vector<1x16xf32> to vector<16xf32>
    %759 = vector.shape_cast %756 : vector<16xf32> to vector<1x16xf32>
    tpu.vector_store %arg5[%c0_192, %c240], %759 {strides = array<i32>} : memref<1x256xf32, #tpu.memory_space<vmem>>, vector<1x16xf32>,
    %c0_193 = arith.constant 0 : index
    %c0_194 = arith.constant 0 : index
    %760 = vector.load %arg5[%c0_193, %c0_194] : memref<1x256xf32, #tpu.memory_space<vmem>>, vector<1x256xf32>
    %761 = vector.shape_cast %760 : vector<1x256xf32> to vector<256xf32>
    %c0_195 = arith.constant 0 : index
    %c0_196 = arith.constant 0 : index
    %c0_197 = arith.constant 0 : index
    %762 = vector.load %arg1[%c0_195, %c0_196, %c0_197] : memref<2x4x256xf32, #tpu.memory_space<vmem>>, vector<1x4x256xf32>
    %763 = vector.shape_cast %762 : vector<1x4x256xf32> to vector<4x256xf32>
    %764 = vector.shape_cast %761 : vector<256xf32> to vector<1x256xf32>
    %765 = vector.broadcast %764 : vector<1x256xf32> to vector<4x256xf32>
    %766 = arith.mulf %763, %765 : vector<4x256xf32>
    %c0_198 = arith.constant 0 : index
    %c0_199 = arith.constant 0 : index
    %c0_200 = arith.constant 0 : index
    %767 = vector.load %arg3[%c0_198, %c0_199, %c0_200] : memref<2x4x256xf32, #tpu.memory_space<vmem>>, vector<1x4x256xf32>
    %768 = vector.shape_cast %767 : vector<1x4x256xf32> to vector<4x256xf32>
    %769 = vector.shape_cast %766 : vector<4x256xf32> to vector<1x4x256xf32>
    tpu.vector_store %arg3[%c0_198, %c0_199, %c0_200], %769 {strides = array<i32>} : memref<2x4x256xf32, #tpu.memory_space<vmem>>, vector<1x4x256xf32>,
    %c1_201 = arith.constant 1 : index
    %c0_202 = arith.constant 0 : index
    %c0_203 = arith.constant 0 : index
    %770 = vector.load %arg1[%c1_201, %c0_202, %c0_203] : memref<2x4x256xf32, #tpu.memory_space<vmem>>, vector<1x1x256xf32>
    %771 = vector.shape_cast %770 : vector<1x1x256xf32> to vector<256xf32>
    %c1_204 = arith.constant 1 : index
    %c1_205 = arith.constant 1 : index
    %c0_206 = arith.constant 0 : index
    %772 = vector.load %arg1[%c1_204, %c1_205, %c0_206] : memref<2x4x256xf32, #tpu.memory_space<vmem>>, vector<1x1x256xf32>
    %773 = vector.shape_cast %772 : vector<1x1x256xf32> to vector<256xf32>
    %774 = arith.addf %771, %773 : vector<256xf32>
    %775 = arith.maximumf %771, %773 : vector<256xf32>
    %c1_207 = arith.constant 1 : index
    %c2_208 = arith.constant 2 : index
    %c0_209 = arith.constant 0 : index
    %776 = vector.load %arg1[%c1_207, %c2_208, %c0_209] : memref<2x4x256xf32, #tpu.memory_space<vmem>>, vector<1x1x256xf32>
    %777 = vector.shape_cast %776 : vector<1x1x256xf32> to vector<256xf32>
    %778 = arith.addf %774, %777 : vector<256xf32>
    %779 = arith.maximumf %775, %777 : vector<256xf32>
    %c1_210 = arith.constant 1 : index
    %c3_211 = arith.constant 3 : index
    %c0_212 = arith.constant 0 : index
    %780 = vector.load %arg1[%c1_210, %c3_211, %c0_212] : memref<2x4x256xf32, #tpu.memory_space<vmem>>, vector<1x1x256xf32>
    %781 = vector.shape_cast %780 : vector<1x1x256xf32> to vector<256xf32>
    %782 = arith.addf %778, %781 : vector<256xf32>
    %783 = arith.maximumf %779, %781 : vector<256xf32>
    %cst_213 = arith.constant 2.500000e-01 : f32
    %784 = vector.broadcast %cst_213 : f32 to vector<256xf32>
    %785 = arith.mulf %782, %784 : vector<256xf32>
    %786 = vector.extract_strided_slice %785 {offsets = [0], sizes = [16], strides = [1]} : vector<256xf32> to vector<16xf32>
    %c0_214 = arith.constant 0 : index
    %c3_215 = arith.constant 3 : index
    %c3_216 = arith.constant 3 : index
    %787 = vector.load %arg4[%c0_214, %c3_215, %c3_216] : memref<2x22x22xf32, #tpu.memory_space<vmem>>, vector<1x1x16xf32>
    %788 = vector.shape_cast %787 : vector<1x1x16xf32> to vector<16xf32>
    %789 = vector.shape_cast %786 : vector<16xf32> to vector<1x1x16xf32>
    tpu.vector_store %arg4[%c0_214, %c3_215, %c3_216], %789 {strides = array<i32>} : memref<2x22x22xf32, #tpu.memory_space<vmem>>, vector<1x1x16xf32>,
    %790 = vector.extract_strided_slice %783 {offsets = [0], sizes = [16], strides = [1]} : vector<256xf32> to vector<16xf32>
    %c1_217 = arith.constant 1 : index
    %c3_218 = arith.constant 3 : index
    %c3_219 = arith.constant 3 : index
    %791 = vector.load %arg4[%c1_217, %c3_218, %c3_219] : memref<2x22x22xf32, #tpu.memory_space<vmem>>, vector<1x1x16xf32>
    %792 = vector.shape_cast %791 : vector<1x1x16xf32> to vector<16xf32>
    %793 = vector.shape_cast %790 : vector<16xf32> to vector<1x1x16xf32>
    tpu.vector_store %arg4[%c1_217, %c3_218, %c3_219], %793 {strides = array<i32>} : memref<2x22x22xf32, #tpu.memory_space<vmem>>, vector<1x1x16xf32>,
    %794 = vector.extract_strided_slice %785 {offsets = [16], sizes = [16], strides = [1]} : vector<256xf32> to vector<16xf32>
    %c0_220 = arith.constant 0 : index
    %c4_221 = arith.constant 4 : index
    %c3_222 = arith.constant 3 : index
    %795 = vector.load %arg4[%c0_220, %c4_221, %c3_222] : memref<2x22x22xf32, #tpu.memory_space<vmem>>, vector<1x1x16xf32>
    %796 = vector.shape_cast %795 : vector<1x1x16xf32> to vector<16xf32>
    %797 = vector.shape_cast %794 : vector<16xf32> to vector<1x1x16xf32>
    tpu.vector_store %arg4[%c0_220, %c4_221, %c3_222], %797 {strides = array<i32>} : memref<2x22x22xf32, #tpu.memory_space<vmem>>, vector<1x1x16xf32>,
    %798 = vector.extract_strided_slice %783 {offsets = [16], sizes = [16], strides = [1]} : vector<256xf32> to vector<16xf32>
    %c1_223 = arith.constant 1 : index
    %c4_224 = arith.constant 4 : index
    %c3_225 = arith.constant 3 : index
    %799 = vector.load %arg4[%c1_223, %c4_224, %c3_225] : memref<2x22x22xf32, #tpu.memory_space<vmem>>, vector<1x1x16xf32>
    %800 = vector.shape_cast %799 : vector<1x1x16xf32> to vector<16xf32>
    %801 = vector.shape_cast %798 : vector<16xf32> to vector<1x1x16xf32>
    tpu.vector_store %arg4[%c1_223, %c4_224, %c3_225], %801 {strides = array<i32>} : memref<2x22x22xf32, #tpu.memory_space<vmem>>, vector<1x1x16xf32>,
    %802 = vector.extract_strided_slice %785 {offsets = [32], sizes = [16], strides = [1]} : vector<256xf32> to vector<16xf32>
    %c0_226 = arith.constant 0 : index
    %c5_227 = arith.constant 5 : index
    %c3_228 = arith.constant 3 : index
    %803 = vector.load %arg4[%c0_226, %c5_227, %c3_228] : memref<2x22x22xf32, #tpu.memory_space<vmem>>, vector<1x1x16xf32>
    %804 = vector.shape_cast %803 : vector<1x1x16xf32> to vector<16xf32>
    %805 = vector.shape_cast %802 : vector<16xf32> to vector<1x1x16xf32>
    tpu.vector_store %arg4[%c0_226, %c5_227, %c3_228], %805 {strides = array<i32>} : memref<2x22x22xf32, #tpu.memory_space<vmem>>, vector<1x1x16xf32>,
    %806 = vector.extract_strided_slice %783 {offsets = [32], sizes = [16], strides = [1]} : vector<256xf32> to vector<16xf32>
    %c1_229 = arith.constant 1 : index
    %c5_230 = arith.constant 5 : index
    %c3_231 = arith.constant 3 : index
    %807 = vector.load %arg4[%c1_229, %c5_230, %c3_231] : memref<2x22x22xf32, #tpu.memory_space<vmem>>, vector<1x1x16xf32>
    %808 = vector.shape_cast %807 : vector<1x1x16xf32> to vector<16xf32>
    %809 = vector.shape_cast %806 : vector<16xf32> to vector<1x1x16xf32>
    tpu.vector_store %arg4[%c1_229, %c5_230, %c3_231], %809 {strides = array<i32>} : memref<2x22x22xf32, #tpu.memory_space<vmem>>, vector<1x1x16xf32>,
    %810 = vector.extract_strided_slice %785 {offsets = [48], sizes = [16], strides = [1]} : vector<256xf32> to vector<16xf32>
    %c0_232 = arith.constant 0 : index
    %c6_233 = arith.constant 6 : index
    %c3_234 = arith.constant 3 : index
    %811 = vector.load %arg4[%c0_232, %c6_233, %c3_234] : memref<2x22x22xf32, #tpu.memory_space<vmem>>, vector<1x1x16xf32>
    %812 = vector.shape_cast %811 : vector<1x1x16xf32> to vector<16xf32>
    %813 = vector.shape_cast %810 : vector<16xf32> to vector<1x1x16xf32>
    tpu.vector_store %arg4[%c0_232, %c6_233, %c3_234], %813 {strides = array<i32>} : memref<2x22x22xf32, #tpu.memory_space<vmem>>, vector<1x1x16xf32>,
    %814 = vector.extract_strided_slice %783 {offsets = [48], sizes = [16], strides = [1]} : vector<256xf32> to vector<16xf32>
    %c1_235 = arith.constant 1 : index
    %c6_236 = arith.constant 6 : index
    %c3_237 = arith.constant 3 : index
    %815 = vector.load %arg4[%c1_235, %c6_236, %c3_237] : memref<2x22x22xf32, #tpu.memory_space<vmem>>, vector<1x1x16xf32>
    %816 = vector.shape_cast %815 : vector<1x1x16xf32> to vector<16xf32>
    %817 = vector.shape_cast %814 : vector<16xf32> to vector<1x1x16xf32>
    tpu.vector_store %arg4[%c1_235, %c6_236, %c3_237], %817 {strides = array<i32>} : memref<2x22x22xf32, #tpu.memory_space<vmem>>, vector<1x1x16xf32>,
    %818 = vector.extract_strided_slice %785 {offsets = [64], sizes = [16], strides = [1]} : vector<256xf32> to vector<16xf32>
    %c0_238 = arith.constant 0 : index
    %c7_239 = arith.constant 7 : index
    %c3_240 = arith.constant 3 : index
    %819 = vector.load %arg4[%c0_238, %c7_239, %c3_240] : memref<2x22x22xf32, #tpu.memory_space<vmem>>, vector<1x1x16xf32>
    %820 = vector.shape_cast %819 : vector<1x1x16xf32> to vector<16xf32>
    %821 = vector.shape_cast %818 : vector<16xf32> to vector<1x1x16xf32>
    tpu.vector_store %arg4[%c0_238, %c7_239, %c3_240], %821 {strides = array<i32>} : memref<2x22x22xf32, #tpu.memory_space<vmem>>, vector<1x1x16xf32>,
    %822 = vector.extract_strided_slice %783 {offsets = [64], sizes = [16], strides = [1]} : vector<256xf32> to vector<16xf32>
    %c1_241 = arith.constant 1 : index
    %c7_242 = arith.constant 7 : index
    %c3_243 = arith.constant 3 : index
    %823 = vector.load %arg4[%c1_241, %c7_242, %c3_243] : memref<2x22x22xf32, #tpu.memory_space<vmem>>, vector<1x1x16xf32>
    %824 = vector.shape_cast %823 : vector<1x1x16xf32> to vector<16xf32>
    %825 = vector.shape_cast %822 : vector<16xf32> to vector<1x1x16xf32>
    tpu.vector_store %arg4[%c1_241, %c7_242, %c3_243], %825 {strides = array<i32>} : memref<2x22x22xf32, #tpu.memory_space<vmem>>, vector<1x1x16xf32>,
    %826 = vector.extract_strided_slice %785 {offsets = [80], sizes = [16], strides = [1]} : vector<256xf32> to vector<16xf32>
    %c0_244 = arith.constant 0 : index
    %c8_245 = arith.constant 8 : index
    %c3_246 = arith.constant 3 : index
    %827 = vector.load %arg4[%c0_244, %c8_245, %c3_246] : memref<2x22x22xf32, #tpu.memory_space<vmem>>, vector<1x1x16xf32>
    %828 = vector.shape_cast %827 : vector<1x1x16xf32> to vector<16xf32>
    %829 = vector.shape_cast %826 : vector<16xf32> to vector<1x1x16xf32>
    tpu.vector_store %arg4[%c0_244, %c8_245, %c3_246], %829 {strides = array<i32>} : memref<2x22x22xf32, #tpu.memory_space<vmem>>, vector<1x1x16xf32>,
    %830 = vector.extract_strided_slice %783 {offsets = [80], sizes = [16], strides = [1]} : vector<256xf32> to vector<16xf32>
    %c1_247 = arith.constant 1 : index
    %c8_248 = arith.constant 8 : index
    %c3_249 = arith.constant 3 : index
    %831 = vector.load %arg4[%c1_247, %c8_248, %c3_249] : memref<2x22x22xf32, #tpu.memory_space<vmem>>, vector<1x1x16xf32>
    %832 = vector.shape_cast %831 : vector<1x1x16xf32> to vector<16xf32>
    %833 = vector.shape_cast %830 : vector<16xf32> to vector<1x1x16xf32>
    tpu.vector_store %arg4[%c1_247, %c8_248, %c3_249], %833 {strides = array<i32>} : memref<2x22x22xf32, #tpu.memory_space<vmem>>, vector<1x1x16xf32>,
    %834 = vector.extract_strided_slice %785 {offsets = [96], sizes = [16], strides = [1]} : vector<256xf32> to vector<16xf32>
    %c0_250 = arith.constant 0 : index
    %c9_251 = arith.constant 9 : index
    %c3_252 = arith.constant 3 : index
    %835 = vector.load %arg4[%c0_250, %c9_251, %c3_252] : memref<2x22x22xf32, #tpu.memory_space<vmem>>, vector<1x1x16xf32>
    %836 = vector.shape_cast %835 : vector<1x1x16xf32> to vector<16xf32>
    %837 = vector.shape_cast %834 : vector<16xf32> to vector<1x1x16xf32>
    tpu.vector_store %arg4[%c0_250, %c9_251, %c3_252], %837 {strides = array<i32>} : memref<2x22x22xf32, #tpu.memory_space<vmem>>, vector<1x1x16xf32>,
    %838 = vector.extract_strided_slice %783 {offsets = [96], sizes = [16], strides = [1]} : vector<256xf32> to vector<16xf32>
    %c1_253 = arith.constant 1 : index
    %c9_254 = arith.constant 9 : index
    %c3_255 = arith.constant 3 : index
    %839 = vector.load %arg4[%c1_253, %c9_254, %c3_255] : memref<2x22x22xf32, #tpu.memory_space<vmem>>, vector<1x1x16xf32>
    %840 = vector.shape_cast %839 : vector<1x1x16xf32> to vector<16xf32>
    %841 = vector.shape_cast %838 : vector<16xf32> to vector<1x1x16xf32>
    tpu.vector_store %arg4[%c1_253, %c9_254, %c3_255], %841 {strides = array<i32>} : memref<2x22x22xf32, #tpu.memory_space<vmem>>, vector<1x1x16xf32>,
    %842 = vector.extract_strided_slice %785 {offsets = [112], sizes = [16], strides = [1]} : vector<256xf32> to vector<16xf32>
    %c0_256 = arith.constant 0 : index
    %c10_257 = arith.constant 10 : index
    %c3_258 = arith.constant 3 : index
    %843 = vector.load %arg4[%c0_256, %c10_257, %c3_258] : memref<2x22x22xf32, #tpu.memory_space<vmem>>, vector<1x1x16xf32>
    %844 = vector.shape_cast %843 : vector<1x1x16xf32> to vector<16xf32>
    %845 = vector.shape_cast %842 : vector<16xf32> to vector<1x1x16xf32>
    tpu.vector_store %arg4[%c0_256, %c10_257, %c3_258], %845 {strides = array<i32>} : memref<2x22x22xf32, #tpu.memory_space<vmem>>, vector<1x1x16xf32>,
    %846 = vector.extract_strided_slice %783 {offsets = [112], sizes = [16], strides = [1]} : vector<256xf32> to vector<16xf32>
    %c1_259 = arith.constant 1 : index
    %c10_260 = arith.constant 10 : index
    %c3_261 = arith.constant 3 : index
    %847 = vector.load %arg4[%c1_259, %c10_260, %c3_261] : memref<2x22x22xf32, #tpu.memory_space<vmem>>, vector<1x1x16xf32>
    %848 = vector.shape_cast %847 : vector<1x1x16xf32> to vector<16xf32>
    %849 = vector.shape_cast %846 : vector<16xf32> to vector<1x1x16xf32>
    tpu.vector_store %arg4[%c1_259, %c10_260, %c3_261], %849 {strides = array<i32>} : memref<2x22x22xf32, #tpu.memory_space<vmem>>, vector<1x1x16xf32>,
    %850 = vector.extract_strided_slice %785 {offsets = [128], sizes = [16], strides = [1]} : vector<256xf32> to vector<16xf32>
    %c0_262 = arith.constant 0 : index
    %c11_263 = arith.constant 11 : index
    %c3_264 = arith.constant 3 : index
    %851 = vector.load %arg4[%c0_262, %c11_263, %c3_264] : memref<2x22x22xf32, #tpu.memory_space<vmem>>, vector<1x1x16xf32>
    %852 = vector.shape_cast %851 : vector<1x1x16xf32> to vector<16xf32>
    %853 = vector.shape_cast %850 : vector<16xf32> to vector<1x1x16xf32>
    tpu.vector_store %arg4[%c0_262, %c11_263, %c3_264], %853 {strides = array<i32>} : memref<2x22x22xf32, #tpu.memory_space<vmem>>, vector<1x1x16xf32>,
    %854 = vector.extract_strided_slice %783 {offsets = [128], sizes = [16], strides = [1]} : vector<256xf32> to vector<16xf32>
    %c1_265 = arith.constant 1 : index
    %c11_266 = arith.constant 11 : index
    %c3_267 = arith.constant 3 : index
    %855 = vector.load %arg4[%c1_265, %c11_266, %c3_267] : memref<2x22x22xf32, #tpu.memory_space<vmem>>, vector<1x1x16xf32>
    %856 = vector.shape_cast %855 : vector<1x1x16xf32> to vector<16xf32>
    %857 = vector.shape_cast %854 : vector<16xf32> to vector<1x1x16xf32>
    tpu.vector_store %arg4[%c1_265, %c11_266, %c3_267], %857 {strides = array<i32>} : memref<2x22x22xf32, #tpu.memory_space<vmem>>, vector<1x1x16xf32>,
    %858 = vector.extract_strided_slice %785 {offsets = [144], sizes = [16], strides = [1]} : vector<256xf32> to vector<16xf32>
    %c0_268 = arith.constant 0 : index
    %c12_269 = arith.constant 12 : index
    %c3_270 = arith.constant 3 : index
    %859 = vector.load %arg4[%c0_268, %c12_269, %c3_270] : memref<2x22x22xf32, #tpu.memory_space<vmem>>, vector<1x1x16xf32>
    %860 = vector.shape_cast %859 : vector<1x1x16xf32> to vector<16xf32>
    %861 = vector.shape_cast %858 : vector<16xf32> to vector<1x1x16xf32>
    tpu.vector_store %arg4[%c0_268, %c12_269, %c3_270], %861 {strides = array<i32>} : memref<2x22x22xf32, #tpu.memory_space<vmem>>, vector<1x1x16xf32>,
    %862 = vector.extract_strided_slice %783 {offsets = [144], sizes = [16], strides = [1]} : vector<256xf32> to vector<16xf32>
    %c1_271 = arith.constant 1 : index
    %c12_272 = arith.constant 12 : index
    %c3_273 = arith.constant 3 : index
    %863 = vector.load %arg4[%c1_271, %c12_272, %c3_273] : memref<2x22x22xf32, #tpu.memory_space<vmem>>, vector<1x1x16xf32>
    %864 = vector.shape_cast %863 : vector<1x1x16xf32> to vector<16xf32>
    %865 = vector.shape_cast %862 : vector<16xf32> to vector<1x1x16xf32>
    tpu.vector_store %arg4[%c1_271, %c12_272, %c3_273], %865 {strides = array<i32>} : memref<2x22x22xf32, #tpu.memory_space<vmem>>, vector<1x1x16xf32>,
    %866 = vector.extract_strided_slice %785 {offsets = [160], sizes = [16], strides = [1]} : vector<256xf32> to vector<16xf32>
    %c0_274 = arith.constant 0 : index
    %c13_275 = arith.constant 13 : index
    %c3_276 = arith.constant 3 : index
    %867 = vector.load %arg4[%c0_274, %c13_275, %c3_276] : memref<2x22x22xf32, #tpu.memory_space<vmem>>, vector<1x1x16xf32>
    %868 = vector.shape_cast %867 : vector<1x1x16xf32> to vector<16xf32>
    %869 = vector.shape_cast %866 : vector<16xf32> to vector<1x1x16xf32>
    tpu.vector_store %arg4[%c0_274, %c13_275, %c3_276], %869 {strides = array<i32>} : memref<2x22x22xf32, #tpu.memory_space<vmem>>, vector<1x1x16xf32>,
    %870 = vector.extract_strided_slice %783 {offsets = [160], sizes = [16], strides = [1]} : vector<256xf32> to vector<16xf32>
    %c1_277 = arith.constant 1 : index
    %c13_278 = arith.constant 13 : index
    %c3_279 = arith.constant 3 : index
    %871 = vector.load %arg4[%c1_277, %c13_278, %c3_279] : memref<2x22x22xf32, #tpu.memory_space<vmem>>, vector<1x1x16xf32>
    %872 = vector.shape_cast %871 : vector<1x1x16xf32> to vector<16xf32>
    %873 = vector.shape_cast %870 : vector<16xf32> to vector<1x1x16xf32>
    tpu.vector_store %arg4[%c1_277, %c13_278, %c3_279], %873 {strides = array<i32>} : memref<2x22x22xf32, #tpu.memory_space<vmem>>, vector<1x1x16xf32>,
    %874 = vector.extract_strided_slice %785 {offsets = [176], sizes = [16], strides = [1]} : vector<256xf32> to vector<16xf32>
    %c0_280 = arith.constant 0 : index
    %c14_281 = arith.constant 14 : index
    %c3_282 = arith.constant 3 : index
    %875 = vector.load %arg4[%c0_280, %c14_281, %c3_282] : memref<2x22x22xf32, #tpu.memory_space<vmem>>, vector<1x1x16xf32>
    %876 = vector.shape_cast %875 : vector<1x1x16xf32> to vector<16xf32>
    %877 = vector.shape_cast %874 : vector<16xf32> to vector<1x1x16xf32>
    tpu.vector_store %arg4[%c0_280, %c14_281, %c3_282], %877 {strides = array<i32>} : memref<2x22x22xf32, #tpu.memory_space<vmem>>, vector<1x1x16xf32>,
    %878 = vector.extract_strided_slice %783 {offsets = [176], sizes = [16], strides = [1]} : vector<256xf32> to vector<16xf32>
    %c1_283 = arith.constant 1 : index
    %c14_284 = arith.constant 14 : index
    %c3_285 = arith.constant 3 : index
    %879 = vector.load %arg4[%c1_283, %c14_284, %c3_285] : memref<2x22x22xf32, #tpu.memory_space<vmem>>, vector<1x1x16xf32>
    %880 = vector.shape_cast %879 : vector<1x1x16xf32> to vector<16xf32>
    %881 = vector.shape_cast %878 : vector<16xf32> to vector<1x1x16xf32>
    tpu.vector_store %arg4[%c1_283, %c14_284, %c3_285], %881 {strides = array<i32>} : memref<2x22x22xf32, #tpu.memory_space<vmem>>, vector<1x1x16xf32>,
    %882 = vector.extract_strided_slice %785 {offsets = [192], sizes = [16], strides = [1]} : vector<256xf32> to vector<16xf32>
    %c0_286 = arith.constant 0 : index
    %c15_287 = arith.constant 15 : index
    %c3_288 = arith.constant 3 : index
    %883 = vector.load %arg4[%c0_286, %c15_287, %c3_288] : memref<2x22x22xf32, #tpu.memory_space<vmem>>, vector<1x1x16xf32>
    %884 = vector.shape_cast %883 : vector<1x1x16xf32> to vector<16xf32>
    %885 = vector.shape_cast %882 : vector<16xf32> to vector<1x1x16xf32>
    tpu.vector_store %arg4[%c0_286, %c15_287, %c3_288], %885 {strides = array<i32>} : memref<2x22x22xf32, #tpu.memory_space<vmem>>, vector<1x1x16xf32>,
    %886 = vector.extract_strided_slice %783 {offsets = [192], sizes = [16], strides = [1]} : vector<256xf32> to vector<16xf32>
    %c1_289 = arith.constant 1 : index
    %c15_290 = arith.constant 15 : index
    %c3_291 = arith.constant 3 : index
    %887 = vector.load %arg4[%c1_289, %c15_290, %c3_291] : memref<2x22x22xf32, #tpu.memory_space<vmem>>, vector<1x1x16xf32>
    %888 = vector.shape_cast %887 : vector<1x1x16xf32> to vector<16xf32>
    %889 = vector.shape_cast %886 : vector<16xf32> to vector<1x1x16xf32>
    tpu.vector_store %arg4[%c1_289, %c15_290, %c3_291], %889 {strides = array<i32>} : memref<2x22x22xf32, #tpu.memory_space<vmem>>, vector<1x1x16xf32>,
    %890 = vector.extract_strided_slice %785 {offsets = [208], sizes = [16], strides = [1]} : vector<256xf32> to vector<16xf32>
    %c0_292 = arith.constant 0 : index
    %c16_293 = arith.constant 16 : index
    %c3_294 = arith.constant 3 : index
    %891 = vector.load %arg4[%c0_292, %c16_293, %c3_294] : memref<2x22x22xf32, #tpu.memory_space<vmem>>, vector<1x1x16xf32>
    %892 = vector.shape_cast %891 : vector<1x1x16xf32> to vector<16xf32>
    %893 = vector.shape_cast %890 : vector<16xf32> to vector<1x1x16xf32>
    tpu.vector_store %arg4[%c0_292, %c16_293, %c3_294], %893 {strides = array<i32>} : memref<2x22x22xf32, #tpu.memory_space<vmem>>, vector<1x1x16xf32>,
    %894 = vector.extract_strided_slice %783 {offsets = [208], sizes = [16], strides = [1]} : vector<256xf32> to vector<16xf32>
    %c1_295 = arith.constant 1 : index
    %c16_296 = arith.constant 16 : index
    %c3_297 = arith.constant 3 : index
    %895 = vector.load %arg4[%c1_295, %c16_296, %c3_297] : memref<2x22x22xf32, #tpu.memory_space<vmem>>, vector<1x1x16xf32>
    %896 = vector.shape_cast %895 : vector<1x1x16xf32> to vector<16xf32>
    %897 = vector.shape_cast %894 : vector<16xf32> to vector<1x1x16xf32>
    tpu.vector_store %arg4[%c1_295, %c16_296, %c3_297], %897 {strides = array<i32>} : memref<2x22x22xf32, #tpu.memory_space<vmem>>, vector<1x1x16xf32>,
    %898 = vector.extract_strided_slice %785 {offsets = [224], sizes = [16], strides = [1]} : vector<256xf32> to vector<16xf32>
    %c0_298 = arith.constant 0 : index
    %c17_299 = arith.constant 17 : index
    %c3_300 = arith.constant 3 : index
    %899 = vector.load %arg4[%c0_298, %c17_299, %c3_300] : memref<2x22x22xf32, #tpu.memory_space<vmem>>, vector<1x1x16xf32>
    %900 = vector.shape_cast %899 : vector<1x1x16xf32> to vector<16xf32>
    %901 = vector.shape_cast %898 : vector<16xf32> to vector<1x1x16xf32>
    tpu.vector_store %arg4[%c0_298, %c17_299, %c3_300], %901 {strides = array<i32>} : memref<2x22x22xf32, #tpu.memory_space<vmem>>, vector<1x1x16xf32>,
    %902 = vector.extract_strided_slice %783 {offsets = [224], sizes = [16], strides = [1]} : vector<256xf32> to vector<16xf32>
    %c1_301 = arith.constant 1 : index
    %c17_302 = arith.constant 17 : index
    %c3_303 = arith.constant 3 : index
    %903 = vector.load %arg4[%c1_301, %c17_302, %c3_303] : memref<2x22x22xf32, #tpu.memory_space<vmem>>, vector<1x1x16xf32>
    %904 = vector.shape_cast %903 : vector<1x1x16xf32> to vector<16xf32>
    %905 = vector.shape_cast %902 : vector<16xf32> to vector<1x1x16xf32>
    tpu.vector_store %arg4[%c1_301, %c17_302, %c3_303], %905 {strides = array<i32>} : memref<2x22x22xf32, #tpu.memory_space<vmem>>, vector<1x1x16xf32>,
    %906 = vector.extract_strided_slice %785 {offsets = [240], sizes = [16], strides = [1]} : vector<256xf32> to vector<16xf32>
    %c0_304 = arith.constant 0 : index
    %c18_305 = arith.constant 18 : index
    %c3_306 = arith.constant 3 : index
    %907 = vector.load %arg4[%c0_304, %c18_305, %c3_306] : memref<2x22x22xf32, #tpu.memory_space<vmem>>, vector<1x1x16xf32>
    %908 = vector.shape_cast %907 : vector<1x1x16xf32> to vector<16xf32>
    %909 = vector.shape_cast %906 : vector<16xf32> to vector<1x1x16xf32>
    tpu.vector_store %arg4[%c0_304, %c18_305, %c3_306], %909 {strides = array<i32>} : memref<2x22x22xf32, #tpu.memory_space<vmem>>, vector<1x1x16xf32>,
    %910 = vector.extract_strided_slice %783 {offsets = [240], sizes = [16], strides = [1]} : vector<256xf32> to vector<16xf32>
    %c1_307 = arith.constant 1 : index
    %c18_308 = arith.constant 18 : index
    %c3_309 = arith.constant 3 : index
    %911 = vector.load %arg4[%c1_307, %c18_308, %c3_309] : memref<2x22x22xf32, #tpu.memory_space<vmem>>, vector<1x1x16xf32>
    %912 = vector.shape_cast %911 : vector<1x1x16xf32> to vector<16xf32>
    %913 = vector.shape_cast %910 : vector<16xf32> to vector<1x1x16xf32>
    tpu.vector_store %arg4[%c1_307, %c18_308, %c3_309], %913 {strides = array<i32>} : memref<2x22x22xf32, #tpu.memory_space<vmem>>, vector<1x1x16xf32>,
    %cst_310 = arith.constant 0.000000e+00 : f32
    %914 = vector.broadcast %cst_310 : f32 to vector<16x16xf32>
    %c0_311 = arith.constant 0 : index
    %c0_312 = arith.constant 0 : index
    %c0_313 = arith.constant 0 : index
    %915 = vector.load %arg4[%c0_311, %c0_312, %c0_313] : memref<2x22x22xf32, #tpu.memory_space<vmem>>, vector<1x22x16xf32>
    %916 = vector.shape_cast %915 : vector<1x22x16xf32> to vector<22x16xf32>
    %c0_314 = arith.constant 0 : index
    %917 = memref.load %arg2[%c0_314] : memref<98xf32, #tpu.memory_space<smem>>
    %918 = vector.extract_strided_slice %916 {offsets = [0, 0], sizes = [16, 16], strides = [1, 1]} : vector<22x16xf32> to vector<16x16xf32>
    %919 = vector.broadcast %917 : f32 to vector<16x16xf32>
    %920 = arith.mulf %918, %919 : vector<16x16xf32>
    %921 = arith.addf %914, %920 : vector<16x16xf32>
    %c7_315 = arith.constant 7 : index
    %922 = memref.load %arg2[%c7_315] : memref<98xf32, #tpu.memory_space<smem>>
    %923 = vector.extract_strided_slice %916 {offsets = [1, 0], sizes = [16, 16], strides = [1, 1]} : vector<22x16xf32> to vector<16x16xf32>
    %924 = vector.broadcast %922 : f32 to vector<16x16xf32>
    %925 = arith.mulf %923, %924 : vector<16x16xf32>
    %926 = arith.addf %921, %925 : vector<16x16xf32>
    %c14_316 = arith.constant 14 : index
    %927 = memref.load %arg2[%c14_316] : memref<98xf32, #tpu.memory_space<smem>>
    %928 = vector.extract_strided_slice %916 {offsets = [2, 0], sizes = [16, 16], strides = [1, 1]} : vector<22x16xf32> to vector<16x16xf32>
    %929 = vector.broadcast %927 : f32 to vector<16x16xf32>
    %930 = arith.mulf %928, %929 : vector<16x16xf32>
    %931 = arith.addf %926, %930 : vector<16x16xf32>
    %c21_317 = arith.constant 21 : index
    %932 = memref.load %arg2[%c21_317] : memref<98xf32, #tpu.memory_space<smem>>
    %933 = vector.extract_strided_slice %916 {offsets = [3, 0], sizes = [16, 16], strides = [1, 1]} : vector<22x16xf32> to vector<16x16xf32>
    %934 = vector.broadcast %932 : f32 to vector<16x16xf32>
    %935 = arith.mulf %933, %934 : vector<16x16xf32>
    %936 = arith.addf %931, %935 : vector<16x16xf32>
    %c28_318 = arith.constant 28 : index
    %937 = memref.load %arg2[%c28_318] : memref<98xf32, #tpu.memory_space<smem>>
    %938 = vector.extract_strided_slice %916 {offsets = [4, 0], sizes = [16, 16], strides = [1, 1]} : vector<22x16xf32> to vector<16x16xf32>
    %939 = vector.broadcast %937 : f32 to vector<16x16xf32>
    %940 = arith.mulf %938, %939 : vector<16x16xf32>
    %941 = arith.addf %936, %940 : vector<16x16xf32>
    %c35_319 = arith.constant 35 : index
    %942 = memref.load %arg2[%c35_319] : memref<98xf32, #tpu.memory_space<smem>>
    %943 = vector.extract_strided_slice %916 {offsets = [5, 0], sizes = [16, 16], strides = [1, 1]} : vector<22x16xf32> to vector<16x16xf32>
    %944 = vector.broadcast %942 : f32 to vector<16x16xf32>
    %945 = arith.mulf %943, %944 : vector<16x16xf32>
    %946 = arith.addf %941, %945 : vector<16x16xf32>
    %c42_320 = arith.constant 42 : index
    %947 = memref.load %arg2[%c42_320] : memref<98xf32, #tpu.memory_space<smem>>
    %948 = vector.extract_strided_slice %916 {offsets = [6, 0], sizes = [16, 16], strides = [1, 1]} : vector<22x16xf32> to vector<16x16xf32>
    %949 = vector.broadcast %947 : f32 to vector<16x16xf32>
    %950 = arith.mulf %948, %949 : vector<16x16xf32>
    %951 = arith.addf %946, %950 : vector<16x16xf32>
    %c0_321 = arith.constant 0 : index
    %c0_322 = arith.constant 0 : index
    %c1_323 = arith.constant 1 : index
    %952 = vector.load %arg4[%c0_321, %c0_322, %c1_323] : memref<2x22x22xf32, #tpu.memory_space<vmem>>, vector<1x22x16xf32>
    %953 = vector.shape_cast %952 : vector<1x22x16xf32> to vector<22x16xf32>
    %c1_324 = arith.constant 1 : index
    %954 = memref.load %arg2[%c1_324] : memref<98xf32, #tpu.memory_space<smem>>
    %955 = vector.extract_strided_slice %953 {offsets = [0, 0], sizes = [16, 16], strides = [1, 1]} : vector<22x16xf32> to vector<16x16xf32>
    %956 = vector.broadcast %954 : f32 to vector<16x16xf32>
    %957 = arith.mulf %955, %956 : vector<16x16xf32>
    %958 = arith.addf %951, %957 : vector<16x16xf32>
    %c8_325 = arith.constant 8 : index
    %959 = memref.load %arg2[%c8_325] : memref<98xf32, #tpu.memory_space<smem>>
    %960 = vector.extract_strided_slice %953 {offsets = [1, 0], sizes = [16, 16], strides = [1, 1]} : vector<22x16xf32> to vector<16x16xf32>
    %961 = vector.broadcast %959 : f32 to vector<16x16xf32>
    %962 = arith.mulf %960, %961 : vector<16x16xf32>
    %963 = arith.addf %958, %962 : vector<16x16xf32>
    %c15_326 = arith.constant 15 : index
    %964 = memref.load %arg2[%c15_326] : memref<98xf32, #tpu.memory_space<smem>>
    %965 = vector.extract_strided_slice %953 {offsets = [2, 0], sizes = [16, 16], strides = [1, 1]} : vector<22x16xf32> to vector<16x16xf32>
    %966 = vector.broadcast %964 : f32 to vector<16x16xf32>
    %967 = arith.mulf %965, %966 : vector<16x16xf32>
    %968 = arith.addf %963, %967 : vector<16x16xf32>
    %c22_327 = arith.constant 22 : index
    %969 = memref.load %arg2[%c22_327] : memref<98xf32, #tpu.memory_space<smem>>
    %970 = vector.extract_strided_slice %953 {offsets = [3, 0], sizes = [16, 16], strides = [1, 1]} : vector<22x16xf32> to vector<16x16xf32>
    %971 = vector.broadcast %969 : f32 to vector<16x16xf32>
    %972 = arith.mulf %970, %971 : vector<16x16xf32>
    %973 = arith.addf %968, %972 : vector<16x16xf32>
    %c29_328 = arith.constant 29 : index
    %974 = memref.load %arg2[%c29_328] : memref<98xf32, #tpu.memory_space<smem>>
    %975 = vector.extract_strided_slice %953 {offsets = [4, 0], sizes = [16, 16], strides = [1, 1]} : vector<22x16xf32> to vector<16x16xf32>
    %976 = vector.broadcast %974 : f32 to vector<16x16xf32>
    %977 = arith.mulf %975, %976 : vector<16x16xf32>
    %978 = arith.addf %973, %977 : vector<16x16xf32>
    %c36_329 = arith.constant 36 : index
    %979 = memref.load %arg2[%c36_329] : memref<98xf32, #tpu.memory_space<smem>>
    %980 = vector.extract_strided_slice %953 {offsets = [5, 0], sizes = [16, 16], strides = [1, 1]} : vector<22x16xf32> to vector<16x16xf32>
    %981 = vector.broadcast %979 : f32 to vector<16x16xf32>
    %982 = arith.mulf %980, %981 : vector<16x16xf32>
    %983 = arith.addf %978, %982 : vector<16x16xf32>
    %c43_330 = arith.constant 43 : index
    %984 = memref.load %arg2[%c43_330] : memref<98xf32, #tpu.memory_space<smem>>
    %985 = vector.extract_strided_slice %953 {offsets = [6, 0], sizes = [16, 16], strides = [1, 1]} : vector<22x16xf32> to vector<16x16xf32>
    %986 = vector.broadcast %984 : f32 to vector<16x16xf32>
    %987 = arith.mulf %985, %986 : vector<16x16xf32>
    %988 = arith.addf %983, %987 : vector<16x16xf32>
    %c0_331 = arith.constant 0 : index
    %c0_332 = arith.constant 0 : index
    %c2_333 = arith.constant 2 : index
    %989 = vector.load %arg4[%c0_331, %c0_332, %c2_333] : memref<2x22x22xf32, #tpu.memory_space<vmem>>, vector<1x22x16xf32>
    %990 = vector.shape_cast %989 : vector<1x22x16xf32> to vector<22x16xf32>
    %c2_334 = arith.constant 2 : index
    %991 = memref.load %arg2[%c2_334] : memref<98xf32, #tpu.memory_space<smem>>
    %992 = vector.extract_strided_slice %990 {offsets = [0, 0], sizes = [16, 16], strides = [1, 1]} : vector<22x16xf32> to vector<16x16xf32>
    %993 = vector.broadcast %991 : f32 to vector<16x16xf32>
    %994 = arith.mulf %992, %993 : vector<16x16xf32>
    %995 = arith.addf %988, %994 : vector<16x16xf32>
    %c9_335 = arith.constant 9 : index
    %996 = memref.load %arg2[%c9_335] : memref<98xf32, #tpu.memory_space<smem>>
    %997 = vector.extract_strided_slice %990 {offsets = [1, 0], sizes = [16, 16], strides = [1, 1]} : vector<22x16xf32> to vector<16x16xf32>
    %998 = vector.broadcast %996 : f32 to vector<16x16xf32>
    %999 = arith.mulf %997, %998 : vector<16x16xf32>
    %1000 = arith.addf %995, %999 : vector<16x16xf32>
    %c16_336 = arith.constant 16 : index
    %1001 = memref.load %arg2[%c16_336] : memref<98xf32, #tpu.memory_space<smem>>
    %1002 = vector.extract_strided_slice %990 {offsets = [2, 0], sizes = [16, 16], strides = [1, 1]} : vector<22x16xf32> to vector<16x16xf32>
    %1003 = vector.broadcast %1001 : f32 to vector<16x16xf32>
    %1004 = arith.mulf %1002, %1003 : vector<16x16xf32>
    %1005 = arith.addf %1000, %1004 : vector<16x16xf32>
    %c23_337 = arith.constant 23 : index
    %1006 = memref.load %arg2[%c23_337] : memref<98xf32, #tpu.memory_space<smem>>
    %1007 = vector.extract_strided_slice %990 {offsets = [3, 0], sizes = [16, 16], strides = [1, 1]} : vector<22x16xf32> to vector<16x16xf32>
    %1008 = vector.broadcast %1006 : f32 to vector<16x16xf32>
    %1009 = arith.mulf %1007, %1008 : vector<16x16xf32>
    %1010 = arith.addf %1005, %1009 : vector<16x16xf32>
    %c30_338 = arith.constant 30 : index
    %1011 = memref.load %arg2[%c30_338] : memref<98xf32, #tpu.memory_space<smem>>
    %1012 = vector.extract_strided_slice %990 {offsets = [4, 0], sizes = [16, 16], strides = [1, 1]} : vector<22x16xf32> to vector<16x16xf32>
    %1013 = vector.broadcast %1011 : f32 to vector<16x16xf32>
    %1014 = arith.mulf %1012, %1013 : vector<16x16xf32>
    %1015 = arith.addf %1010, %1014 : vector<16x16xf32>
    %c37_339 = arith.constant 37 : index
    %1016 = memref.load %arg2[%c37_339] : memref<98xf32, #tpu.memory_space<smem>>
    %1017 = vector.extract_strided_slice %990 {offsets = [5, 0], sizes = [16, 16], strides = [1, 1]} : vector<22x16xf32> to vector<16x16xf32>
    %1018 = vector.broadcast %1016 : f32 to vector<16x16xf32>
    %1019 = arith.mulf %1017, %1018 : vector<16x16xf32>
    %1020 = arith.addf %1015, %1019 : vector<16x16xf32>
    %c44_340 = arith.constant 44 : index
    %1021 = memref.load %arg2[%c44_340] : memref<98xf32, #tpu.memory_space<smem>>
    %1022 = vector.extract_strided_slice %990 {offsets = [6, 0], sizes = [16, 16], strides = [1, 1]} : vector<22x16xf32> to vector<16x16xf32>
    %1023 = vector.broadcast %1021 : f32 to vector<16x16xf32>
    %1024 = arith.mulf %1022, %1023 : vector<16x16xf32>
    %1025 = arith.addf %1020, %1024 : vector<16x16xf32>
    %c0_341 = arith.constant 0 : index
    %c0_342 = arith.constant 0 : index
    %c3_343 = arith.constant 3 : index
    %1026 = vector.load %arg4[%c0_341, %c0_342, %c3_343] : memref<2x22x22xf32, #tpu.memory_space<vmem>>, vector<1x22x16xf32>
    %1027 = vector.shape_cast %1026 : vector<1x22x16xf32> to vector<22x16xf32>
    %c3_344 = arith.constant 3 : index
    %1028 = memref.load %arg2[%c3_344] : memref<98xf32, #tpu.memory_space<smem>>
    %1029 = vector.extract_strided_slice %1027 {offsets = [0, 0], sizes = [16, 16], strides = [1, 1]} : vector<22x16xf32> to vector<16x16xf32>
    %1030 = vector.broadcast %1028 : f32 to vector<16x16xf32>
    %1031 = arith.mulf %1029, %1030 : vector<16x16xf32>
    %1032 = arith.addf %1025, %1031 : vector<16x16xf32>
    %c10_345 = arith.constant 10 : index
    %1033 = memref.load %arg2[%c10_345] : memref<98xf32, #tpu.memory_space<smem>>
    %1034 = vector.extract_strided_slice %1027 {offsets = [1, 0], sizes = [16, 16], strides = [1, 1]} : vector<22x16xf32> to vector<16x16xf32>
    %1035 = vector.broadcast %1033 : f32 to vector<16x16xf32>
    %1036 = arith.mulf %1034, %1035 : vector<16x16xf32>
    %1037 = arith.addf %1032, %1036 : vector<16x16xf32>
    %c17_346 = arith.constant 17 : index
    %1038 = memref.load %arg2[%c17_346] : memref<98xf32, #tpu.memory_space<smem>>
    %1039 = vector.extract_strided_slice %1027 {offsets = [2, 0], sizes = [16, 16], strides = [1, 1]} : vector<22x16xf32> to vector<16x16xf32>
    %1040 = vector.broadcast %1038 : f32 to vector<16x16xf32>
    %1041 = arith.mulf %1039, %1040 : vector<16x16xf32>
    %1042 = arith.addf %1037, %1041 : vector<16x16xf32>
    %c24_347 = arith.constant 24 : index
    %1043 = memref.load %arg2[%c24_347] : memref<98xf32, #tpu.memory_space<smem>>
    %1044 = vector.extract_strided_slice %1027 {offsets = [3, 0], sizes = [16, 16], strides = [1, 1]} : vector<22x16xf32> to vector<16x16xf32>
    %1045 = vector.broadcast %1043 : f32 to vector<16x16xf32>
    %1046 = arith.mulf %1044, %1045 : vector<16x16xf32>
    %1047 = arith.addf %1042, %1046 : vector<16x16xf32>
    %c31_348 = arith.constant 31 : index
    %1048 = memref.load %arg2[%c31_348] : memref<98xf32, #tpu.memory_space<smem>>
    %1049 = vector.extract_strided_slice %1027 {offsets = [4, 0], sizes = [16, 16], strides = [1, 1]} : vector<22x16xf32> to vector<16x16xf32>
    %1050 = vector.broadcast %1048 : f32 to vector<16x16xf32>
    %1051 = arith.mulf %1049, %1050 : vector<16x16xf32>
    %1052 = arith.addf %1047, %1051 : vector<16x16xf32>
    %c38_349 = arith.constant 38 : index
    %1053 = memref.load %arg2[%c38_349] : memref<98xf32, #tpu.memory_space<smem>>
    %1054 = vector.extract_strided_slice %1027 {offsets = [5, 0], sizes = [16, 16], strides = [1, 1]} : vector<22x16xf32> to vector<16x16xf32>
    %1055 = vector.broadcast %1053 : f32 to vector<16x16xf32>
    %1056 = arith.mulf %1054, %1055 : vector<16x16xf32>
    %1057 = arith.addf %1052, %1056 : vector<16x16xf32>
    %c45_350 = arith.constant 45 : index
    %1058 = memref.load %arg2[%c45_350] : memref<98xf32, #tpu.memory_space<smem>>
    %1059 = vector.extract_strided_slice %1027 {offsets = [6, 0], sizes = [16, 16], strides = [1, 1]} : vector<22x16xf32> to vector<16x16xf32>
    %1060 = vector.broadcast %1058 : f32 to vector<16x16xf32>
    %1061 = arith.mulf %1059, %1060 : vector<16x16xf32>
    %1062 = arith.addf %1057, %1061 : vector<16x16xf32>
    %c0_351 = arith.constant 0 : index
    %c0_352 = arith.constant 0 : index
    %c4_353 = arith.constant 4 : index
    %1063 = vector.load %arg4[%c0_351, %c0_352, %c4_353] : memref<2x22x22xf32, #tpu.memory_space<vmem>>, vector<1x22x16xf32>
    %1064 = vector.shape_cast %1063 : vector<1x22x16xf32> to vector<22x16xf32>
    %c4_354 = arith.constant 4 : index
    %1065 = memref.load %arg2[%c4_354] : memref<98xf32, #tpu.memory_space<smem>>
    %1066 = vector.extract_strided_slice %1064 {offsets = [0, 0], sizes = [16, 16], strides = [1, 1]} : vector<22x16xf32> to vector<16x16xf32>
    %1067 = vector.broadcast %1065 : f32 to vector<16x16xf32>
    %1068 = arith.mulf %1066, %1067 : vector<16x16xf32>
    %1069 = arith.addf %1062, %1068 : vector<16x16xf32>
    %c11_355 = arith.constant 11 : index
    %1070 = memref.load %arg2[%c11_355] : memref<98xf32, #tpu.memory_space<smem>>
    %1071 = vector.extract_strided_slice %1064 {offsets = [1, 0], sizes = [16, 16], strides = [1, 1]} : vector<22x16xf32> to vector<16x16xf32>
    %1072 = vector.broadcast %1070 : f32 to vector<16x16xf32>
    %1073 = arith.mulf %1071, %1072 : vector<16x16xf32>
    %1074 = arith.addf %1069, %1073 : vector<16x16xf32>
    %c18_356 = arith.constant 18 : index
    %1075 = memref.load %arg2[%c18_356] : memref<98xf32, #tpu.memory_space<smem>>
    %1076 = vector.extract_strided_slice %1064 {offsets = [2, 0], sizes = [16, 16], strides = [1, 1]} : vector<22x16xf32> to vector<16x16xf32>
    %1077 = vector.broadcast %1075 : f32 to vector<16x16xf32>
    %1078 = arith.mulf %1076, %1077 : vector<16x16xf32>
    %1079 = arith.addf %1074, %1078 : vector<16x16xf32>
    %c25_357 = arith.constant 25 : index
    %1080 = memref.load %arg2[%c25_357] : memref<98xf32, #tpu.memory_space<smem>>
    %1081 = vector.extract_strided_slice %1064 {offsets = [3, 0], sizes = [16, 16], strides = [1, 1]} : vector<22x16xf32> to vector<16x16xf32>
    %1082 = vector.broadcast %1080 : f32 to vector<16x16xf32>
    %1083 = arith.mulf %1081, %1082 : vector<16x16xf32>
    %1084 = arith.addf %1079, %1083 : vector<16x16xf32>
    %c32_358 = arith.constant 32 : index
    %1085 = memref.load %arg2[%c32_358] : memref<98xf32, #tpu.memory_space<smem>>
    %1086 = vector.extract_strided_slice %1064 {offsets = [4, 0], sizes = [16, 16], strides = [1, 1]} : vector<22x16xf32> to vector<16x16xf32>
    %1087 = vector.broadcast %1085 : f32 to vector<16x16xf32>
    %1088 = arith.mulf %1086, %1087 : vector<16x16xf32>
    %1089 = arith.addf %1084, %1088 : vector<16x16xf32>
    %c39_359 = arith.constant 39 : index
    %1090 = memref.load %arg2[%c39_359] : memref<98xf32, #tpu.memory_space<smem>>
    %1091 = vector.extract_strided_slice %1064 {offsets = [5, 0], sizes = [16, 16], strides = [1, 1]} : vector<22x16xf32> to vector<16x16xf32>
    %1092 = vector.broadcast %1090 : f32 to vector<16x16xf32>
    %1093 = arith.mulf %1091, %1092 : vector<16x16xf32>
    %1094 = arith.addf %1089, %1093 : vector<16x16xf32>
    %c46_360 = arith.constant 46 : index
    %1095 = memref.load %arg2[%c46_360] : memref<98xf32, #tpu.memory_space<smem>>
    %1096 = vector.extract_strided_slice %1064 {offsets = [6, 0], sizes = [16, 16], strides = [1, 1]} : vector<22x16xf32> to vector<16x16xf32>
    %1097 = vector.broadcast %1095 : f32 to vector<16x16xf32>
    %1098 = arith.mulf %1096, %1097 : vector<16x16xf32>
    %1099 = arith.addf %1094, %1098 : vector<16x16xf32>
    %c0_361 = arith.constant 0 : index
    %c0_362 = arith.constant 0 : index
    %c5_363 = arith.constant 5 : index
    %1100 = vector.load %arg4[%c0_361, %c0_362, %c5_363] : memref<2x22x22xf32, #tpu.memory_space<vmem>>, vector<1x22x16xf32>
    %1101 = vector.shape_cast %1100 : vector<1x22x16xf32> to vector<22x16xf32>
    %c5_364 = arith.constant 5 : index
    %1102 = memref.load %arg2[%c5_364] : memref<98xf32, #tpu.memory_space<smem>>
    %1103 = vector.extract_strided_slice %1101 {offsets = [0, 0], sizes = [16, 16], strides = [1, 1]} : vector<22x16xf32> to vector<16x16xf32>
    %1104 = vector.broadcast %1102 : f32 to vector<16x16xf32>
    %1105 = arith.mulf %1103, %1104 : vector<16x16xf32>
    %1106 = arith.addf %1099, %1105 : vector<16x16xf32>
    %c12_365 = arith.constant 12 : index
    %1107 = memref.load %arg2[%c12_365] : memref<98xf32, #tpu.memory_space<smem>>
    %1108 = vector.extract_strided_slice %1101 {offsets = [1, 0], sizes = [16, 16], strides = [1, 1]} : vector<22x16xf32> to vector<16x16xf32>
    %1109 = vector.broadcast %1107 : f32 to vector<16x16xf32>
    %1110 = arith.mulf %1108, %1109 : vector<16x16xf32>
    %1111 = arith.addf %1106, %1110 : vector<16x16xf32>
    %c19_366 = arith.constant 19 : index
    %1112 = memref.load %arg2[%c19_366] : memref<98xf32, #tpu.memory_space<smem>>
    %1113 = vector.extract_strided_slice %1101 {offsets = [2, 0], sizes = [16, 16], strides = [1, 1]} : vector<22x16xf32> to vector<16x16xf32>
    %1114 = vector.broadcast %1112 : f32 to vector<16x16xf32>
    %1115 = arith.mulf %1113, %1114 : vector<16x16xf32>
    %1116 = arith.addf %1111, %1115 : vector<16x16xf32>
    %c26_367 = arith.constant 26 : index
    %1117 = memref.load %arg2[%c26_367] : memref<98xf32, #tpu.memory_space<smem>>
    %1118 = vector.extract_strided_slice %1101 {offsets = [3, 0], sizes = [16, 16], strides = [1, 1]} : vector<22x16xf32> to vector<16x16xf32>
    %1119 = vector.broadcast %1117 : f32 to vector<16x16xf32>
    %1120 = arith.mulf %1118, %1119 : vector<16x16xf32>
    %1121 = arith.addf %1116, %1120 : vector<16x16xf32>
    %c33_368 = arith.constant 33 : index
    %1122 = memref.load %arg2[%c33_368] : memref<98xf32, #tpu.memory_space<smem>>
    %1123 = vector.extract_strided_slice %1101 {offsets = [4, 0], sizes = [16, 16], strides = [1, 1]} : vector<22x16xf32> to vector<16x16xf32>
    %1124 = vector.broadcast %1122 : f32 to vector<16x16xf32>
    %1125 = arith.mulf %1123, %1124 : vector<16x16xf32>
    %1126 = arith.addf %1121, %1125 : vector<16x16xf32>
    %c40_369 = arith.constant 40 : index
    %1127 = memref.load %arg2[%c40_369] : memref<98xf32, #tpu.memory_space<smem>>
    %1128 = vector.extract_strided_slice %1101 {offsets = [5, 0], sizes = [16, 16], strides = [1, 1]} : vector<22x16xf32> to vector<16x16xf32>
    %1129 = vector.broadcast %1127 : f32 to vector<16x16xf32>
    %1130 = arith.mulf %1128, %1129 : vector<16x16xf32>
    %1131 = arith.addf %1126, %1130 : vector<16x16xf32>
    %c47_370 = arith.constant 47 : index
    %1132 = memref.load %arg2[%c47_370] : memref<98xf32, #tpu.memory_space<smem>>
    %1133 = vector.extract_strided_slice %1101 {offsets = [6, 0], sizes = [16, 16], strides = [1, 1]} : vector<22x16xf32> to vector<16x16xf32>
    %1134 = vector.broadcast %1132 : f32 to vector<16x16xf32>
    %1135 = arith.mulf %1133, %1134 : vector<16x16xf32>
    %1136 = arith.addf %1131, %1135 : vector<16x16xf32>
    %c0_371 = arith.constant 0 : index
    %c0_372 = arith.constant 0 : index
    %c6_373 = arith.constant 6 : index
    %1137 = vector.load %arg4[%c0_371, %c0_372, %c6_373] : memref<2x22x22xf32, #tpu.memory_space<vmem>>, vector<1x22x16xf32>
    %1138 = vector.shape_cast %1137 : vector<1x22x16xf32> to vector<22x16xf32>
    %c6_374 = arith.constant 6 : index
    %1139 = memref.load %arg2[%c6_374] : memref<98xf32, #tpu.memory_space<smem>>
    %1140 = vector.extract_strided_slice %1138 {offsets = [0, 0], sizes = [16, 16], strides = [1, 1]} : vector<22x16xf32> to vector<16x16xf32>
    %1141 = vector.broadcast %1139 : f32 to vector<16x16xf32>
    %1142 = arith.mulf %1140, %1141 : vector<16x16xf32>
    %1143 = arith.addf %1136, %1142 : vector<16x16xf32>
    %c13_375 = arith.constant 13 : index
    %1144 = memref.load %arg2[%c13_375] : memref<98xf32, #tpu.memory_space<smem>>
    %1145 = vector.extract_strided_slice %1138 {offsets = [1, 0], sizes = [16, 16], strides = [1, 1]} : vector<22x16xf32> to vector<16x16xf32>
    %1146 = vector.broadcast %1144 : f32 to vector<16x16xf32>
    %1147 = arith.mulf %1145, %1146 : vector<16x16xf32>
    %1148 = arith.addf %1143, %1147 : vector<16x16xf32>
    %c20_376 = arith.constant 20 : index
    %1149 = memref.load %arg2[%c20_376] : memref<98xf32, #tpu.memory_space<smem>>
    %1150 = vector.extract_strided_slice %1138 {offsets = [2, 0], sizes = [16, 16], strides = [1, 1]} : vector<22x16xf32> to vector<16x16xf32>
    %1151 = vector.broadcast %1149 : f32 to vector<16x16xf32>
    %1152 = arith.mulf %1150, %1151 : vector<16x16xf32>
    %1153 = arith.addf %1148, %1152 : vector<16x16xf32>
    %c27_377 = arith.constant 27 : index
    %1154 = memref.load %arg2[%c27_377] : memref<98xf32, #tpu.memory_space<smem>>
    %1155 = vector.extract_strided_slice %1138 {offsets = [3, 0], sizes = [16, 16], strides = [1, 1]} : vector<22x16xf32> to vector<16x16xf32>
    %1156 = vector.broadcast %1154 : f32 to vector<16x16xf32>
    %1157 = arith.mulf %1155, %1156 : vector<16x16xf32>
    %1158 = arith.addf %1153, %1157 : vector<16x16xf32>
    %c34_378 = arith.constant 34 : index
    %1159 = memref.load %arg2[%c34_378] : memref<98xf32, #tpu.memory_space<smem>>
    %1160 = vector.extract_strided_slice %1138 {offsets = [4, 0], sizes = [16, 16], strides = [1, 1]} : vector<22x16xf32> to vector<16x16xf32>
    %1161 = vector.broadcast %1159 : f32 to vector<16x16xf32>
    %1162 = arith.mulf %1160, %1161 : vector<16x16xf32>
    %1163 = arith.addf %1158, %1162 : vector<16x16xf32>
    %c41_379 = arith.constant 41 : index
    %1164 = memref.load %arg2[%c41_379] : memref<98xf32, #tpu.memory_space<smem>>
    %1165 = vector.extract_strided_slice %1138 {offsets = [5, 0], sizes = [16, 16], strides = [1, 1]} : vector<22x16xf32> to vector<16x16xf32>
    %1166 = vector.broadcast %1164 : f32 to vector<16x16xf32>
    %1167 = arith.mulf %1165, %1166 : vector<16x16xf32>
    %1168 = arith.addf %1163, %1167 : vector<16x16xf32>
    %c48_380 = arith.constant 48 : index
    %1169 = memref.load %arg2[%c48_380] : memref<98xf32, #tpu.memory_space<smem>>
    %1170 = vector.extract_strided_slice %1138 {offsets = [6, 0], sizes = [16, 16], strides = [1, 1]} : vector<22x16xf32> to vector<16x16xf32>
    %1171 = vector.broadcast %1169 : f32 to vector<16x16xf32>
    %1172 = arith.mulf %1170, %1171 : vector<16x16xf32>
    %1173 = arith.addf %1168, %1172 : vector<16x16xf32>
    %c1_381 = arith.constant 1 : index
    %c0_382 = arith.constant 0 : index
    %c0_383 = arith.constant 0 : index
    %1174 = vector.load %arg4[%c1_381, %c0_382, %c0_383] : memref<2x22x22xf32, #tpu.memory_space<vmem>>, vector<1x22x16xf32>
    %1175 = vector.shape_cast %1174 : vector<1x22x16xf32> to vector<22x16xf32>
    %c49_384 = arith.constant 49 : index
    %1176 = memref.load %arg2[%c49_384] : memref<98xf32, #tpu.memory_space<smem>>
    %1177 = vector.extract_strided_slice %1175 {offsets = [0, 0], sizes = [16, 16], strides = [1, 1]} : vector<22x16xf32> to vector<16x16xf32>
    %1178 = vector.broadcast %1176 : f32 to vector<16x16xf32>
    %1179 = arith.mulf %1177, %1178 : vector<16x16xf32>
    %1180 = arith.addf %1173, %1179 : vector<16x16xf32>
    %c56_385 = arith.constant 56 : index
    %1181 = memref.load %arg2[%c56_385] : memref<98xf32, #tpu.memory_space<smem>>
    %1182 = vector.extract_strided_slice %1175 {offsets = [1, 0], sizes = [16, 16], strides = [1, 1]} : vector<22x16xf32> to vector<16x16xf32>
    %1183 = vector.broadcast %1181 : f32 to vector<16x16xf32>
    %1184 = arith.mulf %1182, %1183 : vector<16x16xf32>
    %1185 = arith.addf %1180, %1184 : vector<16x16xf32>
    %c63_386 = arith.constant 63 : index
    %1186 = memref.load %arg2[%c63_386] : memref<98xf32, #tpu.memory_space<smem>>
    %1187 = vector.extract_strided_slice %1175 {offsets = [2, 0], sizes = [16, 16], strides = [1, 1]} : vector<22x16xf32> to vector<16x16xf32>
    %1188 = vector.broadcast %1186 : f32 to vector<16x16xf32>
    %1189 = arith.mulf %1187, %1188 : vector<16x16xf32>
    %1190 = arith.addf %1185, %1189 : vector<16x16xf32>
    %c70_387 = arith.constant 70 : index
    %1191 = memref.load %arg2[%c70_387] : memref<98xf32, #tpu.memory_space<smem>>
    %1192 = vector.extract_strided_slice %1175 {offsets = [3, 0], sizes = [16, 16], strides = [1, 1]} : vector<22x16xf32> to vector<16x16xf32>
    %1193 = vector.broadcast %1191 : f32 to vector<16x16xf32>
    %1194 = arith.mulf %1192, %1193 : vector<16x16xf32>
    %1195 = arith.addf %1190, %1194 : vector<16x16xf32>
    %c77_388 = arith.constant 77 : index
    %1196 = memref.load %arg2[%c77_388] : memref<98xf32, #tpu.memory_space<smem>>
    %1197 = vector.extract_strided_slice %1175 {offsets = [4, 0], sizes = [16, 16], strides = [1, 1]} : vector<22x16xf32> to vector<16x16xf32>
    %1198 = vector.broadcast %1196 : f32 to vector<16x16xf32>
    %1199 = arith.mulf %1197, %1198 : vector<16x16xf32>
    %1200 = arith.addf %1195, %1199 : vector<16x16xf32>
    %c84_389 = arith.constant 84 : index
    %1201 = memref.load %arg2[%c84_389] : memref<98xf32, #tpu.memory_space<smem>>
    %1202 = vector.extract_strided_slice %1175 {offsets = [5, 0], sizes = [16, 16], strides = [1, 1]} : vector<22x16xf32> to vector<16x16xf32>
    %1203 = vector.broadcast %1201 : f32 to vector<16x16xf32>
    %1204 = arith.mulf %1202, %1203 : vector<16x16xf32>
    %1205 = arith.addf %1200, %1204 : vector<16x16xf32>
    %c91_390 = arith.constant 91 : index
    %1206 = memref.load %arg2[%c91_390] : memref<98xf32, #tpu.memory_space<smem>>
    %1207 = vector.extract_strided_slice %1175 {offsets = [6, 0], sizes = [16, 16], strides = [1, 1]} : vector<22x16xf32> to vector<16x16xf32>
    %1208 = vector.broadcast %1206 : f32 to vector<16x16xf32>
    %1209 = arith.mulf %1207, %1208 : vector<16x16xf32>
    %1210 = arith.addf %1205, %1209 : vector<16x16xf32>
    %c1_391 = arith.constant 1 : index
    %c0_392 = arith.constant 0 : index
    %c1_393 = arith.constant 1 : index
    %1211 = vector.load %arg4[%c1_391, %c0_392, %c1_393] : memref<2x22x22xf32, #tpu.memory_space<vmem>>, vector<1x22x16xf32>
    %1212 = vector.shape_cast %1211 : vector<1x22x16xf32> to vector<22x16xf32>
    %c50_394 = arith.constant 50 : index
    %1213 = memref.load %arg2[%c50_394] : memref<98xf32, #tpu.memory_space<smem>>
    %1214 = vector.extract_strided_slice %1212 {offsets = [0, 0], sizes = [16, 16], strides = [1, 1]} : vector<22x16xf32> to vector<16x16xf32>
    %1215 = vector.broadcast %1213 : f32 to vector<16x16xf32>
    %1216 = arith.mulf %1214, %1215 : vector<16x16xf32>
    %1217 = arith.addf %1210, %1216 : vector<16x16xf32>
    %c57_395 = arith.constant 57 : index
    %1218 = memref.load %arg2[%c57_395] : memref<98xf32, #tpu.memory_space<smem>>
    %1219 = vector.extract_strided_slice %1212 {offsets = [1, 0], sizes = [16, 16], strides = [1, 1]} : vector<22x16xf32> to vector<16x16xf32>
    %1220 = vector.broadcast %1218 : f32 to vector<16x16xf32>
    %1221 = arith.mulf %1219, %1220 : vector<16x16xf32>
    %1222 = arith.addf %1217, %1221 : vector<16x16xf32>
    %c64_396 = arith.constant 64 : index
    %1223 = memref.load %arg2[%c64_396] : memref<98xf32, #tpu.memory_space<smem>>
    %1224 = vector.extract_strided_slice %1212 {offsets = [2, 0], sizes = [16, 16], strides = [1, 1]} : vector<22x16xf32> to vector<16x16xf32>
    %1225 = vector.broadcast %1223 : f32 to vector<16x16xf32>
    %1226 = arith.mulf %1224, %1225 : vector<16x16xf32>
    %1227 = arith.addf %1222, %1226 : vector<16x16xf32>
    %c71_397 = arith.constant 71 : index
    %1228 = memref.load %arg2[%c71_397] : memref<98xf32, #tpu.memory_space<smem>>
    %1229 = vector.extract_strided_slice %1212 {offsets = [3, 0], sizes = [16, 16], strides = [1, 1]} : vector<22x16xf32> to vector<16x16xf32>
    %1230 = vector.broadcast %1228 : f32 to vector<16x16xf32>
    %1231 = arith.mulf %1229, %1230 : vector<16x16xf32>
    %1232 = arith.addf %1227, %1231 : vector<16x16xf32>
    %c78_398 = arith.constant 78 : index
    %1233 = memref.load %arg2[%c78_398] : memref<98xf32, #tpu.memory_space<smem>>
    %1234 = vector.extract_strided_slice %1212 {offsets = [4, 0], sizes = [16, 16], strides = [1, 1]} : vector<22x16xf32> to vector<16x16xf32>
    %1235 = vector.broadcast %1233 : f32 to vector<16x16xf32>
    %1236 = arith.mulf %1234, %1235 : vector<16x16xf32>
    %1237 = arith.addf %1232, %1236 : vector<16x16xf32>
    %c85_399 = arith.constant 85 : index
    %1238 = memref.load %arg2[%c85_399] : memref<98xf32, #tpu.memory_space<smem>>
    %1239 = vector.extract_strided_slice %1212 {offsets = [5, 0], sizes = [16, 16], strides = [1, 1]} : vector<22x16xf32> to vector<16x16xf32>
    %1240 = vector.broadcast %1238 : f32 to vector<16x16xf32>
    %1241 = arith.mulf %1239, %1240 : vector<16x16xf32>
    %1242 = arith.addf %1237, %1241 : vector<16x16xf32>
    %c92_400 = arith.constant 92 : index
    %1243 = memref.load %arg2[%c92_400] : memref<98xf32, #tpu.memory_space<smem>>
    %1244 = vector.extract_strided_slice %1212 {offsets = [6, 0], sizes = [16, 16], strides = [1, 1]} : vector<22x16xf32> to vector<16x16xf32>
    %1245 = vector.broadcast %1243 : f32 to vector<16x16xf32>
    %1246 = arith.mulf %1244, %1245 : vector<16x16xf32>
    %1247 = arith.addf %1242, %1246 : vector<16x16xf32>
    %c1_401 = arith.constant 1 : index
    %c0_402 = arith.constant 0 : index
    %c2_403 = arith.constant 2 : index
    %1248 = vector.load %arg4[%c1_401, %c0_402, %c2_403] : memref<2x22x22xf32, #tpu.memory_space<vmem>>, vector<1x22x16xf32>
    %1249 = vector.shape_cast %1248 : vector<1x22x16xf32> to vector<22x16xf32>
    %c51_404 = arith.constant 51 : index
    %1250 = memref.load %arg2[%c51_404] : memref<98xf32, #tpu.memory_space<smem>>
    %1251 = vector.extract_strided_slice %1249 {offsets = [0, 0], sizes = [16, 16], strides = [1, 1]} : vector<22x16xf32> to vector<16x16xf32>
    %1252 = vector.broadcast %1250 : f32 to vector<16x16xf32>
    %1253 = arith.mulf %1251, %1252 : vector<16x16xf32>
    %1254 = arith.addf %1247, %1253 : vector<16x16xf32>
    %c58_405 = arith.constant 58 : index
    %1255 = memref.load %arg2[%c58_405] : memref<98xf32, #tpu.memory_space<smem>>
    %1256 = vector.extract_strided_slice %1249 {offsets = [1, 0], sizes = [16, 16], strides = [1, 1]} : vector<22x16xf32> to vector<16x16xf32>
    %1257 = vector.broadcast %1255 : f32 to vector<16x16xf32>
    %1258 = arith.mulf %1256, %1257 : vector<16x16xf32>
    %1259 = arith.addf %1254, %1258 : vector<16x16xf32>
    %c65_406 = arith.constant 65 : index
    %1260 = memref.load %arg2[%c65_406] : memref<98xf32, #tpu.memory_space<smem>>
    %1261 = vector.extract_strided_slice %1249 {offsets = [2, 0], sizes = [16, 16], strides = [1, 1]} : vector<22x16xf32> to vector<16x16xf32>
    %1262 = vector.broadcast %1260 : f32 to vector<16x16xf32>
    %1263 = arith.mulf %1261, %1262 : vector<16x16xf32>
    %1264 = arith.addf %1259, %1263 : vector<16x16xf32>
    %c72_407 = arith.constant 72 : index
    %1265 = memref.load %arg2[%c72_407] : memref<98xf32, #tpu.memory_space<smem>>
    %1266 = vector.extract_strided_slice %1249 {offsets = [3, 0], sizes = [16, 16], strides = [1, 1]} : vector<22x16xf32> to vector<16x16xf32>
    %1267 = vector.broadcast %1265 : f32 to vector<16x16xf32>
    %1268 = arith.mulf %1266, %1267 : vector<16x16xf32>
    %1269 = arith.addf %1264, %1268 : vector<16x16xf32>
    %c79_408 = arith.constant 79 : index
    %1270 = memref.load %arg2[%c79_408] : memref<98xf32, #tpu.memory_space<smem>>
    %1271 = vector.extract_strided_slice %1249 {offsets = [4, 0], sizes = [16, 16], strides = [1, 1]} : vector<22x16xf32> to vector<16x16xf32>
    %1272 = vector.broadcast %1270 : f32 to vector<16x16xf32>
    %1273 = arith.mulf %1271, %1272 : vector<16x16xf32>
    %1274 = arith.addf %1269, %1273 : vector<16x16xf32>
    %c86_409 = arith.constant 86 : index
    %1275 = memref.load %arg2[%c86_409] : memref<98xf32, #tpu.memory_space<smem>>
    %1276 = vector.extract_strided_slice %1249 {offsets = [5, 0], sizes = [16, 16], strides = [1, 1]} : vector<22x16xf32> to vector<16x16xf32>
    %1277 = vector.broadcast %1275 : f32 to vector<16x16xf32>
    %1278 = arith.mulf %1276, %1277 : vector<16x16xf32>
    %1279 = arith.addf %1274, %1278 : vector<16x16xf32>
    %c93_410 = arith.constant 93 : index
    %1280 = memref.load %arg2[%c93_410] : memref<98xf32, #tpu.memory_space<smem>>
    %1281 = vector.extract_strided_slice %1249 {offsets = [6, 0], sizes = [16, 16], strides = [1, 1]} : vector<22x16xf32> to vector<16x16xf32>
    %1282 = vector.broadcast %1280 : f32 to vector<16x16xf32>
    %1283 = arith.mulf %1281, %1282 : vector<16x16xf32>
    %1284 = arith.addf %1279, %1283 : vector<16x16xf32>
    %c1_411 = arith.constant 1 : index
    %c0_412 = arith.constant 0 : index
    %c3_413 = arith.constant 3 : index
    %1285 = vector.load %arg4[%c1_411, %c0_412, %c3_413] : memref<2x22x22xf32, #tpu.memory_space<vmem>>, vector<1x22x16xf32>
    %1286 = vector.shape_cast %1285 : vector<1x22x16xf32> to vector<22x16xf32>
    %c52_414 = arith.constant 52 : index
    %1287 = memref.load %arg2[%c52_414] : memref<98xf32, #tpu.memory_space<smem>>
    %1288 = vector.extract_strided_slice %1286 {offsets = [0, 0], sizes = [16, 16], strides = [1, 1]} : vector<22x16xf32> to vector<16x16xf32>
    %1289 = vector.broadcast %1287 : f32 to vector<16x16xf32>
    %1290 = arith.mulf %1288, %1289 : vector<16x16xf32>
    %1291 = arith.addf %1284, %1290 : vector<16x16xf32>
    %c59_415 = arith.constant 59 : index
    %1292 = memref.load %arg2[%c59_415] : memref<98xf32, #tpu.memory_space<smem>>
    %1293 = vector.extract_strided_slice %1286 {offsets = [1, 0], sizes = [16, 16], strides = [1, 1]} : vector<22x16xf32> to vector<16x16xf32>
    %1294 = vector.broadcast %1292 : f32 to vector<16x16xf32>
    %1295 = arith.mulf %1293, %1294 : vector<16x16xf32>
    %1296 = arith.addf %1291, %1295 : vector<16x16xf32>
    %c66_416 = arith.constant 66 : index
    %1297 = memref.load %arg2[%c66_416] : memref<98xf32, #tpu.memory_space<smem>>
    %1298 = vector.extract_strided_slice %1286 {offsets = [2, 0], sizes = [16, 16], strides = [1, 1]} : vector<22x16xf32> to vector<16x16xf32>
    %1299 = vector.broadcast %1297 : f32 to vector<16x16xf32>
    %1300 = arith.mulf %1298, %1299 : vector<16x16xf32>
    %1301 = arith.addf %1296, %1300 : vector<16x16xf32>
    %c73_417 = arith.constant 73 : index
    %1302 = memref.load %arg2[%c73_417] : memref<98xf32, #tpu.memory_space<smem>>
    %1303 = vector.extract_strided_slice %1286 {offsets = [3, 0], sizes = [16, 16], strides = [1, 1]} : vector<22x16xf32> to vector<16x16xf32>
    %1304 = vector.broadcast %1302 : f32 to vector<16x16xf32>
    %1305 = arith.mulf %1303, %1304 : vector<16x16xf32>
    %1306 = arith.addf %1301, %1305 : vector<16x16xf32>
    %c80_418 = arith.constant 80 : index
    %1307 = memref.load %arg2[%c80_418] : memref<98xf32, #tpu.memory_space<smem>>
    %1308 = vector.extract_strided_slice %1286 {offsets = [4, 0], sizes = [16, 16], strides = [1, 1]} : vector<22x16xf32> to vector<16x16xf32>
    %1309 = vector.broadcast %1307 : f32 to vector<16x16xf32>
    %1310 = arith.mulf %1308, %1309 : vector<16x16xf32>
    %1311 = arith.addf %1306, %1310 : vector<16x16xf32>
    %c87_419 = arith.constant 87 : index
    %1312 = memref.load %arg2[%c87_419] : memref<98xf32, #tpu.memory_space<smem>>
    %1313 = vector.extract_strided_slice %1286 {offsets = [5, 0], sizes = [16, 16], strides = [1, 1]} : vector<22x16xf32> to vector<16x16xf32>
    %1314 = vector.broadcast %1312 : f32 to vector<16x16xf32>
    %1315 = arith.mulf %1313, %1314 : vector<16x16xf32>
    %1316 = arith.addf %1311, %1315 : vector<16x16xf32>
    %c94_420 = arith.constant 94 : index
    %1317 = memref.load %arg2[%c94_420] : memref<98xf32, #tpu.memory_space<smem>>
    %1318 = vector.extract_strided_slice %1286 {offsets = [6, 0], sizes = [16, 16], strides = [1, 1]} : vector<22x16xf32> to vector<16x16xf32>
    %1319 = vector.broadcast %1317 : f32 to vector<16x16xf32>
    %1320 = arith.mulf %1318, %1319 : vector<16x16xf32>
    %1321 = arith.addf %1316, %1320 : vector<16x16xf32>
    %c1_421 = arith.constant 1 : index
    %c0_422 = arith.constant 0 : index
    %c4_423 = arith.constant 4 : index
    %1322 = vector.load %arg4[%c1_421, %c0_422, %c4_423] : memref<2x22x22xf32, #tpu.memory_space<vmem>>, vector<1x22x16xf32>
    %1323 = vector.shape_cast %1322 : vector<1x22x16xf32> to vector<22x16xf32>
    %c53_424 = arith.constant 53 : index
    %1324 = memref.load %arg2[%c53_424] : memref<98xf32, #tpu.memory_space<smem>>
    %1325 = vector.extract_strided_slice %1323 {offsets = [0, 0], sizes = [16, 16], strides = [1, 1]} : vector<22x16xf32> to vector<16x16xf32>
    %1326 = vector.broadcast %1324 : f32 to vector<16x16xf32>
    %1327 = arith.mulf %1325, %1326 : vector<16x16xf32>
    %1328 = arith.addf %1321, %1327 : vector<16x16xf32>
    %c60_425 = arith.constant 60 : index
    %1329 = memref.load %arg2[%c60_425] : memref<98xf32, #tpu.memory_space<smem>>
    %1330 = vector.extract_strided_slice %1323 {offsets = [1, 0], sizes = [16, 16], strides = [1, 1]} : vector<22x16xf32> to vector<16x16xf32>
    %1331 = vector.broadcast %1329 : f32 to vector<16x16xf32>
    %1332 = arith.mulf %1330, %1331 : vector<16x16xf32>
    %1333 = arith.addf %1328, %1332 : vector<16x16xf32>
    %c67_426 = arith.constant 67 : index
    %1334 = memref.load %arg2[%c67_426] : memref<98xf32, #tpu.memory_space<smem>>
    %1335 = vector.extract_strided_slice %1323 {offsets = [2, 0], sizes = [16, 16], strides = [1, 1]} : vector<22x16xf32> to vector<16x16xf32>
    %1336 = vector.broadcast %1334 : f32 to vector<16x16xf32>
    %1337 = arith.mulf %1335, %1336 : vector<16x16xf32>
    %1338 = arith.addf %1333, %1337 : vector<16x16xf32>
    %c74_427 = arith.constant 74 : index
    %1339 = memref.load %arg2[%c74_427] : memref<98xf32, #tpu.memory_space<smem>>
    %1340 = vector.extract_strided_slice %1323 {offsets = [3, 0], sizes = [16, 16], strides = [1, 1]} : vector<22x16xf32> to vector<16x16xf32>
    %1341 = vector.broadcast %1339 : f32 to vector<16x16xf32>
    %1342 = arith.mulf %1340, %1341 : vector<16x16xf32>
    %1343 = arith.addf %1338, %1342 : vector<16x16xf32>
    %c81_428 = arith.constant 81 : index
    %1344 = memref.load %arg2[%c81_428] : memref<98xf32, #tpu.memory_space<smem>>
    %1345 = vector.extract_strided_slice %1323 {offsets = [4, 0], sizes = [16, 16], strides = [1, 1]} : vector<22x16xf32> to vector<16x16xf32>
    %1346 = vector.broadcast %1344 : f32 to vector<16x16xf32>
    %1347 = arith.mulf %1345, %1346 : vector<16x16xf32>
    %1348 = arith.addf %1343, %1347 : vector<16x16xf32>
    %c88_429 = arith.constant 88 : index
    %1349 = memref.load %arg2[%c88_429] : memref<98xf32, #tpu.memory_space<smem>>
    %1350 = vector.extract_strided_slice %1323 {offsets = [5, 0], sizes = [16, 16], strides = [1, 1]} : vector<22x16xf32> to vector<16x16xf32>
    %1351 = vector.broadcast %1349 : f32 to vector<16x16xf32>
    %1352 = arith.mulf %1350, %1351 : vector<16x16xf32>
    %1353 = arith.addf %1348, %1352 : vector<16x16xf32>
    %c95_430 = arith.constant 95 : index
    %1354 = memref.load %arg2[%c95_430] : memref<98xf32, #tpu.memory_space<smem>>
    %1355 = vector.extract_strided_slice %1323 {offsets = [6, 0], sizes = [16, 16], strides = [1, 1]} : vector<22x16xf32> to vector<16x16xf32>
    %1356 = vector.broadcast %1354 : f32 to vector<16x16xf32>
    %1357 = arith.mulf %1355, %1356 : vector<16x16xf32>
    %1358 = arith.addf %1353, %1357 : vector<16x16xf32>
    %c1_431 = arith.constant 1 : index
    %c0_432 = arith.constant 0 : index
    %c5_433 = arith.constant 5 : index
    %1359 = vector.load %arg4[%c1_431, %c0_432, %c5_433] : memref<2x22x22xf32, #tpu.memory_space<vmem>>, vector<1x22x16xf32>
    %1360 = vector.shape_cast %1359 : vector<1x22x16xf32> to vector<22x16xf32>
    %c54_434 = arith.constant 54 : index
    %1361 = memref.load %arg2[%c54_434] : memref<98xf32, #tpu.memory_space<smem>>
    %1362 = vector.extract_strided_slice %1360 {offsets = [0, 0], sizes = [16, 16], strides = [1, 1]} : vector<22x16xf32> to vector<16x16xf32>
    %1363 = vector.broadcast %1361 : f32 to vector<16x16xf32>
    %1364 = arith.mulf %1362, %1363 : vector<16x16xf32>
    %1365 = arith.addf %1358, %1364 : vector<16x16xf32>
    %c61_435 = arith.constant 61 : index
    %1366 = memref.load %arg2[%c61_435] : memref<98xf32, #tpu.memory_space<smem>>
    %1367 = vector.extract_strided_slice %1360 {offsets = [1, 0], sizes = [16, 16], strides = [1, 1]} : vector<22x16xf32> to vector<16x16xf32>
    %1368 = vector.broadcast %1366 : f32 to vector<16x16xf32>
    %1369 = arith.mulf %1367, %1368 : vector<16x16xf32>
    %1370 = arith.addf %1365, %1369 : vector<16x16xf32>
    %c68_436 = arith.constant 68 : index
    %1371 = memref.load %arg2[%c68_436] : memref<98xf32, #tpu.memory_space<smem>>
    %1372 = vector.extract_strided_slice %1360 {offsets = [2, 0], sizes = [16, 16], strides = [1, 1]} : vector<22x16xf32> to vector<16x16xf32>
    %1373 = vector.broadcast %1371 : f32 to vector<16x16xf32>
    %1374 = arith.mulf %1372, %1373 : vector<16x16xf32>
    %1375 = arith.addf %1370, %1374 : vector<16x16xf32>
    %c75_437 = arith.constant 75 : index
    %1376 = memref.load %arg2[%c75_437] : memref<98xf32, #tpu.memory_space<smem>>
    %1377 = vector.extract_strided_slice %1360 {offsets = [3, 0], sizes = [16, 16], strides = [1, 1]} : vector<22x16xf32> to vector<16x16xf32>
    %1378 = vector.broadcast %1376 : f32 to vector<16x16xf32>
    %1379 = arith.mulf %1377, %1378 : vector<16x16xf32>
    %1380 = arith.addf %1375, %1379 : vector<16x16xf32>
    %c82_438 = arith.constant 82 : index
    %1381 = memref.load %arg2[%c82_438] : memref<98xf32, #tpu.memory_space<smem>>
    %1382 = vector.extract_strided_slice %1360 {offsets = [4, 0], sizes = [16, 16], strides = [1, 1]} : vector<22x16xf32> to vector<16x16xf32>
    %1383 = vector.broadcast %1381 : f32 to vector<16x16xf32>
    %1384 = arith.mulf %1382, %1383 : vector<16x16xf32>
    %1385 = arith.addf %1380, %1384 : vector<16x16xf32>
    %c89_439 = arith.constant 89 : index
    %1386 = memref.load %arg2[%c89_439] : memref<98xf32, #tpu.memory_space<smem>>
    %1387 = vector.extract_strided_slice %1360 {offsets = [5, 0], sizes = [16, 16], strides = [1, 1]} : vector<22x16xf32> to vector<16x16xf32>
    %1388 = vector.broadcast %1386 : f32 to vector<16x16xf32>
    %1389 = arith.mulf %1387, %1388 : vector<16x16xf32>
    %1390 = arith.addf %1385, %1389 : vector<16x16xf32>
    %c96_440 = arith.constant 96 : index
    %1391 = memref.load %arg2[%c96_440] : memref<98xf32, #tpu.memory_space<smem>>
    %1392 = vector.extract_strided_slice %1360 {offsets = [6, 0], sizes = [16, 16], strides = [1, 1]} : vector<22x16xf32> to vector<16x16xf32>
    %1393 = vector.broadcast %1391 : f32 to vector<16x16xf32>
    %1394 = arith.mulf %1392, %1393 : vector<16x16xf32>
    %1395 = arith.addf %1390, %1394 : vector<16x16xf32>
    %c1_441 = arith.constant 1 : index
    %c0_442 = arith.constant 0 : index
    %c6_443 = arith.constant 6 : index
    %1396 = vector.load %arg4[%c1_441, %c0_442, %c6_443] : memref<2x22x22xf32, #tpu.memory_space<vmem>>, vector<1x22x16xf32>
    %1397 = vector.shape_cast %1396 : vector<1x22x16xf32> to vector<22x16xf32>
    %c55_444 = arith.constant 55 : index
    %1398 = memref.load %arg2[%c55_444] : memref<98xf32, #tpu.memory_space<smem>>
    %1399 = vector.extract_strided_slice %1397 {offsets = [0, 0], sizes = [16, 16], strides = [1, 1]} : vector<22x16xf32> to vector<16x16xf32>
    %1400 = vector.broadcast %1398 : f32 to vector<16x16xf32>
    %1401 = arith.mulf %1399, %1400 : vector<16x16xf32>
    %1402 = arith.addf %1395, %1401 : vector<16x16xf32>
    %c62_445 = arith.constant 62 : index
    %1403 = memref.load %arg2[%c62_445] : memref<98xf32, #tpu.memory_space<smem>>
    %1404 = vector.extract_strided_slice %1397 {offsets = [1, 0], sizes = [16, 16], strides = [1, 1]} : vector<22x16xf32> to vector<16x16xf32>
    %1405 = vector.broadcast %1403 : f32 to vector<16x16xf32>
    %1406 = arith.mulf %1404, %1405 : vector<16x16xf32>
    %1407 = arith.addf %1402, %1406 : vector<16x16xf32>
    %c69_446 = arith.constant 69 : index
    %1408 = memref.load %arg2[%c69_446] : memref<98xf32, #tpu.memory_space<smem>>
    %1409 = vector.extract_strided_slice %1397 {offsets = [2, 0], sizes = [16, 16], strides = [1, 1]} : vector<22x16xf32> to vector<16x16xf32>
    %1410 = vector.broadcast %1408 : f32 to vector<16x16xf32>
    %1411 = arith.mulf %1409, %1410 : vector<16x16xf32>
    %1412 = arith.addf %1407, %1411 : vector<16x16xf32>
    %c76_447 = arith.constant 76 : index
    %1413 = memref.load %arg2[%c76_447] : memref<98xf32, #tpu.memory_space<smem>>
    %1414 = vector.extract_strided_slice %1397 {offsets = [3, 0], sizes = [16, 16], strides = [1, 1]} : vector<22x16xf32> to vector<16x16xf32>
    %1415 = vector.broadcast %1413 : f32 to vector<16x16xf32>
    %1416 = arith.mulf %1414, %1415 : vector<16x16xf32>
    %1417 = arith.addf %1412, %1416 : vector<16x16xf32>
    %c83_448 = arith.constant 83 : index
    %1418 = memref.load %arg2[%c83_448] : memref<98xf32, #tpu.memory_space<smem>>
    %1419 = vector.extract_strided_slice %1397 {offsets = [4, 0], sizes = [16, 16], strides = [1, 1]} : vector<22x16xf32> to vector<16x16xf32>
    %1420 = vector.broadcast %1418 : f32 to vector<16x16xf32>
    %1421 = arith.mulf %1419, %1420 : vector<16x16xf32>
    %1422 = arith.addf %1417, %1421 : vector<16x16xf32>
    %c90_449 = arith.constant 90 : index
    %1423 = memref.load %arg2[%c90_449] : memref<98xf32, #tpu.memory_space<smem>>
    %1424 = vector.extract_strided_slice %1397 {offsets = [5, 0], sizes = [16, 16], strides = [1, 1]} : vector<22x16xf32> to vector<16x16xf32>
    %1425 = vector.broadcast %1423 : f32 to vector<16x16xf32>
    %1426 = arith.mulf %1424, %1425 : vector<16x16xf32>
    %1427 = arith.addf %1422, %1426 : vector<16x16xf32>
    %c97_450 = arith.constant 97 : index
    %1428 = memref.load %arg2[%c97_450] : memref<98xf32, #tpu.memory_space<smem>>
    %1429 = vector.extract_strided_slice %1397 {offsets = [6, 0], sizes = [16, 16], strides = [1, 1]} : vector<22x16xf32> to vector<16x16xf32>
    %1430 = vector.broadcast %1428 : f32 to vector<16x16xf32>
    %1431 = arith.mulf %1429, %1430 : vector<16x16xf32>
    %1432 = arith.addf %1427, %1431 : vector<16x16xf32>
    %cst_451 = arith.constant 0.000000e+00 : f32
    %1433 = vector.broadcast %cst_451 : f32 to vector<16x16xf32>
    %1434 = arith.maximumf %1432, %1433 : vector<16x16xf32>
    %1435 = arith.negf %1434 : vector<16x16xf32>
    %1436 = math.exp %1435 : vector<16x16xf32>
    %cst_452 = arith.constant 1.000000e+00 : f32
    %1437 = vector.broadcast %cst_452 : f32 to vector<16x16xf32>
    %1438 = arith.addf %1437, %1436 : vector<16x16xf32>
    %1439 = arith.divf %1437, %1438 : vector<16x16xf32>
    %cst_453 = arith.constant 1.000000e+00 : f32
    %1440 = vector.broadcast %cst_453 : f32 to vector<16x16xf32>
    %1441 = arith.addf %1439, %1440 : vector<16x16xf32>
    %1442 = vector.extract_strided_slice %1441 {offsets = [0, 0], sizes = [1, 16], strides = [1, 1]} : vector<16x16xf32> to vector<1x16xf32>
    %1443 = vector.shape_cast %1442 : vector<1x16xf32> to vector<16xf32>
    %c0_454 = arith.constant 0 : index
    %c0_455 = arith.constant 0 : index
    %1444 = vector.load %arg5[%c0_454, %c0_455] : memref<1x256xf32, #tpu.memory_space<vmem>>, vector<1x16xf32>
    %1445 = vector.shape_cast %1444 : vector<1x16xf32> to vector<16xf32>
    %1446 = vector.shape_cast %1443 : vector<16xf32> to vector<1x16xf32>
    tpu.vector_store %arg5[%c0_454, %c0_455], %1446 {strides = array<i32>} : memref<1x256xf32, #tpu.memory_space<vmem>>, vector<1x16xf32>,
    %1447 = vector.extract_strided_slice %1441 {offsets = [1, 0], sizes = [1, 16], strides = [1, 1]} : vector<16x16xf32> to vector<1x16xf32>
    %1448 = vector.shape_cast %1447 : vector<1x16xf32> to vector<16xf32>
    %c0_456 = arith.constant 0 : index
    %c16_457 = arith.constant 16 : index
    %1449 = vector.load %arg5[%c0_456, %c16_457] : memref<1x256xf32, #tpu.memory_space<vmem>>, vector<1x16xf32>
    %1450 = vector.shape_cast %1449 : vector<1x16xf32> to vector<16xf32>
    %1451 = vector.shape_cast %1448 : vector<16xf32> to vector<1x16xf32>
    tpu.vector_store %arg5[%c0_456, %c16_457], %1451 {strides = array<i32>} : memref<1x256xf32, #tpu.memory_space<vmem>>, vector<1x16xf32>,
    %1452 = vector.extract_strided_slice %1441 {offsets = [2, 0], sizes = [1, 16], strides = [1, 1]} : vector<16x16xf32> to vector<1x16xf32>
    %1453 = vector.shape_cast %1452 : vector<1x16xf32> to vector<16xf32>
    %c0_458 = arith.constant 0 : index
    %c32_459 = arith.constant 32 : index
    %1454 = vector.load %arg5[%c0_458, %c32_459] : memref<1x256xf32, #tpu.memory_space<vmem>>, vector<1x16xf32>
    %1455 = vector.shape_cast %1454 : vector<1x16xf32> to vector<16xf32>
    %1456 = vector.shape_cast %1453 : vector<16xf32> to vector<1x16xf32>
    tpu.vector_store %arg5[%c0_458, %c32_459], %1456 {strides = array<i32>} : memref<1x256xf32, #tpu.memory_space<vmem>>, vector<1x16xf32>,
    %1457 = vector.extract_strided_slice %1441 {offsets = [3, 0], sizes = [1, 16], strides = [1, 1]} : vector<16x16xf32> to vector<1x16xf32>
    %1458 = vector.shape_cast %1457 : vector<1x16xf32> to vector<16xf32>
    %c0_460 = arith.constant 0 : index
    %c48_461 = arith.constant 48 : index
    %1459 = vector.load %arg5[%c0_460, %c48_461] : memref<1x256xf32, #tpu.memory_space<vmem>>, vector<1x16xf32>
    %1460 = vector.shape_cast %1459 : vector<1x16xf32> to vector<16xf32>
    %1461 = vector.shape_cast %1458 : vector<16xf32> to vector<1x16xf32>
    tpu.vector_store %arg5[%c0_460, %c48_461], %1461 {strides = array<i32>} : memref<1x256xf32, #tpu.memory_space<vmem>>, vector<1x16xf32>,
    %1462 = vector.extract_strided_slice %1441 {offsets = [4, 0], sizes = [1, 16], strides = [1, 1]} : vector<16x16xf32> to vector<1x16xf32>
    %1463 = vector.shape_cast %1462 : vector<1x16xf32> to vector<16xf32>
    %c0_462 = arith.constant 0 : index
    %c64_463 = arith.constant 64 : index
    %1464 = vector.load %arg5[%c0_462, %c64_463] : memref<1x256xf32, #tpu.memory_space<vmem>>, vector<1x16xf32>
    %1465 = vector.shape_cast %1464 : vector<1x16xf32> to vector<16xf32>
    %1466 = vector.shape_cast %1463 : vector<16xf32> to vector<1x16xf32>
    tpu.vector_store %arg5[%c0_462, %c64_463], %1466 {strides = array<i32>} : memref<1x256xf32, #tpu.memory_space<vmem>>, vector<1x16xf32>,
    %1467 = vector.extract_strided_slice %1441 {offsets = [5, 0], sizes = [1, 16], strides = [1, 1]} : vector<16x16xf32> to vector<1x16xf32>
    %1468 = vector.shape_cast %1467 : vector<1x16xf32> to vector<16xf32>
    %c0_464 = arith.constant 0 : index
    %c80_465 = arith.constant 80 : index
    %1469 = vector.load %arg5[%c0_464, %c80_465] : memref<1x256xf32, #tpu.memory_space<vmem>>, vector<1x16xf32>
    %1470 = vector.shape_cast %1469 : vector<1x16xf32> to vector<16xf32>
    %1471 = vector.shape_cast %1468 : vector<16xf32> to vector<1x16xf32>
    tpu.vector_store %arg5[%c0_464, %c80_465], %1471 {strides = array<i32>} : memref<1x256xf32, #tpu.memory_space<vmem>>, vector<1x16xf32>,
    %1472 = vector.extract_strided_slice %1441 {offsets = [6, 0], sizes = [1, 16], strides = [1, 1]} : vector<16x16xf32> to vector<1x16xf32>
    %1473 = vector.shape_cast %1472 : vector<1x16xf32> to vector<16xf32>
    %c0_466 = arith.constant 0 : index
    %c96_467 = arith.constant 96 : index
    %1474 = vector.load %arg5[%c0_466, %c96_467] : memref<1x256xf32, #tpu.memory_space<vmem>>, vector<1x16xf32>
    %1475 = vector.shape_cast %1474 : vector<1x16xf32> to vector<16xf32>
    %1476 = vector.shape_cast %1473 : vector<16xf32> to vector<1x16xf32>
    tpu.vector_store %arg5[%c0_466, %c96_467], %1476 {strides = array<i32>} : memref<1x256xf32, #tpu.memory_space<vmem>>, vector<1x16xf32>,
    %1477 = vector.extract_strided_slice %1441 {offsets = [7, 0], sizes = [1, 16], strides = [1, 1]} : vector<16x16xf32> to vector<1x16xf32>
    %1478 = vector.shape_cast %1477 : vector<1x16xf32> to vector<16xf32>
    %c0_468 = arith.constant 0 : index
    %c112_469 = arith.constant 112 : index
    %1479 = vector.load %arg5[%c0_468, %c112_469] : memref<1x256xf32, #tpu.memory_space<vmem>>, vector<1x16xf32>
    %1480 = vector.shape_cast %1479 : vector<1x16xf32> to vector<16xf32>
    %1481 = vector.shape_cast %1478 : vector<16xf32> to vector<1x16xf32>
    tpu.vector_store %arg5[%c0_468, %c112_469], %1481 {strides = array<i32>} : memref<1x256xf32, #tpu.memory_space<vmem>>, vector<1x16xf32>,
    %1482 = vector.extract_strided_slice %1441 {offsets = [8, 0], sizes = [1, 16], strides = [1, 1]} : vector<16x16xf32> to vector<1x16xf32>
    %1483 = vector.shape_cast %1482 : vector<1x16xf32> to vector<16xf32>
    %c0_470 = arith.constant 0 : index
    %c128_471 = arith.constant 128 : index
    %1484 = vector.load %arg5[%c0_470, %c128_471] : memref<1x256xf32, #tpu.memory_space<vmem>>, vector<1x16xf32>
    %1485 = vector.shape_cast %1484 : vector<1x16xf32> to vector<16xf32>
    %1486 = vector.shape_cast %1483 : vector<16xf32> to vector<1x16xf32>
    tpu.vector_store %arg5[%c0_470, %c128_471], %1486 {strides = array<i32>} : memref<1x256xf32, #tpu.memory_space<vmem>>, vector<1x16xf32>,
    %1487 = vector.extract_strided_slice %1441 {offsets = [9, 0], sizes = [1, 16], strides = [1, 1]} : vector<16x16xf32> to vector<1x16xf32>
    %1488 = vector.shape_cast %1487 : vector<1x16xf32> to vector<16xf32>
    %c0_472 = arith.constant 0 : index
    %c144_473 = arith.constant 144 : index
    %1489 = vector.load %arg5[%c0_472, %c144_473] : memref<1x256xf32, #tpu.memory_space<vmem>>, vector<1x16xf32>
    %1490 = vector.shape_cast %1489 : vector<1x16xf32> to vector<16xf32>
    %1491 = vector.shape_cast %1488 : vector<16xf32> to vector<1x16xf32>
    tpu.vector_store %arg5[%c0_472, %c144_473], %1491 {strides = array<i32>} : memref<1x256xf32, #tpu.memory_space<vmem>>, vector<1x16xf32>,
    %1492 = vector.extract_strided_slice %1441 {offsets = [10, 0], sizes = [1, 16], strides = [1, 1]} : vector<16x16xf32> to vector<1x16xf32>
    %1493 = vector.shape_cast %1492 : vector<1x16xf32> to vector<16xf32>
    %c0_474 = arith.constant 0 : index
    %c160_475 = arith.constant 160 : index
    %1494 = vector.load %arg5[%c0_474, %c160_475] : memref<1x256xf32, #tpu.memory_space<vmem>>, vector<1x16xf32>
    %1495 = vector.shape_cast %1494 : vector<1x16xf32> to vector<16xf32>
    %1496 = vector.shape_cast %1493 : vector<16xf32> to vector<1x16xf32>
    tpu.vector_store %arg5[%c0_474, %c160_475], %1496 {strides = array<i32>} : memref<1x256xf32, #tpu.memory_space<vmem>>, vector<1x16xf32>,
    %1497 = vector.extract_strided_slice %1441 {offsets = [11, 0], sizes = [1, 16], strides = [1, 1]} : vector<16x16xf32> to vector<1x16xf32>
    %1498 = vector.shape_cast %1497 : vector<1x16xf32> to vector<16xf32>
    %c0_476 = arith.constant 0 : index
    %c176_477 = arith.constant 176 : index
    %1499 = vector.load %arg5[%c0_476, %c176_477] : memref<1x256xf32, #tpu.memory_space<vmem>>, vector<1x16xf32>
    %1500 = vector.shape_cast %1499 : vector<1x16xf32> to vector<16xf32>
    %1501 = vector.shape_cast %1498 : vector<16xf32> to vector<1x16xf32>
    tpu.vector_store %arg5[%c0_476, %c176_477], %1501 {strides = array<i32>} : memref<1x256xf32, #tpu.memory_space<vmem>>, vector<1x16xf32>,
    %1502 = vector.extract_strided_slice %1441 {offsets = [12, 0], sizes = [1, 16], strides = [1, 1]} : vector<16x16xf32> to vector<1x16xf32>
    %1503 = vector.shape_cast %1502 : vector<1x16xf32> to vector<16xf32>
    %c0_478 = arith.constant 0 : index
    %c192_479 = arith.constant 192 : index
    %1504 = vector.load %arg5[%c0_478, %c192_479] : memref<1x256xf32, #tpu.memory_space<vmem>>, vector<1x16xf32>
    %1505 = vector.shape_cast %1504 : vector<1x16xf32> to vector<16xf32>
    %1506 = vector.shape_cast %1503 : vector<16xf32> to vector<1x16xf32>
    tpu.vector_store %arg5[%c0_478, %c192_479], %1506 {strides = array<i32>} : memref<1x256xf32, #tpu.memory_space<vmem>>, vector<1x16xf32>,
    %1507 = vector.extract_strided_slice %1441 {offsets = [13, 0], sizes = [1, 16], strides = [1, 1]} : vector<16x16xf32> to vector<1x16xf32>
    %1508 = vector.shape_cast %1507 : vector<1x16xf32> to vector<16xf32>
    %c0_480 = arith.constant 0 : index
    %c208_481 = arith.constant 208 : index
    %1509 = vector.load %arg5[%c0_480, %c208_481] : memref<1x256xf32, #tpu.memory_space<vmem>>, vector<1x16xf32>
    %1510 = vector.shape_cast %1509 : vector<1x16xf32> to vector<16xf32>
    %1511 = vector.shape_cast %1508 : vector<16xf32> to vector<1x16xf32>
    tpu.vector_store %arg5[%c0_480, %c208_481], %1511 {strides = array<i32>} : memref<1x256xf32, #tpu.memory_space<vmem>>, vector<1x16xf32>,
    %1512 = vector.extract_strided_slice %1441 {offsets = [14, 0], sizes = [1, 16], strides = [1, 1]} : vector<16x16xf32> to vector<1x16xf32>
    %1513 = vector.shape_cast %1512 : vector<1x16xf32> to vector<16xf32>
    %c0_482 = arith.constant 0 : index
    %c224_483 = arith.constant 224 : index
    %1514 = vector.load %arg5[%c0_482, %c224_483] : memref<1x256xf32, #tpu.memory_space<vmem>>, vector<1x16xf32>
    %1515 = vector.shape_cast %1514 : vector<1x16xf32> to vector<16xf32>
    %1516 = vector.shape_cast %1513 : vector<16xf32> to vector<1x16xf32>
    tpu.vector_store %arg5[%c0_482, %c224_483], %1516 {strides = array<i32>} : memref<1x256xf32, #tpu.memory_space<vmem>>, vector<1x16xf32>,
    %1517 = vector.extract_strided_slice %1441 {offsets = [15, 0], sizes = [1, 16], strides = [1, 1]} : vector<16x16xf32> to vector<1x16xf32>
    %1518 = vector.shape_cast %1517 : vector<1x16xf32> to vector<16xf32>
    %c0_484 = arith.constant 0 : index
    %c240_485 = arith.constant 240 : index
    %1519 = vector.load %arg5[%c0_484, %c240_485] : memref<1x256xf32, #tpu.memory_space<vmem>>, vector<1x16xf32>
    %1520 = vector.shape_cast %1519 : vector<1x16xf32> to vector<16xf32>
    %1521 = vector.shape_cast %1518 : vector<16xf32> to vector<1x16xf32>
    tpu.vector_store %arg5[%c0_484, %c240_485], %1521 {strides = array<i32>} : memref<1x256xf32, #tpu.memory_space<vmem>>, vector<1x16xf32>,
    %c0_486 = arith.constant 0 : index
    %c0_487 = arith.constant 0 : index
    %1522 = vector.load %arg5[%c0_486, %c0_487] : memref<1x256xf32, #tpu.memory_space<vmem>>, vector<1x256xf32>
    %1523 = vector.shape_cast %1522 : vector<1x256xf32> to vector<256xf32>
    %c1_488 = arith.constant 1 : index
    %c0_489 = arith.constant 0 : index
    %c0_490 = arith.constant 0 : index
    %1524 = vector.load %arg1[%c1_488, %c0_489, %c0_490] : memref<2x4x256xf32, #tpu.memory_space<vmem>>, vector<1x4x256xf32>
    %1525 = vector.shape_cast %1524 : vector<1x4x256xf32> to vector<4x256xf32>
    %1526 = vector.shape_cast %1523 : vector<256xf32> to vector<1x256xf32>
    %1527 = vector.broadcast %1526 : vector<1x256xf32> to vector<4x256xf32>
    %1528 = arith.mulf %1525, %1527 : vector<4x256xf32>
    %c1_491 = arith.constant 1 : index
    %c0_492 = arith.constant 0 : index
    %c0_493 = arith.constant 0 : index
    %1529 = vector.load %arg3[%c1_491, %c0_492, %c0_493] : memref<2x4x256xf32, #tpu.memory_space<vmem>>, vector<1x4x256xf32>
    %1530 = vector.shape_cast %1529 : vector<1x4x256xf32> to vector<4x256xf32>
    %1531 = vector.shape_cast %1528 : vector<4x256xf32> to vector<1x4x256xf32>
    tpu.vector_store %arg3[%c1_491, %c0_492, %c0_493], %1531 {strides = array<i32>} : memref<2x4x256xf32, #tpu.memory_space<vmem>>, vector<1x4x256xf32>,
    return
  }
  func.func @transform_0(%arg0: i32) -> (i32, i32, i32) {
    %c0_i32 = arith.constant 0 : i32
    %c0_i32_0 = arith.constant 0 : i32
    %c0_i32_1 = arith.constant 0 : i32
    return %arg0, %c0_i32, %c0_i32_0 : i32, i32, i32
  }
  func.func @transform_1(%arg0: i32) -> i32 {
    %c0_i32 = arith.constant 0 : i32
    %c0_i32_0 = arith.constant 0 : i32
    return %c0_i32 : i32
  }
  func.func @transform_2(%arg0: i32) -> (i32, i32, i32) {
    %c0_i32 = arith.constant 0 : i32
    %c0_i32_0 = arith.constant 0 : i32
    %c0_i32_1 = arith.constant 0 : i32
    return %arg0, %c0_i32, %c0_i32_0 : i32, i32, i32
  }
}

</mosaic_0001>

<bundles_post_ra>
// kernel: tpu_custom_call.1
= control target key start
LH: loop header
LB: loop body
LE: loop exit
PB: predicated region body
PF: predicated region fallthrough
CT: control target
= control target key end

     0   :  { %7 = vsyncpa [#allocation5], 0  ;;  %s8844_s0 = inlined_call_operand.hbm [shape: f32[2,4,256], index: 0, kind: input, shape index: {}]   ;;  %s8845_s1 = inlined_call_operand.hbm [shape: f32[98], index: 1, kind: input, shape index: {}]   ;;  %s8846_s2 = inlined_call_operand.hbm [shape: f32[2,4,256], index: 2, kind: output, shape index: {}]  }
   0x1   :  { %8 = vsyncpa [#allocation7], 0 }
   0x2   :  { %9 = vsyncpa [#allocation6], 0  ;;  %s14_s11 = sshll.u32 %s8844_s0, 4  ;;  %s4962_s12 = smov [#allocation4]   ;;  %s15_s11 = int_to_ptr.hbm [resolvable:$true] %s14_s11 }
   0x3   :  { %s16_s13 = sshll.u32 %s4962_s12, 4  ;;  %s28_s16 = sshll.u32 %s8845_s1, 4  ;;  %s17_s13 = int_to_ptr.vmem [resolvable:$true] %s16_s13  ;;  %s29_s16 = int_to_ptr.hbm [resolvable:$true] %s28_s16 }
   0x4   :  { %s8847_s17 = smov 128   ;;  %s8851_s18 = smov 8  }
   0x5   :  { %22 = dma.hbm_to_vmem [thread:$0]  %s15_s11, 256, %s17_s13, [#allocation5], %s8847_s17, %s8847_s17, %s8851_s18  }
   0x6   :  { %s4965_s19 = smov [#allocation8]  }
   0x7   :  { %31 = dma.hbm_to_smem %s29_s16, 16, %s4965_s19, [#allocation7]  }
   0x8   :  { %4956 = dma.done.wait [#allocation5], 256  }
   0x9   :  { %4957 = vsyncadd [#allocation5], 4294967040 }
   0xa   :  { %4958 = dma.done.wait [#allocation7], 16  }
   0xb   :  { %4959 = vsyncadd [#allocation7], 4294967280 }
   0xc   :  { %40 = sfence }
   0xd   :  { %v62_v0 = vld [vmem:[#allocation4] ss:$4 sm:$0x3]  ;;  %v64_v1 = vld [vmem:[#allocation4 + $0x1] ss:$4 sm:$0x3] }
   0xe   :  { %v66_v2 = vmax.f32 %v62_v0, %v64_v1  ;;  %v68_v3 = vld [vmem:[#allocation4 + $0x2] ss:$4 sm:$0x3]  ;;  %v65_v4 = vadd.f32 %v64_v1, %v62_v0  ;;  %v72_v5 = vld [vmem:[#allocation4 + $0x3] ss:$4 sm:$0x3] }
   0xf   :  { %s4966_s0 = smov 99   ;;  %s4967_s1 = smov 115   ;;  %vm41_vm0 = vcmask 174080   ;;  %vm46_vm1 = vcmask 23552   ;;  %vm54_vm2 = vcmask 179352   ;;  %v4977_v17 = vmov 0.0  }
  0x10   :  { %v70_v6 = vmax.f32 %v66_v2, %v68_v3  ;;  %v69_v7 = vadd.f32 %v68_v3, %v65_v4  ;;  %s4968_s20 = smov 3   ;;  %s4969_s21 = smov 67   ;;  %43 = vst.msk [vmem:[#allocation2 + $0x18] sm:$0x7] %vm41_vm0, %v4977_v17  ;;  %vm81_vm3 = vcmask 147480   ;;  %vm49_vm4 = vcmask 21504  }
  0x11   :  { %s4970_s22 = smov 83   ;;  %s4971_s23 = smov 51   ;;  %51 = vst.msk [vmem:[#allocation2 + $0x18] sm:$0xff] %vm46_vm1, %v4977_v17  ;;  %vm57_vm5 = vcmask 177304   ;;  %vm287_vm6 = vcmask 1046528   ;;  %vm8850_vm7 = vcmask 1045504  }
  0x12   :  { %v5013_v8 = vmax.f32 %v70_v6, %v72_v5  ;;  %v73_v9 = vadd.f32 %v72_v5, %v69_v7  ;;  %s4972_s24 = smov 19   ;;  %s4973_s25 = smov 35   ;;  %59 = vst.msk [vmem:[#allocation2 + $0x18] sm:$0xff] %vm54_vm2, %v4977_v17  ;;  %vm323_vm8 = vcmask 1044480   ;;  %vm341_vm9 = vcmask 1043456  }
  0x13   :  { %s8852_s26 = smov 112   ;;  %s8854_s27 = smov 96   ;;  %42 = vst.msk [vmem:[#allocation2] sm:$0x7] %vm41_vm0, %v4977_v17  ;;  %vm359_vm10 = vcmask 1042432   ;;  %vm377_vm11 = vcmask 1041408  }
  0x14   :  { %v84_v10 = vperm.slane %v5013_v8, 0  ;;  %v5018_v11 = vmul.f32 0.25, %v73_v9  ;;  %v152_v13 = vrot.slane %v5013_v8, 1  ;;  %s8856_s28 = smov 80   ;;  %44 = vst.msk [vmem:[#allocation2 + $0x13] sm:$0x7] %vm41_vm0, %v4977_v17 }
  0x15   :  { %s4978_s29 = smov 64   ;;  %s4979_s30 = smov 48   ;;  %45 = vst.msk [vmem:[#allocation2 + $0x2b] sm:$0x7] %vm41_vm0, %v4977_v17 }
  0x16   :  { %102 = vrot.lane.b32.xlu2 %v84_v10, %s4966_s0  ;;  %94 = vrot.lane.b32.xlu1 %v84_v10, %s4967_s1  ;;  %v77_v12 = vperm.slane %v5018_v11, 0  ;;  %v146_v14 = vrot.slane %v5018_v11, 1  ;;  %v153_v15 = vperm.slane %v152_v13, 0  ;;  %48 = vst.msk [vmem:[#allocation2 + $0x8] sm:$0xff] %vm46_vm1, %v4977_v17  ;;  %s4980_s3 = smov 32   ;;  %s4981_s4 = smov 16  }
  0x17   :  { %85 = vrot.lane.b32.xlu0 %v84_v10, %s4968_s20  ;;  %52 = vst.msk [vmem:[#allocation2 + $0x20] sm:$0xff] %vm46_vm1, %v4977_v17  ;;  %s5111_s5 = sld [smem:[#allocation8 + $0x2]]  ;;  %s4982_s6 = smov 126  }
  0x18   :  { %v147_v16 = vperm.slane %v146_v14, 0  ;;  %47 = vst.msk [vmem:[#allocation2] sm:$0xff] %vm46_vm1, %v4977_v17  ;;  %s5125_s7 = sld [smem:[#allocation8 + $0x3]]  ;;  %s4983_s9 = smov 125  }
  0x19   :  { %56 = vst.msk [vmem:[#allocation2 + $0x8] sm:$0xff] %vm54_vm2, %v4977_v17  ;;  %s5130_s8 = sld [smem:[#allocation8 + $0x1]]  ;;  %s4984_s11 = smov 127  }
  0x1a   :  { %60 = vst.msk [vmem:[#allocation2 + $0x20] sm:$0xff] %vm54_vm2, %v4977_v17  ;;  %s5136_s10 = sld [smem:[#allocation8 + $0x4]]  ;;  %s4985_s12 = smov 124  }
  0x1b   :  { %55 = vst.msk [vmem:[#allocation2] sm:$0xff] %vm54_vm2, %v4977_v17  ;;  %s4651_s13 = sld [smem:[#allocation8 + $0x8]] }
  0x1c   :  { %53 = vst.msk [vmem:[#allocation2 + $0x28] sm:$0x3f] %vm49_vm4, %v4977_v17  ;;  %s4652_s14 = sld [smem:[#allocation8 + $0xf]] }
  0x1d   :  { %v528_v6 = vstv %s5111_s5  ;;  %61 = vst.msk [vmem:[#allocation2 + $0x28] sm:$0x3f] %vm57_vm5, %v4977_v17  ;;  %s4653_s15 = sld [smem:[#allocation8 + $0x16]] }
  0x1e   :  { %98 = vrot.lane.b32.xlu2 %v77_v12, %s4966_s0  ;;  %90 = vrot.lane.b32.xlu1 %v77_v12, %s4967_s1  ;;  %50 = vst.msk [vmem:[#allocation2 + $0x10] sm:$0x3f] %vm49_vm4, %v4977_v17  ;;  %s4654_s16 = sld [smem:[#allocation8 + $0x1d]] }
  0x1f   :  { %78 = vrot.lane.b32.xlu0 %v77_v12, %s4968_s20  ;;  %58 = vst.msk [vmem:[#allocation2 + $0x10] sm:$0x3f] %vm57_vm5, %v4977_v17  ;;  %s4655_s19 = sld [smem:[#allocation8 + $0x24]] }
  0x20   :  { %s4656_s5 = sld [smem:[#allocation8 + $0x2b]] }
  0x21   :  { %s5620_s17 = sld [smem:[#allocation8 + $0x48]] }
  0x22   :  { %s6688_s18 = sld [smem:[#allocation8 + $0x26]] }
  0x26   :  { %114 = vrot.lane.b32.xlu2 %v77_v12, %s4969_s21  ;;  %110 = vrot.lane.b32.xlu1 %v84_v10, %s4970_s22 }
  0x27   :  { %106 = vrot.lane.b32.xlu0 %v77_v12, %s4970_s22 }
  0x2e   :  { %126 = vrot.lane.b32.xlu2 %v84_v10, %s4971_s23  ;;  %122 = vrot.lane.b32.xlu1 %v77_v12, %s4971_s23 }
  0x2f   :  { %118 = vrot.lane.b32.xlu0 %v84_v10, %s4969_s21 }
  0x36   :  { %138 = vrot.lane.b32.xlu2 %v77_v12, %s4972_s24  ;;  %134 = vrot.lane.b32.xlu1 %v84_v10, %s4973_s25 }
  0x37   :  { %130 = vrot.lane.b32.xlu0 %v77_v12, %s4973_s25 }
  0x3e   :  { %154 = vrot.lane.b32.xlu2 %v153_v15, %s4968_s20  ;;  %148 = vrot.lane.b32.xlu1 %v147_v16, %s4968_s20  ;;  %v668_v16 = vstv %s5125_s7  ;;  %s4658_s7 = sld [smem:[#allocation8 + $0x9]] }
  0x3f   :  { %142 = vrot.lane.b32.xlu0 %v84_v10, %s4972_s24 }
  0x46   :  { %166 = vrot.lane.b32.xlu2 %v5013_v8, %s8852_s26  ;;  %174 = vrot.lane.b32.xlu1 %v5018_v11, %s8854_s27 }
  0x47   :  { %158 = vrot.lane.b32.xlu0 %v5018_v11, %s8852_s26 }
  0x4e   :  { %190 = vrot.lane.b32.xlu2 %v5018_v11, %s8856_s28  ;;  %198 = vrot.lane.b32.xlu1 %v5013_v8, %s8856_s28 }
  0x4f   :  { %182 = vrot.lane.b32.xlu0 %v5013_v8, %s8854_s27 }
  0x56   :  { %214 = vrot.lane.b32.xlu2 %v5013_v8, %s4978_s29  ;;  %222 = vrot.lane.b32.xlu1 %v5018_v11, %s4979_s30 }
  0x57   :  { %206 = vrot.lane.b32.xlu0 %v5018_v11, %s4978_s29 }
  0x5e   :  { %238 = vrot.lane.b32.xlu2 %v5018_v11, %s4980_s3  ;;  %246 = vrot.lane.b32.xlu1 %v5013_v8, %s4980_s3 }
  0x5f   :  { %230 = vrot.lane.b32.xlu0 %v5013_v8, %s4979_s30 }
  0x66   :  { %262 = vrot.lane.b32.xlu2 %v5013_v8, %s4981_s4 }
  0x67   :  { %254 = vrot.lane.b32.xlu0 %v5018_v11, %s4981_s4 }
  0x70   :  { %v103_v18 = vpop.permute.xlu2 %102 }
  0x71   :  { %105 = vst.msk [vmem:[#allocation2 + $0x1d] sm:$0x1] %vm81_vm3, %v103_v18 }
  0x78   :  { %v99_v19 = vpop.permute.xlu2 %98 }
  0x79   :  { %101 = vst.msk [vmem:[#allocation2 + $0x5] sm:$0x1] %vm81_vm3, %v99_v19 }
  0x80   :  { %v115_v20 = vpop.permute.xlu2 %114 }
  0x81   :  { %117 = vst.msk [vmem:[#allocation2 + $0x7] sm:$0x1] %vm81_vm3, %v115_v20  ;;  %v388_v20 = vstv %s5130_s8  ;;  %s4659_s8 = sld [smem:[#allocation8 + $0x10]] }
  0x88   :  { %v95_v21 = vpop.permute.xlu1 %94  ;;  %v127_v22 = vpop.permute.xlu2 %126 }
  0x89   :  { %97 = vst.msk [vmem:[#allocation2 + $0x1c] sm:$0x1] %vm81_vm3, %v95_v21  ;;  %v86_v23 = vpop.permute.xlu0 %85 }
  0x8a   :  { %89 = vst.msk [vmem:[#allocation2 + $0x1b] sm:$0x1] %vm81_vm3, %v86_v23 }
  0x8b   :  { %129 = vst.msk [vmem:[#allocation2 + $0x20] sm:$0x1] %vm81_vm3, %v127_v22  ;;  %v808_v22 = vstv %s5136_s10  ;;  %s4660_s10 = sld [smem:[#allocation8 + $0x17]] }
  0x90   :  { %v139_v24 = vpop.permute.xlu2 %138  ;;  %v91_v25 = vpop.permute.xlu1 %90 }
  0x91   :  { %141 = vst.msk [vmem:[#allocation2 + $0xa] sm:$0x1] %vm81_vm3, %v139_v24  ;;  %v79_v26 = vpop.permute.xlu0 %78 }
  0x92   :  { %93 = vst.msk [vmem:[#allocation2 + $0x4] sm:$0x1] %vm81_vm3, %v91_v25 }
  0x93   :  { %82 = vst.msk [vmem:[#allocation2 + $0x3] sm:$0x1] %vm81_vm3, %v79_v26 }
  0x98   :  { %v155_v27 = vpop.permute.xlu2 %154  ;;  %v111_v28 = vpop.permute.xlu1 %110 }
  0x99   :  { %157 = vst.msk [vmem:[#allocation2 + $0x23] sm:$0x1] %vm81_vm3, %v155_v27  ;;  %v107_v29 = vpop.permute.xlu0 %106 }
  0x9a   :  { %113 = vst.msk [vmem:[#allocation2 + $0x1e] sm:$0x1] %vm81_vm3, %v111_v28 }
  0x9b   :  { %109 = vst.msk [vmem:[#allocation2 + $0x6] sm:$0x1] %vm81_vm3, %v107_v29 }
  0xa0   :  { %v167_v30 = vpop.permute.xlu2 %166  ;;  %v123_v31 = vpop.permute.xlu1 %122 }
  0xa1   :  { %v168_v32 = vrot.slane %v167_v30, 1  ;;  %125 = vst.msk [vmem:[#allocation2 + $0x8] sm:$0x1] %vm81_vm3, %v123_v31  ;;  %v119_v33 = vpop.permute.xlu0 %118 }
  0xa2   :  { %121 = vst.msk [vmem:[#allocation2 + $0x1f] sm:$0x1] %vm81_vm3, %v119_v33  ;;  %v5116_v4 = vld [vmem:[#allocation2] sm:$0xff] }
  0xa3   :  { %v169_v34 = vperm.slane %v168_v32, 0  ;;  %v529_v8 = vmul.f32 %v528_v6, %v5116_v4  ;;  %v669_v19 = vmul.f32 %v668_v16, %v5116_v4  ;;  %v389_v21 = vmul.f32 %v388_v20, %v5116_v4 }
  0xa4   :  { %v809_v23 = vmul.f32 %v808_v22, %v5116_v4 }
  0xa5   :  { %170 = vrot.lane.b32.xlu0 %v169_v34, %s4968_s20 }
  0xa8   :  { %v191_v35 = vpop.permute.xlu2 %190  ;;  %v135_v36 = vpop.permute.xlu1 %134 }
  0xa9   :  { %137 = vst.msk [vmem:[#allocation2 + $0x21] sm:$0x1] %vm81_vm3, %v135_v36  ;;  %v131_v37 = vpop.permute.xlu0 %130  ;;  %v192_v55 = vrot.slane %v191_v35, 1 }
  0xaa   :  { %133 = vst.msk [vmem:[#allocation2 + $0x9] sm:$0x1] %vm81_vm3, %v131_v37 }
  0xab   :  { %v193_v58 = vperm.slane %v192_v55, 0  ;;  %v444_v55 = vstv %s4653_s15  ;;  %s4663_s15 = sld [smem:[#allocation8 + $0x2c]] }
  0xb0   :  { %v215_v38 = vpop.permute.xlu2 %214  ;;  %v149_v39 = vpop.permute.xlu1 %148 }
  0xb1   :  { %v216_v40 = vrot.slane %v215_v38, 1  ;;  %151 = vst.msk [vmem:[#allocation2 + $0xb] sm:$0x1] %vm81_vm3, %v149_v39  ;;  %v143_v41 = vpop.permute.xlu0 %142 }
  0xb2   :  { %145 = vst.msk [vmem:[#allocation2 + $0x22] sm:$0x1] %vm81_vm3, %v143_v41  ;;  %v402_v41 = vstv %s4651_s13  ;;  %s4661_s13 = sld [smem:[#allocation8 + $0x1e]] }
  0xb3   :  { %v217_v42 = vperm.slane %v216_v40, 0 }
  0xb5   :  { %218 = vrot.lane.b32.xlu0 %v217_v42, %s4968_s20 }
  0xb8   :  { %v239_v43 = vpop.permute.xlu2 %238  ;;  %v175_v44 = vpop.permute.xlu1 %174 }
  0xb9   :  { %v159_v45 = vpop.permute.xlu0 %158  ;;  %v240_v59 = vrot.slane %v239_v43, 1  ;;  %v176_v3 = vrot.slane %v175_v44, 1  ;;  %v403_v43 = vmul.f32 %v402_v41, %v5116_v4 }
  0xba   :  { %v160_v5 = vrot.slane %v159_v45, 1 }
  0xbb   :  { %v241_v61 = vperm.slane %v240_v59, 0  ;;  %v177_v7 = vperm.slane %v176_v3, 0 }
  0xbc   :  { %v161_v9 = vperm.slane %v160_v5, 0 }
  0xc0   :  { %v263_v46 = vpop.permute.xlu2 %262  ;;  %v199_v47 = vpop.permute.xlu1 %198 }
  0xc1   :  { %v264_v48 = vrot.slane %v263_v46, 1  ;;  %v200_v49 = vrot.slane %v199_v47, 1  ;;  %v183_v50 = vpop.permute.xlu0 %182  ;;  %v409_v46 = vrot.slane %v403_v43, 1  ;;  %v584_v43 = vstv %s4660_s10  ;;  %s4670_s10 = sld [smem:[#allocation8 + $0x2d]] }
  0xc2   :  { %v184_v51 = vrot.slane %v183_v50, 1 }
  0xc3   :  { %v265_v52 = vperm.slane %v264_v48, 0  ;;  %v201_v53 = vperm.slane %v200_v49, 0  ;;  %v423_v49 = vstv %s4652_s14  ;;  %s4662_s14 = sld [smem:[#allocation8 + $0x25]] }
  0xc4   :  { %v185_v54 = vperm.slane %v184_v51, 0 }
  0xc5   :  { %266 = vrot.lane.b32.xlu0 %v265_v52, %s4968_s20  ;;  %202 = vrot.lane.b32.xlu2 %v201_v53, %s4968_s20 }
  0xc6   :  { %186 = vrot.lane.b32.xlu1 %v185_v54, %s4968_s20  ;;  %v424_v54 = vmul.f32 %v423_v49, %v5116_v4 }
  0xc8   :  { %v223_v56 = vpop.permute.xlu1 %222 }
  0xc9   :  { %v207_v57 = vpop.permute.xlu0 %206  ;;  %v224_v10 = vrot.slane %v223_v56, 1 }
  0xca   :  { %v208_v11 = vrot.slane %v207_v57, 1 }
  0xcb   :  { %v225_v12 = vperm.slane %v224_v10, 0 }
  0xcc   :  { %v209_v14 = vperm.slane %v208_v11, 0 }
  0xcd   :  { %194 = vrot.lane.b32.xlu0 %v193_v58, %s4968_s20 }
  0xd0   :  { %v247_v60 = vpop.permute.xlu1 %246 }
  0xd1   :  { %v248_v62 = vrot.slane %v247_v60, 1  ;;  %v231_v63 = vpop.permute.xlu0 %230  ;;  %v445_v60 = vmul.f32 %v444_v55, %v5116_v4 }
  0xd2   :  { %v232_v0 = vrot.slane %v231_v63, 1  ;;  %v465_v63 = vstv %s4654_s16  ;;  %s4666_s16 = sld [smem:[#allocation8 + $0x11]] }
  0xd3   :  { %v249_v1 = vperm.slane %v248_v62, 0  ;;  %v451_v5 = vrot.slane %v445_v60, 3 }
  0xd4   :  { %v233_v2 = vperm.slane %v232_v0, 0 }
  0xd5   :  { %250 = vrot.lane.b32.xlu2 %v249_v1, %s4968_s20  ;;  %242 = vrot.lane.b32.xlu0 %v241_v61, %s4968_s20  ;;  %v430_v61 = vrot.slane %v424_v54, 2 }
  0xd6   :  { %234 = vrot.lane.b32.xlu1 %v233_v2, %s4968_s20 }
  0xd9   :  { %v255_v13 = vpop.permute.xlu0 %254 }
  0xda   :  { %v256_v15 = vrot.slane %v255_v13, 1  ;;  %v486_v13 = vstv %s4655_s19  ;;  %s4665_s19 = sld [smem:[#allocation8 + $0xa]] }
  0xdc   :  { %v257_v18 = vperm.slane %v256_v15, 0 }
  0xdd   :  { %178 = vrot.lane.b32.xlu2 %v177_v7, %s4968_s20  ;;  %533 = vrot.lane.b32.xlu0 %v529_v8, %s4982_s6 }
  0xde   :  { %162 = vrot.lane.b32.xlu1 %v161_v9, %s4968_s20 }
  0xe5   :  { %226 = vrot.lane.b32.xlu2 %v225_v12, %s4968_s20 }
  0xe6   :  { %210 = vrot.lane.b32.xlu1 %v209_v14, %s4968_s20 }
  0xed   :  { %673 = vrot.lane.b32.xlu2 %v669_v19, %s4983_s9  ;;  %v487_v19 = vmul.f32 %v486_v13, %v5116_v4 }
  0xee   :  { %258 = vrot.lane.b32.xlu1 %v257_v18, %s4968_s20 }
  0xf6   :  { %393 = vrot.lane.b32.xlu1 %v389_v21, %s4984_s11 }
  0xfe   :  { %813 = vrot.lane.b32.xlu1 %v809_v23, %s4985_s12 }
 0x117   :  { %v171_v24 = vpop.permute.xlu0 %170 }
 0x118   :  { %173 = vst.msk [vmem:[#allocation2 + $0x24] sm:$0x1] %vm81_vm3, %v171_v24 }
 0x11f   :  { %v203_v25 = vpop.permute.xlu2 %202 }
 0x120   :  { %205 = vst.msk [vmem:[#allocation2 + $0x26] sm:$0x1] %vm81_vm3, %v203_v25 }
 0x127   :  { %v219_v26 = vpop.permute.xlu0 %218 }
 0x128   :  { %221 = vst.msk [vmem:[#allocation2 + $0x27] sm:$0x1] %vm81_vm3, %v219_v26  ;;  %v493_v26 = vrot.slane %v487_v19, 5 }
 0x12f   :  { %v251_v27 = vpop.permute.xlu2 %250 }
 0x130   :  { %253 = vst.msk [vmem:[#allocation2 + $0x29] sm:$0x1] %vm81_vm3, %v251_v27 }
 0x137   :  { %v179_v28 = vpop.permute.xlu2 %178  ;;  %v267_v29 = vpop.permute.xlu0 %266 }
 0x138   :  { %181 = vst.msk [vmem:[#allocation2 + $0xd] sm:$0x1] %vm81_vm3, %v179_v28  ;;  %v187_v30 = vpop.permute.xlu1 %186  ;;  %v542_v28 = vstv %s4658_s7  ;;  %s4669_s7 = sld [smem:[#allocation8 + $0x26]] }
 0x139   :  { %189 = vst.msk [vmem:[#allocation2 + $0x25] sm:$0x1] %vm81_vm3, %v187_v30 }
 0x13a   :  { %269 = vst.msk [vmem:[#allocation2 + $0x2a] sm:$0x1] %vm81_vm3, %v267_v29 }
 0x13f   :  { %v227_v17 = vpop.permute.xlu2 %226  ;;  %v195_v31 = vpop.permute.xlu0 %194 }
 0x140   :  { %229 = vst.msk [vmem:[#allocation2 + $0x10] sm:$0x1] %vm81_vm3, %v227_v17 }
 0x141   :  { %197 = vst.msk [vmem:[#allocation2 + $0xe] sm:$0x1] %vm81_vm3, %v195_v31 }
 0x147   :  { %v243_v32 = vpop.permute.xlu0 %242 }
 0x148   :  { %v235_v33 = vpop.permute.xlu1 %234  ;;  %245 = vst.msk [vmem:[#allocation2 + $0x11] sm:$0x1] %vm81_vm3, %v243_v32 }
 0x149   :  { %237 = vst.msk [vmem:[#allocation2 + $0x28] sm:$0x1] %vm81_vm3, %v235_v33 }
 0x150   :  { %v163_v34 = vpop.permute.xlu1 %162 }
 0x151   :  { %165 = vst.msk [vmem:[#allocation2 + $0xc] sm:$0x1] %vm81_vm3, %v163_v34  ;;  %v563_v34 = vstv %s4659_s8  ;;  %s4668_s8 = sld [smem:[#allocation8 + $0x1f]] }
 0x158   :  { %v211_v35 = vpop.permute.xlu1 %210 }
 0x159   :  { %213 = vst.msk [vmem:[#allocation2 + $0xf] sm:$0x1] %vm81_vm3, %v211_v35 }
 0x160   :  { %v5160_v36 = vld [vmem:[#allocation2 + $0x8] sm:$0xff]  ;;  %v259_v37 = vpop.permute.xlu1 %258 }
 0x161   :  { %261 = vst.msk [vmem:[#allocation2 + $0x12] sm:$0x1] %vm81_vm3, %v259_v37  ;;  %v390_v38 = vmul.f32 %v388_v20, %v5160_v36  ;;  %v670_v39 = vmul.f32 %v668_v16, %v5160_v36  ;;  %v530_v40 = vmul.f32 %v528_v6, %v5160_v36  ;;  %v404_v42 = vmul.f32 %v402_v41, %v5160_v36 }
 0x162   :  { %v810_v47 = vmul.f32 %v808_v22, %v5160_v36  ;;  %v425_v51 = vmul.f32 %v423_v49, %v5160_v36  ;;  %v446_v57 = vmul.f32 %v444_v55, %v5160_v36  ;;  %v467_v3 = vmul.f32 %v465_v63, %v5160_v36 }
 0x163   :  { %395 = vrot.lane.b32.xlu2 %v390_v38, %s4984_s11  ;;  %675 = vrot.lane.b32.xlu0 %v670_v39, %s4983_s9  ;;  %v410_v44 = vrot.slane %v404_v42, 1  ;;  %v466_v6 = vmul.f32 %v465_v63, %v5116_v4  ;;  %v488_v16 = vmul.f32 %v486_v13, %v5160_v36  ;;  %v507_v20 = vstv %s4656_s5  ;;  %s4667_s5 = sld [smem:[#allocation8 + $0x18]] }
 0x164   :  { %535 = vrot.lane.b32.xlu1 %v530_v40, %s4982_s6  ;;  %v431_v58 = vrot.slane %v425_v51, 2  ;;  %v452_v62 = vrot.slane %v446_v57, 3  ;;  %v473_v10 = vrot.slane %v467_v3, 4  ;;  %v509_v22 = vmul.f32 %v507_v20, %v5160_v36 }
 0x165   :  { %v411_v50 = vsel %vm287_vm6, %v409_v46, %v410_v44  ;;  %v472_v11 = vrot.slane %v466_v6, 4  ;;  %v494_v23 = vrot.slane %v488_v16, 5  ;;  %v508_v25 = vmul.f32 %v507_v20, %v5116_v4 }
 0x166   :  { %v432_v0 = vsel %vm8850_vm7, %v430_v61, %v431_v58  ;;  %v453_v7 = vsel %vm323_vm8, %v451_v5, %v452_v62  ;;  %v515_v27 = vrot.slane %v509_v22, 6  ;;  %v544_v33 = vmul.f32 %v542_v28, %v5160_v36 }
 0x167   :  { %v474_v15 = vsel %vm341_vm9, %v472_v11, %v473_v10  ;;  %v495_v29 = vsel %vm359_vm10, %v493_v26, %v494_v23  ;;  %v514_v32 = vrot.slane %v508_v25, 6  ;;  %v565_v37 = vmul.f32 %v563_v34, %v5160_v36 }
 0x168   :  { %v5173_v45 = vld [vmem:[#allocation2 + $0x10] sm:$0x3f]  ;;  %v564_v40 = vmul.f32 %v563_v34, %v5116_v4  ;;  %v605_v57 = vstv %s4661_s13  ;;  %v703_v22 = vstv %s4666_s16  ;;  %s4672_s13 = sld [smem:[#allocation8 + $0xb]] }
 0x169   :  { %v405_v48 = vmul.f32 %v402_v41, %v5173_v45  ;;  %v426_v52 = vmul.f32 %v423_v49, %v5173_v45  ;;  %v447_v2 = vmul.f32 %v444_v55, %v5173_v45  ;;  %v468_v8 = vmul.f32 %v465_v63, %v5173_v45  ;;  %s4675_s16 = sld [smem:[#allocation8 + $0x20]] }
 0x16a   :  { %v489_v18 = vmul.f32 %v486_v13, %v5173_v45  ;;  %v510_v17 = vmul.f32 %v507_v20, %v5173_v45  ;;  %v545_v31 = vmul.f32 %v542_v28, %v5173_v45  ;;  %v516_v35 = vsel %vm377_vm11, %v514_v32, %v515_v27 }
 0x16b   :  { %815 = vrot.lane.b32.xlu2 %v810_v47, %s4985_s12  ;;  %414 = vrot.lane.b32.xlu0 %v411_v50, %s4984_s11  ;;  %v412_v53 = vrot.slane %v405_v48, 1  ;;  %v433_v59 = vrot.slane %v426_v52, 2  ;;  %v454_v9 = vrot.slane %v447_v2, 3  ;;  %v475_v12 = vrot.slane %v468_v8, 4 }
 0x16c   :  { %v496_v24 = vrot.slane %v489_v18, 5  ;;  %v517_v38 = vrot.slane %v510_v17, 6  ;;  %v552_v39 = vrot.slane %v545_v31, 1  ;;  %v550_v41 = vrot.slane %v544_v33, 1 }
 0x16d   :  { %v413_v56 = vsel %vm287_vm6, %v410_v44, %v412_v53  ;;  %v434_v1 = vsel %vm8850_vm7, %v431_v58, %v433_v59  ;;  %v455_v14 = vsel %vm323_vm8, %v452_v62, %v454_v9  ;;  %v476_v21 = vsel %vm341_vm9, %v473_v10, %v475_v12 }
 0x16e   :  { %416 = vrot.lane.b32.xlu1 %v413_v56, %s4984_s11  ;;  %v497_v30 = vsel %vm359_vm10, %v494_v23, %v496_v24  ;;  %v571_v42 = vrot.slane %v565_v37, 2  ;;  %v518_v44 = vsel %vm377_vm11, %v515_v27, %v517_v38  ;;  %v553_v46 = vsel %vm287_vm6, %v550_v41, %v552_v39 }
 0x16f   :  { %v586_v47 = vmul.f32 %v584_v43, %v5160_v36  ;;  %v570_v48 = vrot.slane %v564_v40, 2  ;;  %v543_v49 = vmul.f32 %v542_v28, %v5116_v4  ;;  %v585_v50 = vmul.f32 %v584_v43, %v5116_v4 }
 0x170   :  { %v587_v52 = vmul.f32 %v584_v43, %v5173_v45  ;;  %v566_v60 = vmul.f32 %v563_v34, %v5173_v45  ;;  %v608_v61 = vmul.f32 %v605_v57, %v5173_v45  ;;  %v607_v62 = vmul.f32 %v605_v57, %v5160_v36 }
 0x171   :  { %v572_v51 = vsel %vm8850_vm7, %v570_v48, %v571_v42  ;;  %v592_v53 = vrot.slane %v586_v47, 3  ;;  %v549_v54 = vrot.slane %v543_v49, 1  ;;  %v591_v55 = vrot.slane %v585_v50, 3 }
 0x172   :  { %v594_v56 = vrot.slane %v587_v52, 3  ;;  %v626_v63 = vstv %s4662_s14  ;;  %v573_v2 = vrot.slane %v566_v60, 2  ;;  %v615_v3 = vrot.slane %v608_v61, 4  ;;  %s4673_s14 = sld [smem:[#allocation8 + $0x12]] }
 0x173   :  { %435 = vrot.lane.b32.xlu2 %v432_v0, %s4984_s11  ;;  %437 = vrot.lane.b32.xlu0 %v434_v1, %s4984_s11  ;;  %v551_v58 = vsel %vm287_vm6, %v549_v54, %v550_v41  ;;  %v593_v59 = vsel %vm323_vm8, %v591_v55, %v592_v53  ;;  %v628_v1 = vmul.f32 %v626_v63, %v5160_v36  ;;  %v613_v6 = vrot.slane %v607_v62, 4 }
 0x174   :  { %v595_v0 = vsel %vm323_vm8, %v592_v53, %v594_v56  ;;  %v627_v5 = vmul.f32 %v626_v63, %v5116_v4  ;;  %v647_v8 = vstv %s4663_s15  ;;  %v574_v9 = vsel %vm8850_vm7, %v571_v42, %v573_v2  ;;  %s4674_s15 = sld [smem:[#allocation8 + $0x19]] }
 0x175   :  { %v616_v10 = vsel %vm341_vm9, %v613_v6, %v615_v3  ;;  %v649_v11 = vmul.f32 %v647_v8, %v5160_v36  ;;  %v606_v13 = vmul.f32 %v605_v57, %v5116_v4  ;;  %v650_v16 = vmul.f32 %v647_v8, %v5173_v45  ;;  %v5278_v57 = vpop.permute.xlu2 %673 }
 0x176   :  { %456 = vrot.lane.b32.xlu1 %v453_v7, %s4984_s11  ;;  %v634_v7 = vrot.slane %v628_v1, 5  ;;  %v633_v12 = vrot.slane %v627_v5, 5  ;;  %v629_v25 = vmul.f32 %v626_v63, %v5173_v45  ;;  %v705_v26 = vmul.f32 %v703_v22, %v5160_v36 }
 0x177   :  { %v655_v18 = vrot.slane %v649_v11, 6  ;;  %v612_v19 = vrot.slane %v606_v13, 4  ;;  %v704_v27 = vmul.f32 %v703_v22, %v5116_v4  ;;  %v682_v28 = vstv %s4665_s19  ;;  %s4676_s19 = sld [smem:[#allocation8 + $0x27]] }
 0x178   :  { %v636_v17 = vrot.slane %v629_v25, 5  ;;  %v711_v31 = vrot.slane %v705_v26, 2  ;;  %v683_v32 = vmul.f32 %v682_v28, %v5116_v4  ;;  %v685_v39 = vmul.f32 %v682_v28, %v5173_v45  ;;  %v5307_v26 = vpop.permute.xlu1 %393 }
 0x179   :  { %v614_v23 = vsel %vm341_vm9, %v612_v19, %v613_v6  ;;  %v710_v33 = vrot.slane %v704_v27, 2  ;;  %v766_v50 = vstv %s4669_s7  ;;  %v745_v56 = vstv %s4668_s8  ;;  %s4678_s7 = sld [smem:[#allocation8 + $0x5]] }
 0x17a   :  { %v637_v37 = vsel %vm359_vm10, %v634_v7, %v636_v17  ;;  %v689_v41 = vrot.slane %v683_v32, 1  ;;  %v768_v53 = vmul.f32 %v766_v50, %v5160_v36  ;;  %v767_v55 = vmul.f32 %v766_v50, %v5116_v4  ;;  %s4679_s8 = sld [smem:[#allocation8 + $0xc]] }
 0x17b   :  { %458 = vrot.lane.b32.xlu2 %v455_v14, %s4984_s11  ;;  %477 = vrot.lane.b32.xlu0 %v474_v15, %s4984_s11  ;;  %v648_v14 = vmul.f32 %v647_v8, %v5116_v4  ;;  %v635_v15 = vsel %vm359_vm10, %v633_v12, %v634_v7  ;;  %v712_v38 = vsel %vm8850_vm7, %v710_v33, %v711_v31  ;;  %v787_v1 = vstv %s4670_s10  ;;  %s4680_s10 = sld [smem:[#allocation8 + $0x13]] }
 0x17c   :  { %v774_v60 = vrot.slane %v768_v53, 5  ;;  %v746_v61 = vmul.f32 %v745_v56, %v5116_v4  ;;  %v773_v63 = vrot.slane %v767_v55, 5  ;;  %v748_v5 = vmul.f32 %v745_v56, %v5173_v45 }
 0x17d   :  { %v654_v20 = vrot.slane %v648_v14, 6  ;;  %v790_v6 = vmul.f32 %v787_v1, %v5173_v45  ;;  %v789_v8 = vmul.f32 %v787_v1, %v5160_v36  ;;  %v769_v11 = vmul.f32 %v766_v50, %v5173_v45 }
 0x17e   :  { %479 = vrot.lane.b32.xlu1 %v476_v21, %s4984_s11  ;;  %v657_v21 = vrot.slane %v650_v16, 6  ;;  %v775_v3 = vsel %vm359_vm10, %v773_v63, %v774_v60  ;;  %v752_v7 = vrot.slane %v746_v61, 4  ;;  %v755_v12 = vrot.slane %v748_v5, 4 }
 0x17f   :  { %v656_v24 = vsel %vm377_vm11, %v654_v20, %v655_v18  ;;  %v797_v13 = vrot.slane %v790_v6, 6  ;;  %v795_v14 = vrot.slane %v789_v8, 6  ;;  %v822_v16 = vstv %s4672_s13  ;;  %s4681_s13 = sld [smem:[#allocation8 + $0x1a]] }
 0x180   :  { %v824_v20 = vmul.f32 %v822_v16, %v5160_v36  ;;  %v825_v25 = vmul.f32 %v822_v16, %v5173_v45  ;;  %v843_v17 = vstv %s4673_s14  ;;  %s4986_s14 = smov 123  }
 0x181   :  { %v798_v19 = vsel %vm377_vm11, %v795_v14, %v797_v13  ;;  %v845_v33 = vmul.f32 %v843_v17, %v5160_v36 }
 0x182   :  { %v830_v27 = vrot.slane %v824_v20, 1 }
 0x183   :  { %498 = vrot.lane.b32.xlu2 %v495_v29, %s4984_s11  ;;  %500 = vrot.lane.b32.xlu0 %v497_v30, %s4984_s11  ;;  %v658_v29 = vsel %vm377_vm11, %v655_v18, %v657_v21  ;;  %v684_v30 = vmul.f32 %v682_v28, %v5160_v36  ;;  %v788_v21 = vmul.f32 %v787_v1, %v5116_v4 }
 0x185   :  { %v690_v34 = vrot.slane %v684_v30, 1  ;;  %v794_v28 = vrot.slane %v788_v21, 6  ;;  %v832_v30 = vrot.slane %v825_v25, 1 }
 0x186   :  { %519 = vrot.lane.b32.xlu1 %v516_v35, %s4984_s11  ;;  %v724_v35 = vstv %s4667_s5  ;;  %s4677_s5 = sld [smem:[#allocation8 + $0x2e]] }
 0x187   :  { %v727_v40 = vmul.f32 %v724_v35, %v5173_v45  ;;  %v726_v42 = vmul.f32 %v724_v35, %v5160_v36  ;;  %v691_v43 = vsel %vm287_vm6, %v689_v41, %v690_v34  ;;  %v725_v54 = vmul.f32 %v724_v35, %v5116_v4 }
 0x188   :  { %v844_v35 = vmul.f32 %v843_v17, %v5116_v4 }
 0x189   :  { %v734_v47 = vrot.slane %v727_v40, 3  ;;  %v732_v48 = vrot.slane %v726_v42, 3  ;;  %v731_v62 = vrot.slane %v725_v54, 3  ;;  %v833_v40 = vsel %vm287_vm6, %v830_v27, %v832_v30 }
 0x18a   :  { %v851_v42 = vrot.slane %v845_v33, 2 }
 0x18b   :  { %521 = vrot.lane.b32.xlu2 %v518_v44, %s4984_s11  ;;  %556 = vrot.lane.b32.xlu0 %v553_v46, %s4982_s6  ;;  %v706_v44 = vmul.f32 %v703_v22, %v5173_v45  ;;  %v692_v46 = vrot.slane %v685_v39, 1  ;;  %v735_v52 = vsel %vm323_vm8, %v732_v48, %v734_v47  ;;  %v733_v2 = vsel %vm323_vm8, %v731_v62, %v732_v48 }
 0x18c   :  { %v823_v22 = vmul.f32 %v822_v16, %v5116_v4  ;;  %v850_v47 = vrot.slane %v844_v35, 2 }
 0x18d   :  { %v713_v49 = vrot.slane %v706_v44, 2 }
 0x18e   :  { %575 = vrot.lane.b32.xlu1 %v572_v51, %s4982_s6  ;;  %v693_v51 = vsel %vm287_vm6, %v690_v34, %v692_v46  ;;  %v846_v34 = vmul.f32 %v843_v17, %v5173_v45  ;;  %v5325_v46 = vpop.permute.xlu1 %813  ;;  %v852_v50 = vsel %vm8850_vm7, %v850_v47, %v851_v42 }
 0x193   :  { %554 = vrot.lane.b32.xlu2 %v551_v58, %s4982_s6  ;;  %596 = vrot.lane.b32.xlu0 %v593_v59, %s4982_s6  ;;  %v714_v58 = vsel %vm8850_vm7, %v711_v31, %v713_v49  ;;  %v747_v59 = vmul.f32 %v745_v56, %v5160_v36  ;;  %v796_v31 = vsel %vm377_vm11, %v794_v28, %v795_v14  ;;  %v885_v49 = vstv %s4675_s16  ;;  %s4683_s16 = sld [smem:[#allocation8 + $0x28]] }
 0x194   :  { %v887_v53 = vmul.f32 %v885_v49, %v5160_v36  ;;  %v886_v55 = vmul.f32 %v885_v49, %v5116_v4 }
 0x196   :  { %598 = vrot.lane.b32.xlu1 %v595_v0, %s4982_s6  ;;  %v753_v0 = vrot.slane %v747_v59, 4  ;;  %v893_v62 = vrot.slane %v887_v53, 4 }
 0x198   :  { %v756_v18 = vsel %vm341_vm9, %v753_v0, %v755_v12 }
 0x19b   :  { %577 = vrot.lane.b32.xlu2 %v574_v9, %s4982_s6  ;;  %619 = vrot.lane.b32.xlu0 %v616_v10, %s4982_s6  ;;  %v754_v10 = vsel %vm341_vm9, %v752_v7, %v753_v0  ;;  %v892_v0 = vrot.slane %v886_v55, 4  ;;  %v1004_v55 = vstv %s4681_s13  ;;  %s4987_s13 = smov 122  }
 0x19d   :  { %v894_v5 = vsel %vm341_vm9, %v892_v0, %v893_v62 }
 0x19e   :  { %638 = vrot.lane.b32.xlu1 %v635_v15, %s4982_s6  ;;  %v776_v15 = vrot.slane %v769_v11, 5 }
 0x1a3   :  { %617 = vrot.lane.b32.xlu2 %v614_v23, %s4982_s6  ;;  %659 = vrot.lane.b32.xlu0 %v656_v24, %s4982_s6  ;;  %v777_v24 = vsel %vm359_vm10, %v774_v60, %v776_v15  ;;  %v888_v60 = vmul.f32 %v885_v49, %v5173_v45 }
 0x1a5   :  { %v895_v1 = vrot.slane %v888_v60, 4 }
 0x1a6   :  { %661 = vrot.lane.b32.xlu1 %v658_v29, %s4982_s6  ;;  %v829_v29 = vrot.slane %v823_v22, 1 }
 0x1a7   :  { %v896_v13 = vsel %vm341_vm9, %v893_v62, %v895_v1  ;;  %v1006_v62 = vmul.f32 %v1004_v55, %v5160_v36  ;;  %v1005_v1 = vmul.f32 %v1004_v55, %v5116_v4 }
 0x1a8   :  { %v831_v32 = vsel %vm287_vm6, %v829_v29, %v830_v27 }
 0x1ab   :  { %640 = vrot.lane.b32.xlu2 %v637_v37, %s4982_s6  ;;  %715 = vrot.lane.b32.xlu0 %v712_v38, %s4983_s9  ;;  %v864_v37 = vstv %s4674_s15  ;;  %v5317_v38 = vpop.permute.xlu0 %533  ;;  %s4682_s15 = sld [smem:[#allocation8 + $0x21]] }
 0x1ac   :  { %v866_v41 = vmul.f32 %v864_v37, %v5160_v36  ;;  %v865_v44 = vmul.f32 %v864_v37, %v5116_v4 }
 0x1ae   :  { %694 = vrot.lane.b32.xlu1 %v691_v43, %s4983_s9  ;;  %v853_v43 = vrot.slane %v846_v34, 2  ;;  %v872_v48 = vrot.slane %v866_v41, 3  ;;  %v871_v54 = vrot.slane %v865_v44, 3  ;;  %v962_v34 = vstv %s4679_s8  ;;  %s4687_s8 = sld [smem:[#allocation8 + $0x14]] }
 0x1b0   :  { %v873_v59 = vsel %vm323_vm8, %v871_v54, %v872_v48 }
 0x1b3   :  { %696 = vrot.lane.b32.xlu2 %v693_v51, %s4983_s9  ;;  %738 = vrot.lane.b32.xlu0 %v735_v52, %s4983_s9  ;;  %v854_v51 = vsel %vm8850_vm7, %v851_v42, %v853_v43  ;;  %v867_v52 = vmul.f32 %v864_v37, %v5173_v45  ;;  %v964_v37 = vmul.f32 %v962_v34, %v5160_v36  ;;  %v983_v43 = vstv %s4680_s10  ;;  %s4688_s10 = sld [smem:[#allocation8 + $0x1b]] }
 0x1b4   :  { %v963_v42 = vmul.f32 %v962_v34, %v5116_v4 }
 0x1b5   :  { %v874_v61 = vrot.slane %v867_v52, 3  ;;  %v970_v49 = vrot.slane %v964_v37, 1 }
 0x1b6   :  { %717 = vrot.lane.b32.xlu1 %v714_v58, %s4983_s9  ;;  %v969_v53 = vrot.slane %v963_v42, 1 }
 0x1bb   :  { %736 = vrot.lane.b32.xlu2 %v733_v2, %s4983_s9  ;;  %778 = vrot.lane.b32.xlu0 %v775_v3, %s4983_s9  ;;  %v906_v2 = vstv %s4676_s19  ;;  %v875_v3 = vsel %vm323_vm8, %v872_v48, %v874_v61  ;;  %v985_v48 = vmul.f32 %v983_v43, %v5160_v36  ;;  %v986_v61 = vmul.f32 %v983_v43, %v5173_v45  ;;  %s4684_s19 = sld [smem:[#allocation8 + $0x2f]] }
 0x1bc   :  { %v908_v6 = vmul.f32 %v906_v2, %v5160_v36  ;;  %v909_v7 = vmul.f32 %v906_v2, %v5173_v45  ;;  %v907_v8 = vmul.f32 %v906_v2, %v5116_v4 }
 0x1bd   :  { %v5291_v9 = vpop.permute.xlu2 %395  ;;  %v991_v54 = vrot.slane %v985_v48, 2 }
 0x1be   :  { %757 = vrot.lane.b32.xlu1 %v754_v10, %s4983_s9  ;;  %v927_v10 = vstv %s4677_s5  ;;  %v914_v15 = vrot.slane %v908_v6, 5  ;;  %v916_v16 = vrot.slane %v909_v7, 5  ;;  %v913_v20 = vrot.slane %v907_v8, 5  ;;  %s4686_s5 = sld [smem:[#allocation8 + $0xd]] }
 0x1bf   :  { %v929_v14 = vmul.f32 %v927_v10, %v5160_v36  ;;  %v930_v25 = vmul.f32 %v927_v10, %v5173_v45  ;;  %v1007_v6 = vmul.f32 %v1004_v55, %v5173_v45  ;;  %v993_v7 = vrot.slane %v986_v61, 2 }
 0x1c0   :  { %v915_v22 = vsel %vm359_vm10, %v913_v20, %v914_v15  ;;  %v1012_v8 = vrot.slane %v1006_v62, 3 }
 0x1c1   :  { %v935_v21 = vrot.slane %v929_v14, 6  ;;  %v937_v17 = vrot.slane %v930_v25, 6  ;;  %v1014_v14 = vrot.slane %v1007_v6, 3 }
 0x1c3   :  { %759 = vrot.lane.b32.xlu2 %v756_v18, %s4983_s9  ;;  %801 = vrot.lane.b32.xlu0 %v798_v19, %s4983_s9  ;;  %v928_v18 = vmul.f32 %v927_v10, %v5116_v4  ;;  %v938_v35 = vsel %vm377_vm11, %v935_v21, %v937_v17 }
 0x1c5   :  { %v5303_v23 = vpop.permute.xlu2 %815  ;;  %v934_v27 = vrot.slane %v928_v18, 6 }
 0x1c6   :  { %8991 = vst [vmem:[#allocation13_spill] sm:$0xff] %v5303_v23  ;;  %780 = vrot.lane.b32.xlu1 %v777_v24, %s4983_s9  ;;  %v917_v24 = vsel %vm359_vm10, %v914_v15, %v916_v16  ;;  %v1025_v15 = vstv %s4682_s15  ;;  %v994_v16 = vsel %vm8850_vm7, %v991_v54, %v993_v7  ;;  %v1102_v7 = vstv %s4686_s5  ;;  %s4689_s15 = sld [smem:[#allocation8 + $0x22]] }
 0x1c7   :  { %v936_v30 = vsel %vm377_vm11, %v934_v27, %v935_v21  ;;  %v1027_v20 = vmul.f32 %v1025_v15, %v5160_v36  ;;  %v1028_v21 = vmul.f32 %v1025_v15, %v5173_v45  ;;  %s5504_s5 = sld [smem:[#allocation8 + $0x32]] }
 0x1cb   :  { %799 = vrot.lane.b32.xlu2 %v796_v31, %s4983_s9  ;;  %834 = vrot.lane.b32.xlu0 %v831_v32, %s4985_s12  ;;  %v948_v31 = vstv %s4678_s7  ;;  %s4685_s7 = sld [smem:[#allocation8 + $0x6]] }
 0x1cc   :  { %v949_v33 = vmul.f32 %v948_v31, %v5116_v4  ;;  %v950_v41 = vmul.f32 %v948_v31, %v5160_v36  ;;  %v1033_v31 = vrot.slane %v1027_v20, 4 }
 0x1cd   :  { %v5319_v39 = vpop.permute.xlu2 %435 }
 0x1ce   :  { %836 = vrot.lane.b32.xlu1 %v833_v40, %s4985_s12  ;;  %v965_v40 = vmul.f32 %v962_v34, %v5173_v45 }
 0x1d3   :  { %855 = vrot.lane.b32.xlu2 %v852_v50, %s4985_s12  ;;  %857 = vrot.lane.b32.xlu0 %v854_v51, %s4985_s12  ;;  %v972_v50 = vrot.slane %v965_v40, 1  ;;  %v984_v51 = vmul.f32 %v983_v43, %v5116_v4 }
 0x1d5   :  { %v5334_v56 = vpop.permute.xlu0 %675  ;;  %v5336_v58 = vpop.permute.xlu2 %458  ;;  %v973_v60 = vsel %vm287_vm6, %v970_v49, %v972_v50  ;;  %v990_v0 = vrot.slane %v984_v51, 2 }
 0x1d6   :  { %8992 = vst [vmem:[#allocation14_spill] sm:$0xff] %v5334_v56  ;;  %876 = vrot.lane.b32.xlu1 %v873_v59, %s4985_s12  ;;  %v5341_v63 = vpop.permute.xlu1 %535  ;;  %v971_v59 = vsel %vm287_vm6, %v969_v53, %v970_v49 }
 0x1d7   :  { %8993 = vst [vmem:[#allocation15_spill] sm:$0xff] %v5336_v58 }
 0x1d8   :  { %8994 = vst [vmem:[#allocation16_spill] sm:$0xff] %v5341_v63 }
 0x1db   :  { %878 = vrot.lane.b32.xlu2 %v875_v3, %s4985_s12  ;;  %897 = vrot.lane.b32.xlu0 %v894_v5, %s4985_s12  ;;  %v992_v5 = vsel %vm8850_vm7, %v990_v0, %v991_v54 }
 0x1dd   :  { %v5350_v11 = vpop.permute.xlu2 %498  ;;  %v5352_v12 = vpop.permute.xlu0 %414 }
 0x1de   :  { %899 = vrot.lane.b32.xlu1 %v896_v13, %s4985_s12  ;;  %v1011_v13 = vrot.slane %v1005_v1, 3 }
 0x1e0   :  { %v5358_v19 = vpop.permute.xlu1 %416  ;;  %v1013_v18 = vsel %vm323_vm8, %v1011_v13, %v1012_v8 }
 0x1e3   :  { %918 = vrot.lane.b32.xlu2 %v915_v22, %s4985_s12  ;;  %920 = vrot.lane.b32.xlu0 %v917_v24, %s4985_s12  ;;  %v1026_v22 = vmul.f32 %v1025_v15, %v5116_v4  ;;  %v1046_v24 = vstv %s4683_s16  ;;  %v1104_v15 = vmul.f32 %v1102_v7, %v5160_v36  ;;  %s4690_s16 = sld [smem:[#allocation8 + $0x29]] }
 0x1e4   :  { %v1048_v17 = vmul.f32 %v1046_v24, %v5160_v36  ;;  %v1047_v34 = vmul.f32 %v1046_v24, %v5116_v4  ;;  %v1049_v48 = vmul.f32 %v1046_v24, %v5173_v45 }
 0x1e5   :  { %v5365_v28 = vpop.permute.xlu2 %521  ;;  %v5367_v29 = vpop.permute.xlu0 %437  ;;  %v1032_v37 = vrot.slane %v1026_v22, 4  ;;  %v1110_v24 = vrot.slane %v1104_v15, 1 }
 0x1e6   :  { %8995 = vst [vmem:[#allocation17_spill] sm:$0xff] %v5365_v28  ;;  %939 = vrot.lane.b32.xlu1 %v936_v30, %s4985_s12  ;;  %v1015_v30 = vsel %vm323_vm8, %v1012_v8, %v1014_v14  ;;  %v1054_v40 = vrot.slane %v1048_v17, 5  ;;  %v1053_v50 = vrot.slane %v1047_v34, 5  ;;  %v1105_v17 = vmul.f32 %v1102_v7, %v5173_v45 }
 0x1e7   :  { %v1034_v42 = vsel %vm341_vm9, %v1032_v37, %v1033_v31 }
 0x1e8   :  { %v5371_v32 = vpop.permute.xlu1 %456  ;;  %v1055_v55 = vsel %vm359_vm10, %v1053_v50, %v1054_v40 }
 0x1eb   :  { %941 = vrot.lane.b32.xlu2 %v938_v35, %s4985_s12  ;;  %953 = vrot.lane.b32.xlu0 %v949_v33, %s4986_s14  ;;  %v1035_v33 = vrot.slane %v1028_v21, 4 }
 0x1ed   :  { %v5381_v44 = vpop.permute.xlu2 %554  ;;  %v5383_v47 = vpop.permute.xlu0 %477  ;;  %v1036_v43 = vsel %vm341_vm9, %v1033_v31, %v1035_v33 }
 0x1ee   :  { %955 = vrot.lane.b32.xlu1 %v950_v41, %s4986_s14  ;;  %v1067_v41 = vstv %s4684_s19  ;;  %s4691_s19 = sld [smem:[#allocation8 + $0x30]] }
 0x1ef   :  { %v1069_v49 = vmul.f32 %v1067_v41, %v5160_v36  ;;  %v1068_v51 = vmul.f32 %v1067_v41, %v5116_v4 }
 0x1f0   :  { %v5388_v52 = vpop.permute.xlu1 %479 }
 0x1f1   :  { %8996 = vst [vmem:[#allocation18_spill] sm:$0xff] %v5388_v52  ;;  %v1075_v61 = vrot.slane %v1069_v49, 6  ;;  %v1074_v0 = vrot.slane %v1068_v51, 6 }
 0x1f3   :  { %974 = vrot.lane.b32.xlu2 %v971_v59, %s4986_s14  ;;  %976 = vrot.lane.b32.xlu0 %v973_v60, %s4986_s14  ;;  %v1070_v59 = vmul.f32 %v1067_v41, %v5173_v45  ;;  %v1056_v60 = vrot.slane %v1049_v48, 5  ;;  %v1076_v6 = vsel %vm377_vm11, %v1074_v0, %v1075_v61  ;;  %v5475_v0 = vld [vmem:[#allocation2] sm:$0xff] }
 0x1f5   :  { %v5397_v2 = vpop.permute.xlu2 %577  ;;  %v5399_v3 = vpop.permute.xlu0 %500  ;;  %v1077_v1 = vrot.slane %v1070_v59, 6 }
 0x1f6   :  { %8997 = vst [vmem:[#allocation19_spill] sm:$0xff] %v5397_v2  ;;  %995 = vrot.lane.b32.xlu1 %v992_v5, %s4986_s14  ;;  %v1057_v5 = vsel %vm359_vm10, %v1054_v40, %v1056_v60 }
 0x1f7   :  { %8998 = vst [vmem:[#allocation20_spill] sm:$0xff] %v5399_v3  ;;  %v1078_v14 = vsel %vm377_vm11, %v1075_v61, %v1077_v1 }
 0x1f8   :  { %v5404_v10 = vpop.permute.xlu1 %519 }
 0x1fb   :  { %997 = vrot.lane.b32.xlu2 %v994_v16, %s4986_s14  ;;  %1016 = vrot.lane.b32.xlu0 %v1013_v18, %s4986_s14  ;;  %v1088_v16 = vstv %s4685_s7  ;;  %v1103_v18 = vmul.f32 %v1102_v7, %v5116_v4  ;;  %s4700_s7 = sld [smem:[#allocation8 + $0x39]] }
 0x1fc   :  { %v1089_v21 = vmul.f32 %v1088_v16, %v5116_v4  ;;  %v1090_v22 = vmul.f32 %v1088_v16, %v5160_v36 }
 0x1fd   :  { %v5413_v25 = vpop.permute.xlu2 %617  ;;  %v5415_v27 = vpop.permute.xlu0 %556  ;;  %v1109_v33 = vrot.slane %v1103_v18, 1 }
 0x1fe   :  { %8999 = vst [vmem:[#allocation21_spill] sm:$0xff] %v5415_v27  ;;  %1018 = vrot.lane.b32.xlu1 %v1015_v30, %s4986_s14  ;;  %v1123_v30 = vstv %s4687_s8  ;;  %s4701_s8 = sld [smem:[#allocation8 + $0x40]] }
 0x1ff   :  { %v1125_v31 = vmul.f32 %v1123_v30, %v5160_v36  ;;  %v1124_v34 = vmul.f32 %v1123_v30, %v5116_v4  ;;  %v1111_v41 = vsel %vm287_vm6, %v1109_v33, %v1110_v24 }
 0x200   :  { %v5421_v35 = vpop.permute.xlu1 %575 }
 0x201   :  { %v1131_v48 = vrot.slane %v1125_v31, 2  ;;  %v1130_v50 = vrot.slane %v1124_v34, 2 }
 0x203   :  { %1037 = vrot.lane.b32.xlu2 %v1034_v42, %s4986_s14  ;;  %1039 = vrot.lane.b32.xlu0 %v1036_v43, %s4986_s14  ;;  %v1126_v42 = vmul.f32 %v1123_v30, %v5173_v45  ;;  %v1112_v43 = vrot.slane %v1105_v17, 1  ;;  %v1132_v59 = vsel %vm8850_vm7, %v1130_v50, %v1131_v48  ;;  %v1186_v17 = vstv %s4690_s16  ;;  %s4704_s16 = sld [smem:[#allocation8 + $0x55]] }
 0x205   :  { %v5430_v53 = vpop.permute.xlu2 %640  ;;  %v5432_v54 = vpop.permute.xlu0 %596  ;;  %v1133_v51 = vrot.slane %v1126_v42, 2  ;;  %v1113_v4 = vsel %vm287_vm6, %v1110_v24, %v1112_v43  ;;  %v1187_v43 = vmul.f32 %v5475_v0, %v1186_v17 }
 0x206   :  { %9000 = vst [vmem:[#allocation22_spill] sm:$0xff] %v5430_v53  ;;  %1058 = vrot.lane.b32.xlu1 %v1055_v55, %s4986_s14  ;;  %v1144_v55 = vstv %s4688_s10  ;;  %s4702_s10 = sld [smem:[#allocation8 + $0x47]] }
 0x207   :  { %v1146_v60 = vmul.f32 %v1144_v55, %v5160_v36  ;;  %v1147_v61 = vmul.f32 %v1144_v55, %v5173_v45  ;;  %v1145_v1 = vmul.f32 %v5475_v0, %v1144_v55  ;;  %v1189_v55 = vmul.f32 %v1186_v17, %v5173_v45 }
 0x208   :  { %v5437_v62 = vpop.permute.xlu1 %598 }
 0x209   :  { %9001 = vst [vmem:[#allocation23_spill] sm:$0xff] %v5437_v62  ;;  %v1152_v16 = vrot.slane %v1146_v60, 3  ;;  %v1154_v18 = vrot.slane %v1147_v61, 3  ;;  %v1151_v24 = vrot.slane %v1145_v1, 3  ;;  %v1193_v61 = vrot.slane %v1187_v43, 5 }
 0x20a   :  { %v1196_v1 = vrot.slane %v1189_v55, 5  ;;  %v1353_v43 = vstv %s4700_s7  ;;  %s4644_s7 = sld [smem:[#allocation8 + $0x7]] }
 0x20b   :  { %1060 = vrot.lane.b32.xlu2 %v1057_v5, %s4986_s14  ;;  %1079 = vrot.lane.b32.xlu0 %v1076_v6, %s4986_s14  ;;  %v1165_v5 = vstv %s4689_s15  ;;  %v1153_v31 = vsel %vm323_vm8, %v1151_v24, %v1152_v16  ;;  %v1155_v33 = vsel %vm323_vm8, %v1152_v16, %v1154_v18  ;;  %s4703_s15 = sld [smem:[#allocation8 + $0x4e]] }
 0x20c   :  { %v1167_v15 = vmul.f32 %v1165_v5, %v5160_v36  ;;  %v1168_v34 = vmul.f32 %v1165_v5, %v5173_v45 }
 0x20d   :  { %v5443_v8 = vpop.permute.xlu2 %696  ;;  %v5445_v13 = vpop.permute.xlu0 %619 }
 0x20e   :  { %9002 = vst [vmem:[#allocation24_spill] sm:$0xff] %v5443_v8  ;;  %1081 = vrot.lane.b32.xlu1 %v1078_v14, %s4986_s14  ;;  %v1134_v14 = vsel %vm8850_vm7, %v1131_v48, %v1133_v51  ;;  %v1173_v30 = vrot.slane %v1167_v15, 4 }
 0x20f   :  { %9003 = vst [vmem:[#allocation25_spill] sm:$0xff] %v5445_v13 }
 0x210   :  { %v5451_v20 = vpop.permute.xlu1 %638 }
 0x213   :  { %1093 = vrot.lane.b32.xlu2 %v1089_v21, %s4987_s13  ;;  %1095 = vrot.lane.b32.xlu0 %v1090_v22, %s4987_s13  ;;  %v1166_v21 = vmul.f32 %v5475_v0, %v1165_v5  ;;  %v1207_v5 = vstv %s4691_s19  ;;  %s4705_s19 = sld [smem:[#allocation8 + $0x5c]] }
 0x214   :  { %v1209_v16 = vmul.f32 %v1207_v5, %v5160_v36  ;;  %v1210_v18 = vmul.f32 %v1207_v5, %v5173_v45 }
 0x215   :  { %v5460_v37 = vpop.permute.xlu2 %736  ;;  %v5462_v40 = vpop.permute.xlu0 %659  ;;  %v1172_v42 = vrot.slane %v1166_v21, 4  ;;  %v1208_v21 = vmul.f32 %v5475_v0, %v1207_v5 }
 0x216   :  { %1114 = vrot.lane.b32.xlu1 %v1111_v41, %s4987_s13  ;;  %v1188_v41 = vmul.f32 %v1186_v17, %v5160_v36 }
 0x217   :  { %v1174_v51 = vsel %vm341_vm9, %v1172_v42, %v1173_v30  ;;  %v1214_v45 = vrot.slane %v1208_v21, 6  ;;  %v1339_v42 = vstv %s5504_s5  ;;  %s5590_s5 = sld [smem:[#allocation8 + $0x33]] }
 0x218   :  { %v5467_v49 = vpop.permute.xlu1 %661 }
 0x219   :  { %9004 = vst [vmem:[#allocation26_spill] sm:$0xff] %v5467_v49 }
 0x21b   :  { %1116 = vrot.lane.b32.xlu2 %v1113_v4, %s4987_s13  ;;  %1135 = vrot.lane.b32.xlu0 %v1132_v59, %s4987_s13  ;;  %v1175_v4 = vrot.slane %v1168_v34, 4  ;;  %v1194_v59 = vrot.slane %v1188_v41, 5  ;;  %v5519_v34 = vld [vmem:[#allocation2 + $0x20] sm:$0xff]  ;;  %v5523_v41 = vld [vmem:[#allocation2 + $0x18] sm:$0xff] }
 0x21d   :  { %v5478_v6 = vpop.permute.xlu2 %759  ;;  %v5480_v7 = vpop.permute.xlu0 %715  ;;  %v1195_v15 = vsel %vm359_vm10, %v1193_v61, %v1194_v59  ;;  %v1340_v61 = vmul.f32 %v1339_v42, %v5523_v41 }
 0x21e   :  { %9005 = vst [vmem:[#allocation27_spill] sm:$0xff] %v5478_v6  ;;  %1137 = vrot.lane.b32.xlu1 %v1134_v14, %s4987_s13  ;;  %v1176_v14 = vsel %vm341_vm9, %v1173_v30, %v1175_v4  ;;  %v1215_v30 = vrot.slane %v1209_v16, 6 }
 0x220   :  { %v5486_v22 = vpop.permute.xlu1 %694  ;;  %v1216_v55 = vsel %vm377_vm11, %v1214_v45, %v1215_v30 }
 0x223   :  { %1156 = vrot.lane.b32.xlu2 %v1153_v31, %s4987_s13  ;;  %1158 = vrot.lane.b32.xlu0 %v1155_v33, %s4987_s13  ;;  %v1197_v31 = vsel %vm359_vm10, %v1194_v59, %v1196_v1  ;;  %v1217_v33 = vrot.slane %v1210_v18, 6  ;;  %v1355_v59 = vmul.f32 %v1353_v43, %v5519_v34  ;;  %v1354_v1 = vmul.f32 %v1353_v43, %v5523_v41 }
 0x225   :  { %v5495_v48 = vpop.permute.xlu2 %799  ;;  %v5497_v50 = vpop.permute.xlu0 %738  ;;  %v1218_v4 = vsel %vm377_vm11, %v1215_v30, %v1217_v33  ;;  %v1361_v16 = vrot.slane %v1355_v59, 1  ;;  %v1360_v21 = vrot.slane %v1354_v1, 1  ;;  %v1374_v33 = vstv %s4701_s8  ;;  %s4707_s8 = sld [smem:[#allocation8 + $0x3a]] }
 0x226   :  { %9006 = vst [vmem:[#allocation28_spill] sm:$0xff] %v5497_v50  ;;  %1177 = vrot.lane.b32.xlu1 %v1174_v51, %s4987_s13  ;;  %v5526_v51 = vld [vmem:[#allocation2 + $0x28] sm:$0x3f]  ;;  %v1395_v59 = vstv %s4702_s10  ;;  %s4708_s10 = sld [smem:[#allocation8 + $0x41]] }
 0x227   :  { %v1362_v45 = vsel %vm287_vm6, %v1360_v21, %v1361_v16  ;;  %v1396_v23 = vmul.f32 %v1395_v59, %v5523_v41 }
 0x228   :  { %v5502_v60 = vpop.permute.xlu1 %717 }
 0x229   :  { %9007 = vst [vmem:[#allocation29_spill] sm:$0xff] %v5502_v60 }
 0x22b   :  { %1179 = vrot.lane.b32.xlu2 %v1176_v14, %s4987_s13  ;;  %1198 = vrot.lane.b32.xlu0 %v1195_v15, %s4987_s13  ;;  %v1356_v15 = vmul.f32 %v1353_v43, %v5526_v51  ;;  %v1375_v43 = vmul.f32 %v1374_v33, %v5523_v41 }
 0x22c   :  { %v1514_v60 = vstv %s4708_s10  ;;  %s5690_s10 = sld [smem:[#allocation8 + $0x2a]] }
 0x22d   :  { %v5513_v24 = vpop.permute.xlu2 %855  ;;  %v5515_v17 = vpop.permute.xlu0 %778  ;;  %v1363_v30 = vrot.slane %v1356_v15, 1  ;;  %v1397_v15 = vmul.f32 %v1395_v59, %v5519_v34  ;;  %v1516_v49 = vmul.f32 %v1514_v60, %v5519_v34 }
 0x22e   :  { %9008 = vst [vmem:[#allocation30_spill] sm:$0xff] %v5513_v24  ;;  %1200 = vrot.lane.b32.xlu1 %v1197_v31, %s4987_s13  ;;  %v1341_v31 = vmul.f32 %v1339_v42, %v5519_v34 }
 0x22f   :  { %v1364_v42 = vsel %vm287_vm6, %v1361_v16, %v1363_v30  ;;  %v1398_v16 = vmul.f32 %v1395_v59, %v5526_v51 }
 0x230   :  { %v5521_v36 = vpop.permute.xlu1 %757 }
 0x231   :  { %v1405_v59 = vrot.slane %v1398_v16, 3  ;;  %v1458_v16 = vstv %s4705_s19  ;;  %s4646_s19 = sld [smem:[#allocation8 + $0x15]] }
 0x233   :  { %1219 = vrot.lane.b32.xlu2 %v1216_v55, %s4987_s13  ;;  %1221 = vrot.lane.b32.xlu0 %v1218_v4, %s4987_s13  ;;  %v1376_v55 = vmul.f32 %v1374_v33, %v5519_v34  ;;  %v1377_v4 = vmul.f32 %v1374_v33, %v5526_v51  ;;  %v1416_v33 = vstv %s4703_s15  ;;  %s5600_s15 = sld [smem:[#allocation8]] }
 0x234   :  { %v1418_v30 = vmul.f32 %v1416_v33, %v5519_v34 }
 0x235   :  { %v5535_v5 = vpop.permute.xlu2 %878  ;;  %v5537_v14 = vpop.permute.xlu0 %801  ;;  %v1382_v21 = vrot.slane %v1376_v55, 2  ;;  %v1402_v55 = vrot.slane %v1396_v23, 3  ;;  %v1437_v23 = vstv %s4704_s16  ;;  %s4645_s16 = sld [smem:[#allocation8 + $0xe]] }
 0x236   :  { %9009 = vst [vmem:[#allocation31_spill] sm:$0xff] %v5535_v5  ;;  %1344 = vrot.lane.b32.xlu1 %v1340_v61, %s4984_s11  ;;  %v1384_v5 = vrot.slane %v1377_v4, 2  ;;  %v1417_v4 = vmul.f32 %v1416_v33, %v5523_v41 }
 0x237   :  { %9010 = vst [vmem:[#allocation32_spill] sm:$0xff] %v5537_v14  ;;  %v1403_v14 = vrot.slane %v1397_v15, 3  ;;  %v5648_v8 = vstv %s4646_s19  ;;  %s4714_s19 = sld [smem:[#allocation8 + $0x3b]] }
 0x238   :  { %v5541_v18 = vpop.permute.xlu1 %780  ;;  %v1385_v6 = vsel %vm8850_vm7, %v1382_v21, %v1384_v5  ;;  %v1419_v5 = vmul.f32 %v1416_v33, %v5526_v51  ;;  %v1438_v33 = vmul.f32 %v1437_v23, %v5523_v41 }
 0x239   :  { %9011 = vst [vmem:[#allocation33_spill] sm:$0xff] %v5541_v18  ;;  %v1404_v15 = vsel %vm323_vm8, %v1402_v55, %v1403_v14 }
 0x23b   :  { %1346 = vrot.lane.b32.xlu2 %v1341_v31, %s4984_s11  ;;  %1365 = vrot.lane.b32.xlu0 %v1362_v45, %s4984_s11  ;;  %v1381_v45 = vrot.slane %v1375_v43, 2  ;;  %v5638_v53 = vstv %s4645_s16  ;;  %s5709_s16 = sld [smem:[#allocation8 + $0x5d]] }
 0x23d   :  { %v5550_v61 = vpop.permute.xlu2 %918  ;;  %v5552_v1 = vpop.permute.xlu0 %834  ;;  %v1383_v18 = vsel %vm8850_vm7, %v1381_v45, %v1382_v21  ;;  %v1424_v21 = vrot.slane %v1418_v30, 4 }
 0x23e   :  { %9012 = vst [vmem:[#allocation34_spill] sm:$0xff] %v5550_v61  ;;  %1367 = vrot.lane.b32.xlu1 %v1364_v42, %s4984_s11 }
 0x240   :  { %v5558_v31 = vpop.permute.xlu1 %836 }
 0x241   :  { %9013 = vst [vmem:[#allocation35_spill] sm:$0xff] %v5558_v31  ;;  %v1406_v31 = vsel %vm323_vm8, %v1403_v14, %v1405_v59  ;;  %v1460_v14 = vmul.f32 %v1458_v16, %v5519_v34  ;;  %v1444_v59 = vrot.slane %v1438_v33, 5 }
 0x243   :  { %1386 = vrot.lane.b32.xlu2 %v1383_v18, %s4984_s11  ;;  %1388 = vrot.lane.b32.xlu0 %v1385_v6, %s4984_s11  ;;  %v1423_v18 = vrot.slane %v1417_v4, 4  ;;  %v1426_v6 = vrot.slane %v1419_v5, 4 }
 0x245   :  { %v5567_v43 = vpop.permute.xlu2 %941  ;;  %v5569_v42 = vpop.permute.xlu0 %857  ;;  %v1425_v50 = vsel %vm341_vm9, %v1423_v18, %v1424_v21  ;;  %v1427_v4 = vsel %vm341_vm9, %v1424_v21, %v1426_v6  ;;  %v1466_v18 = vrot.slane %v1460_v14, 6  ;;  %v1461_v6 = vmul.f32 %v1458_v16, %v5526_v51 }
 0x246   :  { %9014 = vst [vmem:[#allocation36_spill] sm:$0xff] %v5567_v43  ;;  %1407 = vrot.lane.b32.xlu1 %v1404_v15, %s4984_s11  ;;  %v1439_v43 = vmul.f32 %v1437_v23, %v5519_v34 }
 0x247   :  { %9015 = vst [vmem:[#allocation37_spill] sm:$0xff] %v5569_v42  ;;  %v1440_v42 = vmul.f32 %v1437_v23, %v5526_v51  ;;  %v1468_v14 = vrot.slane %v1461_v6, 6 }
 0x248   :  { %v5574_v45 = vpop.permute.xlu1 %876  ;;  %v1445_v15 = vrot.slane %v1439_v43, 5 }
 0x249   :  { %9016 = vst [vmem:[#allocation38_spill] sm:$0xff] %v5574_v45  ;;  %v1447_v5 = vrot.slane %v1440_v42, 5  ;;  %v1469_v6 = vsel %vm377_vm11, %v1466_v18, %v1468_v14 }
 0x24a   :  { %v1446_v23 = vsel %vm359_vm10, %v1444_v59, %v1445_v15 }
 0x24b   :  { %1409 = vrot.lane.b32.xlu2 %v1406_v31, %s4984_s11  ;;  %1428 = vrot.lane.b32.xlu0 %v1425_v50, %s4984_s11  ;;  %v1459_v31 = vmul.f32 %v1458_v16, %v5523_v41  ;;  %v1448_v21 = vsel %vm359_vm10, %v1445_v15, %v1447_v5  ;;  %v1479_v15 = vstv %s5590_s5  ;;  %v5609_v16 = vstv %s4644_s7  ;;  %s5640_s5 = sld [smem:[#allocation8 + $0x1c]] }
 0x24c   :  { %s5650_s7 = sld [smem:[#allocation8 + $0x23]] }
 0x24d   :  { %v5583_v30 = vpop.permute.xlu2 %974  ;;  %v5585_v55 = vpop.permute.xlu0 %897  ;;  %v1465_v43 = vrot.slane %v1459_v31, 6  ;;  %v5613_v31 = vld [vmem:[#allocation2 + $0x8] sm:$0xff] }
 0x24e   :  { %9017 = vst [vmem:[#allocation39_spill] sm:$0xff] %v5583_v30  ;;  %1430 = vrot.lane.b32.xlu1 %v1427_v4, %s4984_s11  ;;  %v5617_v59 = vmul.f32 %v5613_v31, %v5609_v16  ;;  %v1535_v30 = vstv %s5620_s17  ;;  %s5677_s17 = sld [smem:[#allocation8 + $0x56]] }
 0x24f   :  { %9018 = vst [vmem:[#allocation40_spill] sm:$0xff] %v5585_v55  ;;  %v1467_v4 = vsel %vm377_vm11, %v1465_v43, %v1466_v18  ;;  %v1515_v18 = vmul.f32 %v1514_v60, %v5523_v41 }
 0x250   :  { %v5593_v50 = vpop.permute.xlu1 %899 }
 0x251   :  { %9019 = vst [vmem:[#allocation41_spill] sm:$0xff] %v5593_v50 }
 0x253   :  { %1449 = vrot.lane.b32.xlu2 %v1446_v23, %s4984_s11  ;;  %1451 = vrot.lane.b32.xlu0 %v1448_v21, %s4984_s11  ;;  %v1480_v23 = vmul.f32 %v1479_v15, %v5523_v41  ;;  %v1493_v21 = vstv %s4707_s8  ;;  %s5663_s8 = sld [smem:[#allocation8 + $0x4f]] }
 0x254   :  { %v1495_v43 = vmul.f32 %v1493_v21, %v5519_v34  ;;  %v1494_v50 = vmul.f32 %v1493_v21, %v5523_v41 }
 0x255   :  { %v5602_v42 = vpop.permute.xlu2 %997  ;;  %v5604_v33 = vpop.permute.xlu0 %920 }
 0x256   :  { %9020 = vst [vmem:[#allocation42_spill] sm:$0xff] %v5602_v42  ;;  %1470 = vrot.lane.b32.xlu1 %v1467_v4, %s4984_s11  ;;  %v1496_v4 = vmul.f32 %v1493_v21, %v5526_v51  ;;  %v281_v42 = vmul.f32 %v5475_v0, %v5609_v16  ;;  %v5645_v21 = vmul.f32 %v5613_v31, %v5638_v53  ;;  %v1500_v2 = vrot.slane %v1494_v50, 1 }
 0x257   :  { %9021 = vst [vmem:[#allocation43_spill] sm:$0xff] %v5604_v33  ;;  %v1481_v33 = vmul.f32 %v1479_v15, %v5519_v34  ;;  %v1501_v15 = vrot.slane %v1495_v43, 1  ;;  %v1537_v50 = vmul.f32 %v1535_v30, %v5519_v34 }
 0x258   :  { %v5611_v5 = vpop.permute.xlu1 %939 }
 0x259   :  { %9022 = vst [vmem:[#allocation44_spill] sm:$0xff] %v5611_v5  ;;  %v1502_v27 = vsel %vm287_vm6, %v1500_v2, %v1501_v15  ;;  %v1536_v2 = vmul.f32 %v1535_v30, %v5523_v41 }
 0x25b   :  { %1472 = vrot.lane.b32.xlu2 %v1469_v6, %s4984_s11  ;;  %1484 = vrot.lane.b32.xlu0 %v1480_v23, %s4982_s6  ;;  %v1503_v23 = vrot.slane %v1496_v4, 1  ;;  %v288_v6 = vrot.slane %v281_v42, 1  ;;  %v299_v4 = vmul.f32 %v5475_v0, %v5638_v53  ;;  %v1522_v42 = vrot.slane %v1516_v49, 2 }
 0x25c   :  { %v1521_v49 = vrot.slane %v1515_v18, 2  ;;  %v1543_v18 = vrot.slane %v1537_v50, 3  ;;  %v1542_v61 = vrot.slane %v1536_v2, 3  ;;  %v1556_v50 = vstv %s5663_s8  ;;  %s4716_s8 = sld [smem:[#allocation8 + $0x49]] }
 0x25d   :  { %v5633_v14 = vpop.permute.xlu2 %1037  ;;  %v5635_v56 = vpop.permute.xlu0 %953 }
 0x25e   :  { %9023 = vst [vmem:[#allocation45_spill] sm:$0xff] %v5633_v14  ;;  %1486 = vrot.lane.b32.xlu1 %v1481_v33, %s4982_s6  ;;  %v9025_v14 = vstv %s5600_s15  ;;  %v9027_v33 = vrot.slane %v5617_v59, 1  ;;  %v1523_v63 = vsel %vm8850_vm7, %v1521_v49, %v1522_v42  ;;  %v1544_v55 = vsel %vm323_vm8, %v1542_v61, %v1543_v18 }
 0x25f   :  { %9024 = vst [vmem:[#allocation46_spill] sm:$0xff] %v5635_v56  ;;  %v275_v13 = vmul.f32 %v5475_v0, %v9025_v14  ;;  %v1504_v56 = vsel %vm287_vm6, %v1501_v15, %v1503_v23  ;;  %v1517_v14 = vmul.f32 %v1514_v60, %v5526_v51  ;;  %v306_v60 = vrot.slane %v299_v4, 2 }
 0x260   :  { %v5655_v62 = vpop.permute.xlu1 %955  ;;  %v290_v43 = vsel %vm287_vm6, %v288_v6, %v9027_v33  ;;  %v5672_v6 = vmul.f32 %v5613_v31, %v5648_v8  ;;  %v317_v15 = vmul.f32 %v5475_v0, %v5648_v8 }
 0x261   :  { %9026 = vst [vmem:[#allocation47_spill] sm:$0xff] %v5655_v62  ;;  %v295_v33 = vadd.f32 %v290_v43, %v275_v13  ;;  %v1524_v13 = vrot.slane %v1517_v14, 2 }
 0x262   :  { %v324_v28 = vrot.slane %v317_v15, 3 }
 0x263   :  { %1505 = vrot.lane.b32.xlu2 %v1502_v27, %s4982_s6  ;;  %1507 = vrot.lane.b32.xlu0 %v1504_v56, %s4982_s6  ;;  %v1538_v27 = vmul.f32 %v1535_v30, %v5526_v51  ;;  %v5688_v56 = vstv %s5640_s5  ;;  %v5702_v30 = vstv %s5650_s7  ;;  %v1525_v43 = vsel %vm8850_vm7, %v1522_v42, %v1524_v13  ;;  %s4713_s5 = sld [smem:[#allocation8 + $0x34]] }
 0x264   :  { %v5696_v4 = vmul.f32 %v5613_v31, %v5688_v56  ;;  %v5718_v15 = vmul.f32 %v5613_v31, %v5702_v30  ;;  %v1557_v42 = vmul.f32 %v1556_v50, %v5523_v41  ;;  %v1577_v13 = vstv %s5677_s17  ;;  %s4715_s7 = sld [smem:[#allocation8 + $0x42]] }
 0x265   :  { %v5681_v23 = vpop.permute.xlu2 %1060  ;;  %v5683_v62 = vpop.permute.xlu0 %976  ;;  %v1545_v14 = vrot.slane %v1538_v27, 3  ;;  %v353_v2 = vmul.f32 %v5475_v0, %v5702_v30  ;;  %v1580_v58 = vmul.f32 %v1577_v13, %v5526_v51  ;;  %s4717_s17 = sld [smem:[#allocation8 + $0x50]] }
 0x266   :  { %9028 = vst [vmem:[#allocation48_spill] sm:$0xff] %v5681_v23  ;;  %1526 = vrot.lane.b32.xlu1 %v1523_v63, %s4982_s6  ;;  %v9030_v23 = vrot.slane %v5645_v21, 2  ;;  %v335_v63 = vmul.f32 %v5475_v0, %v5688_v56 }
 0x267   :  { %9029 = vst [vmem:[#allocation49_spill] sm:$0xff] %v5683_v62  ;;  %v1546_v45 = vsel %vm323_vm8, %v1543_v18, %v1545_v14  ;;  %v1578_v18 = vmul.f32 %v1577_v13, %v5523_v41  ;;  %v360_v52 = vrot.slane %v353_v2, 5 }
 0x268   :  { %v308_v49 = vsel %vm8850_vm7, %v306_v60, %v9030_v23  ;;  %v5704_v5 = vpop.permute.xlu1 %995  ;;  %v1558_v60 = vmul.f32 %v1556_v50, %v5519_v34  ;;  %v9032_v23 = vrot.slane %v5672_v6, 3 }
 0x269   :  { %v313_v62 = vadd.f32 %v308_v49, %v295_v33  ;;  %9031 = vst [vmem:[#allocation50_spill] sm:$0xff] %v5704_v5  ;;  %v1559_v33 = vmul.f32 %v1556_v50, %v5526_v51  ;;  %v342_v49 = vrot.slane %v335_v63, 4 }
 0x26a   :  { %v326_v27 = vsel %vm323_vm8, %v324_v28, %v9032_v23  ;;  %v1579_v28 = vmul.f32 %v1577_v13, %v5519_v34  ;;  %v9035_v23 = vrot.slane %v5696_v4, 4 }
 0x26b   :  { %1528 = vrot.lane.b32.xlu2 %v1525_v43, %s4982_s6  ;;  %1547 = vrot.lane.b32.xlu0 %v1544_v55, %s4982_s6  ;;  %v331_v61 = vadd.f32 %v326_v27, %v313_v62  ;;  %v5736_v43 = vstv %s5690_s10  ;;  %v1564_v62 = vrot.slane %v1558_v60, 4  ;;  %v1566_v55 = vrot.slane %v1559_v33, 4  ;;  %s4718_s10 = sld [smem:[#allocation8 + $0x57]] }
 0x26c   :  { %v5742_v50 = vmul.f32 %v5613_v31, %v5736_v43  ;;  %v344_v27 = vsel %vm341_vm9, %v342_v49, %v9035_v23  ;;  %v1585_v60 = vrot.slane %v1579_v28, 5  ;;  %v1598_v33 = vstv %s5709_s16  ;;  %s4719_s16 = sld [smem:[#allocation8 + $0x5e]] }
 0x26d   :  { %v5729_v5 = vpop.permute.xlu2 %1093  ;;  %v5731_v3 = vpop.permute.xlu0 %1016  ;;  %v349_v14 = vadd.f32 %v344_v27, %v331_v61  ;;  %v1567_v24 = vsel %vm341_vm9, %v1564_v62, %v1566_v55  ;;  %v1600_v49 = vmul.f32 %v1598_v33, %v5519_v34  ;;  %v9036_v61 = vrot.slane %v5718_v15, 5 }
 0x26e   :  { %9033 = vst [vmem:[#allocation51_spill] sm:$0xff] %v5729_v5  ;;  %1549 = vrot.lane.b32.xlu1 %v1546_v45, %s4982_s6  ;;  %v371_v45 = vmul.f32 %v5475_v0, %v5736_v43  ;;  %v8848_v23 = vrot.slane %v5742_v50, 6  ;;  %v1584_v0 = vrot.slane %v1578_v18, 5  ;;  %v1601_v27 = vmul.f32 %v1598_v33, %v5526_v51 }
 0x26f   :  { %9034 = vst [vmem:[#allocation52_spill] sm:$0xff] %v5731_v3  ;;  %v1563_v3 = vrot.slane %v1557_v42, 4  ;;  %v362_v42 = vsel %vm359_vm10, %v360_v52, %v9036_v61  ;;  %v1587_v52 = vrot.slane %v1580_v58, 5 }
 0x270   :  { %v5748_v5 = vpop.permute.xlu1 %1018  ;;  %v367_v2 = vadd.f32 %v362_v42, %v349_v14  ;;  %v378_v28 = vrot.slane %v371_v45, 6  ;;  %v1586_v55 = vsel %vm359_vm10, %v1584_v0, %v1585_v60  ;;  %v1608_v61 = vrot.slane %v1601_v27, 6 }
 0x271   :  { %v1565_v63 = vsel %vm341_vm9, %v1563_v3, %v1564_v62  ;;  %v1599_v3 = vmul.f32 %v1598_v33, %v5523_v41  ;;  %v1588_v42 = vsel %vm359_vm10, %v1585_v60, %v1587_v52  ;;  %v1633_v33 = vstv %s4714_s19  ;;  %s5854_s19 = sld [smem:[#allocation8 + $0x35]] }
 0x272   :  { %v1619_v60 = vstv %s4713_s5  ;;  %v1634_v27 = vmul.f32 %v1633_v33, %v5523_v41  ;;  %s4721_s5 = sld [smem:[#allocation8 + $0x3c]] }
 0x273   :  { %1568 = vrot.lane.b32.xlu2 %v1565_v63, %s4982_s6  ;;  %1570 = vrot.lane.b32.xlu0 %v1567_v24, %s4982_s6  ;;  %v1606_v63 = vrot.slane %v1600_v49, 6  ;;  %v380_v24 = vsel %vm377_vm11, %v378_v28, %v8848_v23  ;;  %v1605_v45 = vrot.slane %v1599_v3, 6  ;;  %v1635_v3 = vmul.f32 %v1633_v33, %v5519_v34 }
 0x274   :  { %v385_v18 = vadd.f32 %v380_v24, %v367_v2  ;;  %v1621_v24 = vmul.f32 %v1619_v60, %v5519_v34 }
 0x275   :  { %v5764_v62 = vpop.permute.xlu2 %1116  ;;  %v5766_v13 = vpop.permute.xlu0 %1039  ;;  %v1607_v0 = vsel %vm377_vm11, %v1605_v45, %v1606_v63  ;;  %v1609_v2 = vsel %vm377_vm11, %v1606_v63, %v1608_v61  ;;  %v1654_v45 = vstv %s4715_s7  ;;  %v1636_v61 = vmul.f32 %v1633_v33, %v5526_v51  ;;  %s4722_s7 = sld [smem:[#allocation8 + $0x43]] }
 0x276   :  { %1589 = vrot.lane.b32.xlu1 %v1586_v55, %s4982_s6  ;;  %v399_v58 = vadd.f32 %v5307_v26, %v385_v18  ;;  %v1620_v26 = vmul.f32 %v1619_v60, %v5523_v41  ;;  %v1641_v18 = vrot.slane %v1635_v3, 1  ;;  %v1657_v33 = vmul.f32 %v1654_v45, %v5526_v51 }
 0x277   :  { %v1643_v60 = vrot.slane %v1636_v61, 1 }
 0x278   :  { %v5774_v14 = vpop.permute.xlu1 %1058  ;;  %v420_v55 = vadd.f32 %v5352_v12, %v399_v58  ;;  %v1656_v12 = vmul.f32 %v1654_v45, %v5519_v34  ;;  %v1655_v58 = vmul.f32 %v1654_v45, %v5523_v41 }
 0x27a   :  { %v441_v63 = vadd.f32 %v5319_v39, %v420_v55 }
 0x27b   :  { %1591 = vrot.lane.b32.xlu2 %v1588_v42, %s4982_s6  ;;  %1610 = vrot.lane.b32.xlu0 %v1607_v0, %s4982_s6  ;;  %v1640_v42 = vrot.slane %v1634_v27, 1 }
 0x27c   :  { %v462_v0 = vadd.f32 %v5371_v32, %v441_v63  ;;  %v1661_v32 = vrot.slane %v1655_v58, 2  ;;  %v1664_v63 = vrot.slane %v1657_v33, 2 }
 0x27d   :  { %v5781_v49 = vpop.permute.xlu2 %1156  ;;  %v5783_v28 = vpop.permute.xlu0 %1079  ;;  %v1642_v39 = vsel %vm287_vm6, %v1640_v42, %v1641_v18  ;;  %v1644_v42 = vsel %vm287_vm6, %v1641_v18, %v1643_v60 }
 0x27e   :  { %1612 = vrot.lane.b32.xlu1 %v1609_v2, %s4982_s6  ;;  %v483_v55 = vadd.f32 %v5383_v47, %v462_v0  ;;  %v1696_v0 = vstv %s4717_s17  ;;  %s4725_s17 = sld [smem:[#allocation8 + $0x58]] }
 0x27f   :  { %v1698_v18 = vmul.f32 %v1696_v0, %v5519_v34  ;;  %v1697_v60 = vmul.f32 %v1696_v0, %v5523_v41 }
 0x280   :  { %v5790_v52 = vpop.permute.xlu1 %1081 }
 0x283   :  { %1624 = vrot.lane.b32.xlu2 %v1620_v26, %s4983_s9  ;;  %1626 = vrot.lane.b32.xlu0 %v1621_v24, %s4983_s9  ;;  %v1662_v26 = vrot.slane %v1656_v12, 2  ;;  %v1675_v24 = vstv %s4716_s8  ;;  %s4724_s8 = sld [smem:[#allocation8 + $0x51]] }
 0x284   :  { %v1677_v23 = vmul.f32 %v1675_v24, %v5519_v34  ;;  %v1678_v47 = vmul.f32 %v1675_v24, %v5526_v51  ;;  %v1676_v12 = vmul.f32 %v1675_v24, %v5523_v41  ;;  %v1704_v24 = vrot.slane %v1698_v18, 4 }
 0x285   :  { %v5801_v2 = vpop.permute.xlu2 %1179  ;;  %v5803_v3 = vpop.permute.xlu0 %1095  ;;  %v1663_v45 = vsel %vm8850_vm7, %v1661_v32, %v1662_v26 }
 0x286   :  { %9037 = vst [vmem:[#allocation53_spill] sm:$0xff] %v5801_v2  ;;  %1645 = vrot.lane.b32.xlu1 %v1642_v39, %s4983_s9  ;;  %v504_v2 = vadd.f32 %v5350_v11, %v483_v55  ;;  %v1665_v11 = vsel %vm8850_vm7, %v1662_v26, %v1664_v63  ;;  %v1683_v33 = vrot.slane %v1677_v23, 3  ;;  %v1685_v55 = vrot.slane %v1678_v47, 3 }
 0x287   :  { %v1699_v63 = vmul.f32 %v1696_v0, %v5526_v51  ;;  %v1703_v23 = vrot.slane %v1697_v60, 4 }
 0x288   :  { %v5809_v27 = vpop.permute.xlu1 %1114  ;;  %v525_v61 = vadd.f32 %v5404_v10, %v504_v2  ;;  %v1682_v2 = vrot.slane %v1676_v12, 3  ;;  %v1686_v26 = vsel %vm323_vm8, %v1683_v33, %v1685_v55 }
 0x289   :  { %v1705_v18 = vsel %vm341_vm9, %v1703_v23, %v1704_v24  ;;  %v1706_v55 = vrot.slane %v1699_v63, 4 }
 0x28a   :  { %v539_v32 = vadd.f32 %v5317_v38, %v525_v61 }
 0x28b   :  { %1647 = vrot.lane.b32.xlu2 %v1644_v42, %s4983_s9  ;;  %1666 = vrot.lane.b32.xlu0 %v1663_v45, %s4983_s9  ;;  %v1717_v42 = vstv %s4718_s10  ;;  %v1684_v45 = vsel %vm323_vm8, %v1682_v2, %v1683_v33  ;;  %s4726_s10 = sld [smem:[#allocation8 + $0x5f]] }
 0x28c   :  { %v560_v38 = vadd.f32 %v5381_v44, %v539_v32  ;;  %v1718_v47 = vmul.f32 %v1717_v42, %v5523_v41  ;;  %v1720_v33 = vmul.f32 %v1717_v42, %v5526_v51 }
 0x28d   :  { %v5820_v58 = vpop.permute.xlu2 %1219  ;;  %v5822_v39 = vpop.permute.xlu0 %1135 }
 0x28e   :  { %1668 = vrot.lane.b32.xlu1 %v1665_v11, %s4983_s9  ;;  %v1719_v11 = vmul.f32 %v1717_v42, %v5519_v34  ;;  %v581_v0 = vadd.f32 %v5421_v35, %v560_v38  ;;  %v1727_v23 = vrot.slane %v1720_v33, 5  ;;  %v1738_v42 = vstv %s4719_s16  ;;  %s5980_s16 = sld [smem:[#allocation8 + $0x36]] }
 0x28f   :  { %v1707_v35 = vsel %vm341_vm9, %v1704_v24, %v1706_v55  ;;  %v1741_v38 = vmul.f32 %v1738_v42, %v5526_v51 }
 0x290   :  { %v5829_v10 = vpop.permute.xlu1 %1137  ;;  %v1725_v2 = vrot.slane %v1719_v11, 5  ;;  %v602_v60 = vadd.f32 %v5432_v54, %v581_v0  ;;  %v1740_v11 = vmul.f32 %v1738_v42, %v5519_v34 }
 0x292   :  { %v1728_v33 = vsel %vm359_vm10, %v1725_v2, %v1727_v23 }
 0x293   :  { %1687 = vrot.lane.b32.xlu2 %v1684_v45, %s4983_s9  ;;  %1689 = vrot.lane.b32.xlu0 %v1686_v26, %s4983_s9  ;;  %v5847_v45 = vld [vmem:[#allocation2 + $0x10] sm:$0x3f]  ;;  %v1724_v26 = vrot.slane %v1718_v47, 5  ;;  %v1739_v47 = vmul.f32 %v1738_v42, %v5523_v41 }
 0x294   :  { %v283_v44 = vmul.f32 %v5847_v45, %v5609_v16  ;;  %v623_v16 = vadd.f32 %v5413_v25, %v602_v60  ;;  %v301_v0 = vmul.f32 %v5847_v45, %v5638_v53  ;;  %v9039_v25 = vrot.slane %v5617_v59, 1 }
 0x295   :  { %v5839_v61 = vpop.permute.xlu2 %1346  ;;  %v5841_v12 = vpop.permute.xlu0 %1158  ;;  %v1726_v63 = vsel %vm359_vm10, %v1724_v26, %v1725_v2  ;;  %v1748_v26 = vrot.slane %v1741_v38, 6  ;;  %v9040_v2 = vstv %s5600_s15  ;;  %v319_v53 = vmul.f32 %v5847_v45, %v5648_v8  ;;  %s4723_s15 = sld [smem:[#allocation8 + $0x4a]] }
 0x296   :  { %9038 = vst [vmem:[#allocation54_spill] sm:$0xff] %v5839_v61  ;;  %1708 = vrot.lane.b32.xlu1 %v1705_v18, %s4983_s9  ;;  %v291_v54 = vrot.slane %v283_v44, 1  ;;  %v644_v55 = vadd.f32 %v5451_v20, %v623_v16  ;;  %v1746_v44 = vrot.slane %v1740_v11, 6  ;;  %v276_v23 = vmul.f32 %v5613_v31, %v9040_v2 }
 0x297   :  { %v1759_v20 = vstv %s5854_s19  ;;  %v1773_v16 = vstv %s4721_s5  ;;  %v309_v11 = vrot.slane %v301_v0, 2  ;;  %v337_v0 = vmul.f32 %v5847_v45, %v5688_v56  ;;  %s4728_s19 = sld [smem:[#allocation8 + $0x3d]] }
 0x298   :  { %v5852_v32 = vpop.permute.xlu1 %1177  ;;  %v292_v60 = vsel %vm287_vm6, %v9039_v25, %v291_v54  ;;  %v665_v42 = vadd.f32 %v5462_v40, %v644_v55  ;;  %v1749_v59 = vsel %vm377_vm11, %v1746_v44, %v1748_v26  ;;  %v1775_v54 = vmul.f32 %v1773_v16, %v5519_v34  ;;  %s4729_s5 = sld [smem:[#allocation8 + $0x44]] }
 0x299   :  { %v296_v40 = vadd.f32 %v292_v60, %v276_v23  ;;  %v1760_v31 = vmul.f32 %v1759_v20, %v5523_v41  ;;  %v1774_v8 = vmul.f32 %v1773_v16, %v5523_v41  ;;  %v1776_v26 = vmul.f32 %v1773_v16, %v5526_v51 }
 0x29a   :  { %v9042_v25 = vrot.slane %v5645_v21, 2  ;;  %v355_v2 = vmul.f32 %v5847_v45, %v5702_v30  ;;  %v345_v21 = vrot.slane %v337_v0, 4 }
 0x29b   :  { %1710 = vrot.lane.b32.xlu2 %v1707_v35, %s4983_s9  ;;  %1729 = vrot.lane.b32.xlu0 %v1726_v63, %s4983_s9  ;;  %v1745_v63 = vrot.slane %v1739_v47, 6  ;;  %v679_v47 = vadd.f32 %v5278_v57, %v665_v42  ;;  %v1781_v42 = vrot.slane %v1775_v54, 1  ;;  %v1780_v23 = vrot.slane %v1774_v8, 1 }
 0x29c   :  { %v310_v60 = vsel %vm8850_vm7, %v9042_v25, %v309_v11  ;;  %v1761_v11 = vmul.f32 %v1759_v20, %v5519_v34  ;;  %v363_v8 = vrot.slane %v355_v2, 5  ;;  %v373_v20 = vmul.f32 %v5847_v45, %v5736_v43 }
 0x29d   :  { %v5864_v18 = vpop.permute.xlu2 %1386  ;;  %v5866_v24 = vpop.permute.xlu0 %1198  ;;  %v1747_v38 = vsel %vm377_vm11, %v1745_v63, %v1746_v44  ;;  %v700_v57 = vadd.f32 %v5486_v22, %v679_v47  ;;  %v314_v63 = vadd.f32 %v310_v60, %v296_v40  ;;  %v1782_v54 = vsel %vm287_vm6, %v1780_v23, %v1781_v42 }
 0x29e   :  { %1731 = vrot.lane.b32.xlu1 %v1728_v33, %s4983_s9  ;;  %v327_v33 = vrot.slane %v319_v53, 3  ;;  %v1794_v53 = vstv %s4722_s7  ;;  %v9044_v25 = vrot.slane %v5696_v4, 4  ;;  %s4730_s7 = sld [smem:[#allocation8 + $0x4b]] }
 0x29f   :  { %v721_v22 = vadd.f32 %v5480_v7, %v700_v57  ;;  %v1796_v40 = vmul.f32 %v1794_v53, %v5519_v34  ;;  %v1797_v30 = vmul.f32 %v1794_v53, %v5526_v51 }
 0x2a0   :  { %v5877_v35 = vpop.permute.xlu1 %1200  ;;  %v346_v60 = vsel %vm341_vm9, %v9044_v25, %v345_v21 }
 0x2a1   :  { %v742_v57 = vadd.f32 %v5460_v37, %v721_v22  ;;  %v1804_v2 = vrot.slane %v1797_v30, 2 }
 0x2a3   :  { %1750 = vrot.lane.b32.xlu2 %v1747_v38, %s4983_s9  ;;  %1752 = vrot.lane.b32.xlu0 %v1749_v59, %s4983_s9  ;;  %v9043_v38 = vrot.slane %v5672_v6, 3  ;;  %v1783_v59 = vrot.slane %v1776_v26, 1  ;;  %v1795_v6 = vmul.f32 %v1794_v53, %v5523_v41  ;;  %v763_v45 = vadd.f32 %v5521_v36, %v742_v57 }
 0x2a5   :  { %v5895_v55 = vpop.permute.xlu2 %1409  ;;  %v5897_v44 = vpop.permute.xlu0 %1221  ;;  %v328_v16 = vsel %vm323_vm8, %v9043_v38, %v327_v33  ;;  %v1784_v0 = vsel %vm287_vm6, %v1781_v42, %v1783_v59  ;;  %v1801_v42 = vrot.slane %v1795_v6, 2  ;;  %v9046_v38 = vrot.slane %v5718_v15, 5 }
 0x2a6   :  { %9041 = vst [vmem:[#allocation55_spill] sm:$0xff] %v5895_v55  ;;  %1764 = vrot.lane.b32.xlu1 %v1760_v31, %s4985_s12  ;;  %v332_v47 = vadd.f32 %v328_v16, %v314_v63  ;;  %v1815_v31 = vstv %s4723_s15  ;;  %v1802_v63 = vrot.slane %v1796_v40, 2  ;;  %v381_v16 = vrot.slane %v373_v20, 6  ;;  %s4731_s15 = sld [smem:[#allocation8 + $0x52]] }
 0x2a7   :  { %v1817_v26 = vmul.f32 %v1815_v31, %v5519_v34  ;;  %v1816_v43 = vmul.f32 %v1815_v31, %v5523_v41  ;;  %v364_v4 = vsel %vm359_vm10, %v9046_v38, %v363_v8  ;;  %v1818_v22 = vmul.f32 %v1815_v31, %v5526_v51 }
 0x2a8   :  { %v5907_v56 = vpop.permute.xlu1 %1344  ;;  %v350_v23 = vadd.f32 %v346_v60, %v332_v47  ;;  %v1803_v37 = vsel %vm8850_vm7, %v1801_v42, %v1802_v63  ;;  %v1805_v59 = vsel %vm8850_vm7, %v1802_v63, %v1804_v2  ;;  %v784_v40 = vadd.f32 %v5515_v17, %v763_v45 }
 0x2a9   :  { %v1823_v21 = vrot.slane %v1817_v26, 3  ;;  %v1822_v15 = vrot.slane %v1816_v43, 3  ;;  %v9049_v20 = vrot.slane %v5742_v50, 6  ;;  %v1825_v26 = vrot.slane %v1818_v22, 3 }
 0x2aa   :  { %v368_v36 = vadd.f32 %v364_v4, %v350_v23  ;;  %v805_v60 = vadd.f32 %v5495_v48, %v784_v40  ;;  %v1857_v43 = vstv %s4725_s17  ;;  %v9051_v40 = vld [vmem:[#allocation15_spill] sm:$0xff]  ;;  %s4733_s17 = sld [smem:[#allocation8 + $0x60]] }
 0x2ab   :  { %1766 = vrot.lane.b32.xlu2 %v1761_v11, %s4985_s12  ;;  %1785 = vrot.lane.b32.xlu0 %v1782_v54, %s4985_s12  ;;  %v1836_v11 = vstv %s4724_s8  ;;  %v1824_v8 = vsel %vm323_vm8, %v1822_v15, %v1823_v21  ;;  %v1826_v45 = vsel %vm323_vm8, %v1823_v21, %v1825_v26  ;;  %v1859_v42 = vmul.f32 %v1857_v43, %v5519_v34  ;;  %s4732_s8 = sld [smem:[#allocation8 + $0x59]] }
 0x2ac   :  { %v1838_v54 = vmul.f32 %v1836_v11, %v5519_v34  ;;  %v1837_v30 = vmul.f32 %v1836_v11, %v5523_v41  ;;  %v1839_v31 = vmul.f32 %v1836_v11, %v5526_v51  ;;  %v1860_v38 = vmul.f32 %v1857_v43, %v5526_v51 }
 0x2ad   :  { %v5922_v33 = vpop.permute.xlu2 %1449  ;;  %v5924_v7 = vpop.permute.xlu0 %1365  ;;  %v819_v48 = vadd.f32 %v5325_v46, %v805_v60 }
 0x2ae   :  { %1787 = vrot.lane.b32.xlu1 %v1784_v0, %s4985_s12  ;;  %v382_v0 = vsel %vm377_vm11, %v9049_v20, %v381_v16  ;;  %v1844_v25 = vrot.slane %v1838_v54, 4  ;;  %v1843_v63 = vrot.slane %v1837_v30, 4  ;;  %v1846_v23 = vrot.slane %v1839_v31, 4  ;;  %v9052_v31 = vld [vmem:[#allocation30_spill] sm:$0xff] }
 0x2af   :  { %v386_v17 = vadd.f32 %v382_v0, %v368_v36  ;;  %v1878_v16 = vstv %s4726_s10  ;;  %v1865_v54 = vrot.slane %v1859_v42, 5  ;;  %v1867_v36 = vrot.slane %v1860_v38, 5  ;;  %v9058_v38 = vld [vmem:[#allocation40_spill] sm:$0xff]  ;;  %s4735_s10 = sld [smem:[#allocation8 + $0x3e]] }
 0x2b0   :  { %v5935_v53 = vpop.permute.xlu1 %1367  ;;  %v1845_v50 = vsel %vm341_vm9, %v1843_v63, %v1844_v25  ;;  %v1880_v22 = vmul.f32 %v1878_v16, %v5519_v34  ;;  %v1879_v46 = vmul.f32 %v1878_v16, %v5523_v41  ;;  %v1881_v26 = vmul.f32 %v1878_v16, %v5526_v51  ;;  %v9054_v63 = vld [vmem:[#allocation38_spill] sm:$0xff] }
 0x2b1   :  { %9045 = vst [vmem:[#allocation56_spill] sm:$0xff] %v5935_v53  ;;  %v400_v2 = vadd.f32 %v5291_v9, %v386_v17  ;;  %v1858_v9 = vmul.f32 %v1857_v43, %v5523_v41 }
 0x2b2   :  { %v1885_v60 = vrot.slane %v1879_v46, 6 }
 0x2b3   :  { %1806 = vrot.lane.b32.xlu2 %v1803_v37, %s4985_s12  ;;  %1808 = vrot.lane.b32.xlu0 %v1805_v59, %s4985_s12  ;;  %v421_v4 = vadd.f32 %v5358_v19, %v400_v2  ;;  %v1847_v59 = vsel %vm341_vm9, %v1844_v25, %v1846_v23  ;;  %v840_v19 = vadd.f32 %v5552_v1, %v819_v48  ;;  %v9053_v25 = vld [vmem:[#allocation18_spill] sm:$0xff]  ;;  %v9055_v23 = vld [vmem:[#allocation20_spill] sm:$0xff]  ;;  %v1888_v48 = vrot.slane %v1881_v26, 6 }
 0x2b4   :  { %v1868_v1 = vsel %vm359_vm10, %v1865_v54, %v1867_v36  ;;  %v9062_v26 = vld [vmem:[#allocation16_spill] sm:$0xff] }
 0x2b5   :  { %v5948_v47 = vpop.permute.xlu2 %1472  ;;  %v5950_v6 = vpop.permute.xlu0 %1388  ;;  %v442_v11 = vadd.f32 %v5367_v29, %v421_v4  ;;  %v1864_v29 = vrot.slane %v1858_v9, 5  ;;  %v861_v20 = vadd.f32 %v9052_v31, %v840_v19  ;;  %v1899_v9 = vstv %s5980_s16  ;;  %s6095_s16 = sld [smem:[#allocation8 + $0x37]] }
 0x2b6   :  { %9047 = vst [vmem:[#allocation57_spill] sm:$0xff] %v5948_v47  ;;  %1827 = vrot.lane.b32.xlu1 %v1824_v8, %s4985_s12  ;;  %v1886_v8 = vrot.slane %v1880_v22, 6  ;;  %v1900_v22 = vmul.f32 %v1899_v9, %v5523_v41  ;;  %v1913_v19 = vstv %s4728_s19  ;;  %s6098_s19 = sld [smem:[#allocation8 + $0x31]] }
 0x2b7   :  { %9048 = vst [vmem:[#allocation58_spill] sm:$0xff] %v5950_v6  ;;  %v463_v30 = vadd.f32 %v9051_v40, %v442_v11  ;;  %v1866_v0 = vsel %vm359_vm10, %v1864_v29, %v1865_v54  ;;  %v882_v2 = vadd.f32 %v9054_v63, %v861_v20  ;;  %v9059_v11 = vld [vmem:[#allocation17_spill] sm:$0xff]  ;;  %v9060_v54 = vld [vmem:[#allocation34_spill] sm:$0xff]  ;;  %v1915_v29 = vmul.f32 %v1913_v19, %v5519_v34 }
 0x2b8   :  { %v5959_v57 = vpop.permute.xlu1 %1407  ;;  %v1887_v42 = vsel %vm377_vm11, %v1885_v60, %v1886_v8  ;;  %v1889_v46 = vsel %vm377_vm11, %v1886_v8, %v1888_v48  ;;  %v1916_v40 = vmul.f32 %v1913_v19, %v5526_v51  ;;  %v1901_v20 = vmul.f32 %v1899_v9, %v5519_v34  ;;  %v9063_v63 = vld [vmem:[#allocation46_spill] sm:$0xff] }
 0x2b9   :  { %v484_v17 = vadd.f32 %v9053_v25, %v463_v30  ;;  %v903_v4 = vadd.f32 %v9058_v38, %v882_v2  ;;  %v9061_v30 = vld [vmem:[#allocation44_spill] sm:$0xff] }
 0x2bb   :  { %1829 = vrot.lane.b32.xlu2 %v1826_v45, %s4985_s12  ;;  %1848 = vrot.lane.b32.xlu0 %v1845_v50, %s4985_s12  ;;  %v505_v43 = vadd.f32 %v9055_v23, %v484_v17  ;;  %v924_v36 = vadd.f32 %v9060_v54, %v903_v4  ;;  %v1921_v23 = vrot.slane %v1915_v29, 1 }
 0x2bd   :  { %v5972_v21 = vpop.permute.xlu2 %1505  ;;  %v5974_v37 = vpop.permute.xlu0 %1428  ;;  %v945_v31 = vadd.f32 %v9061_v30, %v924_v36 }
 0x2be   :  { %1850 = vrot.lane.b32.xlu1 %v1847_v59, %s4985_s12  ;;  %v526_v59 = vadd.f32 %v9059_v11, %v505_v43  ;;  %v1923_v43 = vrot.slane %v1916_v40, 1  ;;  %v9067_v40 = vld [vmem:[#allocation19_spill] sm:$0xff] }
 0x2bf   :  { %v959_v2 = vadd.f32 %v9063_v63, %v945_v31  ;;  %v9068_v31 = vld [vmem:[#allocation50_spill] sm:$0xff] }
 0x2c0   :  { %v5983_v15 = vpop.permute.xlu1 %1430  ;;  %v540_v25 = vadd.f32 %v9062_v26, %v526_v59  ;;  %v1924_v36 = vsel %vm287_vm6, %v1921_v23, %v1923_v43  ;;  %v9072_v43 = vld [vmem:[#allocation52_spill] sm:$0xff] }
 0x2c1   :  { %9050 = vst [vmem:[#allocation59_spill] sm:$0xff] %v5983_v15 }
 0x2c3   :  { %1869 = vrot.lane.b32.xlu2 %v1866_v0, %s4985_s12  ;;  %1871 = vrot.lane.b32.xlu0 %v1868_v1, %s4985_s12  ;;  %v1914_v0 = vmul.f32 %v1913_v19, %v5523_v41  ;;  %v1934_v1 = vstv %s4729_s5  ;;  %v9066_v19 = vld [vmem:[#allocation39_spill] sm:$0xff]  ;;  %s4693_s5 = sld [smem:[#allocation8 + $0x38]] }
 0x2c4   :  { %v1936_v60 = vmul.f32 %v1934_v1, %v5519_v34  ;;  %v1935_v4 = vmul.f32 %v1934_v1, %v5523_v41  ;;  %v1937_v59 = vmul.f32 %v1934_v1, %v5526_v51  ;;  %v980_v34 = vadd.f32 %v9066_v19, %v959_v2  ;;  %v9069_v1 = vld [vmem:[#allocation23_spill] sm:$0xff] }
 0x2c5   :  { %v5995_v45 = vpop.permute.xlu2 %1528  ;;  %v5997_v50 = vpop.permute.xlu0 %1451  ;;  %v1920_v9 = vrot.slane %v1914_v0, 1  ;;  %v6048_v2 = vld [vmem:[#allocation2 + $0x28] sm:$0x3f] }
 0x2c6   :  { %9056 = vst [vmem:[#allocation15_spill] sm:$0xff] %v5995_v45  ;;  %1890 = vrot.lane.b32.xlu1 %v1887_v42, %s4985_s12  ;;  %v9064_v42 = vld [vmem:[#allocation21_spill] sm:$0xff]  ;;  %v1942_v11 = vrot.slane %v1936_v60, 2  ;;  %v1941_v30 = vrot.slane %v1935_v4, 2  ;;  %v1001_v51 = vadd.f32 %v9068_v31, %v980_v34 }
 0x2c7   :  { %9057 = vst [vmem:[#allocation30_spill] sm:$0xff] %v5997_v50  ;;  %v561_v38 = vadd.f32 %v9064_v42, %v540_v25  ;;  %v1922_v54 = vsel %vm287_vm6, %v1920_v9, %v1921_v23  ;;  %v9073_v9 = vld [vmem:[#allocation25_spill] sm:$0xff] }
 0x2c8   :  { %v6003_v16 = vpop.permute.xlu1 %1470  ;;  %v1943_v63 = vsel %vm8850_vm7, %v1941_v30, %v1942_v11  ;;  %v1022_v42 = vadd.f32 %v9072_v43, %v1001_v51  ;;  %v9074_v30 = vld [vmem:[#allocation45_spill] sm:$0xff] }
 0x2c9   :  { %v582_v41 = vadd.f32 %v9067_v40, %v561_v38  ;;  %v1944_v38 = vrot.slane %v1937_v59, 2  ;;  %v9075_v59 = vld [vmem:[#allocation22_spill] sm:$0xff] }
 0x2ca   :  { %v1043_v31 = vadd.f32 %v9074_v30, %v1022_v42 }
 0x2cb   :  { %1892 = vrot.lane.b32.xlu2 %v1889_v46, %s4985_s12  ;;  %1904 = vrot.lane.b32.xlu0 %v1900_v22, %s4986_s14  ;;  %v1955_v22 = vstv %s4730_s7  ;;  %v6032_v46 = vld [vmem:[#allocation2 + $0x20] sm:$0xff]  ;;  %v603_v26 = vadd.f32 %v9069_v1, %v582_v41  ;;  %s4694_s7 = sld [smem:[#allocation8 + $0x3f]] }
 0x2cc   :  { %v1957_v29 = vmul.f32 %v6032_v46, %v1955_v22  ;;  %v1958_v23 = vmul.f32 %v6048_v2, %v1955_v22 }
 0x2cd   :  { %v6017_v17 = vpop.permute.xlu2 %1568  ;;  %v6019_v8 = vpop.permute.xlu0 %1484  ;;  %v624_v19 = vadd.f32 %v9073_v9, %v603_v26 }
 0x2ce   :  { %1906 = vrot.lane.b32.xlu1 %v1901_v20, %s4986_s14  ;;  %v6039_v20 = vld [vmem:[#allocation2 + $0x18] sm:$0xff]  ;;  %v1963_v4 = vrot.slane %v1957_v29, 3  ;;  %v1965_v40 = vrot.slane %v1958_v23, 3 }
 0x2cf   :  { %v1956_v0 = vmul.f32 %v6039_v20, %v1955_v22  ;;  %v1945_v22 = vsel %vm8850_vm7, %v1942_v11, %v1944_v38  ;;  %v645_v29 = vadd.f32 %v9075_v59, %v624_v19  ;;  %v9076_v23 = vld [vmem:[#allocation26_spill] sm:$0xff] }
 0x2d0   :  { %v6026_v48 = vpop.permute.xlu1 %1486  ;;  %v1966_v38 = vsel %vm323_vm8, %v1963_v4, %v1965_v40 }
 0x2d1   :  { %9065 = vst [vmem:[#allocation18_spill] sm:$0xff] %v6026_v48  ;;  %v666_v43 = vadd.f32 %v9076_v23, %v645_v29  ;;  %v2018_v23 = vstv %s4733_s17  ;;  %s6136_s17 = sld [smem:[#allocation8 + $0x4c]] }
 0x2d3   :  { %1925 = vrot.lane.b32.xlu2 %v1922_v54, %s4986_s14  ;;  %1927 = vrot.lane.b32.xlu0 %v1924_v36, %s4986_s14  ;;  %v1962_v54 = vrot.slane %v1956_v0, 3  ;;  %v1976_v36 = vstv %s4731_s15  ;;  %v1064_v0 = vadd.f32 %v5774_v14, %v1043_v31  ;;  %s4736_s15 = sld [smem:[#allocation8 + $0x45]] }
 0x2d4   :  { %v1978_v41 = vmul.f32 %v6032_v46, %v1976_v36  ;;  %v1979_v1 = vmul.f32 %v6048_v2, %v1976_v36  ;;  %v1977_v26 = vmul.f32 %v6039_v20, %v1976_v36 }
 0x2d5   :  { %v6043_v25 = vpop.permute.xlu2 %1591  ;;  %v6045_v60 = vpop.permute.xlu0 %1507  ;;  %v1964_v51 = vsel %vm323_vm8, %v1962_v54, %v1963_v4  ;;  %v1085_v19 = vadd.f32 %v5783_v28, %v1064_v0  ;;  %v9079_v4 = vld [vmem:[#allocation51_spill] sm:$0xff] }
 0x2d6   :  { %9070 = vst [vmem:[#allocation38_spill] sm:$0xff] %v6043_v25  ;;  %1946 = vrot.lane.b32.xlu1 %v1943_v63, %s4986_s14  ;;  %v1997_v63 = vstv %s4732_s8  ;;  %v1984_v54 = vrot.slane %v1978_v41, 4  ;;  %v1986_v30 = vrot.slane %v1979_v1, 4  ;;  %v1983_v31 = vrot.slane %v1977_v26, 4  ;;  %s6123_s8 = sld [smem:[#allocation8 + $0x46]] }
 0x2d7   :  { %9071 = vst [vmem:[#allocation20_spill] sm:$0xff] %v6045_v60  ;;  %v1999_v9 = vmul.f32 %v6032_v46, %v1997_v63  ;;  %v1998_v14 = vmul.f32 %v6039_v20, %v1997_v63  ;;  %v2000_v29 = vmul.f32 %v6048_v2, %v1997_v63  ;;  %v1099_v40 = vadd.f32 %v9079_v4, %v1085_v19  ;;  %v9080_v63 = vld [vmem:[#allocation24_spill] sm:$0xff] }
 0x2d8   :  { %v6054_v34 = vpop.permute.xlu1 %1526  ;;  %v1985_v25 = vsel %vm341_vm9, %v1983_v31, %v1984_v54  ;;  %v1987_v28 = vsel %vm341_vm9, %v1984_v54, %v1986_v30  ;;  %v2020_v41 = vmul.f32 %v6032_v46, %v2018_v23  ;;  %v2019_v26 = vmul.f32 %v6039_v20, %v2018_v23 }
 0x2d9   :  { %v2005_v59 = vrot.slane %v1999_v9, 5  ;;  %v2004_v1 = vrot.slane %v1998_v14, 5  ;;  %v1120_v0 = vadd.f32 %v5809_v27, %v1099_v40  ;;  %v2021_v54 = vmul.f32 %v6048_v2, %v2018_v23  ;;  %v9083_v14 = vld [vmem:[#allocation29_spill] sm:$0xff] }
 0x2da   :  { %v2007_v27 = vrot.slane %v2000_v29, 5  ;;  %v2026_v30 = vrot.slane %v2020_v41, 6  ;;  %v2053_v41 = vstv %s4735_s10  ;;  %s6143_s10 = sld [smem:[#allocation8 + $0x4d]] }
 0x2db   :  { %1948 = vrot.lane.b32.xlu2 %v1945_v22, %s4986_s14  ;;  %1967 = vrot.lane.b32.xlu0 %v1964_v51, %s4986_s14  ;;  %v9078_v22 = vld [vmem:[#allocation14_spill] sm:$0xff]  ;;  %v2006_v19 = vsel %vm359_vm10, %v2004_v1, %v2005_v59  ;;  %v2028_v4 = vrot.slane %v2021_v54, 6 }
 0x2dc   :  { %v680_v51 = vadd.f32 %v9078_v22, %v666_v43  ;;  %v6173_v45 = vstv %s6123_s8  ;;  %s6237_s8 = sld [smem:[#allocation8 + $0x61]] }
 0x2dd   :  { %v6067_v42 = vpop.permute.xlu2 %1624  ;;  %v6069_v11 = vpop.permute.xlu0 %1547 }
 0x2de   :  { %1969 = vrot.lane.b32.xlu1 %v1966_v38, %s4986_s14  ;;  %v701_v43 = vadd.f32 %v9080_v63, %v680_v51  ;;  %v2025_v51 = vrot.slane %v2019_v26, 6  ;;  %v2039_v63 = vstv %s6095_s16  ;;  %s6149_s16 = sld [smem:[#allocation8 + $0x54]] }
 0x2e0   :  { %v6076_v36 = vpop.permute.xlu1 %1549  ;;  %v722_v31 = vadd.f32 %v9083_v14, %v701_v43  ;;  %v2027_v40 = vsel %vm377_vm11, %v2025_v51, %v2026_v30  ;;  %v9088_v51 = vld [vmem:[#allocation33_spill] sm:$0xff] }
 0x2e1   :  { %9077 = vst [vmem:[#allocation40_spill] sm:$0xff] %v6076_v36 }
 0x2e3   :  { %1988 = vrot.lane.b32.xlu2 %v1985_v25, %s4986_s14  ;;  %1990 = vrot.lane.b32.xlu0 %v1987_v28, %s4986_s14  ;;  %v1141_v25 = vadd.f32 %v5822_v39, %v1120_v0  ;;  %v2008_v39 = vsel %vm359_vm10, %v2005_v59, %v2007_v27  ;;  %v9084_v28 = vld [vmem:[#allocation28_spill] sm:$0xff]  ;;  %v2055_v59 = vmul.f32 %v6032_v46, %v2053_v41  ;;  %v8849_v27 = vstv %s6098_s19 }
 0x2e4   :  { %v743_v1 = vadd.f32 %v9084_v28, %v722_v31  ;;  %v6200_v60 = vstv %s6149_s16  ;;  %s6678_s16 = sld [smem:[#allocation8 + $0xa]] }
 0x2e5   :  { %v6089_v38 = vpop.permute.xlu2 %1647  ;;  %v6091_v9 = vpop.permute.xlu0 %1570  ;;  %v1162_v23 = vadd.f32 %v5781_v49, %v1141_v25  ;;  %v2029_v49 = vsel %vm377_vm11, %v2026_v30, %v2028_v4  ;;  %v6121_v25 = vstv %s4693_s5  ;;  %v6131_v30 = vstv %s4694_s7  ;;  %s6162_s5 = sld [smem:[#allocation8 + $0x53]] }
 0x2e6   :  { %9081 = vst [vmem:[#allocation17_spill] sm:$0xff] %v6089_v38  ;;  %2009 = vrot.lane.b32.xlu1 %v2006_v19, %s4986_s14  ;;  %v9086_v19 = vld [vmem:[#allocation27_spill] sm:$0xff]  ;;  %v6129_v14 = vmul.f32 %v6032_v46, %v6121_v25  ;;  %v1238_v28 = vmul.f32 %v6039_v20, %v6121_v25  ;;  %s6182_s7 = sld [smem:[#allocation8 + $0x5a]] }
 0x2e7   :  { %9082 = vst [vmem:[#allocation34_spill] sm:$0xff] %v6091_v9  ;;  %v1183_v29 = vadd.f32 %v5852_v32, %v1162_v23  ;;  %v764_v54 = vadd.f32 %v9086_v19, %v743_v1  ;;  %v2054_v32 = vmul.f32 %v6039_v20, %v2053_v41  ;;  %v2041_v23 = vmul.f32 %v6032_v46, %v2039_v63 }
 0x2e8   :  { %v6102_v22 = vpop.permute.xlu1 %1589  ;;  %v1255_v19 = vmul.f32 %v6039_v20, %v6131_v30 }
 0x2e9   :  { %v1204_v43 = vadd.f32 %v5866_v24, %v1183_v29  ;;  %v2040_v24 = vmul.f32 %v6039_v20, %v2039_v63  ;;  %v785_v4 = vadd.f32 %v9088_v51, %v764_v54  ;;  %v2056_v29 = vmul.f32 %v6048_v2, %v2053_v41  ;;  %v9089_v54 = vld [vmem:[#allocation32_spill] sm:$0xff] }
 0x2ea   :  { %v2060_v63 = vrot.slane %v2054_v32, 1  ;;  %v6159_v41 = vmul.f32 %v6032_v46, %v6131_v30  ;;  %v1261_v36 = vrot.slane %v1255_v19, 2 }
 0x2eb   :  { %2011 = vrot.lane.b32.xlu2 %v2008_v39, %s4986_s14  ;;  %2030 = vrot.lane.b32.xlu0 %v2027_v40, %s4986_s14  ;;  %v2061_v39 = vrot.slane %v2055_v59, 1  ;;  %v2074_v40 = vstv %s4736_s15  ;;  %v1225_v1 = vadd.f32 %v5820_v58, %v1204_v43  ;;  %v1232_v59 = vmul.f32 %v6039_v20, %v8849_v27  ;;  %s6202_s15 = sld [smem:[#allocation8 + $0x5b]] }
 0x2ec   :  { %v2075_v43 = vmul.f32 %v6039_v20, %v2074_v40  ;;  %v806_v51 = vadd.f32 %v9089_v54, %v785_v4  ;;  %v2077_v27 = vmul.f32 %v6048_v2, %v2074_v40  ;;  %v1244_v58 = vrot.slane %v1238_v28, 1 }
 0x2ed   :  { %v6111_v0 = vpop.permute.xlu2 %1687  ;;  %v6113_v26 = vpop.permute.xlu0 %1610  ;;  %v1234_v38 = vadd.f32 %v1232_v59, %v1225_v1  ;;  %v9092_v4 = vrot.slane %v6129_v14, 1  ;;  %v2095_v28 = vstv %s6136_s17  ;;  %v9093_v1 = vld [vmem:[#allocation13_spill] sm:$0xff]  ;;  %s4761_s17 = sld [smem:[#allocation8 + $0x25]] }
 0x2ee   :  { %9085 = vst [vmem:[#allocation44_spill] sm:$0xff] %v6111_v0  ;;  %2032 = vrot.lane.b32.xlu1 %v2029_v49, %s4986_s14  ;;  %v2076_v49 = vmul.f32 %v6032_v46, %v2074_v40  ;;  %v2081_v40 = vrot.slane %v2075_v43, 2  ;;  %v2084_v19 = vrot.slane %v2077_v27, 2  ;;  %v2097_v59 = vmul.f32 %v6032_v46, %v2095_v28 }
 0x2ef   :  { %v1246_v54 = vsel %vm287_vm6, %v1244_v58, %v9092_v4  ;;  %v2098_v43 = vmul.f32 %v6048_v2, %v2095_v28 }
 0x2f0   :  { %v6133_v31 = vpop.permute.xlu1 %1612  ;;  %v2082_v9 = vrot.slane %v2076_v49, 2  ;;  %v6187_v49 = vmul.f32 %v6032_v46, %v6173_v45  ;;  %v1251_v58 = vadd.f32 %v1246_v54, %v1234_v38  ;;  %v9095_v38 = vrot.slane %v6159_v41, 2  ;;  %v9096_v54 = vld [vmem:[#allocation37_spill] sm:$0xff] }
 0x2f1   :  { %9087 = vst [vmem:[#allocation16_spill] sm:$0xff] %v6133_v31  ;;  %v2063_v31 = vrot.slane %v2056_v29, 1  ;;  %v820_v29 = vadd.f32 %v9093_v1, %v806_v51  ;;  %v1272_v51 = vmul.f32 %v6039_v20, %v6173_v45  ;;  %v6197_v1 = vstv %s6143_s10  ;;  %s6676_s10 = sld [smem:[#allocation8 + $0x2c]] }
 0x2f2   :  { %v2083_v4 = vsel %vm8850_vm7, %v2081_v40, %v2082_v9  ;;  %v1263_v27 = vsel %vm8850_vm7, %v1261_v36, %v9095_v38  ;;  %v2103_v47 = vrot.slane %v2097_v59, 3  ;;  %v2105_v50 = vrot.slane %v2098_v43, 3  ;;  %v9100_v43 = vld [vmem:[#allocation31_spill] sm:$0xff] }
 0x2f3   :  { %2044 = vrot.lane.b32.xlu2 %v2040_v24, %s4987_s13  ;;  %2046 = vrot.lane.b32.xlu0 %v2041_v23, %s4987_s13  ;;  %v2062_v23 = vsel %vm287_vm6, %v2060_v63, %v2061_v39  ;;  %v1268_v38 = vadd.f32 %v1263_v27, %v1251_v58  ;;  %v2137_v58 = vstv %s6182_s7  ;;  %v9101_v27 = vrot.slane %v6187_v49, 3  ;;  %s6682_s7 = sld [smem:[#allocation8 + $0x11]] }
 0x2f4   :  { %v2106_v61 = vsel %vm323_vm8, %v2103_v47, %v2105_v50  ;;  %v9103_v50 = vld [vmem:[#allocation43_spill] sm:$0xff] }
 0x2f5   :  { %v6165_v24 = vpop.permute.xlu2 %1710  ;;  %v6167_v32 = vpop.permute.xlu0 %1626 }
 0x2f6   :  { %9090 = vst [vmem:[#allocation46_spill] sm:$0xff] %v6165_v24  ;;  %2065 = vrot.lane.b32.xlu1 %v2062_v23, %s4987_s13  ;;  %v2064_v23 = vsel %vm287_vm6, %v2061_v39, %v2063_v31  ;;  %v9094_v24 = vld [vmem:[#allocation35_spill] sm:$0xff]  ;;  %v6211_v31 = vmul.f32 %v6032_v46, %v6197_v1  ;;  %v2096_v39 = vmul.f32 %v6039_v20, %v2095_v28  ;;  %v1278_v28 = vrot.slane %v1272_v51, 3 }
 0x2f7   :  { %9091 = vst [vmem:[#allocation21_spill] sm:$0xff] %v6167_v32  ;;  %v841_v32 = vadd.f32 %v9094_v24, %v820_v29  ;;  %v2116_v24 = vstv %s6162_s5  ;;  %s6680_s5 = sld [smem:[#allocation8 + $0x18]] }
 0x2f8   :  { %v6179_v63 = vpop.permute.xlu1 %1645  ;;  %v2118_v36 = vmul.f32 %v6032_v46, %v2116_v24  ;;  %v2117_v29 = vmul.f32 %v6039_v20, %v2116_v24  ;;  %v2102_v59 = vrot.slane %v2096_v39, 3  ;;  %v2119_v15 = vmul.f32 %v6048_v2, %v2116_v24  ;;  %v9102_v39 = vld [vmem:[#allocation41_spill] sm:$0xff] }
 0x2f9   :  { %v862_v40 = vadd.f32 %v9096_v54, %v841_v32  ;;  %v1289_v32 = vmul.f32 %v6039_v20, %v6197_v1  ;;  %v1306_v54 = vmul.f32 %v6039_v20, %v6200_v60 }
 0x2fa   :  { %v2124_v55 = vrot.slane %v2118_v36, 4  ;;  %v2104_v53 = vsel %vm323_vm8, %v2102_v59, %v2103_v47  ;;  %v2138_v47 = vmul.f32 %v6039_v20, %v2137_v58  ;;  %v9107_v36 = vld [vmem:[#allocation36_spill] sm:$0xff] }
 0x2fb   :  { %2067 = vrot.lane.b32.xlu2 %v2064_v23, %s4987_s13  ;;  %2086 = vrot.lane.b32.xlu0 %v2083_v4, %s4987_s13  ;;  %v2085_v4 = vsel %vm8850_vm7, %v2082_v9, %v2084_v19  ;;  %v6232_v9 = vmul.f32 %v6032_v46, %v6200_v60  ;;  %v883_v51 = vadd.f32 %v9100_v43, %v862_v40  ;;  %v1295_v0 = vrot.slane %v1289_v32, 4 }
 0x2fc   :  { %v2123_v40 = vrot.slane %v2117_v29, 4  ;;  %v2140_v29 = vmul.f32 %v6048_v2, %v2137_v58 }
 0x2fd   :  { %v6217_v48 = vpop.permute.xlu2 %1750  ;;  %v6219_v23 = vpop.permute.xlu0 %1666 }
 0x2fe   :  { %9097 = vst [vmem:[#allocation39_spill] sm:$0xff] %v6217_v48  ;;  %2088 = vrot.lane.b32.xlu1 %v2085_v4, %s4987_s13  ;;  %v1280_v4 = vsel %vm323_vm8, %v1278_v28, %v9101_v27  ;;  %v904_v48 = vadd.f32 %v9102_v39, %v883_v51  ;;  %v9104_v28 = vrot.slane %v6211_v31, 4  ;;  %v2126_v51 = vrot.slane %v2119_v15, 4  ;;  %v9109_v39 = vld [vmem:[#allocation47_spill] sm:$0xff] }
 0x2ff   :  { %9098 = vst [vmem:[#allocation19_spill] sm:$0xff] %v6219_v23  ;;  %v1285_v6 = vadd.f32 %v1280_v4, %v1268_v38  ;;  %v6249_v23 = vstv %s6202_s15  ;;  %v1312_v4 = vrot.slane %v1306_v54, 5  ;;  %s6684_s15 = sld [smem:[#allocation8 + $0x1f]] }
 0x300   :  { %v6234_v19 = vpop.permute.xlu1 %1668  ;;  %v6256_v24 = vmul.f32 %v6032_v46, %v6249_v23  ;;  %v925_v38 = vadd.f32 %v9103_v50, %v904_v48  ;;  %v1297_v32 = vsel %vm341_vm9, %v1295_v0, %v9104_v28  ;;  %v1323_v48 = vmul.f32 %v6039_v20, %v6249_v23 }
 0x301   :  { %9099 = vst [vmem:[#allocation50_spill] sm:$0xff] %v6234_v19  ;;  %v2139_v19 = vmul.f32 %v6032_v46, %v2137_v58  ;;  %v1302_v43 = vadd.f32 %v1297_v32, %v1285_v6  ;;  %v2144_v50 = vrot.slane %v2138_v47, 5  ;;  %v2158_v28 = vstv %s6237_s8  ;;  %s6686_s8 = sld [smem:[#allocation8 + $0x2d]] }
 0x302   :  { %v2147_v58 = vrot.slane %v2140_v29, 5  ;;  %v2160_v15 = vmul.f32 %v6032_v46, %v2158_v28  ;;  %v2127_v54 = vsel %vm341_vm9, %v2124_v55, %v2126_v51  ;;  %v1329_v47 = vrot.slane %v1323_v48, 6 }
 0x303   :  { %2107 = vrot.lane.b32.xlu2 %v2104_v53, %s4987_s13  ;;  %2109 = vrot.lane.b32.xlu0 %v2106_v61, %s4987_s13  ;;  %v2125_v61 = vsel %vm341_vm9, %v2123_v40, %v2124_v55  ;;  %v2145_v27 = vrot.slane %v2139_v19, 5  ;;  %v9108_v40 = vrot.slane %v6232_v9, 5 }
 0x304   :  { %v2166_v48 = vrot.slane %v2160_v15, 6 }
 0x305   :  { %v6263_v59 = vpop.permute.xlu2 %1766  ;;  %v6265_v53 = vpop.permute.xlu0 %1689  ;;  %v1314_v6 = vsel %vm359_vm10, %v1312_v4, %v9108_v40  ;;  %v2146_v32 = vsel %vm359_vm10, %v2144_v50, %v2145_v27  ;;  %v9111_v4 = vrot.slane %v6256_v24, 6  ;;  %v2148_v50 = vsel %vm359_vm10, %v2145_v27, %v2147_v58 }
 0x306   :  { %9105 = vst [vmem:[#allocation23_spill] sm:$0xff] %v6263_v59  ;;  %2128 = vrot.lane.b32.xlu1 %v2125_v61, %s4987_s13  ;;  %v946_v59 = vadd.f32 %v9107_v36, %v925_v38  ;;  %v1319_v19 = vadd.f32 %v1314_v6, %v1302_v43  ;;  %v2161_v61 = vmul.f32 %v6048_v2, %v2158_v28  ;;  %v9110_v38 = vld [vmem:[#allocation49_spill] sm:$0xff] }
 0x307   :  { %9106 = vst [vmem:[#allocation52_spill] sm:$0xff] %v6265_v53  ;;  %v2159_v36 = vmul.f32 %v6039_v20, %v2158_v28  ;;  %v1331_v43 = vsel %vm377_vm11, %v1329_v47, %v9111_v4  ;;  %v9112_v28 = vld [vmem:[#allocation42_spill] sm:$0xff] }
 0x308   :  { %v6273_v0 = vpop.permute.xlu1 %1708  ;;  %v960_v53 = vadd.f32 %v9109_v39, %v946_v59  ;;  %v1336_v59 = vadd.f32 %v1331_v43, %v1319_v19  ;;  %v2168_v39 = vrot.slane %v2161_v61, 6 }
 0x309   :  { %v2165_v20 = vrot.slane %v2159_v36, 6 }
 0x30a   :  { %v981_v29 = vadd.f32 %v9110_v38, %v960_v53  ;;  %v1350_v6 = vadd.f32 %v5907_v56, %v1336_v59  ;;  %v9113_v56 = vld [vmem:[#allocation48_spill] sm:$0xff] }
 0x30b   :  { %2130 = vrot.lane.b32.xlu2 %v2127_v54, %s4987_s13  ;;  %2149 = vrot.lane.b32.xlu0 %v2146_v32, %s4987_s13  ;;  %v2167_v54 = vsel %vm377_vm11, %v2165_v20, %v2166_v48  ;;  %v2169_v32 = vsel %vm377_vm11, %v2166_v48, %v2168_v39 }
 0x30c   :  { %v1002_v53 = vadd.f32 %v9112_v28, %v981_v29  ;;  %v1371_v19 = vadd.f32 %v5924_v7, %v1350_v6  ;;  %v9114_v28 = vld [vmem:[#allocation53_spill] sm:$0xff] }
 0x30d   :  { %v6292_v55 = vpop.permute.xlu2 %1806  ;;  %v6294_v51 = vpop.permute.xlu0 %1729 }
 0x30e   :  { %2151 = vrot.lane.b32.xlu1 %v2148_v50, %s4987_s13  ;;  %v1023_v47 = vadd.f32 %v5748_v5, %v1002_v53  ;;  %v1392_v38 = vadd.f32 %v5864_v18, %v1371_v19 }
 0x310   :  { %v6298_v40 = vpop.permute.xlu1 %1731  ;;  %v1044_v27 = vadd.f32 %v5766_v13, %v1023_v47  ;;  %v1413_v29 = vadd.f32 %v5959_v57, %v1392_v38 }
 0x312   :  { %v1065_v36 = vadd.f32 %v9113_v56, %v1044_v27  ;;  %v1434_v50 = vadd.f32 %v5974_v37, %v1413_v29 }
 0x313   :  { %2170 = vrot.lane.b32.xlu2 %v2167_v54, %s4987_s13  ;;  %2172 = vrot.lane.b32.xlu0 %v2169_v32, %s4987_s13  ;;  %v9115_v32 = vstv %s6098_s19  ;;  %s4759_s19 = sld [smem:[#allocation8 + $0x17]] }
 0x314   :  { %v1086_v5 = vadd.f32 %v5790_v52, %v1065_v36  ;;  %v1455_v48 = vadd.f32 %v5922_v33, %v1434_v50 }
 0x315   :  { %v6308_v58 = vpop.permute.xlu2 %1829  ;;  %v6310_v15 = vpop.permute.xlu0 %1752 }
 0x316   :  { %v1100_v4 = vadd.f32 %v5803_v3, %v1086_v5  ;;  %v1476_v52 = vadd.f32 %v6003_v16, %v1455_v48  ;;  %v9117_v5 = vrot.slane %v6159_v41, 2 }
 0x318   :  { %v6313_v61 = vpop.permute.xlu1 %1764  ;;  %v1121_v7 = vadd.f32 %v5764_v62, %v1100_v4  ;;  %v1490_v20 = vadd.f32 %v6019_v8, %v1476_v52  ;;  %v1233_v8 = vmul.f32 %v6032_v46, %v9115_v32 }
 0x31a   :  { %v1142_v18 = vadd.f32 %v5829_v10, %v1121_v7  ;;  %v1511_v62 = vadd.f32 %v5972_v21, %v1490_v20  ;;  %v1240_v10 = vmul.f32 %v6048_v2, %v6121_v25  ;;  %v1257_v21 = vmul.f32 %v6048_v2, %v6131_v30  ;;  %v9119_v20 = vld [vmem:[#allocation19_spill] sm:$0xff] }
 0x31c   :  { %v1163_v57 = vadd.f32 %v5841_v12, %v1142_v18  ;;  %v1532_v16 = vadd.f32 %v6054_v34, %v1511_v62  ;;  %v1247_v27 = vrot.slane %v1240_v10, 1  ;;  %v9116_v34 = vrot.slane %v6129_v14, 1  ;;  %v9121_v10 = vld [vmem:[#allocation44_spill] sm:$0xff] }
 0x31d   :  { %v6320_v43 = vpop.permute.xlu2 %1869  ;;  %v6322_v13 = vpop.permute.xlu0 %1785  ;;  %v1264_v56 = vrot.slane %v1257_v21, 2  ;;  %v1291_v14 = vmul.f32 %v6048_v2, %v6197_v1 }
 0x31e   :  { %v1184_v53 = vadd.f32 %v9114_v28, %v1163_v57  ;;  %v1553_v54 = vadd.f32 %v6069_v11, %v1532_v16  ;;  %v1274_v11 = vmul.f32 %v6048_v2, %v6173_v45  ;;  %v9120_v28 = vrot.slane %v6211_v31, 4 }
 0x31f   :  { %v1265_v29 = vsel %vm8850_vm7, %v9117_v5, %v1264_v56  ;;  %v1298_v18 = vrot.slane %v1291_v14, 4 }
 0x320   :  { %v6325_v59 = vpop.permute.xlu1 %1787  ;;  %v1205_v33 = vadd.f32 %v5877_v35, %v1184_v53  ;;  %v1574_v25 = vadd.f32 %v6017_v17, %v1553_v54  ;;  %v1281_v17 = vrot.slane %v1274_v11, 3 }
 0x321   :  { %v1299_v53 = vsel %vm341_vm9, %v9120_v28, %v1298_v18 }
 0x322   :  { %v1226_v12 = vadd.f32 %v5897_v44, %v1205_v33  ;;  %v1248_v44 = vsel %vm287_vm6, %v9116_v34, %v1247_v27  ;;  %v1595_v46 = vadd.f32 %v6102_v22, %v1574_v25  ;;  %v9118_v22 = vrot.slane %v6187_v49, 3  ;;  %v9124_v25 = vld [vmem:[#allocation39_spill] sm:$0xff] }
 0x324   :  { %v1235_v19 = vadd.f32 %v1233_v8, %v1226_v12  ;;  %v1616_v30 = vadd.f32 %v6113_v26, %v1595_v46  ;;  %v1282_v48 = vsel %vm323_vm8, %v9118_v22, %v1281_v17  ;;  %v1308_v26 = vmul.f32 %v6048_v2, %v6200_v60  ;;  %v9128_v22 = vld [vmem:[#allocation55_spill] sm:$0xff] }
 0x325   :  { %v6332_v3 = vpop.permute.xlu2 %1892  ;;  %v6334_v39 = vpop.permute.xlu0 %1808 }
 0x326   :  { %v1252_v36 = vadd.f32 %v1248_v44, %v1235_v19  ;;  %v1630_v45 = vadd.f32 %v6067_v42, %v1616_v30  ;;  %v1315_v62 = vrot.slane %v1308_v26, 5  ;;  %v1325_v42 = vmul.f32 %v6048_v2, %v6249_v23  ;;  %v9125_v44 = vld [vmem:[#allocation54_spill] sm:$0xff]  ;;  %v9129_v26 = vld [vmem:[#allocation59_spill] sm:$0xff] }
 0x327   :  { %v9123_v2 = vrot.slane %v6256_v24, 6 }
 0x328   :  { %v1828_v37 = vpop.permute.xlu1 %1827  ;;  %v1269_v50 = vadd.f32 %v1265_v29, %v1252_v36  ;;  %v1651_v41 = vadd.f32 %v6179_v63, %v1630_v45  ;;  %v9122_v63 = vrot.slane %v6232_v9, 5  ;;  %v1332_v54 = vrot.slane %v1325_v42, 6  ;;  %v9127_v29 = vld [vmem:[#allocation58_spill] sm:$0xff] }
 0x329   :  { %v9132_v42 = vld [vmem:[#allocation18_spill] sm:$0xff] }
 0x32a   :  { %v1286_v52 = vadd.f32 %v1282_v48, %v1269_v50  ;;  %v1672_v1 = vadd.f32 %v9119_v20, %v1651_v41  ;;  %v1316_v12 = vsel %vm359_vm10, %v9122_v63, %v1315_v62  ;;  %v1333_v23 = vsel %vm377_vm11, %v9123_v2, %v1332_v54  ;;  %v9134_v54 = vld [vmem:[#allocation15_spill] sm:$0xff] }
 0x32c   :  { %v1303_v33 = vadd.f32 %v1299_v53, %v1286_v52  ;;  %v1693_v16 = vadd.f32 %v9121_v10, %v1672_v1  ;;  %v9130_v52 = vld [vmem:[#allocation30_spill] sm:$0xff] }
 0x32d   :  { %v1849_v6 = vpop.permute.xlu0 %1848  ;;  %v6348_v47 = vpop.permute.xlu2 %1925 }
 0x32e   :  { %v1714_v32 = vadd.f32 %v6273_v0, %v1693_v16  ;;  %v1320_v31 = vadd.f32 %v1316_v12, %v1303_v33  ;;  %v9133_v16 = vld [vmem:[#allocation20_spill] sm:$0xff] }
 0x330   :  { %v6352_v35 = vpop.permute.xlu1 %1850  ;;  %v1735_v27 = vadd.f32 %v6294_v51, %v1714_v32  ;;  %v1337_v19 = vadd.f32 %v1333_v23, %v1320_v31  ;;  %v9126_v51 = vld [vmem:[#allocation56_spill] sm:$0xff] }
 0x331   :  { %v9135_v31 = vld [vmem:[#allocation40_spill] sm:$0xff] }
 0x332   :  { %v1756_v34 = vadd.f32 %v9124_v25, %v1735_v27  ;;  %v1351_v56 = vadd.f32 %v9125_v44, %v1337_v19  ;;  %v9136_v19 = vld [vmem:[#allocation34_spill] sm:$0xff] }
 0x334   :  { %v1770_v9 = vadd.f32 %v6313_v61, %v1756_v34  ;;  %v1372_v30 = vadd.f32 %v9126_v51, %v1351_v56 }
 0x335   :  { %v6361_v38 = vpop.permute.xlu0 %1871  ;;  %v6369_v7 = vpop.permute.xlu2 %1948 }
 0x336   :  { %v1791_v46 = vadd.f32 %v6322_v13, %v1770_v9  ;;  %v1393_v17 = vadd.f32 %v9127_v29, %v1372_v30  ;;  %v9139_v30 = vld [vmem:[#allocation21_spill] sm:$0xff] }
 0x338   :  { %v1891_v4 = vpop.permute.xlu1 %1890  ;;  %v1812_v24 = vadd.f32 %v6292_v55, %v1791_v46  ;;  %v1414_v48 = vadd.f32 %v9128_v22, %v1393_v17  ;;  %v9138_v46 = vld [vmem:[#allocation16_spill] sm:$0xff]  ;;  %v9140_v17 = vld [vmem:[#allocation17_spill] sm:$0xff] }
 0x33a   :  { %v1833_v5 = vadd.f32 %v1828_v37, %v1812_v24  ;;  %v1435_v13 = vadd.f32 %v9129_v26, %v1414_v48  ;;  %v9131_v37 = vld [vmem:[#allocation57_spill] sm:$0xff]  ;;  %v9141_v48 = vld [vmem:[#allocation50_spill] sm:$0xff] }
 0x33c   :  { %v1854_v50 = vadd.f32 %v1849_v6, %v1833_v5  ;;  %v1456_v20 = vadd.f32 %v9130_v52, %v1435_v13  ;;  %v9142_v13 = vld [vmem:[#allocation52_spill] sm:$0xff] }
 0x33d   :  { %v1905_v57 = vpop.permute.xlu0 %1904  ;;  %v1989_v60 = vpop.permute.xlu2 %1988 }
 0x33e   :  { %v1875_v18 = vadd.f32 %v6320_v43, %v1854_v50  ;;  %v1477_v53 = vadd.f32 %v9131_v37, %v1456_v20 }
 0x340   :  { %v6384_v49 = vpop.permute.xlu1 %1906  ;;  %v1896_v41 = vadd.f32 %v1891_v4, %v1875_v18  ;;  %v1491_v33 = vadd.f32 %v9132_v42, %v1477_v53 }
 0x342   :  { %v1910_v28 = vadd.f32 %v1905_v57, %v1896_v41  ;;  %v1512_v43 = vadd.f32 %v9133_v16, %v1491_v33 }
 0x344   :  { %v1931_v6 = vadd.f32 %v6348_v47, %v1910_v28  ;;  %v1533_v32 = vadd.f32 %v9134_v54, %v1512_v43  ;;  %v9143_v28 = vld [vmem:[#allocation46_spill] sm:$0xff] }
 0x345   :  { %v6391_v8 = vpop.permute.xlu0 %1927  ;;  %v6400_v11 = vpop.permute.xlu2 %2011 }
 0x346   :  { %v1554_v27 = vadd.f32 %v9135_v31, %v1533_v32 }
 0x348   :  { %v1947_v21 = vpop.permute.xlu1 %1946  ;;  %v1575_v25 = vadd.f32 %v9136_v19, %v1554_v27 }
 0x349   :  { %v1952_v10 = vadd.f32 %v1947_v21, %v1931_v6  ;;  %v9137_v21 = vld [vmem:[#allocation38_spill] sm:$0xff] }
 0x34a   :  { %v1596_v44 = vadd.f32 %v9137_v21, %v1575_v25 }
 0x34c   :  { %v1617_v51 = vadd.f32 %v9138_v46, %v1596_v44 }
 0x34d   :  { %v1968_v0 = vpop.permute.xlu0 %1967  ;;  %v2045_v61 = vpop.permute.xlu2 %2044 }
 0x34e   :  { %v1973_v4 = vadd.f32 %v1968_v0, %v1952_v10  ;;  %v1631_v24 = vadd.f32 %v9139_v30, %v1617_v51  ;;  %v9144_v10 = vld [vmem:[#allocation23_spill] sm:$0xff] }
 0x350   :  { %v6403_v36 = vpop.permute.xlu1 %1969  ;;  %v1994_v57 = vadd.f32 %v1989_v60, %v1973_v4  ;;  %v1652_v50 = vadd.f32 %v9140_v17, %v1631_v24 }
 0x352   :  { %v1673_v18 = vadd.f32 %v9141_v48, %v1652_v50 }
 0x354   :  { %v1694_v41 = vadd.f32 %v9142_v13, %v1673_v18 }
 0x355   :  { %v6408_v14 = vpop.permute.xlu0 %1990  ;;  %v6417_v62 = vpop.permute.xlu2 %2067 }
 0x356   :  { %v1715_v37 = vadd.f32 %v9143_v28, %v1694_v41 }
 0x358   :  { %v2010_v45 = vpop.permute.xlu1 %2009  ;;  %v1736_v6 = vadd.f32 %v6298_v40, %v1715_v37  ;;  %v2358_v37 = vld [vmem:[#allocation4 + $0x8] ss:$4 sm:$0x3] }
 0x359   :  { %v2015_v23 = vadd.f32 %v2010_v45, %v1994_v57 }
 0x35a   :  { %v1757_v33 = vadd.f32 %v6310_v15, %v1736_v6  ;;  %v2364_v6 = vld [vmem:[#allocation4 + $0xa] ss:$4 sm:$0x3] }
 0x35c   :  { %v1771_v16 = vadd.f32 %v9144_v10, %v1757_v33  ;;  %v2368_v10 = vld [vmem:[#allocation4 + $0xb] ss:$4 sm:$0x3] }
 0x35d   :  { %v2031_v1 = vpop.permute.xlu0 %2030  ;;  %v2108_v2 = vpop.permute.xlu2 %2107 }
 0x35e   :  { %v2036_v47 = vadd.f32 %v2031_v1, %v2015_v23  ;;  %v1792_v43 = vadd.f32 %v6325_v59, %v1771_v16 }
 0x360   :  { %v6414_v55 = vpop.permute.xlu1 %2032  ;;  %v2050_v56 = vadd.f32 %v2045_v61, %v2036_v47 }
 0x365   :  { %v6422_v63 = vpop.permute.xlu0 %2046  ;;  %v2131_v5 = vpop.permute.xlu2 %2130 }
 0x368   :  { %v2066_v12 = vpop.permute.xlu1 %2065 }
 0x369   :  { %v2071_v0 = vadd.f32 %v2066_v12, %v2050_v56  ;;  %v1813_v12 = vadd.f32 %v6334_v39, %v1792_v43 }
 0x36b   :  { %v1834_v32 = vadd.f32 %v6308_v58, %v1813_v12 }
 0x36d   :  { %v2087_v34 = vpop.permute.xlu0 %2086  ;;  %v2171_v61 = vpop.permute.xlu2 %2170  ;;  %v1855_v57 = vadd.f32 %v6352_v35, %v1834_v32 }
 0x36e   :  { %v2092_v29 = vadd.f32 %v2087_v34, %v2071_v0 }
 0x36f   :  { %v1876_v40 = vadd.f32 %v6361_v38, %v1855_v57 }
 0x370   :  { %v6427_v9 = vpop.permute.xlu1 %2088  ;;  %v2113_v22 = vadd.f32 %v2108_v2, %v2092_v29 }
 0x371   :  { %v1897_v15 = vadd.f32 %v6332_v3, %v1876_v40 }
 0x373   :  { %v1911_v25 = vadd.f32 %v6384_v49, %v1897_v15 }
 0x375   :  { %v2110_v60 = vpop.permute.xlu0 %2109  ;;  %v1932_v34 = vadd.f32 %v6391_v8, %v1911_v25  ;;  %v2220_v25 = vlaneseq }
 0x377   :  { %v1953_v21 = vadd.f32 %v6369_v7, %v1932_v34  ;;  %vm6523_vm5 = vcmp.lt.s32.totalorder %v2220_v25, 16 }
 0x378   :  { %v2129_v45 = vpop.permute.xlu1 %2128 }
 0x379   :  { %v2134_v26 = vadd.f32 %v2129_v45, %v2113_v22  ;;  %v1974_v3 = vadd.f32 %v6403_v36, %v1953_v21 }
 0x37b   :  { %v1995_v44 = vadd.f32 %v6408_v14, %v1974_v3 }
 0x37d   :  { %v2150_v52 = vpop.permute.xlu0 %2149  ;;  %v2016_v49 = vadd.f32 %v6400_v11, %v1995_v44 }
 0x37e   :  { %v2155_v20 = vadd.f32 %v2150_v52, %v2134_v26 }
 0x37f   :  { %v2037_v8 = vadd.f32 %v6414_v55, %v2016_v49 }
 0x380   :  { %v2176_v1 = vadd.f32 %v2171_v61, %v2155_v20  ;;  %v2152_v30 = vpop.permute.xlu1 %2151 }
 0x381   :  { %v2051_v46 = vadd.f32 %v6422_v63, %v2037_v8  ;;  %v9152_v8 = vmov 0 }
 0x382   :  { %v2178_v53 = vmax.f32 %v2176_v1, 0.0 }
 0x383   :  { %v2072_v51 = vadd.f32 %v6417_v62, %v2051_v46 }
 0x384   :  { %v4741_v42 = vmul.f32 -1.442695, %v2178_v53  ;;  %v2360_v53 = vld [vmem:[#allocation4 + $0x9] ss:$4 sm:$0x3] }
 0x385   :  { %v2093_v7 = vadd.f32 %v6427_v9, %v2072_v51  ;;  %v2173_v24 = vpop.permute.xlu0 %2172  ;;  %v2362_v33 = vmax.f32 %v2358_v37, %v2360_v53 }
 0x386   :  { %4869 = vpow2.f32 %v4741_v42  ;;  %v2361_v42 = vadd.f32 %v2360_v53, %v2358_v37 }
 0x387   :  { %v2114_v36 = vadd.f32 %v2110_v60, %v2093_v7  ;;  %v2366_v43 = vmax.f32 %v2362_v33, %v2364_v6 }
 0x388   :  { %v2365_v16 = vadd.f32 %v2364_v6, %v2361_v42 }
 0x389   :  { %v2135_v11 = vadd.f32 %v2131_v5, %v2114_v36  ;;  %v6477_v12 = vmax.f32 %v2366_v43, %v2368_v10  ;;  %v9155_v36 = vmov 0 }
 0x38b   :  { %v2156_v29 = vadd.f32 %v2152_v30, %v2135_v11  ;;  %v2379_v57 = vperm.slane %v6477_v12, 0 }
 0x38c   :  { %v4870_v4 = vpop.eup %4869 }
 0x38d   :  { %v2186_v54 = vadd.f32 1.0, %v4870_v4  ;;  %v2177_v55 = vadd.f32 %v2173_v24, %v2156_v29  ;;  %v2369_v4 = vadd.f32 %v2368_v10, %v2365_v16  ;;  %2380 = vrot.lane.b32.xlu1 %v2379_v57, %s4968_s20 }
 0x38f   :  { %4871 = vrcp.f32 %v2186_v54  ;;  %v2199_v23 = vand.u32 2147483648, %v2186_v54  ;;  %v2197_v59 = vand.u32 2147483647, %v2186_v54  ;;  %vm2193_vm13 = vweird.f32 %v2186_v54 }
 0x390   :  { %v2179_v17 = vmax.f32 %v2177_v55, 0.0  ;;  %v6480_v32 = vmul.f32 0.25, %v2369_v4 }
 0x391   :  { %v2200_v58 = vor.u32 1.1754944e-38, %v2199_v23  ;;  %vm2198_vm15 = vcmp.eq.f32.partialorder %v2197_v59, 8.507059e+37  ;;  %v2446_v23 = vrot.slane %v6477_v12, 1 }
 0x392   :  { %v4742_v62 = vmul.f32 -1.442695, %v2179_v17  ;;  %9145 = vst [vmem:[#allocation25_spill] sm:$0xff] %v6480_v32  ;;  %v2440_v15 = vrot.slane %v6480_v32, 1  ;;  %v9158_v17 = vmov 0 }
 0x393   :  { %v2447_v59 = vperm.slane %v2446_v23, 0 }
 0x394   :  { %4873 = vpow2.f32 %v4742_v62 }
 0x395   :  { %v4872_v31 = vpop.eup %4871 }
 0x396   :  { %v2189_v27 = vmul.f32 %v4872_v31, %v2186_v54  ;;  %vm2194_vm12 = vweird.f32 %v4872_v31 }
 0x397   :  { %vm2195_vm14 = vmor %vm2193_vm13, %vm2194_vm12  ;;  %vm2232_vm12 = vcmp.ge.s32.totalorder %v2220_v25, 16  ;;  %vm2233_vm13 = vcmp.lt.s32.totalorder %v2220_v25, 32 }
 0x398   :  { %v2190_v2 = vsub.f32 1.0, %v2189_v27 }
 0x39a   :  { %v2191_v19 = vmul.f32 %v4872_v31, %v2190_v2  ;;  %v4874_v50 = vpop.eup %4873 }
 0x39b   :  { %v2187_v9 = vadd.f32 1.0, %v4874_v50 }
 0x39c   :  { %v2192_v39 = vadd.f32 %v4872_v31, %v2191_v19  ;;  %v2441_v19 = vperm.slane %v2440_v15, 0 }
 0x39d   :  { %4875 = vrcp.f32 %v2187_v9  ;;  %v2214_v18 = vand.u32 2147483648, %v2187_v9  ;;  %v2212_v13 = vand.u32 2147483647, %v2187_v9  ;;  %vm2208_vm1 = vweird.f32 %v2187_v9 }
 0x39e   :  { %v2196_v35 = vsel %vm2195_vm14, %v4872_v31, %v2192_v39  ;;  %v2373_v31 = vperm.slane %v6480_v32, 0  ;;  %v9146_v39 = vmov 0  ;;  %vm2242_vm14 = vcmp.ge.s32.totalorder %v2220_v25, 32 }
 0x39f   :  { %v2201_v47 = vsel %vm2198_vm15, %v2200_v58, %v2196_v35  ;;  %v2215_v52 = vor.u32 1.1754944e-38, %v2214_v18  ;;  %vm2213_vm4 = vcmp.eq.f32.partialorder %v2212_v13, 8.507059e+37  ;;  %v9147_v39 = vsel %vm6523_vm5, 4294967295, %v9146_v39 }
 0x3a0   :  { %v6447_v38 = vadd.f32 1.0, %v2201_v47  ;;  %2374 = vrot.lane.b32.xlu0 %v2373_v31, %s4968_s20  ;;  %2384 = vrot.lane.b32.xlu2 %v2373_v31, %s4967_s1  ;;  %9148 = vst [vmem:[#allocation45_spill] sm:$0xff] %v9147_v39  ;;  %vm2243_vm15 = vcmp.lt.s32.totalorder %v2220_v25, 48 }
 0x3a1   :  { %2392 = vrot.lane.b32.xlu1 %v2373_v31, %s4966_s0 }
 0x3a2   :  { %2226 = vst [vmem:[#allocation1] sm:$0xff] %v6447_v38 }
 0x3a3   :  { %v4876_v60 = vpop.eup %4875  ;;  %2224 = vst.msk [vmem:[#allocation3] sm:$0x1] %vm6523_vm5, %v6447_v38 }
 0x3a4   :  { %v2204_v22 = vmul.f32 %v4876_v60, %v2187_v9  ;;  %vm2209_vm0 = vweird.f32 %v4876_v60 }
 0x3a5   :  { %vm2210_vm2 = vmor %vm2208_vm1, %vm2209_vm0 }
 0x3a6   :  { %v2205_v48 = vsub.f32 1.0, %v2204_v22  ;;  %vm6552_vm0 = vmand %vm2232_vm12, %vm2233_vm13  ;;  %vm2262_vm13 = vcmp.ge.s32.totalorder %v2220_v25, 64  ;;  %v9164_v22 = vmov 0 }
 0x3a7   :  { %vm6556_vm1 = vmand %vm2242_vm14, %vm2243_vm15  ;;  %vm2263_vm14 = vcmp.lt.s32.totalorder %v2220_v25, 80  ;;  %vm2272_vm15 = vcmp.ge.s32.totalorder %v2220_v25, 80 }
 0x3a8   :  { %v2206_v26 = vmul.f32 %v4876_v60, %v2205_v48  ;;  %2388 = vrot.lane.b32.xlu0 %v2379_v57, %s4967_s1  ;;  %2396 = vrot.lane.b32.xlu2 %v2379_v57, %s4966_s0  ;;  %v9153_v8 = vsel %vm6556_vm1, 4294967295, %v9152_v8  ;;  %s4752_s0 = sld [smem:[#allocation8 + $0x16]] }
 0x3a9   :  { %v6454_v56 = vld [vmem:[#allocation1 + $0x1] ss:$9 sm:$0xff]  ;;  %9154 = vst [vmem:[#allocation26_spill] sm:$0xff] %v9153_v8  ;;  %s4754_s1 = sld [smem:[#allocation8 + $0x24]] }
 0x3aa   :  { %2236 = vst [vmem:[#allocation1] sm:$0xff] %v6447_v38  ;;  %v2207_v41 = vadd.f32 %v4876_v60, %v2206_v26  ;;  %2229 = vrot.lane.b32.xlu1 %v6454_v56, %s4981_s4  ;;  %v9149_v56 = vmov 0 }
 0x3ab   :  { %v9150_v56 = vsel %vm6552_vm0, 4294967295, %v9149_v56 }
 0x3ac   :  { %v2211_v20 = vsel %vm2210_vm2, %v4876_v60, %v2207_v41  ;;  %9151 = vst [vmem:[#allocation22_spill] sm:$0xff] %v9150_v56  ;;  %vm2252_vm2 = vcmp.ge.s32.totalorder %v2220_v25, 48 }
 0x3ad   :  { %v2216_v1 = vsel %vm2213_vm4, %v2215_v52, %v2211_v20  ;;  %vm2253_vm4 = vcmp.lt.s32.totalorder %v2220_v25, 64  ;;  %v9167_v52 = vmov 0 }
 0x3ae   :  { %v6474_v28 = vadd.f32 1.0, %v2216_v1  ;;  %vm6568_vm12 = vmand %vm2252_vm2, %vm2253_vm4  ;;  %vm2273_vm2 = vcmp.lt.s32.totalorder %v2220_v25, 96 }
 0x3af   :  { %v9156_v36 = vsel %vm6568_vm12, 4294967295, %v9155_v36  ;;  %vm6583_vm4 = vmand %vm2262_vm13, %vm2263_vm14  ;;  %vm2282_vm13 = vcmp.ge.s32.totalorder %v2220_v25, 96  ;;  %vm2283_vm14 = vcmp.lt.s32.totalorder %v2220_v25, 112 }
 0x3b0   :  { %2400 = vrot.lane.b32.xlu0 %v2373_v31, %s4970_s22  ;;  %2408 = vrot.lane.b32.xlu2 %v2373_v31, %s4969_s21  ;;  %2296 = vst.msk [vmem:[#allocation3 + $0x1] sm:$0x1] %vm6523_vm5, %v6474_v28  ;;  %v9159_v17 = vsel %vm6583_vm4, 4294967295, %v9158_v17  ;;  %vm6587_vm7 = vmand %vm2272_vm15, %vm2273_vm2  ;;  %vm2292_vm2 = vcmp.ge.s32.totalorder %v2220_v25, 112 }
 0x3b1   :  { %v6460_v0 = vld [vmem:[#allocation1 + $0x2] ss:$9 sm:$0xff]  ;;  %9157 = vst [vmem:[#allocation14_spill] sm:$0xff] %v9156_v36  ;;  %vm6600_vm15 = vmand %vm2282_vm13, %vm2283_vm14  ;;  %vm2293_vm13 = vcmp.lt.s32.totalorder %v2220_v25, 128 }
 0x3b2   :  { %2246 = vst [vmem:[#allocation1] sm:$0xff] %v6447_v38  ;;  %2404 = vrot.lane.b32.xlu1 %v2379_v57, %s4970_s22  ;;  %v9165_v22 = vsel %vm6600_vm15, 4294967295, %v9164_v22  ;;  %vm6615_vm14 = vmand %vm2292_vm2, %vm2293_vm13  ;;  %s4755_s22 = sld [smem:[#allocation8 + $0x2b]]  ;;  %vm9209_vm2 = vcmask 1045504  }
 0x3b3   :  { %9160 = vst [vmem:[#allocation51_spill] sm:$0xff] %v9159_v17  ;;  %v9168_v52 = vsel %vm6615_vm14, 4294967295, %v9167_v52  ;;  %vm9223_vm13 = vmmov %vm9209_vm2 }
 0x3b4   :  { %9166 = vst [vmem:[#allocation29_spill] sm:$0xff] %v9165_v22 }
 0x3b5   :  { %9169 = vst [vmem:[#allocation28_spill] sm:$0xff] %v9168_v52 }
 0x3b8   :  { %2239 = vrot.lane.b32.xlu2 %v6460_v0, %s4980_s3 }
 0x3b9   :  { %v6464_v14 = vld [vmem:[#allocation1 + $0x3] ss:$9 sm:$0xff] }
 0x3ba   :  { %2256 = vst [vmem:[#allocation1] sm:$0xff] %v6447_v38  ;;  %2249 = vrot.lane.b32.xlu0 %v6464_v14, %s4979_s30  ;;  %2416 = vrot.lane.b32.xlu1 %v2373_v31, %s4971_s23 }
 0x3c0   :  { %2420 = vrot.lane.b32.xlu2 %v2379_v57, %s4971_s23  ;;  %s4757_s23 = sld [smem:[#allocation8 + $0x9]] }
 0x3c1   :  { %v6467_v63 = vld [vmem:[#allocation1 + $0x4] ss:$9 sm:$0xff] }
 0x3c2   :  { %2266 = vst [vmem:[#allocation1] sm:$0xff] %v6447_v38  ;;  %2412 = vrot.lane.b32.xlu0 %v2379_v57, %s4969_s21  ;;  %2259 = vrot.lane.b32.xlu1 %v6467_v63, %s4978_s29  ;;  %v9161_v63 = vmov 0  ;;  %s4753_s21 = sld [smem:[#allocation8 + $0x1d]] }
 0x3c3   :  { %v9162_v63 = vsel %vm6587_vm7, 4294967295, %v9161_v63 }
 0x3c4   :  { %9163 = vst [vmem:[#allocation24_spill] sm:$0xff] %v9162_v63 }
 0x3c8   :  { %2432 = vrot.lane.b32.xlu2 %v2373_v31, %s4972_s24 }
 0x3c9   :  { %v6470_v45 = vld [vmem:[#allocation1 + $0x5] ss:$9 sm:$0xff] }
 0x3ca   :  { %2276 = vst [vmem:[#allocation1] sm:$0xff] %v6447_v38  ;;  %2424 = vrot.lane.b32.xlu0 %v2373_v31, %s4973_s25  ;;  %2428 = vrot.lane.b32.xlu1 %v2379_v57, %s4973_s25  ;;  %s4760_s25 = sld [smem:[#allocation8 + $0x1e]] }
 0x3d0   :  { %2269 = vrot.lane.b32.xlu2 %v6470_v45, %s8856_s28 }
 0x3d1   :  { %v2278_v5 = vld [vmem:[#allocation1 + $0x6] ss:$9 sm:$0xff] }
 0x3d2   :  { %2286 = vst [vmem:[#allocation1] sm:$0xff] %v6447_v38  ;;  %2279 = vrot.lane.b32.xlu0 %v2278_v5, %s8854_s27  ;;  %2442 = vrot.lane.b32.xlu1 %v2441_v19, %s4968_s20 }
 0x3d8   :  { %2448 = vrot.lane.b32.xlu2 %v2447_v59, %s4968_s20 }
 0x3d9   :  { %v2288_v61 = vld [vmem:[#allocation1 + $0x7] ss:$9 sm:$0xff] }
 0x3da   :  { %2298 = vst [vmem:[#allocation1] sm:$0xff] %v6474_v28  ;;  %2436 = vrot.lane.b32.xlu0 %v2379_v57, %s4972_s24  ;;  %2289 = vrot.lane.b32.xlu1 %v2288_v61, %s8852_s26  ;;  %s4758_s24 = sld [smem:[#allocation8 + $0x10]] }
 0x3e0   :  { %2460 = vrot.lane.b32.xlu2 %v6477_v12, %s8852_s26 }
 0x3e1   :  { %v2300_v54 = vld [vmem:[#allocation1 + $0x1] ss:$9 sm:$0xff] }
 0x3e2   :  { %2305 = vst [vmem:[#allocation1] sm:$0xff] %v6474_v28  ;;  %2452 = vrot.lane.b32.xlu0 %v6480_v32, %s8852_s26 }
 0x3e8   :  { %2301 = vrot.lane.b32.xlu2 %v2300_v54, %s4981_s4 }
 0x3e9   :  { %v2307_v40 = vld [vmem:[#allocation1 + $0x2] ss:$9 sm:$0xff] }
 0x3ea   :  { %2312 = vst [vmem:[#allocation1] sm:$0xff] %v6474_v28  ;;  %2308 = vrot.lane.b32.xlu0 %v2307_v40, %s4980_s3 }
 0x3f1   :  { %v6491_v27 = vld [vmem:[#allocation1 + $0x3] ss:$9 sm:$0xff] }
 0x3f2   :  { %2319 = vst [vmem:[#allocation1] sm:$0xff] %v6474_v28 }
 0x3f9   :  { %v6498_v2 = vld [vmem:[#allocation1 + $0x4] ss:$9 sm:$0xff] }
 0x3fa   :  { %2326 = vst [vmem:[#allocation1] sm:$0xff] %v6474_v28  ;;  %v2385_v34 = vpop.permute.xlu2 %2384 }
 0x3fb   :  { %2387 = vst.msk [vmem:[#allocation2 + $0x4] sm:$0x1] %vm81_vm3, %v2385_v34 }
 0x3ff   :  { %v2381_v47 = vpop.permute.xlu1 %2380 }
 0x400   :  { %2383 = vst.msk [vmem:[#allocation2 + $0x1b] sm:$0x1] %vm81_vm3, %v2381_v47 }
 0x401   :  { %v2328_v30 = vld [vmem:[#allocation1 + $0x5] ss:$9 sm:$0xff] }
 0x402   :  { %v2397_v58 = vpop.permute.xlu2 %2396  ;;  %2333 = vst [vmem:[#allocation1] sm:$0xff] %v6474_v28 }
 0x403   :  { %2399 = vst.msk [vmem:[#allocation2 + $0x1d] sm:$0x1] %vm81_vm3, %v2397_v58 }
 0x409   :  { %v2335_v26 = vld [vmem:[#allocation1 + $0x6] ss:$9 sm:$0xff] }
 0x40a   :  { %v2409_v35 = vpop.permute.xlu2 %2408  ;;  %2340 = vst [vmem:[#allocation1] sm:$0xff] %v6474_v28 }
 0x40b   :  { %2411 = vst.msk [vmem:[#allocation2 + $0x7] sm:$0x1] %vm81_vm3, %v2409_v35 }
 0x411   :  { %v2342_v58 = vld [vmem:[#allocation1 + $0x7] ss:$9 sm:$0xff] }
 0x412   :  { %v2375_v38 = vpop.permute.xlu0 %2374  ;;  %v2240_v21 = vpop.permute.xlu2 %2239 }
 0x413   :  { %2377 = vst.msk [vmem:[#allocation2 + $0x3] sm:$0x1] %vm81_vm3, %v2375_v38  ;;  %v2393_v3 = vpop.permute.xlu1 %2392 }
 0x414   :  { %2395 = vst.msk [vmem:[#allocation2 + $0x5] sm:$0x1] %vm81_vm3, %v2393_v3 }
 0x41a   :  { %v2389_v44 = vpop.permute.xlu0 %2388  ;;  %v2421_v49 = vpop.permute.xlu2 %2420 }
 0x41b   :  { %2391 = vst.msk [vmem:[#allocation2 + $0x1c] sm:$0x1] %vm81_vm3, %v2389_v44 }
 0x41c   :  { %2423 = vst.msk [vmem:[#allocation2 + $0x20] sm:$0x1] %vm81_vm3, %v2421_v49  ;;  %v2230_v46 = vpop.permute.xlu1 %2229 }
 0x41d   :  { %2235 = vst.msk [vmem:[#allocation3] sm:$0x1] %vm6552_vm0, %v2230_v46 }
 0x41e   :  { %2245 = vst.msk [vmem:[#allocation3] sm:$0x1] %vm6556_vm1, %v2240_v21 }
 0x422   :  { %v2401_v51 = vpop.permute.xlu0 %2400  ;;  %v2433_v0 = vpop.permute.xlu2 %2432 }
 0x423   :  { %2403 = vst.msk [vmem:[#allocation2 + $0x6] sm:$0x1] %vm81_vm3, %v2401_v51 }
 0x424   :  { %2435 = vst.msk [vmem:[#allocation2 + $0xa] sm:$0x1] %vm81_vm3, %v2433_v0  ;;  %v2405_v7 = vpop.permute.xlu1 %2404 }
 0x425   :  { %2407 = vst.msk [vmem:[#allocation2 + $0x1e] sm:$0x1] %vm81_vm3, %v2405_v7 }
 0x42a   :  { %v2270_v14 = vpop.permute.xlu2 %2269 }
 0x42c   :  { %v2250_v11 = vpop.permute.xlu0 %2249  ;;  %v2417_v24 = vpop.permute.xlu1 %2416 }
 0x42d   :  { %2255 = vst.msk [vmem:[#allocation3] sm:$0x1] %vm6568_vm12, %v2250_v11 }
 0x42e   :  { %2419 = vst.msk [vmem:[#allocation2 + $0x8] sm:$0x1] %vm81_vm3, %v2417_v24 }
 0x432   :  { %v2449_v29 = vpop.permute.xlu2 %2448 }
 0x433   :  { %2451 = vst.msk [vmem:[#allocation2 + $0x23] sm:$0x1] %vm81_vm3, %v2449_v29 }
 0x434   :  { %v2413_v55 = vpop.permute.xlu0 %2412  ;;  %v2260_v62 = vpop.permute.xlu1 %2259 }
 0x435   :  { %2415 = vst.msk [vmem:[#allocation2 + $0x1f] sm:$0x1] %vm81_vm3, %v2413_v55 }
 0x436   :  { %2265 = vst.msk [vmem:[#allocation3] sm:$0x1] %vm6583_vm4, %v2260_v62 }
 0x437   :  { %2275 = vst.msk [vmem:[#allocation3] sm:$0x1] %vm6587_vm7, %v2270_v14 }
 0x43a   :  { %v2461_v50 = vpop.permute.xlu2 %2460 }
 0x43b   :  { %v2462_v9 = vrot.slane %v2461_v50, 1 }
 0x43c   :  { %v2425_v45 = vpop.permute.xlu0 %2424  ;;  %v2429_v60 = vpop.permute.xlu1 %2428 }
 0x43d   :  { %2427 = vst.msk [vmem:[#allocation2 + $0x9] sm:$0x1] %vm81_vm3, %v2425_v45  ;;  %v2463_v5 = vperm.slane %v2462_v9, 0 }
 0x43e   :  { %2431 = vst.msk [vmem:[#allocation2 + $0x21] sm:$0x1] %vm81_vm3, %v2429_v60 }
 0x43f   :  { %2464 = vrot.lane.b32.xlu0 %v2463_v5, %s4968_s20 }
 0x442   :  { %v2302_v48 = vpop.permute.xlu2 %2301 }
 0x443   :  { %2304 = vst.msk [vmem:[#allocation3 + $0x1] sm:$0x1] %vm6552_vm0, %v2302_v48 }
 0x444   :  { %v2280_v18 = vpop.permute.xlu0 %2279  ;;  %v2443_v13 = vpop.permute.xlu1 %2442 }
 0x445   :  { %2285 = vst.msk [vmem:[#allocation3] sm:$0x1] %vm6600_vm15, %v2280_v18  ;;  %v6690_v18 = vld [vmem:[#allocation2] sm:$0xff] }
 0x446   :  { %2445 = vst.msk [vmem:[#allocation2 + $0xb] sm:$0x1] %vm81_vm3, %v2443_v13  ;;  %v6696_v13 = vstv %s4754_s1  ;;  %s6728_s1 = sld [smem:[#allocation8 + $0x20]] }
 0x447   :  { %2476 = vrot.lane.b32.xlu0 %v6477_v12, %s8854_s27  ;;  %9171 = vst [vmem:[#allocation33_spill] sm:$0xff] %v6696_v13 }
 0x44c   :  { %v2437_v41 = vpop.permute.xlu0 %2436  ;;  %v2290_v20 = vpop.permute.xlu1 %2289 }
 0x44d   :  { %2439 = vst.msk [vmem:[#allocation2 + $0x22] sm:$0x1] %vm81_vm3, %v2437_v41  ;;  %v6698_v41 = vstv %s4753_s21  ;;  %s6738_s21 = sld [smem:[#allocation8 + $0x2e]] }
 0x44e   :  { %2295 = vst.msk [vmem:[#allocation3] sm:$0x1] %vm6615_vm14, %v2290_v20  ;;  %v6702_v20 = vstv %s4755_s22  ;;  %s6750_s22 = sld [smem:[#allocation8 + $0xc]] }
 0x44f   :  { %2329 = vrot.lane.b32.xlu0 %v2328_v30, %s8856_s28  ;;  %v2348_v30 = vld [vmem:[#allocation4] sm:$0xff]  ;;  %9172 = vst [vmem:[#allocation32_spill] sm:$0xff] %v6698_v41 }
 0x450   :  { %9173 = vst [vmem:[#allocation13_spill] sm:$0xff] %v6702_v20 }
 0x454   :  { %v2453_v61 = vpop.permute.xlu0 %2452 }
 0x455   :  { %v2454_v1 = vrot.slane %v2453_v61, 1  ;;  %v6704_v61 = vstv %s4757_s23  ;;  %s6774_s23 = sld [smem:[#allocation8 + $0x13]] }
 0x456   :  { %9174 = vst [vmem:[#allocation35_spill] sm:$0xff] %v6704_v61 }
 0x457   :  { %v2455_v28 = vperm.slane %v2454_v1, 0 }
 0x459   :  { %2456 = vrot.lane.b32.xlu1 %v2455_v28, %s4968_s20  ;;  %v6712_v28 = vstv %s4758_s24  ;;  %s6796_s24 = sld [smem:[#allocation8 + $0x21]] }
 0x45a   :  { %9175 = vst [vmem:[#allocation37_spill] sm:$0xff] %v6712_v28 }
 0x45c   :  { %v2309_v37 = vpop.permute.xlu0 %2308 }
 0x45d   :  { %2311 = vst.msk [vmem:[#allocation3 + $0x1] sm:$0x1] %vm6556_vm1, %v2309_v37  ;;  %v6714_v37 = vstv %s4760_s25  ;;  %s6811_s25 = sld [smem:[#allocation8 + $0x1a]] }
 0x45e   :  { %9176 = vst [vmem:[#allocation31_spill] sm:$0xff] %v6714_v37 }
 0x45f   :  { %v6890_v63 = vstv %s6796_s24  ;;  %s4787_s24 = sld [smem:[#allocation8 + $0x1b]] }
 0x460   :  { %9193 = vst [vmem:[#allocation30_spill] sm:$0xff] %v6890_v63  ;;  %v6922_v8 = vmul.f32 %v6890_v63, %v6690_v18 }
 0x461   :  { %2468 = vrot.lane.b32.xlu1 %v6480_v32, %s8854_s27 }
 0x469   :  { %2315 = vrot.lane.b32.xlu1 %v6491_v27, %s4979_s30 }
 0x4b1   :  { %v2465_v53 = vpop.permute.xlu0 %2464 }
 0x4b2   :  { %2467 = vst.msk [vmem:[#allocation2 + $0x24] sm:$0x1] %vm81_vm3, %v2465_v53  ;;  %v6720_v53 = vmul.f32 %v6696_v13, %v6690_v18 }
 0x4b9   :  { %v2477_v6 = vpop.permute.xlu0 %2476 }
 0x4ba   :  { %v2478_v42 = vrot.slane %v2477_v6, 1  ;;  %v6724_v6 = vmul.f32 %v6698_v41, %v6690_v18 }
 0x4bc   :  { %v2479_v33 = vperm.slane %v2478_v42, 0  ;;  %v6726_v42 = vstv %s4759_s19  ;;  %s7287_s19 = sld [smem:[#allocation8 + $0x1]] }
 0x4bd   :  { %9177 = vst [vmem:[#allocation41_spill] sm:$0xff] %v6726_v42 }
 0x4be   :  { %2480 = vrot.lane.b32.xlu1 %v2479_v33, %s4968_s20  ;;  %v6732_v33 = vmul.f32 %v6704_v61, %v6690_v18 }
 0x4c1   :  { %v2330_v34 = vpop.permute.xlu0 %2329 }
 0x4c6   :  { %2492 = vrot.lane.b32.xlu1 %v6477_v12, %s8856_s28 }
 0x4cb   :  { %v2457_v10 = vpop.permute.xlu1 %2456 }
 0x4cc   :  { %2459 = vst.msk [vmem:[#allocation2 + $0xc] sm:$0x1] %vm81_vm3, %v2457_v10  ;;  %v6736_v10 = vmul.f32 %v6702_v20, %v6690_v18 }
 0x4ce   :  { %2336 = vrot.lane.b32.xlu1 %v2335_v26, %s8854_s27  ;;  %v6692_v26 = vstv %s4752_s0  ;;  %s6700_s27 = sld [smem:[#allocation8 + $0xb]] }
 0x4cf   :  { %9170 = vst [vmem:[#allocation27_spill] sm:$0xff] %v6692_v26  ;;  %v6710_v1 = vmul.f32 %v6692_v26, %v6690_v18  ;;  %s6716_s0 = sld [smem:[#allocation8 + $0x27]] }
 0x4d3   :  { %v2469_v16 = vpop.permute.xlu1 %2468 }
 0x4d4   :  { %v2470_v43 = vrot.slane %v2469_v16, 1  ;;  %v6742_v16 = vmul.f32 %v6714_v37, %v6690_v18 }
 0x4d6   :  { %v2471_v4 = vperm.slane %v2470_v43, 0  ;;  %v6746_v43 = vmul.f32 %v6712_v28, %v6690_v18 }
 0x4d8   :  { %2472 = vrot.lane.b32.xlu2 %v2471_v4, %s4968_s20  ;;  %v6748_v4 = vstv %s4761_s17  ;;  %s4751_s17 = sld [smem:[#allocation8 + $0xf]] }
 0x4db   :  { %v2316_v54 = vpop.permute.xlu1 %2315 }
 0x4dc   :  { %2318 = vst.msk [vmem:[#allocation3 + $0x1] sm:$0x1] %vm6568_vm12, %v2316_v54 }
 0x4e0   :  { %2484 = vrot.lane.b32.xlu2 %v6480_v32, %s8856_s28  ;;  %s6706_s28 = sld [smem:[#allocation8 + $0x19]] }
 0x4e8   :  { %2322 = vrot.lane.b32.xlu2 %v6498_v2, %s4978_s29 }
 0x530   :  { %v2481_v57 = vpop.permute.xlu1 %2480 }
 0x531   :  { %2483 = vst.msk [vmem:[#allocation2 + $0x25] sm:$0x1] %vm81_vm3, %v2481_v57  ;;  %v6755_v57 = vmul.f32 %v6726_v42, %v6690_v18 }
 0x532   :  { %v2473_v31 = vpop.permute.xlu2 %2472 }
 0x533   :  { %2475 = vst.msk [vmem:[#allocation2 + $0xd] sm:$0x1] %vm81_vm3, %v2473_v31 }
 0x538   :  { %v2493_v40 = vpop.permute.xlu1 %2492 }
 0x539   :  { %v2494_v15 = vrot.slane %v2493_v40, 1 }
 0x53a   :  { %v2485_v27 = vpop.permute.xlu2 %2484 }
 0x53b   :  { %v2486_v23 = vrot.slane %v2485_v27, 1  ;;  %v2495_v19 = vperm.slane %v2494_v15, 0  ;;  %v6760_v27 = vstv %s6676_s10  ;;  %v6763_v15 = vstv %s6680_s5  ;;  %s4750_s10 = sld [smem:[#allocation8 + $0x8]] }
 0x53c   :  { %9178 = vst [vmem:[#allocation43_spill] sm:$0xff] %v6760_v27  ;;  %s4770_s5 = sld [smem:[#allocation8 + $0x4]] }
 0x53d   :  { %v2487_v59 = vperm.slane %v2486_v23, 0  ;;  %2496 = vrot.lane.b32.xlu2 %v2495_v19, %s4968_s20  ;;  %9179 = vst [vmem:[#allocation36_spill] sm:$0xff] %v6763_v15  ;;  %v6899_v19 = vstv %s6811_s25  ;;  %s4785_s25 = sld [smem:[#allocation8 + $0xd]] }
 0x53e   :  { %9194 = vst [vmem:[#allocation57_spill] sm:$0xff] %v6899_v19  ;;  %v6937_v56 = vmul.f32 %v6899_v19, %v6690_v18 }
 0x53f   :  { %2488 = vrot.lane.b32.xlu0 %v2487_v59, %s4968_s20  ;;  %v6769_v59 = vmul.f32 %v6748_v4, %v6690_v18 }
 0x540   :  { %v2337_v2 = vpop.permute.xlu1 %2336 }
 0x542   :  { %v2323_v25 = vpop.permute.xlu2 %2322 }
 0x543   :  { %2325 = vst.msk [vmem:[#allocation3 + $0x1] sm:$0x1] %vm6583_vm4, %v2323_v25  ;;  %v6772_v25 = vstv %s6678_s16  ;;  %s4763_s16 = sld [smem:[#allocation8 + $0x3]] }
 0x544   :  { %2332 = vst.msk [vmem:[#allocation3 + $0x1] sm:$0x1] %vm6587_vm7, %v2330_v34 }
 0x545   :  { %2339 = vst.msk [vmem:[#allocation3 + $0x1] sm:$0x1] %vm6600_vm15, %v2337_v2  ;;  %2508 = vrot.lane.b32.xlu2 %v6477_v12, %s4978_s29 }
 0x546   :  { %9180 = vst [vmem:[#allocation47_spill] sm:$0xff] %v6772_v25 }
 0x547   :  { %2500 = vrot.lane.b32.xlu0 %v6480_v32, %s4978_s29 }
 0x54d   :  { %2343 = vrot.lane.b32.xlu2 %v2342_v58, %s8852_s26  ;;  %s6694_s26 = sld [smem:[#allocation8 + $0x12]]  ;;  %v6779_v58 = vstv %s6682_s7 }
 0x54e   :  { %9181 = vst [vmem:[#allocation49_spill] sm:$0xff] %v6779_v58  ;;  %s4743_s7 = sld [smem:[#allocation8 + $0x7]] }
 0x597   :  { %v2497_v35 = vpop.permute.xlu2 %2496 }
 0x598   :  { %2499 = vst.msk [vmem:[#allocation2 + $0x26] sm:$0x1] %vm81_vm3, %v2497_v35  ;;  %v6782_v35 = vstv %s6686_s8  ;;  %s7502_s8 = sld [smem:[#allocation8]] }
 0x599   :  { %9182 = vst [vmem:[#allocation42_spill] sm:$0xff] %v6782_v35 }
 0x59f   :  { %v2509_v47 = vpop.permute.xlu2 %2508 }
 0x5a0   :  { %v2510_v38 = vrot.slane %v2509_v47, 1 }
 0x5a2   :  { %v2511_v21 = vperm.slane %v2510_v38, 0  ;;  %v6787_v38 = vmul.f32 %v6760_v27, %v6690_v18 }
 0x5a4   :  { %2512 = vrot.lane.b32.xlu0 %v2511_v21, %s4968_s20  ;;  %v6791_v21 = vmul.f32 %v6763_v15, %v6690_v18 }
 0x5a7   :  { %v2344_v3 = vpop.permute.xlu2 %2343 }
 0x5a8   :  { %2346 = vst.msk [vmem:[#allocation3 + $0x1] sm:$0x1] %vm6615_vm14, %v2344_v3  ;;  %v6794_v3 = vstv %s6684_s15  ;;  %s4744_s15 = sld [smem:[#allocation8 + $0xe]] }
 0x5a9   :  { %9183 = vst [vmem:[#allocation48_spill] sm:$0xff] %v6794_v3 }
 0x5ac   :  { %2524 = vrot.lane.b32.xlu0 %v6477_v12, %s4979_s30 }
 0x5af   :  { %v2347_v0 = vld [vmem:[#allocation3] sm:$0x3] }
 0x5b0   :  { %v2351_v7 = vperm.slane %v2347_v0, 1  ;;  %v2350_v14 = vperm.slane %v2347_v0, 0  ;;  %v6815_v0 = vmul.f32 %v6779_v58, %v6690_v18 }
 0x5b1   :  { %v2489_v44 = vpop.permute.xlu0 %2488 }
 0x5b2   :  { %2491 = vst.msk [vmem:[#allocation2 + $0xe] sm:$0x1] %vm81_vm3, %v2489_v44  ;;  %v2352_v11 = vrot.slane %v2351_v7, 4  ;;  %v6800_v44 = vmul.f32 %v6772_v25, %v6690_v18  ;;  %v6819_v7 = vmul.f32 %v6782_v35, %v6690_v18 }
 0x5b4   :  { %v2353_v24 = vsel %vm341_vm9, %v2350_v14, %v2352_v11  ;;  %v6822_v14 = vstv %s6706_s28  ;;  %v6825_v11 = vstv %s6716_s0  ;;  %v2977_v23 = vrot.slane %v6800_v44, 1  ;;  %s7179_s28 = sld [smem:[#allocation8 + $0x6]] }
 0x5b5   :  { %v2355_v29 = vmul.f32 %v2353_v24, %v2348_v30  ;;  %9187 = vst [vmem:[#allocation39_spill] sm:$0xff] %v6822_v14  ;;  %v6829_v30 = vmul.f32 %v6794_v3, %v6690_v18  ;;  %v6832_v24 = vstv %s6728_s1  ;;  %s4745_s0 = sld [smem:[#allocation8 + $0x15]] }
 0x5b6   :  { %9188 = vst [vmem:[#allocation54_spill] sm:$0xff] %v6825_v11  ;;  %v6865_v47 = vmul.f32 %v6832_v24, %v6690_v18  ;;  %s4746_s1 = sld [smem:[#allocation8 + $0x1c]] }
 0x5b7   :  { %2356 = vst [vmem:[#allocation9] sm:$0xff] %v2355_v29  ;;  %v6835_v29 = vstv %s6738_s21  ;;  %s7530_s21 = sld [smem:[#allocation8 + $0x23]] }
 0x5b8   :  { %9189 = vst [vmem:[#allocation56_spill] sm:$0xff] %v6832_v24 }
 0x5b9   :  { %v2501_v49 = vpop.permute.xlu0 %2500  ;;  %9190 = vst [vmem:[#allocation58_spill] sm:$0xff] %v6835_v29 }
 0x5ba   :  { %v2502_v46 = vrot.slane %v2501_v49, 1  ;;  %v6803_v49 = vstv %s6688_s18  ;;  %s6878_s18 = sld [smem:[#allocation8 + $0x28]] }
 0x5bb   :  { %9184 = vst [vmem:[#allocation53_spill] sm:$0xff] %v6803_v49 }
 0x5bc   :  { %v2503_v51 = vperm.slane %v2502_v46, 0  ;;  %v6806_v46 = vstv %s6694_s26  ;;  %s6924_s26 = sld [smem:[#allocation8 + $0x2f]] }
 0x5bd   :  { %9185 = vst [vmem:[#allocation19_spill] sm:$0xff] %v6806_v46 }
 0x5be   :  { %2504 = vrot.lane.b32.xlu1 %v2503_v51, %s4968_s20  ;;  %v6809_v51 = vstv %s6700_s27  ;;  %s7073_s27 = sld [smem:[#allocation8 + $0x14]] }
 0x5bf   :  { %9186 = vst [vmem:[#allocation44_spill] sm:$0xff] %v6809_v51 }
 0x5c6   :  { %2516 = vrot.lane.b32.xlu1 %v6480_v32, %s4979_s30 }
 0x616   :  { %v2513_v55 = vpop.permute.xlu0 %2512 }
 0x617   :  { %2515 = vst.msk [vmem:[#allocation2 + $0x27] sm:$0x1] %vm81_vm3, %v2513_v55  ;;  %v6838_v55 = vstv %s6750_s22  ;;  %s7547_s22 = sld [smem:[#allocation8 + $0x2a]] }
 0x618   :  { %9191 = vst [vmem:[#allocation55_spill] sm:$0xff] %v6838_v55  ;;  %v6869_v34 = vmul.f32 %v6838_v55, %v6690_v18 }
 0x61e   :  { %v2525_v62 = vpop.permute.xlu0 %2524 }
 0x61f   :  { %v2526_v50 = vrot.slane %v2525_v62, 1  ;;  %v6861_v62 = vmul.f32 %v6822_v14, %v6690_v18 }
 0x621   :  { %v2527_v45 = vperm.slane %v2526_v50, 0  ;;  %v6843_v50 = vmul.f32 %v6803_v49, %v6690_v18 }
 0x623   :  { %2528 = vrot.lane.b32.xlu1 %v2527_v45, %s4968_s20  ;;  %v6847_v45 = vmul.f32 %v6806_v46, %v6690_v18 }
 0x62b   :  { %2540 = vrot.lane.b32.xlu1 %v6477_v12, %s4980_s3 }
 0x630   :  { %v2505_v9 = vpop.permute.xlu1 %2504 }
 0x631   :  { %2507 = vst.msk [vmem:[#allocation2 + $0xf] sm:$0x1] %vm81_vm3, %v2505_v9  ;;  %v6851_v9 = vmul.f32 %v6809_v51, %v6690_v18 }
 0x638   :  { %v2517_v5 = vpop.permute.xlu1 %2516  ;;  %v6880_v2 = vld [vmem:[#allocation2 + $0x8] sm:$0xff] }
 0x639   :  { %v2518_v60 = vrot.slane %v2517_v5, 1  ;;  %v6876_v5 = vstv %s6774_s23  ;;  %v6903_v40 = vmul.f32 %v6692_v26, %v6880_v2  ;;  %v6910_v17 = vmul.f32 %v6696_v13, %v6880_v2  ;;  %s7560_s23 = sld [smem:[#allocation8 + $0x5]] }
 0x63a   :  { %9192 = vst [vmem:[#allocation59_spill] sm:$0xff] %v6876_v5  ;;  %v6896_v44 = vmul.f32 %v6876_v5, %v6690_v18  ;;  %v6914_v36 = vmul.f32 %v6698_v41, %v6880_v2  ;;  %v6918_v31 = vmul.f32 %v6702_v20, %v6880_v2  ;;  %v6929_v54 = vmul.f32 %v6704_v61, %v6880_v2 }
 0x63b   :  { %v2519_v48 = vperm.slane %v2518_v60, 0  ;;  %v6873_v60 = vmul.f32 %v6835_v29, %v6690_v18  ;;  %9195 = vst [vmem:[#allocation18_spill] sm:$0xff] %v6910_v17  ;;  %v6933_v52 = vmul.f32 %v6712_v28, %v6880_v2  ;;  %v9196_v20 = vrot.slane %v6903_v40, 3 }
 0x63c   :  { %v9197_v61 = vrot.slane %v6710_v1, 3  ;;  %v6954_v39 = vmul.f32 %v6714_v37, %v6880_v2  ;;  %v9199_v13 = vrot.slane %v6910_v17, 5  ;;  %v9200_v41 = vrot.slane %v6720_v53, 5 }
 0x63d   :  { %2520 = vrot.lane.b32.xlu2 %v2519_v48, %s4968_s20  ;;  %v6857_v48 = vmul.f32 %v6825_v11, %v6690_v18  ;;  %v9201_v1 = vrot.slane %v6914_v36, 4  ;;  %v9204_v28 = vrot.slane %v6736_v10, 6  ;;  %v6978_v17 = vstv %s6878_s18  ;;  %s4790_s18 = sld [smem:[#allocation8 + $0x30]] }
 0x63e   :  { %v6948_v26 = vsel %vm323_vm8, %v9197_v61, %v9196_v20  ;;  %9198 = vst [vmem:[#allocation20_spill] sm:$0xff] %v6954_v39  ;;  %v6961_v22 = vsel %vm359_vm10, %v9200_v41, %v9199_v13  ;;  %v9202_v20 = vrot.slane %v6724_v6, 4  ;;  %v9205_v53 = vrot.slane %v6929_v54, 1 }
 0x63f   :  { %v9206_v13 = vrot.slane %v6732_v33, 1  ;;  %v8886_v6 = vrot.slane %v6954_v39, 4  ;;  %v7005_v33 = vmul.f32 %v6760_v27, %v6880_v2  ;;  %v7026_v27 = vmul.f32 %v6978_v17, %v6690_v18 }
 0x640   :  { %v6968_v61 = vsel %vm341_vm9, %v9202_v20, %v9201_v1  ;;  %v9207_v1 = vrot.slane %v6933_v52, 2  ;;  %v9208_v20 = vrot.slane %v6746_v43, 2  ;;  %v7048_v43 = vmul.f32 %v6794_v3, %v6880_v2 }
 0x641   :  { %v6985_v41 = vsel %vm287_vm6, %v9206_v13, %v9205_v53  ;;  %v7009_v53 = vmul.f32 %v6772_v25, %v6880_v2  ;;  %v9212_v13 = vrot.slane %v6742_v16, 4  ;;  %v7032_v16 = vstv %s6924_s26  ;;  %s4788_s26 = sld [smem:[#allocation8 + $0x22]] }
 0x642   :  { %v6993_v10 = vsel %vm9209_vm2, %v9208_v20, %v9207_v1  ;;  %9214 = vst [vmem:[#allocation38_spill] sm:$0xff] %v7032_v16  ;;  %v9216_v39 = vrot.slane %v6769_v59, 5  ;;  %v7071_v3 = vmul.f32 %v6782_v35, %v6880_v2  ;;  %v9221_v59 = vrot.slane %v6791_v21, 3 }
 0x643   :  { %9210 = vst [vmem:[#allocation15_spill] sm:$0xff] %v6993_v10  ;;  %v7017_v1 = vsel %vm341_vm9, %v9212_v13, %v8886_v6  ;;  %v7022_v10 = vmul.f32 %v6763_v15, %v6880_v2  ;;  %v9215_v13 = vrot.slane %v6755_v57, 3  ;;  %v9217_v57 = vrot.slane %v7005_v33, 6 }
 0x644   :  { %v9219_v15 = vrot.slane %v7009_v53, 1  ;;  %v7095_v21 = vmul.f32 %v6809_v51, %v6880_v2  ;;  %v9225_v35 = vrot.slane %v6829_v30, 4  ;;  %v9230_v30 = vrot.slane %v6847_v45, 2 }
 0x645   :  { %2532 = vrot.lane.b32.xlu2 %v6480_v32, %s4980_s3  ;;  %v9203_v32 = vrot.slane %v6918_v31, 6  ;;  %9213 = vst [vmem:[#allocation34_spill] sm:$0xff] %v7022_v10  ;;  %v9235_v45 = vrot.slane %v6861_v62, 3  ;;  %v7191_v62 = vmul.f32 %v6890_v63, %v6880_v2  ;;  %v7213_v63 = vmul.f32 %v6899_v19, %v6880_v2 }
 0x647   :  { %v6975_v37 = vsel %vm377_vm11, %v9204_v28, %v9203_v32  ;;  %v6997_v32 = vmul.f32 %v6726_v42, %v6880_v2  ;;  %v7001_v28 = vmul.f32 %v6748_v4, %v6880_v2  ;;  %v7044_v42 = vmul.f32 %v6779_v58, %v6880_v2  ;;  %9237 = vst [vmem:[#allocation17_spill] sm:$0xff] %v7191_v62 }
 0x648   :  { %v7067_v58 = vsel %vm287_vm6, %v2977_v23, %v9219_v15  ;;  %v7086_v15 = vmul.f32 %v6803_v49, %v6880_v2  ;;  %v9224_v23 = vrot.slane %v7048_v43, 4  ;;  %v7116_v49 = vmul.f32 %v6822_v14, %v6880_v2  ;;  %9241 = vst [vmem:[#allocation50_spill] sm:$0xff] %v7213_v63 }
 0x649   :  { %9211 = vst [vmem:[#allocation40_spill] sm:$0xff] %v6997_v32  ;;  %v8890_v20 = vrot.slane %v6997_v32, 3  ;;  %v8893_v25 = vrot.slane %v7001_v28, 5 }
 0x64a   :  { %v8901_v51 = vrot.slane %v7086_v15, 5 }
 0x64b   :  { %v7039_v6 = vsel %vm323_vm8, %v9215_v13, %v8890_v20  ;;  %v7055_v32 = vsel %vm359_vm10, %v9216_v39, %v8893_v25  ;;  %v9218_v13 = vrot.slane %v6787_v38, 6  ;;  %v9220_v39 = vrot.slane %v7022_v10, 3 }
 0x64c   :  { %v7091_v25 = vmul.f32 %v6806_v46, %v6880_v2  ;;  %v7111_v46 = vsel %vm341_vm9, %v9225_v35, %v9224_v23  ;;  %v9226_v10 = vrot.slane %v7071_v3, 6  ;;  %v7129_v35 = vmul.f32 %v6825_v11, %v6880_v2 }
 0x64d   :  { %v7062_v20 = vsel %vm377_vm11, %v9218_v13, %v9217_v57  ;;  %v7080_v38 = vsel %vm323_vm8, %v9221_v59, %v9220_v39  ;;  %v8899_v57 = vrot.slane %v7044_v42, 2  ;;  %v3356_v39 = vmul.f32 %v7032_v16, %v6690_v18 }
 0x64e   :  { %v9222_v59 = vrot.slane %v6815_v0, 2  ;;  %v9227_v0 = vrot.slane %v6819_v7, 6  ;;  %9228 = vst [vmem:[#allocation16_spill] sm:$0xff] %v7129_v35  ;;  %v9229_v23 = vrot.slane %v6843_v50, 5  ;;  %v8908_v11 = vrot.slane %v7129_v35, 5 }
 0x650   :  { %v7104_v13 = vsel %vm9223_vm13, %v9222_v59, %v8899_v57  ;;  %v7123_v59 = vsel %vm377_vm11, %v9227_v0, %v9226_v10  ;;  %v8905_v57 = vrot.slane %v7091_v25, 2  ;;  %v7136_v14 = vsel %vm359_vm10, %v9229_v23, %v8901_v51  ;;  %vm9245_vm13 = vmmov %vm9209_vm2 }
 0x651   :  { %v7141_v10 = vmul.f32 %v6832_v24, %v6880_v2  ;;  %v7145_v0 = vmul.f32 %v6835_v29, %v6880_v2  ;;  %v9231_v23 = vrot.slane %v7095_v21, 1  ;;  %v9232_v51 = vrot.slane %v6851_v9, 1 }
 0x652   :  { %v7152_v50 = vsel %vm9209_vm2, %v9230_v30, %v8905_v57  ;;  %v7164_v24 = vmul.f32 %v6838_v55, %v6880_v2  ;;  %v9234_v29 = vrot.slane %v7116_v49, 3  ;;  %v9238_v9 = vrot.slane %v6865_v47, 4 }
 0x653   :  { %v7159_v7 = vsel %vm287_vm6, %v9232_v51, %v9231_v23  ;;  %v8911_v57 = vrot.slane %v7141_v10, 4  ;;  %v7177_v51 = vmul.f32 %v6876_v5, %v6880_v2  ;;  %v9236_v23 = vrot.slane %v6857_v48, 5 }
 0x654   :  { %9233 = vst [vmem:[#allocation21_spill] sm:$0xff] %v7164_v24  ;;  %v7171_v30 = vsel %vm323_vm8, %v9235_v45, %v9234_v29  ;;  %v7194_v45 = vstv %s7073_s27  ;;  %v9239_v48 = vrot.slane %v7145_v0, 6  ;;  %v9242_v35 = vrot.slane %v7164_v24, 1  ;;  %s4799_s27 = sld [smem:[#allocation8 + $0x39]] }
 0x655   :  { %v7186_v55 = vsel %vm359_vm10, %v9236_v23, %v8908_v11  ;;  %v7201_v5 = vsel %vm341_vm9, %v9238_v9, %v8911_v57  ;;  %v9240_v23 = vrot.slane %v6873_v60, 6  ;;  %v8914_v29 = vrot.slane %v7177_v51, 2 }
 0x656   :  { %v9243_v47 = vrot.slane %v6869_v34, 1  ;;  %v8917_v57 = vrot.slane %v7191_v62, 4  ;;  %v3299_v60 = vrot.slane %v6937_v56, 3  ;;  %v8918_v34 = vrot.slane %v7213_v63, 3 }
 0x657   :  { %v7208_v11 = vsel %vm377_vm11, %v9240_v23, %v9239_v48  ;;  %v7226_v48 = vmul.f32 %v6978_v17, %v6880_v2  ;;  %v9244_v23 = vrot.slane %v6896_v44, 2  ;;  %v3412_v56 = vmul.f32 %v7194_v45, %v6690_v18 }
 0x658   :  { %v7220_v9 = vsel %vm287_vm6, %v9243_v47, %v9242_v35  ;;  %v7238_v35 = vmul.f32 %v7032_v16, %v6880_v2  ;;  %v9248_v47 = vrot.slane %v6922_v8, 4  ;;  %v3341_v44 = vrot.slane %v7026_v27, 5 }
 0x659   :  { %v7233_v19 = vsel %vm9245_vm13, %v9244_v23, %v8914_v29  ;;  %v8919_v23 = vrot.slane %v7226_v48, 5  ;;  %v7254_v29 = vsel %vm323_vm8, %v3299_v60, %v8918_v34  ;;  %v3362_v16 = vrot.slane %v3356_v39, 6  ;;  %vm9255_vm13 = vmmov %vm9209_vm2 }
 0x65a   :  { %9246 = vst [vmem:[#allocation52_spill] sm:$0xff] %v7233_v19  ;;  %v7247_v24 = vsel %vm341_vm9, %v9248_v47, %v8917_v57  ;;  %v8920_v19 = vrot.slane %v7238_v35, 6  ;;  %v7259_v62 = vmul.f32 %v7194_v45, %v6880_v2  ;;  %v8922_v27 = vstv %s7179_s28 }
 0x65b   :  { %9247 = vst [vmem:[#allocation46_spill] sm:$0xff] %v7238_v35  ;;  %v7264_v8 = vsel %vm359_vm10, %v3341_v44, %v8919_v23  ;;  %v3418_v60 = vrot.slane %v3412_v56, 2  ;;  %v7276_v57 = vmul.f32 %v8922_v27, %v6880_v2 }
 0x65c   :  { %9249 = vst [vmem:[#allocation23_spill] sm:$0xff] %v7254_v29  ;;  %v7270_v47 = vsel %vm377_vm11, %v3362_v16, %v8920_v19  ;;  %v8923_v39 = vrot.slane %v7259_v62, 2 }
 0x65d   :  { %9250 = vst [vmem:[#allocation60_spill] sm:$0xff] %v7264_v8 }
 0x65e   :  { %9251 = vst [vmem:[#allocation61_spill] sm:$0xff] %v7270_v47  ;;  %v7281_v34 = vsel %vm9209_vm2, %v3418_v60, %v8923_v39  ;;  %v9254_v60 = vld [vmem:[#allocation25_spill] sm:$0xff] }
 0x65f   :  { %9252 = vst [vmem:[#allocation62_spill] sm:$0xff] %v7276_v57  ;;  %v2690_v57 = vstv %s4750_s10  ;;  %s7758_s10 = sld [smem:[#allocation8 + $0x32]] }
 0x660   :  { %9253 = vst [vmem:[#allocation63_spill] sm:$0xff] %v7281_v34  ;;  %v2692_v34 = vmul.f32 %v2690_v57, %v6880_v2 }
 0x695   :  { %v2529_v44 = vpop.permute.xlu1 %2528 }
 0x696   :  { %2531 = vst.msk [vmem:[#allocation2 + $0x28] sm:$0x1] %vm81_vm3, %v2529_v44 }
 0x697   :  { %v2521_v23 = vpop.permute.xlu2 %2520 }
 0x698   :  { %2523 = vst.msk [vmem:[#allocation2 + $0x10] sm:$0x1] %vm81_vm3, %v2521_v23  ;;  %v2676_v23 = vstv %s7287_s19  ;;  %s4802_s19 = sld [smem:[#allocation8 + $0x4e]] }
 0x699   :  { %v2678_v44 = vmul.f32 %v2676_v23, %v6880_v2 }
 0x69d   :  { %v2541_v16 = vpop.permute.xlu1 %2540 }
 0x69e   :  { %v2542_v56 = vrot.slane %v2541_v16, 1 }
 0x69f   :  { %v2533_v19 = vpop.permute.xlu2 %2532 }
 0x6a0   :  { %v2534_v35 = vrot.slane %v2533_v19, 1  ;;  %v2543_v47 = vperm.slane %v2542_v56, 0  ;;  %v2711_v19 = vstv %s4751_s17  ;;  %s4800_s17 = sld [smem:[#allocation8 + $0x40]] }
 0x6a2   :  { %v2535_v8 = vperm.slane %v2534_v35, 0  ;;  %2544 = vrot.lane.b32.xlu2 %v2543_v47, %s4968_s20  ;;  %v2713_v35 = vmul.f32 %v2711_v19, %v6880_v2 }
 0x6a4   :  { %2536 = vrot.lane.b32.xlu0 %v2535_v8, %s4968_s20  ;;  %v2712_v8 = vmul.f32 %v2711_v19, %v6690_v18  ;;  %v2719_v47 = vrot.slane %v2713_v35, 2  ;;  %v2698_v35 = vrot.slane %v2692_v34, 1 }
 0x6a6   :  { %v2718_v16 = vrot.slane %v2712_v8, 2 }
 0x6a8   :  { %v2720_v56 = vsel %vm9255_vm13, %v2718_v16, %v2719_v47  ;;  %vm9284_vm13 = vmmov %vm9209_vm2 }
 0x6aa   :  { %2556 = vrot.lane.b32.xlu2 %v6477_v12, %s4981_s4 }
 0x6ac   :  { %2548 = vrot.lane.b32.xlu0 %v9254_v60, %s4981_s4 }
 0x6b2   :  { %2683 = vrot.lane.b32.xlu2 %v2678_v44, %s4984_s11  ;;  %v2691_v44 = vmul.f32 %v2690_v57, %v6690_v18 }
 0x6b4   :  { %v2697_v8 = vrot.slane %v2691_v44, 1 }
 0x6b6   :  { %v2699_v16 = vsel %vm287_vm6, %v2697_v8, %v2698_v35  ;;  %v9256_v8 = vld [vmem:[#allocation27_spill] sm:$0xff] }
 0x6ba   :  { %2723 = vrot.lane.b32.xlu2 %v2720_v56, %s4984_s11 }
 0x6fc   :  { %v2545_v12 = vpop.permute.xlu2 %2544 }
 0x6fd   :  { %2547 = vst.msk [vmem:[#allocation2 + $0x29] sm:$0x1] %vm81_vm3, %v2545_v12 }
 0x704   :  { %v2557_v60 = vpop.permute.xlu2 %2556 }
 0x705   :  { %v2558_v27 = vrot.slane %v2557_v60, 1 }
 0x707   :  { %v2559_v39 = vperm.slane %v2558_v27, 0  ;;  %v2677_v27 = vmul.f32 %v2676_v23, %v6690_v18 }
 0x709   :  { %2560 = vrot.lane.b32.xlu0 %v2559_v39, %s4968_s20 }
 0x711   :  { %2702 = vrot.lane.b32.xlu0 %v2699_v16, %s4984_s11 }
 0x716   :  { %v2537_v56 = vpop.permute.xlu0 %2536 }
 0x717   :  { %2539 = vst.msk [vmem:[#allocation2 + $0x11] sm:$0x1] %vm81_vm3, %v2537_v56 }
 0x71e   :  { %v2549_v12 = vpop.permute.xlu0 %2548 }
 0x71f   :  { %v2550_v63 = vrot.slane %v2549_v12, 1 }
 0x721   :  { %v2551_v60 = vperm.slane %v2550_v63, 0  ;;  %v9257_v63 = vrot.slane %v6903_v40, 3  ;;  %v9259_v40 = vld [vmem:[#allocation13_spill] sm:$0xff] }
 0x723   :  { %2552 = vrot.lane.b32.xlu1 %v2551_v60, %s4968_s20  ;;  %s4756_s20 = sld [smem:[#allocation8 + $0x2]] }
 0x72b   :  { %2681 = vrot.lane.b32.xlu1 %v2677_v27, %s4984_s11 }
 0x77b   :  { %v2561_v39 = vpop.permute.xlu0 %2560 }
 0x77c   :  { %2563 = vst.msk [vmem:[#allocation2 + $0x2a] sm:$0x1] %vm81_vm3, %v2561_v39 }
 0x795   :  { %v2553_v34 = vpop.permute.xlu1 %2552 }
 0x796   :  { %2555 = vst.msk [vmem:[#allocation2 + $0x12] sm:$0x1] %vm81_vm3, %v2553_v34  ;;  %vm9258_vm3 = vmmov %vm9209_vm2 }
 0x79d   :  { %v7312_v44 = vld [vmem:[#allocation2 + $0x10] sm:$0x3f] }
 0x79e   :  { %v2735_v16 = vmul.f32 %v9256_v8, %v7312_v44  ;;  %v2693_v23 = vmul.f32 %v2690_v57, %v7312_v44  ;;  %v2714_v60 = vmul.f32 %v2711_v19, %v7312_v44  ;;  %v2798_v8 = vmul.f32 %v9259_v40, %v7312_v44  ;;  %v9260_v57 = vld [vmem:[#allocation32_spill] sm:$0xff]  ;;  %v9267_v40 = vld [vmem:[#allocation35_spill] sm:$0xff] }
 0x79f   :  { %v2756_v19 = vmul.f32 %v9260_v57, %v7312_v44 }
 0x7a0   :  { %v2742_v56 = vrot.slane %v2735_v16, 3  ;;  %v2700_v27 = vrot.slane %v2693_v23, 1  ;;  %v2721_v39 = vrot.slane %v2714_v60, 2  ;;  %v2805_v16 = vrot.slane %v2798_v8, 6  ;;  %v9264_v60 = vld [vmem:[#allocation18_spill] sm:$0xff] }
 0x7a1   :  { %v2833_v8 = vmul.f32 %v9267_v40, %v7312_v44 }
 0x7a2   :  { %v2743_v12 = vsel %vm323_vm8, %v9257_v63, %v2742_v56  ;;  %v2701_v34 = vsel %vm287_vm6, %v2698_v35, %v2700_v27  ;;  %v2722_v29 = vsel %vm9258_vm3, %v2719_v47, %v2721_v39  ;;  %v9261_v56 = vld [vmem:[#allocation33_spill] sm:$0xff]  ;;  %v9265_v27 = vrot.slane %v9264_v60, 5  ;;  %vm9290_vm3 = vmmov %vm9209_vm2 }
 0x7a3   :  { %2746 = vrot.lane.b32.xlu2 %v2743_v12, %s4984_s11  ;;  %2704 = vrot.lane.b32.xlu1 %v2701_v34, %s4984_s11  ;;  %v2777_v63 = vmul.f32 %v9261_v56, %v7312_v44  ;;  %v9263_v12 = vrot.slane %v6914_v36, 4  ;;  %v2816_v39 = vstv %s4756_s20  ;;  %v9269_v56 = vrot.slane %v6929_v54, 1  ;;  %s7762_s20 = sld [smem:[#allocation8 + $0x33]] }
 0x7a4   :  { %2725 = vrot.lane.b32.xlu0 %v2722_v29, %s4984_s11  ;;  %v9262_v29 = vrot.slane %v6918_v31, 6  ;;  %v9266_v31 = vld [vmem:[#allocation37_spill] sm:$0xff]  ;;  %v2817_v34 = vmul.f32 %v2816_v39, %v6690_v18  ;;  %v2956_v60 = vstv %s4763_s16  ;;  %s4801_s16 = sld [smem:[#allocation8 + $0x47]] }
 0x7a5   :  { %v2784_v35 = vrot.slane %v2777_v63, 5 }
 0x7a6   :  { %v2806_v47 = vsel %vm377_vm11, %v9262_v29, %v2805_v16  ;;  %v9268_v16 = vrot.slane %v6933_v52, 2  ;;  %v9270_v29 = vld [vmem:[#allocation41_spill] sm:$0xff] }
 0x7ab   :  { %2786 = vrot.lane.b32.xlu2 %v6961_v22, %s4984_s11  ;;  %2744 = vrot.lane.b32.xlu1 %v6948_v26, %s4984_s11  ;;  %v2763_v22 = vrot.slane %v2756_v19, 4  ;;  %v2785_v26 = vsel %vm359_vm10, %v9265_v27, %v2784_v35  ;;  %v2840_v19 = vrot.slane %v2833_v8, 1  ;;  %v9272_v35 = vld [vmem:[#allocation15_spill] sm:$0xff]  ;;  %v9274_v27 = vld [vmem:[#allocation40_spill] sm:$0xff] }
 0x7ac   :  { %2765 = vrot.lane.b32.xlu0 %v6968_v61, %s4984_s11  ;;  %v2854_v61 = vmul.f32 %v9266_v31, %v7312_v44  ;;  %v9279_v8 = vld [vmem:[#allocation43_spill] sm:$0xff] }
 0x7ad   :  { %v2764_v23 = vsel %vm341_vm9, %v9263_v12, %v2763_v22  ;;  %v2841_v63 = vsel %vm287_vm6, %v9269_v56, %v2840_v19  ;;  %v9271_v22 = vld [vmem:[#allocation31_spill] sm:$0xff]  ;;  %v9273_v12 = vrot.slane %v7001_v28, 5 }
 0x7ae   :  { %v2861_v36 = vrot.slane %v2854_v61, 2  ;;  %v2896_v54 = vmul.f32 %v9271_v22, %v7312_v44  ;;  %v9276_v61 = vld [vmem:[#allocation20_spill] sm:$0xff]  ;;  %v9278_v28 = vld [vmem:[#allocation47_spill] sm:$0xff] }
 0x7af   :  { %v9285_v22 = vld [vmem:[#allocation48_spill] sm:$0xff] }
 0x7b0   :  { %v2862_v57 = vsel %vm9209_vm2, %v9268_v16, %v2861_v36  ;;  %v2973_v36 = vmul.f32 %v9278_v28, %v7312_v44  ;;  %v2938_v16 = vmul.f32 %v9279_v8, %v7312_v44  ;;  %v3096_v28 = vstv %s4770_s5  ;;  %s4803_s5 = sld [smem:[#allocation8 + $0x55]] }
 0x7b2   :  { %v2980_v40 = vrot.slane %v2973_v36, 1  ;;  %v3098_v36 = vmul.f32 %v3096_v28, %v6880_v2 }
 0x7b3   :  { %2809 = vrot.lane.b32.xlu2 %v2806_v47, %s4984_s11  ;;  %2767 = vrot.lane.b32.xlu1 %v2764_v23, %s4984_s11  ;;  %v2875_v47 = vmul.f32 %v9270_v29, %v7312_v44  ;;  %v2903_v23 = vrot.slane %v2896_v54, 4  ;;  %v3036_v54 = vmul.f32 %v9285_v22, %v7312_v44 }
 0x7b4   :  { %2788 = vrot.lane.b32.xlu0 %v2785_v26, %s4984_s11  ;;  %v9275_v26 = vrot.slane %v9274_v27, 3 }
 0x7bb   :  { %2842 = vrot.lane.b32.xlu2 %v6985_v41, %s4982_s6  ;;  %2807 = vrot.lane.b32.xlu1 %v6975_v37, %s4984_s11  ;;  %v2818_v41 = vmul.f32 %v2816_v39, %v6880_v2  ;;  %v2917_v37 = vmul.f32 %v6748_v4, %v7312_v44  ;;  %v9277_v39 = vrot.slane %v9276_v61, 4  ;;  %v9291_v61 = vld [vmem:[#allocation34_spill] sm:$0xff] }
 0x7bc   :  { %2821 = vrot.lane.b32.xlu0 %v2817_v34, %s4982_s6 }
 0x7bd   :  { %v2924_v52 = vrot.slane %v2917_v37, 5  ;;  %v2904_v34 = vsel %vm341_vm9, %v9277_v39, %v2903_v23  ;;  %v9281_v37 = vrot.slane %v7226_v48, 5  ;;  %v9292_v39 = vrot.slane %v9291_v61, 3 }
 0x7bf   :  { %v2925_v4 = vsel %vm359_vm10, %v9273_v12, %v2924_v52 }
 0x7c3   :  { %2865 = vrot.lane.b32.xlu2 %v2862_v57, %s4982_s6  ;;  %2823 = vrot.lane.b32.xlu1 %v2818_v41, %s4982_s6  ;;  %v3337_v57 = vmul.f32 %v6978_v17, %v7312_v44  ;;  %v9280_v41 = vrot.slane %v7009_v53, 1  ;;  %v3414_v17 = vmul.f32 %v7194_v45, %v7312_v44  ;;  %v7430_v45 = vpop.permute.xlu2 %2683 }
 0x7c4   :  { %2844 = vrot.lane.b32.xlu0 %v2841_v63, %s4982_s6  ;;  %v2945_v63 = vrot.slane %v2938_v16, 6  ;;  %v9295_v16 = vrot.slane %v7086_v15, 5  ;;  %v3097_v15 = vmul.f32 %v3096_v28, %v6690_v18 }
 0x7c5   :  { %v3344_v19 = vrot.slane %v3337_v57, 5  ;;  %v2981_v56 = vsel %vm287_vm6, %v9280_v41, %v2980_v40  ;;  %v3421_v29 = vrot.slane %v3414_v17, 2  ;;  %v9299_v17 = vld [vmem:[#allocation19_spill] sm:$0xff] }
 0x7c7   :  { %v7413_v52 = vsel %vm359_vm10, %v9281_v37, %v3344_v19  ;;  %v9296_v19 = vrot.slane %v7071_v3, 6  ;;  %v9298_v3 = vld [vmem:[#allocation44_spill] sm:$0xff] }
 0x7c8   :  { %v3113_v37 = vmul.f32 %v9298_v3, %v7312_v44 }
 0x7ca   :  { %v3120_v22 = vrot.slane %v3113_v37, 1  ;;  %v2625_v37 = vstv %s4746_s1  ;;  %s7840_s1 = sld [smem:[#allocation8 + $0x41]] }
 0x7cb   :  { %2905 = vrot.lane.b32.xlu2 %v7017_v1, %s4982_s6  ;;  %2863 = vrot.lane.b32.xlu1 %v9272_v35, %s4982_s6  ;;  %v2882_v1 = vrot.slane %v2875_v47, 3  ;;  %v9283_v47 = vrot.slane %v7259_v62, 2  ;;  %v9286_v35 = vld [vmem:[#allocation49_spill] sm:$0xff]  ;;  %v9288_v62 = vrot.slane %v7048_v43, 4  ;;  %v7446_v27 = vpop.permute.xlu2 %2723 }
 0x7cc   :  { %2884 = vrot.lane.b32.xlu0 %v7039_v6, %s4982_s6  ;;  %v2957_v6 = vmul.f32 %v2956_v60, %v6690_v18  ;;  %v2994_v12 = vmul.f32 %v9286_v35, %v7312_v44 }
 0x7cd   :  { %v2883_v31 = vsel %vm323_vm8, %v9275_v26, %v2882_v1  ;;  %v7426_v48 = vsel %vm9284_vm13, %v9283_v47, %v3421_v29  ;;  %v9289_v26 = vrot.slane %v7044_v42, 2  ;;  %v9294_v42 = vld [vmem:[#allocation42_spill] sm:$0xff]  ;;  %v7494_v29 = vpop.permute.xlu0 %2702  ;;  %v2574_v47 = vstv %s4743_s7  ;;  %vm9306_vm13 = vmmov %vm9209_vm2  ;;  %s4808_s7 = sld [smem:[#allocation8 + $0x48]] }
 0x7ce   :  { %v2576_v35 = vmul.f32 %v2574_v47, %v6880_v2 }
 0x7d3   :  { %2928 = vrot.lane.b32.xlu2 %v2925_v4, %s4982_s6  ;;  %2886 = vrot.lane.b32.xlu1 %v2883_v31, %s4982_s6  ;;  %v9287_v4 = vld [vmem:[#allocation36_spill] sm:$0xff] }
 0x7d4   :  { %2907 = vrot.lane.b32.xlu0 %v2904_v34, %s4982_s6  ;;  %v3015_v1 = vmul.f32 %v9287_v4, %v7312_v44  ;;  %v9302_v4 = vrot.slane %v7091_v25, 2  ;;  %v9303_v25 = vld [vmem:[#allocation58_spill] sm:$0xff] }
 0x7d5   :  { %v3218_v61 = vmul.f32 %v9303_v25, %v7312_v44 }
 0x7db   :  { %2961 = vrot.lane.b32.xlu2 %v2957_v6, %s4983_s9  ;;  %2926 = vrot.lane.b32.xlu1 %v7055_v32, %s4982_s6  ;;  %v2958_v32 = vmul.f32 %v2956_v60, %v6880_v2  ;;  %v3022_v60 = vrot.slane %v3015_v1, 3  ;;  %v3078_v6 = vmul.f32 %v9294_v42, %v7312_v44 }
 0x7dc   :  { %2947 = vrot.lane.b32.xlu0 %v7062_v20, %s4982_s6  ;;  %v9282_v20 = vrot.slane %v7005_v33, 6  ;;  %v3043_v33 = vrot.slane %v3036_v54, 4 }
 0x7dd   :  { %v3085_v40 = vrot.slane %v3078_v6, 6  ;;  %v2608_v6 = vstv %s4745_s0  ;;  %s4810_s0 = sld [smem:[#allocation8 + $0x56]] }
 0x7de   :  { %v2946_v53 = vsel %vm377_vm11, %v9282_v20, %v2945_v63  ;;  %v3044_v23 = vsel %vm341_vm9, %v9288_v62, %v3043_v33  ;;  %v9300_v20 = vrot.slane %v7116_v49, 3  ;;  %v2577_v33 = vmul.f32 %v2574_v47, %v7312_v44 }
 0x7df   :  { %v2575_v62 = vmul.f32 %v2574_v47, %v6690_v18  ;;  %v2610_v3 = vmul.f32 %v2608_v6, %v6880_v2 }
 0x7e3   :  { %2984 = vrot.lane.b32.xlu2 %v2981_v56, %s4983_s9  ;;  %2949 = vrot.lane.b32.xlu1 %v2946_v53, %s4982_s6 }
 0x7e4   :  { %2963 = vrot.lane.b32.xlu0 %v2958_v32, %s4983_s9  ;;  %v3134_v32 = vmul.f32 %v9299_v17, %v7312_v44 }
 0x7e6   :  { %v3141_v54 = vrot.slane %v3134_v32, 2 }
 0x7e8   :  { %v3142_v1 = vsel %vm9209_vm2, %v9302_v4, %v3141_v54  ;;  %v2616_v4 = vrot.slane %v2610_v3, 3  ;;  %v9312_v3 = vld [vmem:[#allocation59_spill] sm:$0xff] }
 0x7eb   :  { %3024 = vrot.lane.b32.xlu2 %v7080_v38, %s4983_s9  ;;  %2982 = vrot.lane.b32.xlu1 %v7067_v58, %s4983_s9  ;;  %v3001_v38 = vrot.slane %v2994_v12, 2  ;;  %v3023_v58 = vsel %vm323_vm8, %v9292_v39, %v3022_v60  ;;  %v9301_v12 = vrot.slane %v7095_v21, 1  ;;  %v2582_v60 = vrot.slane %v2576_v35, 1 }
 0x7ec   :  { %3003 = vrot.lane.b32.xlu0 %v7104_v13, %s4983_s9  ;;  %v9293_v13 = vld [vmem:[#allocation53_spill] sm:$0xff]  ;;  %v2568_v39 = vstv %s7502_s8  ;;  %s7801_s8 = sld [smem:[#allocation8 + $0x3a]] }
 0x7ed   :  { %v3002_v31 = vsel %vm9290_vm3, %v9289_v26, %v3001_v38  ;;  %v3057_v34 = vmul.f32 %v9293_v13, %v7312_v44  ;;  %v3121_v49 = vsel %vm287_vm6, %v9301_v12, %v3120_v22  ;;  %v2591_v38 = vstv %s4744_s15  ;;  %vm9308_vm3 = vmmov %vm9209_vm2  ;;  %s4804_s15 = sld [smem:[#allocation8 + $0x5c]] }
 0x7ee   :  { %v2594_v26 = vmul.f32 %v2591_v38, %v7312_v44  ;;  %v2581_v13 = vrot.slane %v2575_v62, 1  ;;  %v2570_v42 = vmul.f32 %v2568_v39, %v6880_v2  ;;  %v2592_v28 = vmul.f32 %v2591_v38, %v6690_v18 }
 0x7f0   :  { %v2598_v32 = vrot.slane %v2592_v28, 2 }
 0x7f3   :  { %3047 = vrot.lane.b32.xlu2 %v3044_v23, %s4983_s9  ;;  %3005 = vrot.lane.b32.xlu1 %v3002_v31, %s4983_s9  ;;  %v2584_v23 = vrot.slane %v2577_v33, 1 }
 0x7f4   :  { %3026 = vrot.lane.b32.xlu0 %v3023_v58, %s4983_s9  ;;  %v2593_v58 = vmul.f32 %v2591_v38, %v6880_v2 }
 0x7fb   :  { %3087 = vrot.lane.b32.xlu2 %v7123_v59, %s4983_s9  ;;  %3045 = vrot.lane.b32.xlu1 %v7111_v46, %s4983_s9  ;;  %v3064_v59 = vrot.slane %v3057_v34, 5  ;;  %v3086_v46 = vsel %vm377_vm11, %v9296_v19, %v3085_v40  ;;  %v2585_v34 = vsel %vm287_vm6, %v2582_v60, %v2584_v23  ;;  %v2583_v40 = vsel %vm287_vm6, %v2581_v13, %v2582_v60 }
 0x7fc   :  { %3066 = vrot.lane.b32.xlu0 %v7136_v14, %s4983_s9  ;;  %v9297_v14 = vld [vmem:[#allocation39_spill] sm:$0xff]  ;;  %v2589_v19 = vadd.f32 %v2585_v34, %v2570_v42  ;;  %v2642_v23 = vstv %s7530_s21  ;;  %v2626_v60 = vmul.f32 %v2625_v37, %v6690_v18  ;;  %v9309_v13 = vrot.slane %v7141_v10, 4  ;;  %v9310_v42 = vld [vmem:[#allocation16_spill] sm:$0xff]  ;;  %s4809_s21 = sld [smem:[#allocation8 + $0x4f]] }
 0x7fd   :  { %v7458_v43 = vpop.permute.xlu2 %2746  ;;  %v3065_v57 = vsel %vm359_vm10, %v9295_v16, %v3064_v59  ;;  %v3155_v41 = vmul.f32 %v9297_v14, %v7312_v44  ;;  %v2611_v59 = vmul.f32 %v2608_v6, %v7312_v44  ;;  %v3225_v16 = vrot.slane %v3218_v61, 6 }
 0x7fe   :  { %v2643_v10 = vmul.f32 %v2642_v23, %v6690_v18 }
 0x7ff   :  { %v3162_v63 = vrot.slane %v3155_v41, 3  ;;  %v9305_v41 = vld [vmem:[#allocation54_spill] sm:$0xff]  ;;  %v2618_v47 = vrot.slane %v2611_v59, 3 }
 0x801   :  { %v3163_v53 = vsel %vm323_vm8, %v9300_v20, %v3162_v63  ;;  %v2599_v63 = vrot.slane %v2593_v58, 2  ;;  %v2609_v20 = vmul.f32 %v2608_v6, %v6690_v18  ;;  %v9311_v6 = vrot.slane %v9310_v42, 5 }
 0x803   :  { %3103 = vrot.lane.b32.xlu2 %v3098_v36, %s4985_s12  ;;  %3068 = vrot.lane.b32.xlu1 %v3065_v57, %s4983_s9  ;;  %v2569_v57 = vmul.f32 %v2568_v39, %v6690_v18  ;;  %v2600_v62 = vsel %vm9308_vm3, %v2598_v32, %v2599_v63  ;;  %v2615_v25 = vrot.slane %v2609_v20, 3  ;;  %v2619_v39 = vsel %vm323_vm8, %v2616_v4, %v2618_v47  ;;  %vm9330_vm3 = vmmov %vm9209_vm2 }
 0x804   :  { %3089 = vrot.lane.b32.xlu0 %v3086_v46, %s4983_s9  ;;  %v9304_v46 = vld [vmem:[#allocation56_spill] sm:$0xff]  ;;  %v3236_v32 = vstv %s7560_s23  ;;  %s4811_s23 = sld [smem:[#allocation8 + $0x5d]] }
 0x805   :  { %v7470_v8 = vpop.permute.xlu2 %2786  ;;  %v3176_v14 = vmul.f32 %v9304_v46, %v7312_v44  ;;  %v2588_v17 = vadd.f32 %v2583_v40, %v2569_v57  ;;  %v2644_v40 = vmul.f32 %v2642_v23, %v6880_v2 }
 0x807   :  { %v3183_v12 = vrot.slane %v3176_v14, 4  ;;  %v2605_v38 = vadd.f32 %v2600_v62, %v2588_v17  ;;  %v2650_v20 = vrot.slane %v2644_v40, 5 }
 0x809   :  { %v3184_v34 = vsel %vm341_vm9, %v9309_v13, %v3183_v12 }
 0x80b   :  { %3143 = vrot.lane.b32.xlu2 %v7152_v50, %s4985_s12  ;;  %3101 = vrot.lane.b32.xlu1 %v3097_v15, %s4985_s12  ;;  %v7496_v50 = vpop.permute.xlu1 %2681  ;;  %v3197_v15 = vmul.f32 %v9305_v41, %v7312_v44 }
 0x80c   :  { %3122 = vrot.lane.b32.xlu0 %v7159_v7, %s4985_s12 }
 0x80d   :  { %v7484_v56 = vpop.permute.xlu2 %2809 }
 0x813   :  { %3166 = vrot.lane.b32.xlu2 %v3163_v53, %s4985_s12  ;;  %3124 = vrot.lane.b32.xlu1 %v3121_v49, %s4985_s12  ;;  %v2628_v53 = vmul.f32 %v2625_v37, %v7312_v44  ;;  %v3204_v49 = vrot.slane %v3197_v15, 5 }
 0x814   :  { %3145 = vrot.lane.b32.xlu0 %v3142_v1, %s4985_s12  ;;  %v2627_v1 = vmul.f32 %v2625_v37, %v6880_v2  ;;  %v3274_v37 = vmul.f32 %v9312_v3, %v7312_v44  ;;  %v9317_v3 = vld [vmem:[#allocation57_spill] sm:$0xff] }
 0x815   :  { %v7505_v7 = vpop.permute.xlu2 %2842  ;;  %v7518_v31 = vpop.permute.xlu1 %2704  ;;  %v2635_v61 = vrot.slane %v2628_v53, 4  ;;  %v3205_v28 = vsel %vm359_vm10, %v9311_v6, %v3204_v49 }
 0x816   :  { %v7520_v21 = vpop.permute.xlu0 %2725  ;;  %v2633_v59 = vrot.slane %v2627_v1, 4  ;;  %v3281_v1 = vrot.slane %v3274_v37, 2  ;;  %v3295_v37 = vmul.f32 %v9317_v3, %v7312_v44 }
 0x818   :  { %v2636_v41 = vsel %vm341_vm9, %v2633_v59, %v2635_v61 }
 0x81b   :  { %3206 = vrot.lane.b32.xlu2 %v7186_v55, %s4985_s12  ;;  %v2601_v55 = vrot.slane %v2594_v26, 2  ;;  %3164 = vrot.lane.b32.xlu1 %v7171_v30, %s4985_s12  ;;  %v9307_v30 = vrot.slane %v7145_v0, 6  ;;  %v2645_v26 = vmul.f32 %v2642_v23, %v7312_v44 }
 0x81c   :  { %3185 = vrot.lane.b32.xlu0 %v7201_v5, %s4985_s12 }
 0x81d   :  { %v7533_v36 = vpop.permute.xlu2 %2865  ;;  %v2602_v22 = vsel %vm9306_vm13, %v2599_v63, %v2601_v55  ;;  %v7552_v54 = vpop.permute.xlu1 %2744  ;;  %v3226_v5 = vsel %vm377_vm11, %v9307_v30, %v3225_v16  ;;  %v2617_v55 = vsel %vm323_vm8, %v2615_v25, %v2616_v4  ;;  %v2659_v16 = vstv %s7547_s22  ;;  %vm9329_vm13 = vmmov %vm9209_vm2  ;;  %s4813_s22 = sld [smem:[#allocation8 + $0x3b]] }
 0x81e   :  { %v7554_v33 = vpop.permute.xlu0 %2765  ;;  %v2606_v35 = vadd.f32 %v2602_v22, %v2589_v19  ;;  %v2622_v57 = vadd.f32 %v2617_v55, %v2605_v38  ;;  %v2632_v19 = vrot.slane %v2626_v60, 4  ;;  %v2662_v46 = vmul.f32 %v2659_v16, %v7312_v44 }
 0x81f   :  { %v2652_v14 = vrot.slane %v2645_v26, 5  ;;  %v2661_v53 = vmul.f32 %v2659_v16, %v6880_v2  ;;  %v2649_v30 = vrot.slane %v2643_v10, 5  ;;  %v3237_v4 = vmul.f32 %v3236_v32, %v6690_v18 }
 0x820   :  { %v2623_v58 = vadd.f32 %v2619_v39, %v2606_v35  ;;  %v2634_v47 = vsel %vm341_vm9, %v2632_v19, %v2633_v59  ;;  %v2669_v12 = vrot.slane %v2662_v46, 6  ;;  %v3238_v59 = vmul.f32 %v3236_v32, %v6880_v2  ;;  %v7640_v32 = vld [vmem:[#allocation2] sm:$0xff] }
 0x821   :  { %v2639_v22 = vadd.f32 %v2634_v47, %v2622_v57  ;;  %v2653_v49 = vsel %vm359_vm10, %v2650_v20, %v2652_v14  ;;  %v2667_v38 = vrot.slane %v2661_v53, 6  ;;  %v2651_v60 = vsel %vm359_vm10, %v2649_v30, %v2650_v20 }
 0x822   :  { %v2640_v17 = vadd.f32 %v2636_v41, %v2623_v58  ;;  %v7645_v53 = vstv %s4787_s24  ;;  %s7938_s24 = sld [smem:[#allocation8 + $0x34]] }
 0x823   :  { %3229 = vrot.lane.b32.xlu2 %v3226_v5, %s4985_s12  ;;  %3187 = vrot.lane.b32.xlu1 %v3184_v34, %s4985_s12  ;;  %v2660_v5 = vmul.f32 %v2659_v16, %v6690_v18  ;;  %v2656_v26 = vadd.f32 %v2651_v60, %v2639_v22  ;;  %v2670_v61 = vsel %vm377_vm11, %v2667_v38, %v2669_v12  ;;  %v9314_v18 = vrot.slane %v7177_v51, 2  ;;  %v9315_v16 = vld [vmem:[#allocation21_spill] sm:$0xff] }
 0x824   :  { %3208 = vrot.lane.b32.xlu0 %v3205_v28, %s4985_s12  ;;  %v2657_v62 = vadd.f32 %v2653_v49, %v2640_v17  ;;  %v9316_v57 = vrot.slane %v9315_v16, 1  ;;  %v9319_v17 = vld [vmem:[#allocation23_spill] sm:$0xff]  ;;  %v7651_v22 = vmul.f32 %v7645_v53, %v6880_v2  ;;  %v7694_v16 = vstv %s4788_s26  ;;  %s4815_s26 = sld [smem:[#allocation8 + $0x49]] }
 0x825   :  { %v7566_v0 = vpop.permute.xlu2 %2905  ;;  %v7584_v15 = vpop.permute.xlu1 %2767  ;;  %v2666_v25 = vrot.slane %v2660_v5, 6  ;;  %v3282_v13 = vsel %vm9209_vm2, %v9314_v18, %v3281_v1 }
 0x826   :  { %v7586_v63 = vpop.permute.xlu0 %2788  ;;  %v2674_v34 = vadd.f32 %v2670_v61, %v2657_v62  ;;  %v3440_v49 = vrot.slane %v7651_v22, 3  ;;  %v9321_v62 = vld [vmem:[#allocation50_spill] sm:$0xff] }
 0x827   :  { %v2668_v6 = vsel %vm377_vm11, %v2666_v25, %v2667_v38 }
 0x828   :  { %v2688_v55 = vadd.f32 %v7430_v45, %v2674_v34 }
 0x82a   :  { %v2709_v19 = vadd.f32 %v7518_v31, %v2688_v55  ;;  %v9318_v31 = vld [vmem:[#allocation52_spill] sm:$0xff] }
 0x82b   :  { %3262 = vrot.lane.b32.xlu2 %v7220_v9, %s4986_s14  ;;  %v9313_v9 = vld [vmem:[#allocation55_spill] sm:$0xff]  ;;  %3227 = vrot.lane.b32.xlu1 %v7208_v11, %s4985_s12  ;;  %v2673_v11 = vadd.f32 %v2668_v6, %v2656_v26 }
 0x82c   :  { %v3253_v23 = vmul.f32 %v9313_v9, %v7312_v44  ;;  %3241 = vrot.lane.b32.xlu0 %v3237_v4, %s4986_s14  ;;  %v2730_v45 = vadd.f32 %v7520_v21, %v2709_v19  ;;  %v9320_v21 = vstv %s7179_s28  ;;  %v7661_v4 = vstv %s4785_s25  ;;  %s4789_s28 = sld [smem:[#allocation8 + $0x29]]  ;;  %v9324_v19 = vld [vmem:[#allocation61_spill] sm:$0xff] }
 0x82d   :  { %v7596_v35 = vpop.permute.xlu2 %2928  ;;  %v2808_v39 = vpop.permute.xlu1 %2807  ;;  %v2687_v40 = vadd.f32 %v7496_v50, %v2673_v11  ;;  %v3377_v20 = vmul.f32 %v7640_v32, %v9320_v21  ;;  %v9322_v9 = vrot.slane %v9321_v62, 3  ;;  %v3391_v26 = vmul.f32 %v7640_v32, %v7661_v4  ;;  %s4816_s25 = sld [smem:[#allocation8 + $0x50]] }
 0x82e   :  { %v7607_v58 = vpop.permute.xlu0 %2821  ;;  %v3260_v42 = vrot.slane %v3253_v23, 1  ;;  %v7669_v23 = vmul.f32 %v7661_v4, %v6880_v2 }
 0x82f   :  { %v2708_v14 = vadd.f32 %v7494_v29, %v2687_v40  ;;  %v2751_v29 = vadd.f32 %v7458_v43, %v2730_v45  ;;  %v3302_v43 = vrot.slane %v3295_v37, 3 }
 0x830   :  { %v3261_v51 = vsel %vm287_vm6, %v9316_v57, %v3260_v42  ;;  %v7696_v57 = vld [vmem:[#allocation2 + $0x20] sm:$0xff] }
 0x831   :  { %v2729_v41 = vadd.f32 %v7446_v27, %v2708_v14  ;;  %v2772_v30 = vadd.f32 %v7584_v15, %v2751_v29  ;;  %v3303_v15 = vsel %vm323_vm8, %v9322_v9, %v3302_v43  ;;  %v7709_v14 = vld [vmem:[#allocation2 + $0x18] sm:$0xff]  ;;  %v9326_v9 = vld [vmem:[#allocation63_spill] sm:$0xff] }
 0x833   :  { %3285 = vrot.lane.b32.xlu2 %v3282_v13, %s4986_s14  ;;  %3243 = vrot.lane.b32.xlu1 %v3238_v59, %s4986_s14  ;;  %v2793_v1 = vadd.f32 %v7586_v63, %v2772_v30  ;;  %v7677_v63 = vstv %s4790_s18  ;;  %v3397_v59 = vrot.slane %v3391_v26, 1  ;;  %s4814_s18 = sld [smem:[#allocation8 + $0x42]] }
 0x834   :  { %3264 = vrot.lane.b32.xlu0 %v3261_v51, %s4986_s14  ;;  %v7684_v13 = vmul.f32 %v7677_v63, %v6880_v2  ;;  %v3496_v6 = vmul.f32 %v7640_v32, %v7677_v63  ;;  %v7704_v51 = vmul.f32 %v7694_v16, %v6880_v2 }
 0x835   :  { %v7614_v28 = vpop.permute.xlu2 %2961  ;;  %v2824_v10 = vpop.permute.xlu1 %2823  ;;  %v2814_v34 = vadd.f32 %v7484_v56, %v2793_v1  ;;  %v4892_v1 = vld [vmem:[#allocation2 + $0x8] sm:$0xff] }
 0x836   :  { %v2845_v46 = vpop.permute.xlu0 %2844  ;;  %v3503_v55 = vrot.slane %v7684_v13, 6 }
 0x837   :  { %v2828_v11 = vadd.f32 %v2824_v10, %v2814_v34  ;;  %v3502_v10 = vrot.slane %v3496_v6, 6 }
 0x839   :  { %v2849_v45 = vadd.f32 %v2845_v46, %v2828_v11  ;;  %v3504_v2 = vsel %vm377_vm11, %v3502_v10, %v3503_v55  ;;  %v8939_v46 = vrot.slane %v7704_v51, 4 }
 0x83b   :  { %3325 = vrot.lane.b32.xlu2 %v7247_v24, %s4986_s14  ;;  %3283 = vrot.lane.b32.xlu1 %v9318_v31, %s4986_s14  ;;  %v2750_v24 = vadd.f32 %v7552_v54, %v2729_v41  ;;  %v3433_v54 = vmul.f32 %v7640_v32, %v7645_v53  ;;  %v7713_v41 = vstv %s4799_s27  ;;  %s4820_s27 = sld [smem:[#allocation8 + $0x3c]] }
 0x83c   :  { %3304 = vrot.lane.b32.xlu0 %v9319_v17, %s4986_s14  ;;  %v7720_v31 = vmul.f32 %v7713_v41, %v7696_v57  ;;  %v3642_v29 = vmul.f32 %v7713_v41, %v7709_v14 }
 0x83d   :  { %v7629_v50 = vpop.permute.xlu2 %2984  ;;  %v2864_v27 = vpop.permute.xlu1 %2863  ;;  %v2771_v5 = vadd.f32 %v7554_v33, %v2750_v24  ;;  %v9323_v33 = vld [vmem:[#allocation60_spill] sm:$0xff]  ;;  %v3439_v38 = vrot.slane %v3433_v54, 3  ;;  %v2870_v24 = vadd.f32 %v7533_v36, %v2849_v45  ;;  %v7731_v54 = vstv %s4789_s28  ;;  %v9325_v36 = vld [vmem:[#allocation30_spill] sm:$0xff]  ;;  %s4817_s28 = sld [smem:[#allocation8 + $0x57]] }
 0x83e   :  { %v7647_v47 = vpop.permute.xlu0 %2884  ;;  %v8931_v43 = vrot.slane %v7720_v31, 1  ;;  %v7737_v62 = vmul.f32 %v4892_v1, %v7731_v54 }
 0x83f   :  { %v2792_v60 = vadd.f32 %v7470_v8, %v2771_v5  ;;  %v3441_v18 = vsel %vm323_vm8, %v3439_v38, %v3440_v49  ;;  %v3398_v8 = vrot.slane %v7669_v23, 1  ;;  %v3475_v38 = vmul.f32 %v7640_v32, %v7731_v54 }
 0x841   :  { %v2813_v42 = vadd.f32 %v2808_v39, %v2792_v60  ;;  %v3399_v39 = vsel %vm287_vm6, %v3397_v59, %v3398_v8  ;;  %v7747_v60 = vstv %s4802_s19  ;;  %v3481_v59 = vrot.slane %v3475_v38, 5  ;;  %s4818_s19 = sld [smem:[#allocation8 + $0x5e]] }
 0x842   :  { %v7754_v34 = vmul.f32 %v7747_v60, %v7696_v57  ;;  %v7797_v38 = vstv %s4801_s16  ;;  %s4821_s16 = sld [smem:[#allocation8 + $0x43]] }
 0x843   :  { %3381 = vrot.lane.b32.xlu2 %v3377_v20, %s4987_s13  ;;  %3306 = vrot.lane.b32.xlu1 %v3303_v15, %s4986_s14  ;;  %v2827_v56 = vadd.f32 %v7607_v58, %v2813_v42  ;;  %v3454_v58 = vmul.f32 %v7640_v32, %v7694_v16  ;;  %v3648_v15 = vrot.slane %v3642_v29, 1  ;;  %v3705_v32 = vmul.f32 %v7747_v60, %v7709_v14 }
 0x844   :  { %3346 = vrot.lane.b32.xlu0 %v9323_v33, %s4986_s14 }
 0x845   :  { %v7658_v12 = vpop.permute.xlu2 %3024  ;;  %v2887_v25 = vpop.permute.xlu1 %2886  ;;  %v2848_v17 = vadd.f32 %v7505_v7, %v2827_v56  ;;  %v3460_v20 = vrot.slane %v3454_v58, 4  ;;  %v9327_v58 = vld [vmem:[#allocation17_spill] sm:$0xff]  ;;  %v3711_v29 = vrot.slane %v3705_v32, 4 }
 0x846   :  { %v2908_v61 = vpop.permute.xlu0 %2907  ;;  %v2891_v5 = vadd.f32 %v2887_v25, %v2870_v24 }
 0x847   :  { %v2869_v21 = vadd.f32 %v2864_v27, %v2848_v17  ;;  %v3462_v7 = vsel %vm341_vm9, %v3460_v20, %v8939_v46  ;;  %v3316_v27 = vmul.f32 %v9325_v36, %v7312_v44 }
 0x848   :  { %v2912_v42 = vadd.f32 %v2908_v61, %v2891_v5  ;;  %v8926_v61 = vrot.slane %v7754_v34, 4 }
 0x849   :  { %v2890_v33 = vadd.f32 %v7647_v47, %v2869_v21  ;;  %v8938_v47 = vrot.slane %v7737_v62, 5  ;;  %v3323_v6 = vrot.slane %v3316_v27, 4 }
 0x84a   :  { %v2933_v10 = vadd.f32 %v7596_v35, %v2912_v42  ;;  %v3713_v20 = vsel %vm341_vm9, %v3711_v29, %v8926_v61 }
 0x84b   :  { %3444 = vrot.lane.b32.xlu2 %v3441_v18, %s4987_s13  ;;  %3367 = vrot.lane.b32.xlu1 %v9324_v19, %s4986_s14  ;;  %v3650_v18 = vsel %vm287_vm6, %v3648_v15, %v8931_v43  ;;  %v2911_v11 = vadd.f32 %v7566_v0, %v2890_v33  ;;  %v3483_v0 = vsel %vm359_vm10, %v3481_v59, %v8938_v47  ;;  %v8925_v15 = vstv %s7762_s20 }
 0x84c   :  { %3402 = vrot.lane.b32.xlu0 %v3399_v39, %s4987_s13  ;;  %v7767_v39 = vstv %s4800_s17  ;;  %v3684_v59 = vmul.f32 %v7797_v38, %v7709_v14  ;;  %s4823_s17 = sld [smem:[#allocation8 + $0x51]] }
 0x84d   :  { %v7691_v40 = vpop.permute.xlu2 %3047  ;;  %v2927_v3 = vpop.permute.xlu1 %2926  ;;  %v7772_v19 = vmul.f32 %v7767_v39, %v7696_v57  ;;  %v3663_v35 = vmul.f32 %v7767_v39, %v7709_v14 }
 0x84e   :  { %v2948_v37 = vpop.permute.xlu0 %2947  ;;  %v2932_v45 = vadd.f32 %v2927_v3, %v2911_v11 }
 0x84f   :  { %v8932_v1 = vrot.slane %v7772_v19, 2  ;;  %v3669_v27 = vrot.slane %v3663_v35, 2 }
 0x850   :  { %v2953_v5 = vadd.f32 %v2948_v37, %v2932_v45 }
 0x852   :  { %v2967_v37 = vadd.f32 %v7614_v28, %v2953_v5  ;;  %v7820_v28 = vstv %s4808_s7  ;;  %s4822_s7 = sld [smem:[#allocation8 + $0x4a]] }
 0x853   :  { %3507 = vrot.lane.b32.xlu2 %v3504_v2, %s4987_s13  ;;  %3423 = vrot.lane.b32.xlu1 %v9326_v9, %s4987_s13  ;;  %v9328_v2 = vrot.slane %v9327_v58, 4  ;;  %v7829_v58 = vmul.f32 %v7820_v28, %v7696_v57  ;;  %v3824_v29 = vmul.f32 %v7820_v28, %v7709_v14 }
 0x854   :  { %3465 = vrot.lane.b32.xlu0 %v3462_v7, %s4987_s13  ;;  %v8934_v7 = vstv %s7758_s10 }
 0x855   :  { %v7728_v30 = vpop.permute.xlu2 %3087  ;;  %v2950_v26 = vpop.permute.xlu1 %2949  ;;  %v3324_v17 = vsel %vm341_vm9, %v9328_v2, %v3323_v6  ;;  %v3628_v33 = vmul.f32 %v8934_v7, %v7709_v14  ;;  %v3768_v6 = vmul.f32 %v8925_v15, %v7709_v14 }
 0x856   :  { %v2964_v25 = vpop.permute.xlu0 %2963  ;;  %v2954_v24 = vadd.f32 %v2950_v26, %v2933_v10  ;;  %v7799_v26 = vstv %s4803_s5  ;;  %s8090_s5 = sld [smem:[#allocation8 + $0x35]] }
 0x857   :  { %v7813_v42 = vmul.f32 %v7799_v26, %v7696_v57  ;;  %v3726_v10 = vmul.f32 %v7799_v26, %v7709_v14 }
 0x858   :  { %v2968_v36 = vadd.f32 %v2964_v25, %v2954_v24  ;;  %v7809_v25 = vmul.f32 %v7797_v38, %v7696_v57  ;;  %v7836_v24 = vstv %s4804_s15  ;;  %s4824_s15 = sld [smem:[#allocation8 + $0x58]] }
 0x859   :  { %v3732_v5 = vrot.slane %v3726_v10, 5 }
 0x85a   :  { %v2989_v32 = vadd.f32 %v7629_v50, %v2968_v36  ;;  %v8933_v50 = vrot.slane %v7809_v25, 3 }
 0x85b   :  { %3653 = vrot.lane.b32.xlu2 %v3650_v18, %s4984_s11  ;;  %3486 = vrot.lane.b32.xlu1 %v3483_v0, %s4987_s13  ;;  %v3671_v18 = vsel %vm9329_vm13, %v3669_v27, %v8932_v1  ;;  %v8927_v27 = vrot.slane %v7829_v58, 3  ;;  %vm9345_vm13 = vmmov %vm9209_vm2 }
 0x85c   :  { %3327 = vrot.lane.b32.xlu0 %v3324_v17, %s4986_s14  ;;  %v8928_v17 = vrot.slane %v7813_v42, 5 }
 0x85d   :  { %v7765_v56 = vpop.permute.xlu2 %3103  ;;  %v2983_v3 = vpop.permute.xlu1 %2982 }
 0x85e   :  { %v3004_v21 = vpop.permute.xlu0 %3003  ;;  %v2988_v11 = vadd.f32 %v2983_v3, %v2967_v37  ;;  %v7848_v37 = vstv %s7801_s8  ;;  %s4827_s8 = sld [smem:[#allocation8 + $0x3d]] }
 0x85f   :  { %v3782_v10 = vmul.f32 %v7848_v37, %v7709_v14 }
 0x860   :  { %v3009_v35 = vadd.f32 %v3004_v21, %v2988_v11  ;;  %v3830_v11 = vrot.slane %v3824_v29, 3 }
 0x861   :  { %v3788_v15 = vrot.slane %v3782_v10, 1 }
 0x863   :  { %3716 = vrot.lane.b32.xlu2 %v3713_v20, %s4984_s11  ;;  %3632 = vrot.lane.b32.xlu1 %v3628_v33, %s4984_s11  ;;  %v3690_v20 = vrot.slane %v3684_v59, 3  ;;  %v7845_v33 = vmul.f32 %v7836_v24, %v7696_v57  ;;  %v3030_v59 = vadd.f32 %v7658_v12, %v3009_v35 }
 0x864   :  { %3674 = vrot.lane.b32.xlu0 %v3671_v18, %s4984_s11 }
 0x865   :  { %v7791_v9 = vpop.permute.xlu2 %3143  ;;  %v3006_v45 = vpop.permute.xlu1 %3005  ;;  %v3692_v21 = vsel %vm323_vm8, %v3690_v20, %v8933_v50  ;;  %v8930_v20 = vrot.slane %v7845_v33, 6 }
 0x866   :  { %v3027_v0 = vpop.permute.xlu0 %3026  ;;  %v3010_v2 = vadd.f32 %v3006_v45, %v2989_v32  ;;  %v7859_v32 = vmul.f32 %v7848_v37, %v7696_v57  ;;  %v7868_v45 = vstv %s4810_s0  ;;  %s4825_s0 = sld [smem:[#allocation8 + $0x5f]] }
 0x867   :  { %v7876_v29 = vmul.f32 %v7868_v45, %v7696_v57 }
 0x868   :  { %v3031_v3 = vadd.f32 %v3027_v0, %v3010_v2  ;;  %v8929_v12 = vrot.slane %v7859_v32, 1 }
 0x86a   :  { %v3052_v18 = vadd.f32 %v7691_v40, %v3031_v3  ;;  %v3747_v40 = vmul.f32 %v7836_v24, %v7709_v14  ;;  %v3832_v3 = vsel %vm323_vm8, %v3830_v11, %v8927_v27  ;;  %v8936_v27 = vrot.slane %v7876_v29, 5 }
 0x86b   :  { %3772 = vrot.lane.b32.xlu2 %v3768_v6, %s4982_s6  ;;  %v3734_v6 = vsel %vm359_vm10, %v3732_v5, %v8928_v17  ;;  %3695 = vrot.lane.b32.xlu1 %v3692_v21, %s4984_s11  ;;  %v3866_v21 = vmul.f32 %v7868_v45, %v7709_v14  ;;  %v7889_v17 = vstv %s7840_s1  ;;  %s4830_s1 = sld [smem:[#allocation8 + $0x52]] }
 0x86c   :  { %3737 = vrot.lane.b32.xlu0 %v3734_v6, %s4984_s11  ;;  %v3753_v35 = vrot.slane %v3747_v40, 6  ;;  %v3790_v40 = vsel %vm287_vm6, %v3788_v15, %v8929_v12  ;;  %v7899_v10 = vmul.f32 %v7889_v17, %v7696_v57 }
 0x86d   :  { %v7838_v36 = vpop.permute.xlu2 %3166  ;;  %v3046_v0 = vpop.permute.xlu1 %3045 }
 0x86e   :  { %v3067_v2 = vpop.permute.xlu0 %3066  ;;  %v3051_v5 = vadd.f32 %v3046_v0, %v3030_v59  ;;  %v3755_v11 = vsel %vm377_vm11, %v3753_v35, %v8930_v20  ;;  %v7891_v59 = vstv %s4809_s21  ;;  %s4792_s21 = sld [smem:[#allocation8 + $0x38]] }
 0x870   :  { %v3072_v6 = vadd.f32 %v3067_v2, %v3051_v5  ;;  %v7903_v2 = vmul.f32 %v7891_v59, %v7696_v57  ;;  %v3845_v5 = vmul.f32 %v7891_v59, %v7709_v14 }
 0x872   :  { %v3093_v0 = vadd.f32 %v7728_v30, %v3072_v6  ;;  %v3803_v30 = vmul.f32 %v7889_v17, %v7709_v14  ;;  %v3851_v43 = vrot.slane %v3845_v5, 4 }
 0x873   :  { %3835 = vrot.lane.b32.xlu2 %v3832_v3, %s4982_s6  ;;  %3758 = vrot.lane.b32.xlu1 %v3755_v11, %s4984_s11  ;;  %v3872_v3 = vrot.slane %v3866_v21, 5  ;;  %v8937_v11 = vrot.slane %v7899_v10, 2  ;;  %v8935_v21 = vrot.slane %v7903_v2, 4 }
 0x874   :  { %3793 = vrot.lane.b32.xlu0 %v3790_v40, %s4982_s6  ;;  %v3809_v20 = vrot.slane %v3803_v30, 2 }
 0x875   :  { %v7882_v61 = vpop.permute.xlu2 %3206  ;;  %v3069_v15 = vpop.permute.xlu1 %3068  ;;  %v3874_v6 = vsel %vm359_vm10, %v3872_v3, %v8936_v27  ;;  %v9331_v3 = vld [vmem:[#allocation38_spill] sm:$0xff] }
 0x876   :  { %v3090_v35 = vpop.permute.xlu0 %3089  ;;  %v3073_v12 = vadd.f32 %v3069_v15, %v3052_v18  ;;  %v3811_v7 = vsel %vm9330_vm3, %v3809_v20, %v8937_v11  ;;  %v3853_v18 = vsel %vm341_vm9, %v3851_v43, %v8935_v21  ;;  %v3358_v15 = vmul.f32 %v9331_v3, %v7312_v44  ;;  %vm9361_vm3 = vmmov %vm9209_vm2 }
 0x877   :  { %v7945_v3 = vstv %s4811_s23  ;;  %s8194_s23 = sld [smem:[#allocation8 + $0x31]] }
 0x878   :  { %v3094_v40 = vadd.f32 %v3090_v35, %v3073_v12  ;;  %v7930_v12 = vstv %s4813_s22  ;;  %v9332_v35 = vld [vmem:[#allocation62_spill] sm:$0xff]  ;;  %v3365_v43 = vrot.slane %v3358_v15, 6  ;;  %v7953_v15 = vmul.f32 %v7945_v3, %v7696_v57  ;;  %s4793_s22 = sld [smem:[#allocation8 + $0x3f]] }
 0x87a   :  { %v3108_v50 = vadd.f32 %v7765_v56, %v3094_v40  ;;  %v7934_v56 = vmul.f32 %v7930_v12, %v7696_v57 }
 0x87b   :  { %3877 = vrot.lane.b32.xlu2 %v3874_v6, %s4982_s6  ;;  %3814 = vrot.lane.b32.xlu1 %v3811_v7, %s4982_s6  ;;  %v3922_v7 = vmul.f32 %v7930_v12, %v7709_v14 }
 0x87c   :  { %3856 = vrot.lane.b32.xlu0 %v3853_v18, %s4982_s6  ;;  %v8940_v18 = vrot.slane %v7934_v56, 1 }
 0x87d   :  { %v7917_v1 = vpop.permute.xlu2 %3229  ;;  %v3102_v30 = vpop.permute.xlu1 %3101 }
 0x87e   :  { %v3123_v5 = vpop.permute.xlu0 %3122  ;;  %v3107_v20 = vadd.f32 %v3102_v30, %v3093_v0  ;;  %v9333_v0 = vld [vmem:[#allocation46_spill] sm:$0xff] }
 0x87f   :  { %v9334_v30 = vrot.slane %v9333_v0, 6  ;;  %v3435_v0 = vmul.f32 %v7645_v53, %v7312_v44  ;;  %v4893_v53 = vld [vmem:[#allocation2 + $0x10] sm:$0x3f] }
 0x880   :  { %v3128_v6 = vadd.f32 %v3123_v5, %v3107_v20  ;;  %v3928_v5 = vrot.slane %v3922_v7, 1  ;;  %v3887_v20 = vmul.f32 %v7945_v3, %v7709_v14 }
 0x881   :  { %v3442_v46 = vrot.slane %v3435_v0, 3 }
 0x882   :  { %v3149_v21 = vadd.f32 %v7791_v9, %v3128_v6  ;;  %v3893_v27 = vrot.slane %v3887_v20, 6  ;;  %v7980_v20 = vstv %s4816_s25  ;;  %s4829_s25 = sld [smem:[#allocation8 + $0x4b]] }
 0x883   :  { %3383 = vrot.lane.b32.xlu2 %v9332_v35, %s4987_s13  ;;  %v3366_v35 = vsel %vm377_vm11, %v9334_v30, %v3365_v43  ;;  %3348 = vrot.lane.b32.xlu1 %v7413_v52, %s4986_s14  ;;  %v3930_v43 = vsel %vm287_vm6, %v3928_v5, %v8940_v18  ;;  %v8941_v52 = vrot.slane %v7953_v15, 6  ;;  %v3985_v0 = vmul.f32 %v7980_v20, %v7709_v14 }
 0x884   :  { %3369 = vrot.lane.b32.xlu0 %v3366_v35, %s4986_s14  ;;  %v8942_v35 = vstv %s7938_s24 }
 0x885   :  { %v7942_v40 = vpop.permute.xlu2 %3262  ;;  %v3125_v9 = vpop.permute.xlu1 %3124  ;;  %v3908_v47 = vmul.f32 %v8942_v35, %v7709_v14  ;;  %v3895_v44 = vsel %vm377_vm11, %v3893_v27, %v8941_v52 }
 0x886   :  { %v3146_v6 = vpop.permute.xlu0 %3145  ;;  %v3129_v30 = vadd.f32 %v3125_v9, %v3108_v50  ;;  %v3393_v50 = vmul.f32 %v4893_v53, %v7661_v4 }
 0x888   :  { %v3150_v7 = vadd.f32 %v3146_v6, %v3129_v30  ;;  %v3400_v4 = vrot.slane %v3393_v50, 1 }
 0x88a   :  { %v3171_v5 = vadd.f32 %v7838_v36, %v3150_v7  ;;  %v7987_v36 = vmul.f32 %v7980_v20, %v7696_v57  ;;  %v7994_v7 = vstv %s4814_s18  ;;  %s4828_s18 = sld [smem:[#allocation8 + $0x44]] }
 0x88b   :  { %3933 = vrot.lane.b32.xlu2 %v3930_v43, %s4983_s9  ;;  %3898 = vrot.lane.b32.xlu1 %v3895_v44, %s4982_s6  ;;  %v3443_v43 = vsel %vm323_vm8, %v3440_v49, %v3442_v46  ;;  %v7999_v49 = vmul.f32 %v7994_v7, %v7696_v57  ;;  %v8001_v46 = vstv %s4815_s26  ;;  %v3401_v44 = vsel %vm287_vm6, %v3398_v8, %v3400_v4  ;;  %s8213_s26 = sld [smem:[#allocation8 + $0x46]] }
 0x88c   :  { %3912 = vrot.lane.b32.xlu0 %v3908_v47, %s4983_s9  ;;  %9335 = vst [vmem:[#allocation25_spill] sm:$0xff] %v7987_v36  ;;  %v8943_v22 = vrot.slane %v7987_v36, 4  ;;  %v8009_v50 = vmul.f32 %v8001_v46, %v7696_v57  ;;  %v3498_v4 = vmul.f32 %v4893_v53, %v7677_v63 }
 0x88d   :  { %v7968_v11 = vpop.permute.xlu2 %3285  ;;  %v3165_v9 = vpop.permute.xlu1 %3164 }
 0x88e   :  { %v3186_v6 = vpop.permute.xlu0 %3185  ;;  %v3170_v27 = vadd.f32 %v3165_v9, %v3149_v21  ;;  %v3991_v9 = vrot.slane %v3985_v0, 4 }
 0x890   :  { %v3191_v47 = vadd.f32 %v3186_v6, %v3170_v27  ;;  %v3943_v6 = vmul.f32 %v7994_v7, %v7709_v14  ;;  %v3993_v8 = vsel %vm341_vm9, %v3991_v9, %v8943_v22  ;;  %v8948_v27 = vrot.slane %v7999_v49, 2 }
 0x891   :  { %v3505_v9 = vrot.slane %v3498_v4, 6 }
 0x892   :  { %v3212_v21 = vadd.f32 %v7882_v61, %v3191_v47  ;;  %v3964_v61 = vmul.f32 %v8001_v46, %v7709_v14  ;;  %v3949_v0 = vrot.slane %v3943_v6, 2  ;;  %v3477_v6 = vmul.f32 %v4893_v53, %v7731_v54 }
 0x893   :  { %3446 = vrot.lane.b32.xlu2 %v3443_v43, %s4987_s13  ;;  %3404 = vrot.lane.b32.xlu1 %v3401_v44, %s4987_s13 }
 0x894   :  { %3425 = vrot.lane.b32.xlu0 %v7426_v48, %s4987_s13  ;;  %v8946_v48 = vrot.slane %v8009_v50, 3  ;;  %v3970_v18 = vrot.slane %v3964_v61, 3  ;;  %v3951_v35 = vsel %vm9209_vm2, %v3949_v0, %v8948_v27  ;;  %v8038_v61 = vstv %s4820_s27  ;;  %s8229_s27 = sld [smem:[#allocation8 + $0x4d]] }
 0x895   :  { %v7992_v30 = vpop.permute.xlu2 %3325  ;;  %v3188_v23 = vpop.permute.xlu1 %3187  ;;  %v8059_v0 = vstv %s4818_s19  ;;  %v8125_v27 = vstv %s4822_s7  ;;  %s8276_s19 = sld [smem:[#allocation8 + $0x5b]] }
 0x896   :  { %v3209_v43 = vpop.permute.xlu0 %3208  ;;  %v3192_v47 = vadd.f32 %v3188_v23, %v3171_v5  ;;  %v3972_v63 = vsel %vm323_vm8, %v3970_v18, %v8946_v48  ;;  %v3456_v5 = vmul.f32 %v4893_v53, %v7694_v16  ;;  %v8045_v18 = vmul.f32 %v8038_v61, %v7696_v57  ;;  %9343 = vst [vmem:[#allocation37_spill] sm:$0xff] %v8125_v27  ;;  %s8321_s7 = sld [smem:[#allocation8 + $0x59]] }
 0x897   :  { %v4062_v53 = vmul.f32 %v8038_v61, %v7709_v14 }
 0x898   :  { %v3213_v44 = vadd.f32 %v3209_v43, %v3192_v47  ;;  %v3463_v54 = vrot.slane %v3456_v5, 4  ;;  %v8052_v47 = vstv %s4817_s28  ;;  %v8944_v13 = vrot.slane %v8045_v18, 1  ;;  %s8239_s28 = sld [smem:[#allocation8 + $0x54]] }
 0x89a   :  { %v3234_v22 = vadd.f32 %v7917_v1, %v3213_v44  ;;  %v3506_v1 = vsel %vm377_vm11, %v3503_v55, %v3505_v9  ;;  %v8057_v55 = vmul.f32 %v8052_v47, %v7696_v57  ;;  %v9336_v44 = vrot.slane %v7704_v51, 4 }
 0x89b   :  { %3996 = vrot.lane.b32.xlu2 %v3993_v8, %s4983_s9  ;;  %3954 = vrot.lane.b32.xlu1 %v3951_v35, %s4983_s9  ;;  %v3484_v35 = vrot.slane %v3477_v6, 5  ;;  %v8070_v6 = vmul.f32 %v8059_v0, %v7696_v57  ;;  %v4027_v51 = vmul.f32 %v8059_v0, %v7709_v14 }
 0x89c   :  { %3975 = vrot.lane.b32.xlu0 %v3972_v63, %s4983_s9  ;;  %v3464_v9 = vsel %vm341_vm9, %v9336_v44, %v3463_v54  ;;  %v9337_v63 = vrot.slane %v7737_v62, 5 }
 0x89d   :  { %v8025_v52 = vpop.permute.xlu2 %3381  ;;  %v3228_v23 = vpop.permute.xlu1 %3227  ;;  %9338 = vst [vmem:[#allocation27_spill] sm:$0xff] %v8070_v6 }
 0x89e   :  { %v3242_v43 = vpop.permute.xlu0 %3241  ;;  %v3233_v16 = vadd.f32 %v3228_v23, %v3212_v21  ;;  %v3485_v5 = vsel %vm359_vm10, %v9337_v63, %v3484_v35  ;;  %v4068_v23 = vrot.slane %v4062_v53, 1  ;;  %v8947_v53 = vrot.slane %v8057_v55, 5 }
 0x8a0   :  { %v3247_v8 = vadd.f32 %v3242_v43, %v3233_v16  ;;  %v8078_v43 = vstv %s4823_s17  ;;  %v4070_v16 = vsel %vm287_vm6, %v4068_v23, %v8944_v13  ;;  %s8300_s17 = sld [smem:[#allocation8 + $0x37]] }
 0x8a1   :  { %9339 = vst [vmem:[#allocation13_spill] sm:$0xff] %v8078_v43  ;;  %v8085_v54 = vmul.f32 %v8078_v43, %v7696_v57  ;;  %v4125_v44 = vmul.f32 %v8078_v43, %v7709_v14 }
 0x8a2   :  { %v3268_v21 = vadd.f32 %v7942_v40, %v3247_v8  ;;  %v4006_v40 = vmul.f32 %v8052_v47, %v7709_v14  ;;  %v8945_v8 = vrot.slane %v8070_v6, 6 }
 0x8a3   :  { %3509 = vrot.lane.b32.xlu2 %v3506_v1, %s4987_s13  ;;  %3467 = vrot.lane.b32.xlu1 %v3464_v9, %s4987_s13  ;;  %9340 = vst [vmem:[#allocation32_spill] sm:$0xff] %v8085_v54  ;;  %v8952_v13 = vrot.slane %v8085_v54, 4 }
 0x8a4   :  { %3488 = vrot.lane.b32.xlu0 %v3485_v5, %s4987_s13  ;;  %v4012_v63 = vrot.slane %v4006_v40, 5  ;;  %v4033_v5 = vrot.slane %v4027_v51, 6 }
 0x8a5   :  { %v8050_v4 = vpop.permute.xlu2 %3444  ;;  %v3244_v62 = vpop.permute.xlu1 %3243 }
 0x8a6   :  { %v3265_v1 = vpop.permute.xlu0 %3264  ;;  %v3248_v35 = vadd.f32 %v3244_v62, %v3234_v22  ;;  %v8097_v22 = vstv %s4821_s16  ;;  %v4035_v40 = vsel %vm377_vm11, %v4033_v5, %v8945_v8  ;;  %v8951_v8 = vstv %s8090_s5  ;;  %s8311_s16 = sld [smem:[#allocation8 + $0x60]] }
 0x8a7   :  { %9341 = vst [vmem:[#allocation33_spill] sm:$0xff] %v8097_v22  ;;  %v8108_v51 = vmul.f32 %v8097_v22, %v7696_v57 }
 0x8a8   :  { %v3269_v9 = vadd.f32 %v3265_v1, %v3248_v35  ;;  %v4131_v1 = vrot.slane %v4125_v44, 4 }
 0x8a9   :  { %9342 = vst [vmem:[#allocation18_spill] sm:$0xff] %v8108_v51 }
 0x8aa   :  { %v3290_v62 = vadd.f32 %v7968_v11, %v3269_v9  ;;  %v4083_v11 = vmul.f32 %v8097_v22, %v7709_v14  ;;  %v8127_v22 = vstv %s4824_s15  ;;  %s4836_s15 = sld [smem:[#allocation8 + $0x4c]] }
 0x8ab   :  { %4073 = vrot.lane.b32.xlu2 %v4070_v16, %s4985_s12  ;;  %v4014_v16 = vsel %vm359_vm10, %v4012_v63, %v8947_v53  ;;  %v4133_v63 = vsel %vm341_vm9, %v4131_v1, %v8952_v13  ;;  %v4048_v53 = vmul.f32 %v8951_v8, %v7709_v14  ;;  %9344 = vst [vmem:[#allocation35_spill] sm:$0xff] %v8127_v22 }
 0x8ac   :  { %4017 = vrot.lane.b32.xlu1 %v4014_v16, %s4983_s9  ;;  %4038 = vrot.lane.b32.xlu0 %v4035_v40, %s4983_s9  ;;  %v8950_v16 = vrot.slane %v8108_v51, 2  ;;  %v4089_v40 = vrot.slane %v4083_v11, 2  ;;  %v8139_v11 = vmul.f32 %v8127_v22, %v7696_v57 }
 0x8ad   :  { %v8094_v23 = vpop.permute.xlu2 %3507  ;;  %v3284_v35 = vpop.permute.xlu1 %3283 }
 0x8ae   :  { %v3305_v9 = vpop.permute.xlu0 %3304  ;;  %v3289_v5 = vadd.f32 %v3284_v35, %v3268_v21  ;;  %v4091_v1 = vsel %vm9345_vm13, %v4089_v40, %v8950_v16  ;;  %v8135_v35 = vmul.f32 %v8125_v27, %v7696_v57  ;;  %9347 = vst [vmem:[#allocation31_spill] sm:$0xff] %v8139_v11  ;;  %v8959_v13 = vrot.slane %v8139_v11, 5  ;;  %vm9373_vm13 = vmmov %vm9209_vm2 }
 0x8b0   :  { %v3310_v48 = vadd.f32 %v3305_v9, %v3289_v5  ;;  %9346 = vst [vmem:[#allocation41_spill] sm:$0xff] %v8135_v35  ;;  %v9348_v9 = vstv %s7758_s10  ;;  %v8150_v5 = vstv %s4827_s8  ;;  %s8161_s10 = sld [smem:[#allocation8 + $0x36]] }
 0x8b1   :  { %9349 = vst [vmem:[#allocation15_spill] sm:$0xff] %v8150_v5  ;;  %v8154_v8 = vmul.f32 %v8150_v5, %v7696_v57  ;;  %s4834_s8 = sld [smem:[#allocation8 + $0x3e]] }
 0x8b2   :  { %v3331_v21 = vadd.f32 %v7992_v30, %v3310_v48  ;;  %v4104_v30 = vmul.f32 %v8125_v27, %v7709_v14  ;;  %v4146_v48 = vmul.f32 %v8127_v22, %v7709_v14  ;;  %v4202_v22 = vmul.f32 %v8150_v5, %v7709_v14 }
 0x8b3   :  { %4136 = vrot.lane.b32.xlu2 %v4133_v63, %s4985_s12  ;;  %v3629_v63 = vmul.f32 %v9348_v9, %v7696_v57  ;;  %9350 = vst [vmem:[#allocation40_spill] sm:$0xff] %v8154_v8  ;;  %v8958_v9 = vrot.slane %v8135_v35, 3  ;;  %v8963_v36 = vrot.slane %v8154_v8, 1 }
 0x8b4   :  { %4052 = vrot.lane.b32.xlu1 %v4048_v53, %s4985_s12  ;;  %4094 = vrot.lane.b32.xlu0 %v4091_v1, %s4985_s12  ;;  %v4110_v27 = vrot.slane %v4104_v30, 3  ;;  %v4152_v51 = vrot.slane %v4146_v48, 5  ;;  %v4208_v48 = vrot.slane %v4202_v22, 1 }
 0x8b5   :  { %v8120_v44 = vpop.permute.xlu2 %3653  ;;  %v3307_v40 = vpop.permute.xlu1 %3306 }
 0x8b6   :  { %v3347_v16 = vpop.permute.xlu0 %3346  ;;  %v8156_v53 = vadd.f32 %v3307_v40, %v3290_v62  ;;  %v8168_v62 = vstv %s4825_s0  ;;  %s4838_s0 = sld [smem:[#allocation8 + $0x5a]] }
 0x8b7   :  { %v3352_v1 = vadd.f32 %v3347_v16, %v3331_v21  ;;  %9351 = vst [vmem:[#allocation20_spill] sm:$0xff] %v8168_v62  ;;  %v8170_v16 = vld [vmem:[#allocation2 + $0x28] sm:$0x3f]  ;;  %v4112_v21 = vsel %vm323_vm8, %v4110_v27, %v8958_v9  ;;  %v8180_v30 = vmul.f32 %v8168_v62, %v7696_v57  ;;  %v4167_v40 = vmul.f32 %v8168_v62, %v7709_v14 }
 0x8b9   :  { %9352 = vst [vmem:[#allocation47_spill] sm:$0xff] %v8180_v30  ;;  %v8964_v22 = vrot.slane %v8180_v30, 6  ;;  %v4173_v35 = vrot.slane %v4167_v40, 6  ;;  %v9354_v40 = vrot.slane %v7809_v25, 3 }
 0x8bb   :  { %3634 = vrot.lane.b32.xlu2 %v3629_v63, %s4984_s11  ;;  %v4154_v63 = vsel %vm359_vm10, %v4152_v51, %v8959_v13  ;;  %v4210_v51 = vsel %vm287_vm6, %v4208_v48, %v8963_v36  ;;  %v3686_v13 = vmul.f32 %v7797_v38, %v8170_v16  ;;  %v8225_v36 = vstv %s4793_s22 }
 0x8bc   :  { %4115 = vrot.lane.b32.xlu1 %v4112_v21, %s4985_s12  ;;  %4157 = vrot.lane.b32.xlu0 %v4154_v63, %s4985_s12  ;;  %v8965_v21 = vstv %s8161_s10  ;;  %9356 = vst [vmem:[#allocation49_spill] sm:$0xff] %v8225_v36 }
 0x8bd   :  { %v8165_v54 = vpop.permute.xlu2 %3716  ;;  %v3368_v27 = vpop.permute.xlu1 %3367  ;;  %v4188_v48 = vmul.f32 %v8965_v21, %v7709_v14  ;;  %v3693_v38 = vrot.slane %v3686_v13, 3 }
 0x8be   :  { %v3403_v9 = vpop.permute.xlu0 %3402  ;;  %v3373_v11 = vadd.f32 %v3368_v27, %v3352_v1  ;;  %v4175_v27 = vsel %vm377_vm11, %v4173_v35, %v8964_v22 }
 0x8bf   :  { %v3694_v35 = vsel %vm323_vm8, %v9354_v40, %v3693_v38 }
 0x8c0   :  { %v3387_v63 = vadd.f32 %v8025_v52, %v3373_v11  ;;  %v3644_v52 = vmul.f32 %v7713_v41, %v8170_v16  ;;  %v8211_v11 = vstv %s4830_s1  ;;  %s4837_s1 = sld [smem:[#allocation8 + $0x53]] }
 0x8c1   :  { %9353 = vst [vmem:[#allocation43_spill] sm:$0xff] %v8211_v11  ;;  %v8222_v41 = vmul.f32 %v8211_v11, %v7696_v57  ;;  %v4265_v22 = vmul.f32 %v8211_v11, %v7709_v14  ;;  %v9362_v11 = vrot.slane %v7720_v31, 1  ;;  %v9365_v31 = vstv %s8194_s23 }
 0x8c2   :  { %v3408_v1 = vadd.f32 %v3403_v9, %v3387_v63  ;;  %v8218_v63 = vstv %s4792_s21 }
 0x8c3   :  { %4213 = vrot.lane.b32.xlu2 %v4210_v51, %s4986_s14  ;;  %v3665_v51 = vmul.f32 %v7767_v39, %v8170_v16  ;;  %9355 = vst [vmem:[#allocation48_spill] sm:$0xff] %v8222_v41  ;;  %v3526_v40 = vmul.f32 %v8218_v63, %v7709_v14 }
 0x8c4   :  { %4178 = vrot.lane.b32.xlu1 %v4175_v27, %s4985_s12  ;;  %4192 = vrot.lane.b32.xlu0 %v4188_v48, %s4986_s14  ;;  %v3651_v27 = vrot.slane %v3644_v52, 1  ;;  %v8264_v52 = vmul.f32 %v8218_v63, %v7696_v57 }
 0x8c5   :  { %v8197_v5 = vpop.permute.xlu2 %3772  ;;  %v3424_v13 = vpop.permute.xlu1 %3423  ;;  %v3672_v48 = vrot.slane %v3665_v51, 2  ;;  %v3543_v51 = vmul.f32 %v8225_v36, %v7709_v14 }
 0x8c6   :  { %v3466_v9 = vpop.permute.xlu0 %3465  ;;  %v3429_v39 = vadd.f32 %v3424_v13, %v3408_v1  ;;  %v8237_v1 = vstv %s4829_s25  ;;  %v8248_v13 = vstv %s4828_s18  ;;  %v3652_v8 = vsel %vm287_vm6, %v9362_v11, %v3651_v27  ;;  %9364 = vst [vmem:[#allocation39_spill] sm:$0xff] %v8264_v52 }
 0x8c7   :  { %9357 = vst [vmem:[#allocation36_spill] sm:$0xff] %v8237_v1  ;;  %v8258_v30 = vmul.f32 %v8248_v13, %v7696_v57  ;;  %v3532_v11 = vrot.slane %v3526_v40, 1  ;;  %v4223_v27 = vmul.f32 %v8248_v13, %v7709_v14 }
 0x8c8   :  { %v3450_v25 = vadd.f32 %v8050_v4, %v3429_v39  ;;  %v8246_v4 = vmul.f32 %v8237_v1, %v7696_v57  ;;  %9359 = vst [vmem:[#allocation53_spill] sm:$0xff] %v8248_v13  ;;  %v9360_v39 = vrot.slane %v7772_v19, 2  ;;  %v4244_v19 = vmul.f32 %v8237_v1, %v7709_v14 }
 0x8c9   :  { %9363 = vst [vmem:[#allocation42_spill] sm:$0xff] %v8258_v30  ;;  %v3549_v13 = vrot.slane %v3543_v51, 2  ;;  %v8304_v51 = vstv %s8229_s27 }
 0x8ca   :  { %9358 = vst [vmem:[#allocation34_spill] sm:$0xff] %v8246_v4  ;;  %v3673_v38 = vsel %vm9361_vm3, %v9360_v39, %v3672_v48  ;;  %v3520_v48 = vmul.f32 %v9365_v31, %v7709_v14  ;;  %v9368_v39 = vrot.slane %v8222_v41, 4  ;;  %v8976_v40 = vrot.slane %v8246_v4, 3  ;;  %vm9380_vm3 = vmmov %vm9209_vm2 }
 0x8cb   :  { %3697 = vrot.lane.b32.xlu2 %v3694_v35, %s4984_s11  ;;  %v3471_v35 = vadd.f32 %v3466_v9, %v3450_v25  ;;  %v4271_v9 = vrot.slane %v4265_v22, 4  ;;  %v8274_v25 = vstv %s8213_s26  ;;  %v3749_v31 = vmul.f32 %v7836_v24, %v8170_v16  ;;  %9369 = vst [vmem:[#allocation58_spill] sm:$0xff] %v8304_v51 }
 0x8cc   :  { %3676 = vrot.lane.b32.xlu0 %v3673_v38, %s4984_s11  ;;  %3655 = vrot.lane.b32.xlu1 %v3652_v8, %s4984_s11  ;;  %9366 = vst [vmem:[#allocation44_spill] sm:$0xff] %v8274_v25  ;;  %v8280_v8 = vmul.f32 %v8225_v36, %v7696_v57  ;;  %v8977_v36 = vrot.slane %v8258_v30, 2  ;;  %v4250_v43 = vrot.slane %v4244_v19, 3  ;;  %v3728_v19 = vmul.f32 %v7799_v26, %v8170_v16 }
 0x8cd   :  { %v8235_v21 = vpop.permute.xlu2 %3835  ;;  %v3487_v38 = vpop.permute.xlu1 %3486  ;;  %v4273_v62 = vsel %vm341_vm9, %v4271_v9, %v9368_v39  ;;  %v3560_v9 = vmul.f32 %v8274_v25, %v7709_v14  ;;  %v8298_v39 = vmul.f32 %v8274_v25, %v7696_v57  ;;  %v3707_v41 = vmul.f32 %v7747_v60, %v8170_v16 }
 0x8ce   :  { %9367 = vst [vmem:[#allocation19_spill] sm:$0xff] %v8280_v8  ;;  %v3328_v22 = vpop.permute.xlu0 %3327  ;;  %v3492_v1 = vadd.f32 %v3487_v38, %v3471_v35  ;;  %v4252_v38 = vsel %vm323_vm8, %v4250_v43, %v8976_v40  ;;  %v9371_v43 = vrot.slane %v8264_v52, 1  ;;  %v3735_v4 = vrot.slane %v3728_v19, 5 }
 0x8cf   :  { %v8289_v6 = vadd.f32 %v3328_v22, %v8156_v53  ;;  %v4229_v53 = vrot.slane %v4223_v27, 2  ;;  %v8319_v22 = vmul.f32 %v8304_v51, %v7696_v57 }
 0x8d0   :  { %v3513_v24 = vadd.f32 %v8094_v23, %v3492_v1  ;;  %v3756_v23 = vrot.slane %v3749_v31, 6  ;;  %v3534_v40 = vsel %vm287_vm6, %v3532_v11, %v9371_v43  ;;  %v3577_v31 = vmul.f32 %v8304_v51, %v7709_v14 }
 0x8d1   :  { %v4231_v27 = vsel %vm9209_vm2, %v4229_v53, %v8977_v36  ;;  %v3566_v53 = vrot.slane %v3560_v9, 3  ;;  %v8345_v36 = vstv %s8276_s19  ;;  %v9372_v11 = vrot.slane %v8280_v8, 2 }
 0x8d2   :  { %v3522_v1 = vadd.f32 %v3520_v48, %v3513_v24  ;;  %v8353_v43 = vmul.f32 %v8345_v36, %v7696_v57  ;;  %v9374_v9 = vrot.slane %v7845_v33, 6  ;;  %v3583_v8 = vrot.slane %v3577_v31, 4 }
 0x8d3   :  { %4276 = vrot.lane.b32.xlu2 %v4273_v62, %s4986_s14  ;;  %v8307_v62 = vstv %s8239_s28  ;;  %v3611_v52 = vmul.f32 %v8345_v36, %v7709_v14 }
 0x8d4   :  { %9370 = vst [vmem:[#allocation56_spill] sm:$0xff] %v8307_v62  ;;  %4255 = vrot.lane.b32.xlu0 %v4252_v38, %s4986_s14  ;;  %4234 = vrot.lane.b32.xlu1 %v4231_v27, %s4986_s14  ;;  %v8340_v24 = vmul.f32 %v8307_v62, %v7696_v57  ;;  %v3539_v26 = vadd.f32 %v3534_v40, %v3522_v1 }
 0x8d5   :  { %v8309_v35 = vpop.permute.xlu2 %3877  ;;  %v3594_v60 = vmul.f32 %v8307_v62, %v7709_v14  ;;  %v3551_v38 = vsel %vm9373_vm13, %v3549_v13, %v9372_v11  ;;  %v3633_v48 = vpop.permute.xlu1 %3632  ;;  %v3757_v1 = vsel %vm377_vm11, %v9374_v9, %v3756_v23  ;;  %v3714_v13 = vrot.slane %v3707_v41, 4  ;;  %vm9387_vm13 = vmmov %vm9209_vm2 }
 0x8d6   :  { %v3675_v40 = vpop.permute.xlu0 %3674  ;;  %v3556_v30 = vadd.f32 %v3551_v38, %v3539_v26  ;;  %v9375_v11 = vrot.slane %v8298_v39, 3  ;;  %v8990_v62 = vrot.slane %v8340_v24, 5  ;;  %v8986_v23 = vstv %s8300_s17 }
 0x8d7   :  { %v3600_v51 = vrot.slane %v3594_v60, 5  ;;  %v8369_v26 = vstv %s8311_s16  ;;  %v9376_v41 = vrot.slane %v8319_v22, 4  ;;  %v8380_v38 = vstv %s8321_s7 }
 0x8d8   :  { %v3568_v27 = vsel %vm323_vm8, %v3566_v53, %v9375_v11  ;;  %v8988_v53 = vrot.slane %v8353_v43, 6  ;;  %v8377_v31 = vmul.f32 %v8369_v26, %v7696_v57  ;;  %v9378_v9 = vrot.slane %v7754_v34, 4 }
 0x8d9   :  { %v3573_v33 = vadd.f32 %v3568_v27, %v3556_v30  ;;  %v3585_v19 = vsel %vm341_vm9, %v3583_v8, %v9376_v41  ;;  %v9377_v30 = vrot.slane %v7813_v42, 5  ;;  %v8390_v8 = vmul.f32 %v8380_v38, %v7696_v57 }
 0x8da   :  { %v3602_v11 = vsel %vm359_vm10, %v3600_v51, %v8990_v62  ;;  %v3617_v41 = vrot.slane %v3611_v52, 6  ;;  %v4307_v34 = vmul.f32 %v8369_v26, %v7709_v14  ;;  %v4286_v57 = vmul.f32 %v8380_v38, %v7709_v14 }
 0x8db   :  { %3760 = vrot.lane.b32.xlu2 %v3757_v1, %s4984_s11  ;;  %v3590_v60 = vadd.f32 %v3585_v19, %v3573_v33  ;;  %v3736_v27 = vsel %vm359_vm10, %v9377_v30, %v3735_v4  ;;  %v3715_v1 = vsel %vm341_vm9, %v9378_v9, %v3714_v13  ;;  %v4328_v4 = vmul.f32 %v8986_v23, %v7709_v14 }
 0x8dc   :  { %3739 = vrot.lane.b32.xlu0 %v3736_v27, %s4984_s11  ;;  %3718 = vrot.lane.b32.xlu1 %v3715_v1, %s4984_s11  ;;  %v3619_v51 = vsel %vm377_vm11, %v3617_v41, %v8988_v53  ;;  %v3805_v33 = vmul.f32 %v7889_v17, %v8170_v16  ;;  %v8985_v30 = vrot.slane %v8390_v8, 5  ;;  %v4313_v9 = vrot.slane %v4307_v34, 6  ;;  %s4835_s11 = sld [smem:[#allocation8 + $0x45]] }
 0x8dd   :  { %v8365_v25 = vpop.permute.xlu2 %3383  ;;  %v3607_v42 = vadd.f32 %v3602_v11, %v3590_v60  ;;  %v3696_v52 = vpop.permute.xlu1 %3695  ;;  %v8987_v60 = vrot.slane %v8377_v31, 6  ;;  %v4292_v14 = vrot.slane %v4286_v57, 5  ;;  %v8425_v34 = vstv %s4836_s15 }
 0x8de   :  { %v3738_v13 = vpop.permute.xlu0 %3737  ;;  %v3812_v11 = vrot.slane %v3805_v33, 2 }
 0x8df   :  { %v3624_v19 = vadd.f32 %v3619_v51, %v3607_v42  ;;  %v4315_v17 = vsel %vm377_vm11, %v4313_v9, %v8987_v60  ;;  %v4294_v42 = vsel %vm359_vm10, %v4292_v14, %v8985_v30  ;;  %v9379_v51 = vrot.slane %v7899_v10, 2  ;;  %v8437_v14 = vld [vmem:[#allocation2 + $0x18] sm:$0xff] }
 0x8e1   :  { %v3638_v27 = vadd.f32 %v3633_v48, %v3624_v19  ;;  %v3784_v48 = vmul.f32 %v7848_v37, %v8170_v16  ;;  %v3813_v33 = vsel %vm9380_vm3, %v9379_v51, %v3812_v11  ;;  %v8430_v19 = vld [vmem:[#allocation2 + $0x20] sm:$0xff]  ;;  %vm9411_vm3 = vmmov %vm9209_vm2 }
 0x8e2   :  { %v8444_v11 = vstv %s4835_s11 }
 0x8e3   :  { %4332 = vrot.lane.b32.xlu2 %v4328_v4, %s4987_s13  ;;  %v3659_v41 = vadd.f32 %v8120_v44, %v3638_v27  ;;  %v8434_v27 = vmul.f32 %v8430_v19, %v8425_v34  ;;  %v3791_v9 = vrot.slane %v3784_v48, 1  ;;  %v8454_v48 = vstv %s4834_s8 }
 0x8e4   :  { %4318 = vrot.lane.b32.xlu0 %v4315_v17, %s4986_s14  ;;  %4297 = vrot.lane.b32.xlu1 %v4294_v42, %s4986_s14  ;;  %v9381_v17 = vstv %s7762_s20  ;;  %v4363_v30 = vmul.f32 %v8437_v14, %v8444_v11  ;;  %s4839_s20 = sld [smem:[#allocation8 + $0x61]] }
 0x8e5   :  { %v8412_v1 = vpop.permute.xlu2 %3933  ;;  %v3680_v4 = vadd.f32 %v3675_v40, %v3659_v41  ;;  %v3759_v44 = vpop.permute.xlu1 %3758  ;;  %v4384_v40 = vmul.f32 %v8437_v14, %v8425_v34  ;;  %v3769_v42 = vmul.f32 %v8430_v19, %v9381_v17  ;;  %v8989_v51 = vrot.slane %v8434_v27, 3 }
 0x8e6   :  { %v3794_v57 = vpop.permute.xlu0 %3793 }
 0x8e7   :  { %v3701_v37 = vadd.f32 %v3696_v52, %v3680_v4  ;;  %v8452_v52 = vmul.f32 %v8430_v19, %v8444_v11  ;;  %v4390_v17 = vrot.slane %v4384_v40, 3 }
 0x8e9   :  { %v3722_v41 = vadd.f32 %v8165_v54, %v3701_v37  ;;  %v8461_v37 = vmul.f32 %v8430_v19, %v8454_v48 }
 0x8eb   :  { %3816 = vrot.lane.b32.xlu2 %v3813_v33, %s4982_s6  ;;  %v3743_v4 = vadd.f32 %v3738_v13, %v3722_v41  ;;  %v9382_v33 = vrot.slane %v7859_v32, 1  ;;  %v4342_v13 = vmul.f32 %v8437_v14, %v8454_v48 }
 0x8ec   :  { %3774 = vrot.lane.b32.xlu1 %v3769_v42, %s4982_s6  ;;  %v3868_v42 = vmul.f32 %v7868_v45, %v8170_v16 }
 0x8ed   :  { %v8442_v10 = vpop.permute.xlu2 %3446  ;;  %v3792_v54 = vsel %vm287_vm6, %v9382_v33, %v3791_v9  ;;  %v3764_v23 = vadd.f32 %v3759_v44, %v3743_v4  ;;  %v3815_v32 = vpop.permute.xlu1 %3814  ;;  %v4392_v9 = vsel %vm323_vm8, %v4390_v17, %v8989_v51  ;;  %v4370_v33 = vrot.slane %v8452_v52, 2 }
 0x8ee   :  { %3795 = vrot.lane.b32.xlu0 %v3792_v54, %s4982_s6  ;;  %v3857_v41 = vpop.permute.xlu0 %3856  ;;  %v4349_v44 = vrot.slane %v8461_v37, 1  ;;  %v4369_v4 = vrot.slane %v4363_v30, 2  ;;  %v4348_v60 = vrot.slane %v4342_v13, 1  ;;  %v3875_v51 = vrot.slane %v3868_v42, 5 }
 0x8ef   :  { %v3778_v40 = vadd.f32 %v8197_v5, %v3764_v23  ;;  %v3847_v5 = vmul.f32 %v7891_v59, %v8170_v16  ;;  %v3826_v23 = vmul.f32 %v7820_v28, %v8170_v16  ;;  %v4344_v52 = vmul.f32 %v8454_v48, %v8170_v16 }
 0x8f0   :  { %v4371_v17 = vsel %vm9209_vm2, %v4369_v4, %v4370_v33  ;;  %v4350_v45 = vsel %vm287_vm6, %v4348_v60, %v4349_v44 }
 0x8f1   :  { %v3799_v54 = vadd.f32 %v3794_v57, %v3778_v40  ;;  %v8493_v57 = vstv %s4839_s20  ;;  %v3854_v40 = vrot.slane %v3847_v5, 4  ;;  %v3833_v4 = vrot.slane %v3826_v23, 3 }
 0x8f2   :  { %v8500_v59 = vmul.f32 %v8430_v19, %v8493_v57  ;;  %v9384_v5 = vrot.slane %v7903_v2, 4 }
 0x8f3   :  { %4395 = vrot.lane.b32.xlu2 %v4392_v9, %s4987_s13  ;;  %v3820_v62 = vadd.f32 %v3815_v32, %v3799_v54  ;;  %v9383_v9 = vrot.slane %v7876_v29, 5 }
 0x8f4   :  { %4353 = vrot.lane.b32.xlu1 %v4350_v45, %s4987_s13  ;;  %v3855_v23 = vsel %vm341_vm9, %v9384_v5, %v3854_v40 }
 0x8f5   :  { %v8478_v53 = vpop.permute.xlu2 %3996  ;;  %v3841_v30 = vadd.f32 %v8235_v21, %v3820_v62  ;;  %v3349_v13 = vpop.permute.xlu1 %3348  ;;  %v3876_v60 = vsel %vm359_vm10, %v9383_v9, %v3875_v51  ;;  %v4447_v21 = vmul.f32 %v8437_v14, %v8493_v57  ;;  %v8509_v51 = vstv %s4838_s0 }
 0x8f6   :  { %4374 = vrot.lane.b32.xlu0 %v4371_v17, %s4987_s13  ;;  %v3370_v32 = vpop.permute.xlu0 %3369  ;;  %v3353_v28 = vadd.f32 %v3349_v13, %v8289_v6  ;;  %v4454_v17 = vrot.slane %v8500_v59, 6  ;;  %v8516_v6 = vstv %s4837_s1 }
 0x8f7   :  { %v3862_v42 = vadd.f32 %v3857_v41, %v3841_v30  ;;  %v8514_v41 = vmul.f32 %v8430_v19, %v8509_v51  ;;  %v8527_v13 = vmul.f32 %v8430_v19, %v8516_v6  ;;  %v4405_v2 = vmul.f32 %v8437_v14, %v8516_v6 }
 0x8f8   :  { %v3374_v62 = vadd.f32 %v3370_v32, %v3353_v28  ;;  %v4453_v32 = vrot.slane %v4447_v21, 6 }
 0x8f9   :  { %v3883_v54 = vadd.f32 %v8309_v35, %v3862_v42  ;;  %v9385_v35 = vrot.slane %v7829_v58, 3  ;;  %v3945_v42 = vmul.f32 %v7994_v7, %v8170_v16  ;;  %v4433_v40 = vrot.slane %v8514_v41, 5 }
 0x8fa   :  { %v3388_v45 = vadd.f32 %v8365_v25, %v3374_v62  ;;  %v4426_v25 = vmul.f32 %v8437_v14, %v8509_v51  ;;  %v4455_v58 = vsel %vm377_vm11, %v4453_v32, %v4454_v17  ;;  %v4411_v5 = vrot.slane %v4405_v2, 4 }
 0x8fb   :  { %3879 = vrot.lane.b32.xlu2 %v3876_v60, %s4982_s6  ;;  %v3834_v30 = vsel %vm323_vm8, %v9385_v35, %v3833_v4  ;;  %v4412_v4 = vrot.slane %v8527_v13, 4  ;;  %v9386_v2 = vrot.slane %v7999_v49, 2  ;;  %v9389_v49 = vrot.slane %v7953_v15, 6 }
 0x8fc   :  { %3837 = vrot.lane.b32.xlu1 %v3834_v30, %s4982_s6  ;;  %v4432_v62 = vrot.slane %v4426_v25, 5  ;;  %v4449_v41 = vmul.f32 %v8493_v57, %v8170_v16 }
 0x8fd   :  { %v8507_v29 = vpop.permute.xlu2 %3509  ;;  %v3899_v9 = vpop.permute.xlu1 %3898  ;;  %v4413_v7 = vsel %vm341_vm9, %v4411_v5, %v4412_v4 }
 0x8fe   :  { %3858 = vrot.lane.b32.xlu0 %v3855_v23, %s4982_s6  ;;  %v3913_v60 = vpop.permute.xlu0 %3912  ;;  %v3904_v28 = vadd.f32 %v3899_v9, %v3883_v54  ;;  %v3952_v23 = vrot.slane %v3945_v42, 2  ;;  %v4434_v35 = vsel %vm359_vm10, %v4432_v62, %v4433_v40  ;;  %v3889_v54 = vmul.f32 %v7945_v3, %v8170_v16 }
 0x900   :  { %v3918_v21 = vadd.f32 %v3913_v60, %v3904_v28  ;;  %v3953_v9 = vsel %vm9387_vm13, %v9386_v2, %v3952_v23  ;;  %v4008_v60 = vmul.f32 %v8052_v47, %v8170_v16  ;;  %v3896_v3 = vrot.slane %v3889_v54, 6  ;;  %vm9440_vm13 = vmmov %vm9209_vm2 }
 0x901   :  { %v9388_v28 = vstv %s7938_s24  ;;  %v3966_v47 = vmul.f32 %v8001_v46, %v8170_v16  ;;  %v4064_v54 = vmul.f32 %v8038_v61, %v8170_v16  ;;  %v3987_v61 = vmul.f32 %v7980_v20, %v8170_v16  ;;  %v9395_v20 = vld [vmem:[#allocation49_spill] sm:$0xff]  ;;  %s9459_s24 = smov 128  }
 0x902   :  { %v8554_v30 = vadd.f32 %v8412_v1, %v3918_v21  ;;  %v3909_v21 = vmul.f32 %v8430_v19, %v9388_v28  ;;  %v4015_v62 = vrot.slane %v4008_v60, 5  ;;  %v3897_v23 = vsel %vm377_vm11, %v9389_v49, %v3896_v3 }
 0x903   :  { %4458 = vrot.lane.b32.xlu2 %v4455_v58, %s4987_s13  ;;  %v3973_v46 = vrot.slane %v3966_v47, 3  ;;  %v3528_v3 = vmul.f32 %v8218_v63, %v8170_v16  ;;  %v3545_v47 = vmul.f32 %v9395_v20, %v8170_v16 }
 0x904   :  { %4416 = vrot.lane.b32.xlu1 %v4413_v7, %s4987_s13 }
 0x905   :  { %v8543_v14 = vpop.permute.xlu2 %4073  ;;  %v3405_v32 = vpop.permute.xlu1 %3404 }
 0x906   :  { %4437 = vrot.lane.b32.xlu0 %v4434_v35, %s4987_s13  ;;  %v3426_v25 = vpop.permute.xlu0 %3425  ;;  %v3409_v58 = vadd.f32 %v3405_v32, %v3388_v45  ;;  %v3924_v45 = vmul.f32 %v7930_v12, %v8170_v16  ;;  %v4071_v12 = vrot.slane %v4064_v54, 1 }
 0x908   :  { %v3430_v42 = vadd.f32 %v3426_v25, %v3409_v58  ;;  %v3931_v32 = vrot.slane %v3924_v45, 1  ;;  %v9391_v25 = vrot.slane %v8009_v50, 3 }
 0x90a   :  { %v3451_v5 = vadd.f32 %v8442_v10, %v3430_v42  ;;  %v9390_v10 = vrot.slane %v8057_v55, 5  ;;  %v3974_v2 = vsel %vm323_vm8, %v9391_v25, %v3973_v46  ;;  %v4029_v55 = vmul.f32 %v8059_v0, %v8170_v16 }
 0x90b   :  { %3956 = vrot.lane.b32.xlu2 %v3953_v9, %s4983_s9  ;;  %v9392_v9 = vrot.slane %v7934_v56, 1  ;;  %v9393_v42 = vrot.slane %v8045_v18, 1  ;;  %v9397_v18 = vld [vmem:[#allocation44_spill] sm:$0xff] }
 0x90c   :  { %3900 = vrot.lane.b32.xlu1 %v3897_v23, %s4982_s6  ;;  %v4016_v15 = vsel %vm359_vm10, %v9390_v10, %v4015_v62  ;;  %v4036_v49 = vrot.slane %v4029_v55, 6  ;;  %v3994_v23 = vrot.slane %v3987_v61, 4  ;;  %v9396_v10 = vstv %s8194_s23  ;;  %v9402_v55 = vld [vmem:[#allocation33_spill] sm:$0xff]  ;;  %s9448_s6 = smov 80  }
 0x90d   :  { %v8564_v1 = vpop.permute.xlu2 %4136  ;;  %v8579_v35 = vpop.permute.xlu1 %3954  ;;  %v3932_v60 = vsel %vm287_vm6, %v9392_v9, %v3931_v32  ;;  %v4072_v28 = vsel %vm287_vm6, %v9393_v42, %v4071_v12  ;;  %v3521_v63 = vmul.f32 %v8430_v19, %v9396_v10  ;;  %v3562_v54 = vmul.f32 %v9397_v18, %v8170_v16  ;;  %v9398_v12 = vld [vmem:[#allocation27_spill] sm:$0xff] }
 0x90e   :  { %3914 = vrot.lane.b32.xlu0 %v3909_v21, %s4983_s9  ;;  %v8581_v7 = vpop.permute.xlu0 %3975  ;;  %v9394_v21 = vld [vmem:[#allocation13_spill] sm:$0xff]  ;;  %v4085_v61 = vmul.f32 %v9402_v55, %v8170_v16 }
 0x90f   :  { %v4127_v62 = vmul.f32 %v9394_v21, %v8170_v16 }
 0x911   :  { %v4134_v46 = vrot.slane %v4127_v62, 4 }
 0x913   :  { %4019 = vrot.lane.b32.xlu2 %v4016_v15, %s4983_s9  ;;  %v3535_v15 = vrot.slane %v3528_v3, 1  ;;  %v9403_v3 = vld [vmem:[#allocation58_spill] sm:$0xff] }
 0x914   :  { %3935 = vrot.lane.b32.xlu1 %v3932_v60, %s4983_s9 }
 0x915   :  { %v8595_v58 = vpop.permute.xlu2 %3634  ;;  %v3468_v50 = vpop.permute.xlu1 %3467 }
 0x916   :  { %3977 = vrot.lane.b32.xlu0 %v3974_v2, %s4983_s9  ;;  %v3489_v56 = vpop.permute.xlu0 %3488  ;;  %v3472_v0 = vadd.f32 %v3468_v50, %v3451_v5  ;;  %v9399_v5 = vrot.slane %v9398_v12, 6  ;;  %v9400_v2 = vld [vmem:[#allocation25_spill] sm:$0xff]  ;;  %v3552_v50 = vrot.slane %v3545_v47, 2 }
 0x917   :  { %v9401_v9 = vrot.slane %v9400_v2, 4 }
 0x918   :  { %v3493_v45 = vadd.f32 %v3489_v56, %v3472_v0  ;;  %v4037_v25 = vsel %vm377_vm11, %v9399_v5, %v4036_v49  ;;  %v3579_v56 = vmul.f32 %v9403_v3, %v8170_v16  ;;  %v3569_v0 = vrot.slane %v3562_v54, 3  ;;  %v9406_v49 = vld [vmem:[#allocation56_spill] sm:$0xff] }
 0x919   :  { %v3995_v60 = vsel %vm341_vm9, %v9401_v9, %v3994_v23  ;;  %v3596_v23 = vmul.f32 %v9406_v49, %v8170_v16  ;;  %v3613_v54 = vmul.f32 %v8345_v36, %v8170_v16  ;;  %v9412_v9 = vrot.slane %v8298_v39, 3 }
 0x91a   :  { %v3514_v32 = vadd.f32 %v8507_v29, %v3493_v45  ;;  %v9407_v45 = vld [vmem:[#allocation32_spill] sm:$0xff]  ;;  %v9418_v49 = vrot.slane %v8319_v22, 4 }
 0x91b   :  { %4075 = vrot.lane.b32.xlu2 %v4072_v28, %s4985_s12  ;;  %v9404_v28 = vld [vmem:[#allocation39_spill] sm:$0xff]  ;;  %v9408_v10 = vrot.slane %v9407_v45, 4  ;;  %v3603_v55 = vrot.slane %v3596_v23, 5  ;;  %v9419_v45 = vstv %s8161_s10 }
 0x91c   :  { %3998 = vrot.lane.b32.xlu1 %v3995_v60, %s4983_s9  ;;  %v3523_v29 = vadd.f32 %v3521_v63, %v3514_v32  ;;  %v9405_v21 = vrot.slane %v9404_v28, 1  ;;  %v4092_v63 = vrot.slane %v4085_v61, 2  ;;  %v9409_v32 = vld [vmem:[#allocation19_spill] sm:$0xff]  ;;  %v3570_v60 = vsel %vm323_vm8, %v9412_v9, %v3569_v0 }
 0x91d   :  { %v8631_v42 = vpop.permute.xlu2 %4213  ;;  %v4135_v18 = vsel %vm341_vm9, %v9408_v10, %v4134_v46  ;;  %v9410_v5 = vrot.slane %v9409_v32, 2  ;;  %v9413_v46 = vstv %s8090_s5  ;;  %v3620_v0 = vrot.slane %v3613_v54, 6 }
 0x91e   :  { %4040 = vrot.lane.b32.xlu0 %v4037_v25, %s4983_s9  ;;  %v3536_v62 = vsel %vm287_vm6, %v9405_v21, %v3535_v15  ;;  %v4018_v20 = vpop.permute.xlu1 %4017  ;;  %v8638_v47 = vpop.permute.xlu0 %4038  ;;  %v3586_v15 = vrot.slane %v3579_v56, 4  ;;  %v4049_v61 = vmul.f32 %v8430_v19, %v9413_v46  ;;  %v4189_v10 = vmul.f32 %v8430_v19, %v9419_v45 }
 0x91f   :  { %v3540_v12 = vadd.f32 %v3536_v62, %v3523_v29  ;;  %v3553_v25 = vsel %vm9411_vm3, %v9410_v5, %v3552_v50  ;;  %v9414_v29 = vld [vmem:[#allocation18_spill] sm:$0xff]  ;;  %v9416_v50 = vld [vmem:[#allocation37_spill] sm:$0xff]  ;;  %v9417_v62 = vld [vmem:[#allocation35_spill] sm:$0xff]  ;;  %v9422_v9 = vrot.slane %v8353_v43, 6 }
 0x920   :  { %v9415_v28 = vrot.slane %v9414_v29, 2  ;;  %v4106_v56 = vmul.f32 %v9416_v50, %v8170_v16  ;;  %v4148_v36 = vmul.f32 %v9417_v62, %v8170_v16  ;;  %v3587_v39 = vsel %vm341_vm9, %v9418_v49, %v3586_v15  ;;  %v9421_v5 = vld [vmem:[#allocation36_spill] sm:$0xff]  ;;  %v9425_v50 = vld [vmem:[#allocation41_spill] sm:$0xff]  ;;  %v9427_v62 = vld [vmem:[#allocation31_spill] sm:$0xff] }
 0x921   :  { %v3557_v2 = vadd.f32 %v3553_v25, %v3540_v12  ;;  %v4246_v22 = vmul.f32 %v9421_v5, %v8170_v16  ;;  %v9431_v5 = vld [vmem:[#allocation53_spill] sm:$0xff]  ;;  %vm9443_vm3 = vmmov %vm9209_vm2 }
 0x922   :  { %v4093_v21 = vsel %vm9209_vm2, %v9415_v28, %v4092_v63  ;;  %v4113_v54 = vrot.slane %v4106_v56, 3  ;;  %v3960_v28 = vadd.f32 %v8579_v35, %v8554_v30  ;;  %v9426_v56 = vrot.slane %v9425_v50, 3 }
 0x923   :  { %4138 = vrot.lane.b32.xlu2 %v4135_v18, %s4985_s12  ;;  %v3574_v3 = vadd.f32 %v3570_v60, %v3557_v2  ;;  %v9420_v18 = vrot.slane %v8340_v24, 5  ;;  %v4155_v2 = vrot.slane %v4148_v36, 5  ;;  %v3621_v60 = vsel %vm377_vm11, %v9422_v9, %v3620_v0  ;;  %v9423_v24 = vld [vmem:[#allocation20_spill] sm:$0xff] }
 0x924   :  { %4054 = vrot.lane.b32.xlu1 %v4049_v61, %s4985_s12  ;;  %v9424_v61 = vld [vmem:[#allocation15_spill] sm:$0xff]  ;;  %v4253_v29 = vrot.slane %v4246_v22, 3  ;;  %v4114_v43 = vsel %vm323_vm8, %v9426_v56, %v4113_v54  ;;  %v9428_v36 = vrot.slane %v9427_v62, 5  ;;  %v3981_v45 = vadd.f32 %v8581_v7, %v3960_v28 }
 0x925   :  { %v3591_v23 = vadd.f32 %v3587_v39, %v3574_v3  ;;  %v3604_v12 = vsel %vm359_vm10, %v9420_v18, %v3603_v55  ;;  %v8675_v15 = vpop.permute.xlu2 %3697  ;;  %v4169_v55 = vmul.f32 %v9423_v24, %v8170_v16  ;;  %v4204_v3 = vmul.f32 %v9424_v61, %v8170_v16  ;;  %v9436_v24 = vld [vmem:[#allocation43_spill] sm:$0xff] }
 0x926   :  { %4096 = vrot.lane.b32.xlu0 %v4093_v21, %s4985_s12  ;;  %v4053_v63 = vpop.permute.xlu1 %4052  ;;  %v4095_v32 = vpop.permute.xlu0 %4094  ;;  %v4156_v49 = vsel %vm359_vm10, %v9428_v36, %v4155_v2  ;;  %v4225_v22 = vmul.f32 %v9431_v5, %v8170_v16  ;;  %v4002_v54 = vadd.f32 %v8478_v53, %v3981_v45  ;;  %v9432_v2 = vld [vmem:[#allocation47_spill] sm:$0xff]  ;;  %v9437_v53 = vrot.slane %v8377_v31, 6 }
 0x927   :  { %v3608_v25 = vadd.f32 %v3604_v12, %v3591_v23  ;;  %v9429_v23 = vld [vmem:[#allocation34_spill] sm:$0xff]  ;;  %v4211_v18 = vrot.slane %v4204_v3, 1  ;;  %v9433_v9 = vrot.slane %v9432_v2, 6  ;;  %v4365_v50 = vmul.f32 %v8444_v11, %v8170_v16 }
 0x928   :  { %v9430_v30 = vrot.slane %v9429_v23, 3  ;;  %v4023_v61 = vadd.f32 %v4018_v20, %v4002_v54  ;;  %v4232_v56 = vrot.slane %v4225_v22, 2  ;;  %v9438_v20 = vld [vmem:[#allocation42_spill] sm:$0xff]  ;;  %v4288_v11 = vmul.f32 %v8380_v38, %v8170_v16 }
 0x929   :  { %v3625_v46 = vadd.f32 %v3621_v60, %v3608_v25  ;;  %v4372_v36 = vrot.slane %v4365_v50, 2 }
 0x92a   :  { %v4254_v35 = vsel %vm323_vm8, %v9430_v30, %v4253_v29  ;;  %v4044_v62 = vadd.f32 %v8638_v47, %v4023_v61  ;;  %v9439_v30 = vrot.slane %v9438_v20, 2  ;;  %v4295_v22 = vrot.slane %v4288_v11, 5 }
 0x92b   :  { %4194 = vrot.lane.b32.xlu2 %v4189_v10, %s4986_s14  ;;  %v8688_v21 = vadd.f32 %v8595_v58, %v3625_v46  ;;  %v4309_v58 = vmul.f32 %v8369_v26, %v8170_v16  ;;  %v4176_v10 = vrot.slane %v4169_v55, 6  ;;  %v9434_v46 = vld [vmem:[#allocation40_spill] sm:$0xff]  ;;  %v4267_v55 = vmul.f32 %v9436_v24, %v8170_v16 }
 0x92c   :  { %4117 = vrot.lane.b32.xlu1 %v4114_v43, %s4985_s12  ;;  %v9435_v26 = vrot.slane %v9434_v46, 1  ;;  %v4233_v31 = vsel %vm9440_vm13, %v9439_v30, %v4232_v56  ;;  %v4407_v24 = vmul.f32 %v8516_v6, %v8170_v16 }
 0x92d   :  { %v8707_v12 = vpop.permute.xlu2 %4276  ;;  %v4316_v25 = vrot.slane %v4309_v58, 6  ;;  %v4177_v60 = vsel %vm377_vm11, %v9433_v9, %v4176_v10  ;;  %v4274_v43 = vrot.slane %v4267_v55, 4  ;;  %v9445_v9 = vrot.slane %v8390_v8, 5 }
 0x92e   :  { %4159 = vrot.lane.b32.xlu0 %v4156_v49, %s4985_s12  ;;  %v4116_v39 = vpop.permute.xlu1 %4115  ;;  %v8698_v0 = vpop.permute.xlu0 %4157  ;;  %v4212_v7 = vsel %vm287_vm6, %v9435_v26, %v4211_v18  ;;  %v4058_v49 = vadd.f32 %v4053_v63, %v4044_v62  ;;  %v4373_v63 = vsel %vm9443_vm3, %v4370_v33, %v4372_v36  ;;  %v4428_v18 = vmul.f32 %v8509_v51, %v8170_v16 }
 0x92f   :  { %v4317_v28 = vsel %vm377_vm11, %v9437_v53, %v4316_v25  ;;  %v9444_v25 = vstv %s8300_s17  ;;  %v4386_v33 = vmul.f32 %v8425_v34, %v8170_v16  ;;  %v4414_v61 = vrot.slane %v4407_v24, 4 }
 0x930   :  { %v4079_v5 = vadd.f32 %v8543_v14, %v4058_v49  ;;  %v4329_v38 = vmul.f32 %v8430_v19, %v9444_v25  ;;  %v4435_v54 = vrot.slane %v4428_v18, 5 }
 0x931   :  { %v4393_v26 = vrot.slane %v4386_v33, 3  ;;  %v4415_v6 = vsel %vm341_vm9, %v4412_v4, %v4414_v61 }
 0x932   :  { %v4100_v2 = vadd.f32 %v4095_v32, %v4079_v5  ;;  %v4436_v8 = vsel %vm359_vm10, %v4433_v40, %v4435_v54  ;;  %v4351_v32 = vrot.slane %v4344_v52, 1 }
 0x933   :  { %4257 = vrot.lane.b32.xlu2 %v4254_v35, %s4986_s14  ;;  %v9441_v35 = vld [vmem:[#allocation48_spill] sm:$0xff] }
 0x934   :  { %4180 = vrot.lane.b32.xlu1 %v4177_v60, %s4985_s12  ;;  %v9442_v58 = vrot.slane %v9441_v35, 4  ;;  %v4296_v60 = vsel %vm359_vm10, %v9445_v9, %v4295_v22  ;;  %v4121_v51 = vadd.f32 %v4116_v39, %v4100_v2  ;;  %v4352_v34 = vsel %vm287_vm6, %v4349_v44, %v4351_v32 }
 0x935   :  { %v8729_v23 = vpop.permute.xlu2 %3760 }
 0x936   :  { %4215 = vrot.lane.b32.xlu0 %v4212_v7, %s4986_s14  ;;  %v4179_v3 = vpop.permute.xlu1 %4178  ;;  %v4193_v29 = vpop.permute.xlu0 %4192  ;;  %v4275_v45 = vsel %vm341_vm9, %v9442_v58, %v4274_v43  ;;  %v4142_v48 = vadd.f32 %v8564_v1, %v4121_v51  ;;  %v9446_v7 = vrot.slane %v8434_v27, 3  ;;  %v4456_v27 = vrot.slane %v4449_v41, 6 }
 0x938   :  { %v4394_v39 = vsel %vm323_vm8, %v9446_v7, %v4393_v26  ;;  %v4163_v40 = vadd.f32 %v8698_v0, %v4142_v48  ;;  %v4457_v16 = vsel %vm377_vm11, %v4454_v17, %v4456_v27 }
 0x93a   :  { %v4184_v55 = vadd.f32 %v4179_v3, %v4163_v40 }
 0x93b   :  { %4320 = vrot.lane.b32.xlu2 %v4317_v28, %s4986_s14 }
 0x93c   :  { %4236 = vrot.lane.b32.xlu1 %v4233_v31, %s4986_s14  ;;  %v4198_v53 = vadd.f32 %v4193_v29, %v4184_v55 }
 0x93d   :  { %v4333_v14 = vpop.permute.xlu2 %4332 }
 0x93e   :  { %4278 = vrot.lane.b32.xlu0 %v4275_v45, %s4986_s14  ;;  %v3656_v47 = vpop.permute.xlu1 %3655  ;;  %v3677_v10 = vpop.permute.xlu0 %3676  ;;  %v4219_v3 = vadd.f32 %v8631_v42, %v4198_v53 }
 0x93f   :  { %v3660_v28 = vadd.f32 %v3656_v47, %v8688_v21 }
 0x941   :  { %v3681_v56 = vadd.f32 %v3677_v10, %v3660_v28 }
 0x943   :  { %4376 = vrot.lane.b32.xlu2 %v4373_v63, %s4987_s13  ;;  %v3702_v59 = vadd.f32 %v8675_v15, %v3681_v56 }
 0x944   :  { %4299 = vrot.lane.b32.xlu1 %v4296_v60, %s4986_s14  ;;  %s4627_s14 = sshll.u32 %s8846_s2, 4  ;;  %s4628_s14 = int_to_ptr.hbm [resolvable:$true] %s4627_s14 }
 0x945   :  { %v3817_v44 = vpop.permute.xlu2 %3816 }
 0x946   :  { %4334 = vrot.lane.b32.xlu0 %v4329_v38, %s4987_s13  ;;  %v4235_v46 = vpop.permute.xlu1 %4234  ;;  %v4256_v19 = vpop.permute.xlu0 %4255 }
 0x947   :  { %v4240_v50 = vadd.f32 %v4235_v46, %v4219_v3 }
 0x949   :  { %v4261_v13 = vadd.f32 %v4256_v19, %v4240_v50 }
 0x94b   :  { %4439 = vrot.lane.b32.xlu2 %v4436_v8, %s4987_s13  ;;  %v4282_v17 = vadd.f32 %v8707_v12, %v4261_v13 }
 0x94c   :  { %4355 = vrot.lane.b32.xlu1 %v4352_v34, %s4987_s13 }
 0x94d   :  { %v4396_v29 = vpop.permute.xlu2 %4395 }
 0x94e   :  { %4397 = vrot.lane.b32.xlu0 %v4394_v39, %s4987_s13  ;;  %v3719_v1 = vpop.permute.xlu1 %3718  ;;  %v3740_v37 = vpop.permute.xlu0 %3739 }
 0x94f   :  { %v3723_v62 = vadd.f32 %v3719_v1, %v3702_v59 }
 0x951   :  { %v3744_v31 = vadd.f32 %v3740_v37, %v3723_v62 }
 0x953   :  { %v3765_v42 = vadd.f32 %v8729_v23, %v3744_v31 }
 0x954   :  { %4418 = vrot.lane.b32.xlu1 %v4415_v6, %s4987_s13 }
 0x955   :  { %v3880_v49 = vpop.permute.xlu2 %3879 }
 0x956   :  { %4460 = vrot.lane.b32.xlu0 %v4457_v16, %s4987_s13  ;;  %v4298_v57 = vpop.permute.xlu1 %4297  ;;  %v4319_v0 = vpop.permute.xlu0 %4318  ;;  %s9458_s13 = smov 8  }
 0x957   :  { %v4303_v36 = vadd.f32 %v4298_v57, %v4282_v17 }
 0x959   :  { %v4324_v35 = vadd.f32 %v4319_v0, %v4303_v36 }
 0x95b   :  { %v4338_v21 = vadd.f32 %v4333_v14, %v4324_v35 }
 0x95d   :  { %v4459_v45 = vpop.permute.xlu2 %4458 }
 0x95e   :  { %v3775_v43 = vpop.permute.xlu1 %3774 }
 0x95f   :  { %v3779_v58 = vadd.f32 %v3775_v43, %v3765_v42 }
 0x960   :  { %v3796_v4 = vpop.permute.xlu0 %3795 }
 0x961   :  { %v3800_v63 = vadd.f32 %v3796_v4, %v3779_v58 }
 0x963   :  { %v3821_v15 = vadd.f32 %v3817_v44, %v3800_v63 }
 0x965   :  { %v3957_v54 = vpop.permute.xlu2 %3956 }
 0x966   :  { %v4354_v20 = vpop.permute.xlu1 %4353 }
 0x967   :  { %v4359_v11 = vadd.f32 %v4354_v20, %v4338_v21 }
 0x968   :  { %v4375_v30 = vpop.permute.xlu0 %4374 }
 0x969   :  { %v4380_v18 = vadd.f32 %v4375_v30, %v4359_v11 }
 0x96b   :  { %v4401_v5 = vadd.f32 %v4396_v29, %v4380_v18 }
 0x96d   :  { %v4020_v19 = vpop.permute.xlu2 %4019 }
 0x96e   :  { %v3838_v47 = vpop.permute.xlu1 %3837 }
 0x96f   :  { %v3842_v25 = vadd.f32 %v3838_v47, %v3821_v15 }
 0x970   :  { %v3859_v10 = vpop.permute.xlu0 %3858 }
 0x971   :  { %v3863_v9 = vadd.f32 %v3859_v10, %v3842_v25 }
 0x973   :  { %v3884_v51 = vadd.f32 %v3880_v49, %v3863_v9 }
 0x975   :  { %v4076_v24 = vpop.permute.xlu2 %4075 }
 0x976   :  { %v4417_v12 = vpop.permute.xlu1 %4416 }
 0x977   :  { %v4422_v38 = vadd.f32 %v4417_v12, %v4401_v5 }
 0x978   :  { %v4438_v22 = vpop.permute.xlu0 %4437 }
 0x979   :  { %v4443_v2 = vadd.f32 %v4438_v22, %v4422_v38 }
 0x97b   :  { %v4464_v60 = vadd.f32 %v4459_v45, %v4443_v2 }
 0x97d   :  { %v4466_v52 = vmax.f32 %v4464_v60, 0.0  ;;  %v4139_v0 = vpop.permute.xlu2 %4138 }
 0x97e   :  { %v3901_v23 = vpop.permute.xlu1 %3900 }
 0x97f   :  { %v4840_v33 = vmul.f32 -1.442695, %v4466_v52  ;;  %v3905_v46 = vadd.f32 %v3901_v23, %v3884_v51 }
 0x980   :  { %v3915_v14 = vpop.permute.xlu0 %3914 }
 0x981   :  { %4877 = vpow2.f32 %v4840_v33  ;;  %v3919_v8 = vadd.f32 %v3915_v14, %v3905_v46 }
 0x985   :  { %v4195_v30 = vpop.permute.xlu2 %4194 }
 0x986   :  { %v3936_v32 = vpop.permute.xlu1 %3935 }
 0x987   :  { %v4878_v26 = vpop.eup %4877  ;;  %v3940_v48 = vadd.f32 %v3936_v32, %v3919_v8 }
 0x988   :  { %v3978_v34 = vpop.permute.xlu0 %3977  ;;  %v4474_v7 = vadd.f32 1.0, %v4878_v26 }
 0x989   :  { %v3961_v39 = vadd.f32 %v3957_v54, %v3940_v48 }
 0x98a   :  { %4879 = vrcp.f32 %v4474_v7  ;;  %v4487_v53 = vand.u32 2147483648, %v4474_v7  ;;  %v4485_v16 = vand.u32 2147483647, %v4474_v7  ;;  %vm4481_vm8 = vweird.f32 %v4474_v7 }
 0x98b   :  { %v3982_v41 = vadd.f32 %v3978_v34, %v3961_v39 }
 0x98c   :  { %v4488_v56 = vor.u32 1.1754944e-38, %v4487_v53  ;;  %vm4486_vm11 = vcmp.eq.f32.partialorder %v4485_v16, 8.507059e+37 }
 0x98d   :  { %v4258_v47 = vpop.permute.xlu2 %4257 }
 0x98e   :  { %v3999_v40 = vpop.permute.xlu1 %3998 }
 0x98f   :  { %v4003_v1 = vadd.f32 %v3999_v40, %v3982_v41 }
 0x990   :  { %v4041_v37 = vpop.permute.xlu0 %4040  ;;  %v4880_v55 = vpop.eup %4879 }
 0x991   :  { %v4477_v44 = vmul.f32 %v4880_v55, %v4474_v7  ;;  %v4024_v61 = vadd.f32 %v4020_v19, %v4003_v1  ;;  %vm4482_vm6 = vweird.f32 %v4880_v55 }
 0x992   :  { %vm4483_vm10 = vmor %vm4481_vm8, %vm4482_vm6 }
 0x993   :  { %v4478_v27 = vsub.f32 1.0, %v4477_v44  ;;  %v4045_v57 = vadd.f32 %v4041_v37, %v4024_v61 }
 0x995   :  { %v4479_v6 = vmul.f32 %v4880_v55, %v4478_v27  ;;  %v4321_v22 = vpop.permute.xlu2 %4320 }
 0x996   :  { %v4055_v3 = vpop.permute.xlu1 %4054 }
 0x997   :  { %v4480_v28 = vadd.f32 %v4880_v55, %v4479_v6  ;;  %v4059_v50 = vadd.f32 %v4055_v3, %v4045_v57 }
 0x998   :  { %v4097_v29 = vpop.permute.xlu0 %4096 }
 0x999   :  { %v4484_v13 = vsel %vm4483_vm10, %v4880_v55, %v4480_v28  ;;  %v4080_v43 = vadd.f32 %v4076_v24, %v4059_v50 }
 0x99a   :  { %v4489_v4 = vsel %vm4486_vm11, %v4488_v56, %v4484_v13 }
 0x99b   :  { %v4506_v59 = vadd.f32 1.0, %v4489_v4  ;;  %v4101_v62 = vadd.f32 %v4097_v29, %v4080_v43 }
 0x99d   :  { %4508 = vst.msk [vmem:[#allocation3] sm:$0x1] %vm6523_vm5, %v4506_v59  ;;  %v4377_v33 = vpop.permute.xlu2 %4376 }
 0x99e   :  { %4510 = vst [vmem:[#allocation1] sm:$0xff] %v4506_v59  ;;  %v4118_v36 = vpop.permute.xlu1 %4117 }
 0x99f   :  { %v4122_v49 = vadd.f32 %v4118_v36, %v4101_v62 }
 0x9a0   :  { %v4160_v20 = vpop.permute.xlu0 %4159 }
 0x9a1   :  { %v4143_v31 = vadd.f32 %v4139_v0, %v4122_v49 }
 0x9a3   :  { %v4164_v35 = vadd.f32 %v4160_v20, %v4143_v31 }
 0x9a5   :  { %v4512_v42 = vld [vmem:[#allocation1 + $0x1] ss:$9 sm:$0xff]  ;;  %v4440_v34 = vpop.permute.xlu2 %4439 }
 0x9a6   :  { %4513 = vrot.lane.b32.xlu1 %v4512_v42, %s4981_s4  ;;  %4517 = vst [vmem:[#allocation1] sm:$0xff] %v4506_v59  ;;  %v4181_v21 = vpop.permute.xlu1 %4180 }
 0x9a7   :  { %v4185_v58 = vadd.f32 %v4181_v21, %v4164_v35 }
 0x9a8   :  { %v4216_v45 = vpop.permute.xlu0 %4215 }
 0x9a9   :  { %v4199_v11 = vadd.f32 %v4195_v30, %v4185_v58 }
 0x9ab   :  { %v4220_v10 = vadd.f32 %v4216_v45, %v4199_v11 }
 0x9ad   :  { %v4519_v63 = vld [vmem:[#allocation1 + $0x2] ss:$9 sm:$0xff] }
 0x9ae   :  { %4520 = vrot.lane.b32.xlu0 %v4519_v63, %s4980_s3  ;;  %4524 = vst [vmem:[#allocation1] sm:$0xff] %v4506_v59  ;;  %v4237_v18 = vpop.permute.xlu1 %4236 }
 0x9af   :  { %v4241_v15 = vadd.f32 %v4237_v18, %v4220_v10 }
 0x9b0   :  { %v4279_v5 = vpop.permute.xlu0 %4278 }
 0x9b1   :  { %v4262_v12 = vadd.f32 %v4258_v47, %v4241_v15 }
 0x9b3   :  { %v4283_v38 = vadd.f32 %v4279_v5, %v4262_v12 }
 0x9b5   :  { %v4526_v25 = vld [vmem:[#allocation1 + $0x3] ss:$9 sm:$0xff] }
 0x9b6   :  { %4531 = vst [vmem:[#allocation1] sm:$0xff] %v4506_v59  ;;  %v4300_v54 = vpop.permute.xlu1 %4299 }
 0x9b7   :  { %v4304_v2 = vadd.f32 %v4300_v54, %v4283_v38 }
 0x9b8   :  { %v4335_v9 = vpop.permute.xlu0 %4334 }
 0x9b9   :  { %v4325_v60 = vadd.f32 %v4321_v22, %v4304_v2 }
 0x9bb   :  { %v4339_v23 = vadd.f32 %v4335_v9, %v4325_v60  ;;  %v4611_v9 = vld [vmem:[#allocation4 + $0x8] sm:$0xff] }
 0x9bd   :  { %v4533_v52 = vld [vmem:[#allocation1 + $0x4] ss:$9 sm:$0xff] }
 0x9be   :  { %4538 = vst [vmem:[#allocation1] sm:$0xff] %v4506_v59  ;;  %v4356_v51 = vpop.permute.xlu1 %4355 }
 0x9bf   :  { %v4360_v14 = vadd.f32 %v4356_v51, %v4339_v23 }
 0x9c0   :  { %v4398_v46 = vpop.permute.xlu0 %4397 }
 0x9c1   :  { %v4381_v19 = vadd.f32 %v4377_v33, %v4360_v14 }
 0x9c3   :  { %v4402_v32 = vadd.f32 %v4398_v46, %v4381_v19 }
 0x9c5   :  { %v4540_v8 = vld [vmem:[#allocation1 + $0x5] ss:$9 sm:$0xff] }
 0x9c6   :  { %4545 = vst [vmem:[#allocation1] sm:$0xff] %v4506_v59  ;;  %v4419_v26 = vpop.permute.xlu1 %4418 }
 0x9c7   :  { %v4423_v48 = vadd.f32 %v4419_v26, %v4402_v32 }
 0x9c8   :  { %v4461_v39 = vpop.permute.xlu0 %4460 }
 0x9c9   :  { %v4444_v7 = vadd.f32 %v4440_v34, %v4423_v48 }
 0x9cb   :  { %v4465_v24 = vadd.f32 %v4461_v39, %v4444_v7 }
 0x9cd   :  { %v4547_v41 = vld [vmem:[#allocation1 + $0x6] ss:$9 sm:$0xff]  ;;  %v4467_v40 = vmax.f32 %v4465_v24, 0.0 }
 0x9ce   :  { %4552 = vst [vmem:[#allocation1] sm:$0xff] %v4506_v59 }
 0x9cf   :  { %v4841_v1 = vmul.f32 -1.442695, %v4467_v40 }
 0x9d1   :  { %4881 = vpow2.f32 %v4841_v1 }
 0x9d5   :  { %v4554_v29 = vld [vmem:[#allocation1 + $0x7] ss:$9 sm:$0xff] }
 0x9d7   :  { %v4882_v37 = vpop.eup %4881 }
 0x9d8   :  { %v4475_v55 = vadd.f32 1.0, %v4882_v37 }
 0x9da   :  { %4883 = vrcp.f32 %v4475_v55  ;;  %v4502_v53 = vand.u32 2147483648, %v4475_v55  ;;  %v4500_v16 = vand.u32 2147483647, %v4475_v55  ;;  %vm4496_vm13 = vweird.f32 %v4475_v55 }
 0x9dc   :  { %v4503_v0 = vor.u32 1.1754944e-38, %v4502_v53  ;;  %vm4501_vm6 = vcmp.eq.f32.partialorder %v4500_v16, 8.507059e+37 }
 0x9e0   :  { %v4884_v44 = vpop.eup %4883 }
 0x9e1   :  { %v4492_v61 = vmul.f32 %v4884_v44, %v4475_v55  ;;  %vm4497_vm2 = vweird.f32 %v4884_v44 }
 0x9e2   :  { %vm4498_vm3 = vmor %vm4496_vm13, %vm4497_vm2 }
 0x9e3   :  { %v4493_v27 = vsub.f32 1.0, %v4492_v61 }
 0x9e5   :  { %v4494_v6 = vmul.f32 %v4884_v44, %v4493_v27 }
 0x9e7   :  { %v4495_v57 = vadd.f32 %v4884_v44, %v4494_v6 }
 0x9e9   :  { %v4499_v3 = vsel %vm4498_vm3, %v4884_v44, %v4495_v57 }
 0x9ea   :  { %v4504_v28 = vsel %vm4501_vm6, %v4503_v0, %v4499_v3 }
 0x9eb   :  { %v4507_v50 = vadd.f32 1.0, %v4504_v28 }
 0x9ed   :  { %4559 = vst.msk [vmem:[#allocation3 + $0x1] sm:$0x1] %vm6523_vm5, %v4507_v50 }
 0x9ee   :  { %4561 = vst [vmem:[#allocation1] sm:$0xff] %v4507_v50 }
 0x9f5   :  { %v4563_v56 = vld [vmem:[#allocation1 + $0x1] ss:$9 sm:$0xff] }
 0x9f6   :  { %4564 = vrot.lane.b32.xlu2 %v4563_v56, %s4981_s4  ;;  %4568 = vst [vmem:[#allocation1] sm:$0xff] %v4507_v50  ;;  %s9449_s4 = smov 96  }
 0x9fd   :  { %v4570_v13 = vld [vmem:[#allocation1 + $0x2] ss:$9 sm:$0xff] }
 0x9fe   :  { %4527 = vrot.lane.b32.xlu2 %v4526_v25, %s4979_s30  ;;  %4571 = vrot.lane.b32.xlu1 %v4570_v13, %s4980_s3  ;;  %4575 = vst [vmem:[#allocation1] sm:$0xff] %v4507_v50  ;;  %s9451_s3 = smov 112  }
 0xa05   :  { %v4577_v43 = vld [vmem:[#allocation1 + $0x3] ss:$9 sm:$0xff] }
 0xa06   :  { %4534 = vrot.lane.b32.xlu1 %v4533_v52, %s4978_s29  ;;  %4578 = vrot.lane.b32.xlu0 %v4577_v43, %s4979_s30  ;;  %4582 = vst [vmem:[#allocation1] sm:$0xff] %v4507_v50 }
 0xa0d   :  { %v4584_v4 = vld [vmem:[#allocation1 + $0x4] ss:$9 sm:$0xff] }
 0xa0e   :  { %4541 = vrot.lane.b32.xlu0 %v4540_v8, %s9448_s6  ;;  %4585 = vrot.lane.b32.xlu2 %v4584_v4, %s4978_s29  ;;  %4589 = vst [vmem:[#allocation1] sm:$0xff] %v4507_v50  ;;  %s4988_s29 = smov [#allocation9]  }
 0xa0f   :  { %s4625_s30 = sshll.u32 %s4988_s29, 4  ;;  %s4626_s30 = int_to_ptr.vmem [resolvable:$true] %s4625_s30 }
 0xa15   :  { %v4591_v59 = vld [vmem:[#allocation1 + $0x5] ss:$9 sm:$0xff] }
 0xa16   :  { %4548 = vrot.lane.b32.xlu2 %v4547_v41, %s9449_s4  ;;  %4592 = vrot.lane.b32.xlu1 %v4591_v59, %s9448_s6  ;;  %4596 = vst [vmem:[#allocation1] sm:$0xff] %v4507_v50 }
 0xa18   :  { %v4514_v17 = vpop.permute.xlu1 %4513 }
 0xa19   :  { %4516 = vst.msk [vmem:[#allocation3] sm:$0x1] %vm6552_vm0, %v4514_v17 }
 0xa1d   :  { %v4598_v36 = vld [vmem:[#allocation1 + $0x6] ss:$9 sm:$0xff] }
 0xa1e   :  { %4555 = vrot.lane.b32.xlu1 %v4554_v29, %s9451_s3  ;;  %4599 = vrot.lane.b32.xlu0 %v4598_v36, %s9449_s4  ;;  %4603 = vst [vmem:[#allocation1] sm:$0xff] %v4507_v50 }
 0xa20   :  { %v4521_v49 = vpop.permute.xlu0 %4520 }
 0xa21   :  { %4523 = vst.msk [vmem:[#allocation3] sm:$0x1] %vm6556_vm1, %v4521_v49 }
 0xa25   :  { %v4605_v30 = vld [vmem:[#allocation1 + $0x7] ss:$9 sm:$0xff] }
 0xa26   :  { %4606 = vrot.lane.b32.xlu2 %v4605_v30, %s9451_s3 }
 0xa50   :  { %v4565_v31 = vpop.permute.xlu2 %4564 }
 0xa51   :  { %4567 = vst.msk [vmem:[#allocation3 + $0x1] sm:$0x1] %vm6552_vm0, %v4565_v31 }
 0xa58   :  { %v4528_v35 = vpop.permute.xlu2 %4527 }
 0xa59   :  { %4530 = vst.msk [vmem:[#allocation3] sm:$0x1] %vm6568_vm12, %v4528_v35 }
 0xa68   :  { %v4586_v58 = vpop.permute.xlu2 %4585 }
 0xa70   :  { %v4572_v21 = vpop.permute.xlu1 %4571  ;;  %v4549_v63 = vpop.permute.xlu2 %4548 }
 0xa71   :  { %4574 = vst.msk [vmem:[#allocation3 + $0x1] sm:$0x1] %vm6556_vm1, %v4572_v21 }
 0xa78   :  { %v4535_v45 = vpop.permute.xlu1 %4534  ;;  %v4579_v11 = vpop.permute.xlu0 %4578 }
 0xa79   :  { %4537 = vst.msk [vmem:[#allocation3] sm:$0x1] %vm6583_vm4, %v4535_v45 }
 0xa7a   :  { %4581 = vst.msk [vmem:[#allocation3 + $0x1] sm:$0x1] %vm6568_vm12, %v4579_v11 }
 0xa7b   :  { %4588 = vst.msk [vmem:[#allocation3 + $0x1] sm:$0x1] %vm6583_vm4, %v4586_v58 }
 0xa80   :  { %v4542_v10 = vpop.permute.xlu0 %4541  ;;  %v4607_v38 = vpop.permute.xlu2 %4606 }
 0xa81   :  { %4544 = vst.msk [vmem:[#allocation3] sm:$0x1] %vm6587_vm7, %v4542_v10 }
 0xa82   :  { %4551 = vst.msk [vmem:[#allocation3] sm:$0x1] %vm6600_vm15, %v4549_v63 }
 0xa88   :  { %v4593_v5 = vpop.permute.xlu1 %4592 }
 0xa89   :  { %4595 = vst.msk [vmem:[#allocation3 + $0x1] sm:$0x1] %vm6587_vm7, %v4593_v5 }
 0xa90   :  { %v4556_v12 = vpop.permute.xlu1 %4555  ;;  %v4600_v22 = vpop.permute.xlu0 %4599 }
 0xa91   :  { %4558 = vst.msk [vmem:[#allocation3] sm:$0x1] %vm6615_vm14, %v4556_v12 }
 0xa92   :  { %4602 = vst.msk [vmem:[#allocation3 + $0x1] sm:$0x1] %vm6600_vm15, %v4600_v22 }
 0xa93   :  { %4609 = vst.msk [vmem:[#allocation3 + $0x1] sm:$0x1] %vm6615_vm14, %v4607_v38 }
 0xa9a   :  { %v4610_v54 = vld [vmem:[#allocation3] sm:$0x3] }
 0xa9b   :  { %v4614_v2 = vperm.slane %v4610_v54, 1  ;;  %v4613_v60 = vperm.slane %v4610_v54, 0 }
 0xa9d   :  { %v4615_v52 = vrot.slane %v4614_v2, 4 }
 0xa9f   :  { %v4616_v23 = vsel %vm341_vm9, %v4613_v60, %v4615_v52 }
 0xaa0   :  { %v4618_v33 = vmul.f32 %v4616_v23, %v4611_v9 }
 0xaa2   :  { %4620 = vst [vmem:[#allocation9 + $0x8] sm:$0xff] %v4618_v33 }
 0xaa3   :  { %4633 = dma.vmem_to_hbm [thread:$0]  %s4626_s30, 256, %s4628_s14, [#allocation6], %s9459_s24, %s9459_s24, %s9458_s13  }
 0xaa4   :  { %4960 = dma.done.wait [#allocation6], 256  }
 0xaa5   :  { %4961 = vsyncadd [#allocation6], 4294967040 }
 0xaa6   :  { %4638 = vsyncpa [#allocation5], 1 }
 0xaa7   :  { %4639 = vsyncpa [#allocation6], 1 }
 0xaa8   :  { %4640 = vsyncpa [#allocation7], 1 }

</bundles_post_ra>
